<compile_context>
chip_gen: v5e
topology: v5e:2x2
jax: 0.10.0
libtpu: 0.0.40
codegen_flags: <defaults>
</compile_context>

<pallas_src>
import functools

import jax
import jax.numpy as jnp
from jax.experimental import pallas as pl
from jax.experimental.pallas import tpu as pltpu

CP = 128          # physical channel width (padded once, network-wide)
EPS = 1e-5        # BatchNorm eps


# --------------------------------------------------------------------------- #
# Fused conv kernel:
#   y = (M,K)bf16 @ (K,CP)bf16  (f32 acc)  + bias  [+ residual]
#   outputs: [y]  and/or  [relu(scale*y + shift)]   (next layer's BN+ReLU)
# --------------------------------------------------------------------------- #
def _fused_conv_kernel(*refs, has_res, has_act, emit_main):
    idx = 0
    a_ref = refs[idx]; idx += 1
    w_ref = refs[idx]; idx += 1
    b_ref = refs[idx]; idx += 1
    r_ref = None
    if has_res:
        r_ref = refs[idx]; idx += 1
    if has_act:
        s_ref = refs[idx]; idx += 1
        t_ref = refs[idx]; idx += 1
    outs = refs[idx:]

    y = jnp.dot(a_ref[...], w_ref[...], preferred_element_type=jnp.float32)
    y = y + b_ref[...]
    if has_res:
        y = y + r_ref[...]

    oi = 0
    if emit_main:
        outs[oi][...] = y
        oi += 1
    if has_act:
        outs[oi][...] = jnp.maximum(y * s_ref[...] + t_ref[...], 0.0)


def fused_conv(cols, w, b, *, residual=None, act=None, emit_main=True):
    """cols:(M,K) bf16, w:(K,CP) bf16, b:(1,CP) f32, residual:(M,CP) f32,
    act=(scale, shift) each (1,CP) f32.
    Returns a tuple of f32 (M,CP) outputs: (main?, relu(scale*main+shift)?)."""
    M, K = cols.shape
    has_res = residual is not None
    has_act = act is not None
    assert emit_main or has_act

    # Grid only over M; whole K and N=CP fit in one VMEM block at these sizes.
    tm = 256 if (M % 256 == 0 and M >= 512) else M
    gm = M // tm

    in_specs = [pl.BlockSpec((tm, K), lambda i: (i, 0)),
                pl.BlockSpec((K, CP), lambda i: (0, 0)),
                pl.BlockSpec((1, CP), lambda i: (0, 0))]
    args = [cols, w, b]
    if has_res:
        in_specs.append(pl.BlockSpec((tm, CP), lambda i: (i, 0)))
        args.append(residual)
    if has_act:
        in_specs += [pl.BlockSpec((1, CP), lambda i: (0, 0)),
                     pl.BlockSpec((1, CP), lambda i: (0, 0))]
        args += list(act)

    n_out = int(emit_main) + int(has_act)
    out_specs = tuple(pl.BlockSpec((tm, CP), lambda i: (i, 0))
                      for _ in range(n_out))
    out_shape = tuple(jax.ShapeDtypeStruct((M, CP), jnp.float32)
                      for _ in range(n_out))

    kernel = functools.partial(_fused_conv_kernel, has_res=has_res,
                               has_act=has_act, emit_main=emit_main)
    return pl.pallas_call(
        kernel,
        out_shape=out_shape,
        grid_spec=pltpu.PrefetchScalarGridSpec(
            num_scalar_prefetch=0,
            grid=(gm,),
            in_specs=in_specs,
            out_specs=out_specs),
        compiler_params=pltpu.CompilerParams(
            dimension_semantics=("parallel",)),
    )(*args)


# --------------------------------------------------------------------------- #
# Fused head kernel: global average pool + linear + bias.
# --------------------------------------------------------------------------- #
_VMEM_SPEC = pl.BlockSpec(memory_space=pltpu.MemorySpace.VMEM)


def _head_kernel(x_ref, w_ref, b_ref, o_ref):
    # x: (N, H*W, CP) -> mean over spatial -> (N, CP) -> @ (CP, CP) + bias.
    f = jnp.mean(x_ref[...], axis=1)
    o_ref[...] = jnp.dot(f, w_ref[...],
                         preferred_element_type=jnp.float32) + b_ref[...]


def head(a, lin_w, lin_b):
    N, H, W, C = a.shape
    xf = a.reshape(N, H * W, C)
    return pl.pallas_call(
        _head_kernel,
        out_shape=jax.ShapeDtypeStruct((N, CP), jnp.float32),
        in_specs=[_VMEM_SPEC, _VMEM_SPEC, _VMEM_SPEC],
        out_specs=_VMEM_SPEC,
    )(xf, lin_w, lin_b)


# --------------------------------------------------------------------------- #
# XLA glue: im2col for 3x3 convs (padding=1) on already-activated tensors.
# --------------------------------------------------------------------------- #
def _im2col(x, stride):
    """x: (N,H,W,CP) f32 activation. Returns bf16 cols (N*Ho*Wo, 9*CP), Ho, Wo.
    Spatial zero-padding is applied to the already-activated tensor, which
    matches Conv2d(padding=1) applied after bn+relu."""
    N, H, W, C = x.shape
    Ho = (H + 2 - 3) // stride + 1
    Wo = (W + 2 - 3) // stride + 1
    xp = jnp.pad(x.astype(jnp.bfloat16), ((0, 0), (1, 1), (1, 1), (0, 0)))
    taps = []
    for ki in range(3):
        for kj in range(3):
            taps.append(xp[:, ki:ki + stride * Ho:stride,
                           kj:kj + stride * Wo:stride, :])
    cols = jnp.concatenate(taps, axis=-1).reshape(N * Ho * Wo, 9 * C)
    return cols, Ho, Wo


# --------------------------------------------------------------------------- #
# Parameters (channel-padded to CP, BN folded to scale/shift, weights in bf16)
# --------------------------------------------------------------------------- #
def _bn_fold(key, c):
    k1, k2 = jax.random.split(key)
    gamma = 1.0 + 0.1 * jax.random.normal(k1, (c,), jnp.float32)
    beta = 0.1 * jax.random.normal(k2, (c,), jnp.float32)
    running_mean = jnp.zeros((c,), jnp.float32)   # fresh-init running stats
    running_var = jnp.ones((c,), jnp.float32)
    scale = gamma / jnp.sqrt(running_var + EPS)
    shift = beta - running_mean * scale
    s = jnp.zeros((1, CP), jnp.float32).at[0, :c].set(scale)
    t = jnp.zeros((1, CP), jnp.float32).at[0, :c].set(shift)
    return s, t


def _conv_fold(key, kh, kw, cin, cout):
    k1, k2 = jax.random.split(key)
    w = jax.random.normal(k1, (kh, kw, cin, cout), jnp.float32)
    w = w / jnp.sqrt(float(kh * kw * cin))
    b = 0.01 * jax.random.normal(k2, (cout,), jnp.float32)
    wp = jnp.zeros((kh, kw, CP, CP), jnp.float32).at[:, :, :cin, :cout].set(w)
    wp = wp.reshape(kh * kw * CP, CP).astype(jnp.bfloat16)
    bp = jnp.zeros((1, CP), jnp.float32).at[0, :cout].set(b)
    return wp, bp


def _linear_fold(key, cin, cout):
    k1, k2 = jax.random.split(key)
    w = jax.random.normal(k1, (cin, cout), jnp.float32) / jnp.sqrt(float(cin))
    b = 0.01 * jax.random.normal(k2, (cout,), jnp.float32)
    wp = jnp.zeros((CP, CP), jnp.float32).at[:cin, :cout].set(w)
    bp = jnp.zeros((1, CP), jnp.float32).at[0, :cout].set(b)
    return wp, bp


def make_config(depth, width):
    l = (depth - 4) // 6
    cfg = []
    in_ch = 16
    for out_ch, stride in [(16 * width, 1), (32 * width, 2), (64 * width, 2)]:
        for s in [stride] + [1] * (l - 1):
            has_sc = (s != 1) or (in_ch != out_ch)
            cfg.append((s, has_sc, in_ch, out_ch))
            in_ch = out_ch
    return tuple(cfg)


def make_params(key, depth=10, width=1, num_classes=10):
    cfg = make_config(depth, width)
    keys = iter(jax.random.split(key, 8 * len(cfg) + 16))
    params = {}
    params['init_w'], params['init_b'] = _conv_fold(next(keys), 3, 3, 3, 16)
    blocks = []
    for (s, has_sc, cin, cout) in cfg:
        blk = {}
        blk['bn1_s'], blk['bn1_t'] = _bn_fold(next(keys), cin)
        blk['w1'], blk['b1'] = _conv_fold(next(keys), 3, 3, cin, cout)
        blk['bn2_s'], blk['bn2_t'] = _bn_fold(next(keys), cout)
        blk['w2'], blk['b2'] = _conv_fold(next(keys), 3, 3, cout, cout)
        if has_sc:
            blk['wsc'], blk['bsc'] = _conv_fold(next(keys), 1, 1, cin, cout)
        blocks.append(blk)
    params['blocks'] = blocks
    params['bn_s'], params['bn_t'] = _bn_fold(next(keys), 64 * width)
    params['lin_w'], params['lin_b'] = _linear_fold(next(keys), 64 * width,
                                                    num_classes)
    return params, cfg


# --------------------------------------------------------------------------- #
# Forward pass
# --------------------------------------------------------------------------- #
@functools.partial(jax.jit, static_argnums=(2, 3))
def wideresnet_forward(params, x_nchw, config, num_classes):
    # NCHW (PyTorch convention) -> NHWC, channel-padded to CP once.
    x = jnp.transpose(x_nchw, (0, 2, 3, 1)).astype(jnp.float32)
    N, H, W, C = x.shape
    x = jnp.pad(x, ((0, 0), (0, 0), (0, 0), (0, CP - C)))

    blocks = params['blocks']
    nb = len(blocks)

    # init conv; its epilogue also emits relu(bn1_block0(x0)) for the 1st block.
    cols, Ho, Wo = _im2col(x, 1)
    u_f, a_f = fused_conv(cols, params['init_w'], params['init_b'],
                          act=(blocks[0]['bn1_s'], blocks[0]['bn1_t']))
    u = u_f.reshape(N, Ho, Wo, CP)      # raw residual stream
    a = a_f.reshape(N, Ho, Wo, CP)      # relu(bn1(u))

    for bi, ((stride, has_sc, _, _), blk) in enumerate(zip(config, blocks)):
        if bi + 1 < nb:
            nxt = (blocks[bi + 1]['bn1_s'], blocks[bi + 1]['bn1_t'])
        else:
            nxt = (params['bn_s'], params['bn_t'])   # final BN feeds the head

        # conv1: bias + bn2 + relu fused in the epilogue; only act is needed.
        cols1, Ho, Wo = _im2col(a, stride)
        (a2_f,) = fused_conv(cols1, blk['w1'], blk['b1'],
                             act=(blk['bn2_s'], blk['bn2_t']), emit_main=False)
        a2 = a2_f.reshape(N, Ho, Wo, CP)

        # shortcut path (identity, or fused 1x1 conv on the raw stream u).
        if has_sc:
            sub = u[:, ::stride, ::stride, :]
            (r,) = fused_conv(sub.reshape(-1, CP).astype(jnp.bfloat16),
                              blk['wsc'], blk['bsc'])
        else:
            r = u.reshape(-1, CP)

        # conv2: bias + residual add fused; also emits relu(next_bn(u_next)).
        # dropout before conv2 is identity (eval semantics).
        cols2, Ho2, Wo2 = _im2col(a2, 1)
        u_f, a_f = fused_conv(cols2, blk['w2'], blk['b2'], residual=r, act=nxt)
        u = u_f.reshape(N, Ho2, Wo2, CP)
        a = a_f.reshape(N, Ho2, Wo2, CP)

    # fused head: global average pool + linear + bias in one kernel.
    logits = head(a, params['lin_w'], params['lin_b'])
    return logits[:, :num_classes]


# --------------------------------------------------------------------------- #
if __name__ == "__main__":
    key = jax.random.PRNGKey(0)
    k_param, k_x = jax.random.split(key)

    DEPTH, WIDTH, NUM_CLASSES = 10, 1, 10     # small WideResNet-10-1
    params, cfg = make_params(k_param, DEPTH, WIDTH, NUM_CLASSES)

    # NCHW input, like the PyTorch module expects.
    x = jax.random.normal(k_x, (2, 3, 16, 16), jnp.float32)

    logits = wideresnet_forward(params, x, cfg, NUM_CLASSES)
    jax.block_until_ready(logits)
    assert logits.shape == (2, NUM_CLASSES)
    assert bool(jnp.all(jnp.isfinite(logits)))
    print("KERNEL_OK")
</pallas_src>

<mosaic_0001>
module attributes {stable_mosaic.version = 11 : i64} {
  func.func @_fused_conv_kernel(%arg0: i32, %arg1: memref<256x1152xbf16, #tpu.memory_space<vmem>>, %arg2: memref<1152x128xbf16, #tpu.memory_space<vmem>>, %arg3: memref<1x128xf32, #tpu.memory_space<vmem>>, %arg4: memref<1x128xf32, #tpu.memory_space<vmem>>, %arg5: memref<1x128xf32, #tpu.memory_space<vmem>>, %arg6: memref<256x128xf32, #tpu.memory_space<vmem>>, %arg7: memref<256x128xf32, #tpu.memory_space<vmem>>) attributes {dimension_semantics = [#tpu.dimension_semantics<parallel>], iteration_bounds = array<i64: 2>, scalar_prefetch = 0 : i64, scratch_operands = 0 : i64, tpu.core_type = #tpu.core_type<tc>, window_params = [{transform_indices = @transform_0, window_bounds = array<i64: 256, 1152>}, {pipeline_mode = #tpu.pipeline_mode<synchronous>, transform_indices = @transform_1, window_bounds = array<i64: 1152, 128>}, {pipeline_mode = #tpu.pipeline_mode<synchronous>, transform_indices = @transform_2, window_bounds = array<i64: 1, 128>}, {pipeline_mode = #tpu.pipeline_mode<synchronous>, transform_indices = @transform_3, window_bounds = array<i64: 1, 128>}, {pipeline_mode = #tpu.pipeline_mode<synchronous>, transform_indices = @transform_4, window_bounds = array<i64: 1, 128>}, {transform_indices = @transform_5, window_bounds = array<i64: 256, 128>}, {transform_indices = @transform_6, window_bounds = array<i64: 256, 128>}]} {
    %c0 = arith.constant 0 : index
    %c0_0 = arith.constant 0 : index
    %0 = vector.load %arg1[%c0, %c0_0] : memref<256x1152xbf16, #tpu.memory_space<vmem>>, vector<256x1152xbf16>
    %c0_1 = arith.constant 0 : index
    %c0_2 = arith.constant 0 : index
    %1 = vector.load %arg2[%c0_1, %c0_2] : memref<1152x128xbf16, #tpu.memory_space<vmem>>, vector<1152x128xbf16>
    %cst = arith.constant dense<0.000000e+00> : vector<256x128xf32>
    %2 = tpu.matmul %0, %1, %cst {dimension_numbers = #tpu.dot_dimension_numbers<[1], [0], [0], [1], [0, 0, 1, 1], [], []>} : vector<256x1152xbf16>, vector<1152x128xbf16>, vector<256x128xf32> -> vector<256x128xf32>
    %c0_3 = arith.constant 0 : index
    %c0_4 = arith.constant 0 : index
    %3 = vector.load %arg3[%c0_3, %c0_4] : memref<1x128xf32, #tpu.memory_space<vmem>>, vector<1x128xf32>
    %4 = vector.broadcast %3 : vector<1x128xf32> to vector<256x128xf32>
    %5 = arith.addf %2, %4 : vector<256x128xf32>
    %c0_5 = arith.constant 0 : index
    %c0_6 = arith.constant 0 : index
    %6 = vector.load %arg6[%c0_5, %c0_6] : memref<256x128xf32, #tpu.memory_space<vmem>>, vector<256x128xf32>
    tpu.vector_store %arg6[%c0_5, %c0_6], %5 {strides = array<i32>} : memref<256x128xf32, #tpu.memory_space<vmem>>, vector<256x128xf32>,
    %c0_7 = arith.constant 0 : index
    %c0_8 = arith.constant 0 : index
    %7 = vector.load %arg4[%c0_7, %c0_8] : memref<1x128xf32, #tpu.memory_space<vmem>>, vector<1x128xf32>
    %8 = vector.broadcast %7 : vector<1x128xf32> to vector<256x128xf32>
    %9 = arith.mulf %5, %8 : vector<256x128xf32>
    %c0_9 = arith.constant 0 : index
    %c0_10 = arith.constant 0 : index
    %10 = vector.load %arg5[%c0_9, %c0_10] : memref<1x128xf32, #tpu.memory_space<vmem>>, vector<1x128xf32>
    %11 = vector.broadcast %10 : vector<1x128xf32> to vector<256x128xf32>
    %12 = arith.addf %9, %11 : vector<256x128xf32>
    %cst_11 = arith.constant 0.000000e+00 : f32
    %13 = vector.broadcast %cst_11 : f32 to vector<256x128xf32>
    %14 = arith.maximumf %12, %13 : vector<256x128xf32>
    %c0_12 = arith.constant 0 : index
    %c0_13 = arith.constant 0 : index
    %15 = vector.load %arg7[%c0_12, %c0_13] : memref<256x128xf32, #tpu.memory_space<vmem>>, vector<256x128xf32>
    tpu.vector_store %arg7[%c0_12, %c0_13], %14 {strides = array<i32>} : memref<256x128xf32, #tpu.memory_space<vmem>>, vector<256x128xf32>,
    return
  }
  func.func @transform_0(%arg0: i32) -> (i32, i32) {
    %c0_i32 = arith.constant 0 : i32
    %c0_i32_0 = arith.constant 0 : i32
    return %arg0, %c0_i32 : i32, i32
  }
  func.func @transform_1(%arg0: i32) -> (i32, i32) {
    %c0_i32 = arith.constant 0 : i32
    %c0_i32_0 = arith.constant 0 : i32
    %c0_i32_1 = arith.constant 0 : i32
    return %c0_i32, %c0_i32_0 : i32, i32
  }
  func.func @transform_2(%arg0: i32) -> (i32, i32) {
    %c0_i32 = arith.constant 0 : i32
    %c0_i32_0 = arith.constant 0 : i32
    %c0_i32_1 = arith.constant 0 : i32
    return %c0_i32, %c0_i32_0 : i32, i32
  }
  func.func @transform_3(%arg0: i32) -> (i32, i32) {
    %c0_i32 = arith.constant 0 : i32
    %c0_i32_0 = arith.constant 0 : i32
    %c0_i32_1 = arith.constant 0 : i32
    return %c0_i32, %c0_i32_0 : i32, i32
  }
  func.func @transform_4(%arg0: i32) -> (i32, i32) {
    %c0_i32 = arith.constant 0 : i32
    %c0_i32_0 = arith.constant 0 : i32
    %c0_i32_1 = arith.constant 0 : i32
    return %c0_i32, %c0_i32_0 : i32, i32
  }
  func.func @transform_5(%arg0: i32) -> (i32, i32) {
    %c0_i32 = arith.constant 0 : i32
    %c0_i32_0 = arith.constant 0 : i32
    return %arg0, %c0_i32 : i32, i32
  }
  func.func @transform_6(%arg0: i32) -> (i32, i32) {
    %c0_i32 = arith.constant 0 : i32
    %c0_i32_0 = arith.constant 0 : i32
    return %arg0, %c0_i32 : i32, i32
  }
}

module attributes {stable_mosaic.version = 11 : i64} {
  func.func @_fused_conv_kernel(%arg0: i32, %arg1: memref<256x1152xbf16, #tpu.memory_space<vmem>>, %arg2: memref<1152x128xbf16, #tpu.memory_space<vmem>>, %arg3: memref<1x128xf32, #tpu.memory_space<vmem>>, %arg4: memref<1x128xf32, #tpu.memory_space<vmem>>, %arg5: memref<1x128xf32, #tpu.memory_space<vmem>>, %arg6: memref<256x128xf32, #tpu.memory_space<vmem>>) attributes {dimension_semantics = [#tpu.dimension_semantics<parallel>], iteration_bounds = array<i64: 2>, scalar_prefetch = 0 : i64, scratch_operands = 0 : i64, tpu.core_type = #tpu.core_type<tc>, window_params = [{transform_indices = @transform_0, window_bounds = array<i64: 256, 1152>}, {pipeline_mode = #tpu.pipeline_mode<synchronous>, transform_indices = @transform_1, window_bounds = array<i64: 1152, 128>}, {pipeline_mode = #tpu.pipeline_mode<synchronous>, transform_indices = @transform_2, window_bounds = array<i64: 1, 128>}, {pipeline_mode = #tpu.pipeline_mode<synchronous>, transform_indices = @transform_3, window_bounds = array<i64: 1, 128>}, {pipeline_mode = #tpu.pipeline_mode<synchronous>, transform_indices = @transform_4, window_bounds = array<i64: 1, 128>}, {transform_indices = @transform_5, window_bounds = array<i64: 256, 128>}]} {
    %c0 = arith.constant 0 : index
    %c0_0 = arith.constant 0 : index
    %0 = vector.load %arg1[%c0, %c0_0] : memref<256x1152xbf16, #tpu.memory_space<vmem>>, vector<256x1152xbf16>
    %c0_1 = arith.constant 0 : index
    %c0_2 = arith.constant 0 : index
    %1 = vector.load %arg2[%c0_1, %c0_2] : memref<1152x128xbf16, #tpu.memory_space<vmem>>, vector<1152x128xbf16>
    %cst = arith.constant dense<0.000000e+00> : vector<256x128xf32>
    %2 = tpu.matmul %0, %1, %cst {dimension_numbers = #tpu.dot_dimension_numbers<[1], [0], [0], [1], [0, 0, 1, 1], [], []>} : vector<256x1152xbf16>, vector<1152x128xbf16>, vector<256x128xf32> -> vector<256x128xf32>
    %c0_3 = arith.constant 0 : index
    %c0_4 = arith.constant 0 : index
    %3 = vector.load %arg3[%c0_3, %c0_4] : memref<1x128xf32, #tpu.memory_space<vmem>>, vector<1x128xf32>
    %4 = vector.broadcast %3 : vector<1x128xf32> to vector<256x128xf32>
    %5 = arith.addf %2, %4 : vector<256x128xf32>
    %c0_5 = arith.constant 0 : index
    %c0_6 = arith.constant 0 : index
    %6 = vector.load %arg4[%c0_5, %c0_6] : memref<1x128xf32, #tpu.memory_space<vmem>>, vector<1x128xf32>
    %7 = vector.broadcast %6 : vector<1x128xf32> to vector<256x128xf32>
    %8 = arith.mulf %5, %7 : vector<256x128xf32>
    %c0_7 = arith.constant 0 : index
    %c0_8 = arith.constant 0 : index
    %9 = vector.load %arg5[%c0_7, %c0_8] : memref<1x128xf32, #tpu.memory_space<vmem>>, vector<1x128xf32>
    %10 = vector.broadcast %9 : vector<1x128xf32> to vector<256x128xf32>
    %11 = arith.addf %8, %10 : vector<256x128xf32>
    %cst_9 = arith.constant 0.000000e+00 : f32
    %12 = vector.broadcast %cst_9 : f32 to vector<256x128xf32>
    %13 = arith.maximumf %11, %12 : vector<256x128xf32>
    %c0_10 = arith.constant 0 : index
    %c0_11 = arith.constant 0 : index
    %14 = vector.load %arg6[%c0_10, %c0_11] : memref<256x128xf32, #tpu.memory_space<vmem>>, vector<256x128xf32>
    tpu.vector_store %arg6[%c0_10, %c0_11], %13 {strides = array<i32>} : memref<256x128xf32, #tpu.memory_space<vmem>>, vector<256x128xf32>,
    return
  }
  func.func @transform_0(%arg0: i32) -> (i32, i32) {
    %c0_i32 = arith.constant 0 : i32
    %c0_i32_0 = arith.constant 0 : i32
    return %arg0, %c0_i32 : i32, i32
  }
  func.func @transform_1(%arg0: i32) -> (i32, i32) {
    %c0_i32 = arith.constant 0 : i32
    %c0_i32_0 = arith.constant 0 : i32
    %c0_i32_1 = arith.constant 0 : i32
    return %c0_i32, %c0_i32_0 : i32, i32
  }
  func.func @transform_2(%arg0: i32) -> (i32, i32) {
    %c0_i32 = arith.constant 0 : i32
    %c0_i32_0 = arith.constant 0 : i32
    %c0_i32_1 = arith.constant 0 : i32
    return %c0_i32, %c0_i32_0 : i32, i32
  }
  func.func @transform_3(%arg0: i32) -> (i32, i32) {
    %c0_i32 = arith.constant 0 : i32
    %c0_i32_0 = arith.constant 0 : i32
    %c0_i32_1 = arith.constant 0 : i32
    return %c0_i32, %c0_i32_0 : i32, i32
  }
  func.func @transform_4(%arg0: i32) -> (i32, i32) {
    %c0_i32 = arith.constant 0 : i32
    %c0_i32_0 = arith.constant 0 : i32
    %c0_i32_1 = arith.constant 0 : i32
    return %c0_i32, %c0_i32_0 : i32, i32
  }
  func.func @transform_5(%arg0: i32) -> (i32, i32) {
    %c0_i32 = arith.constant 0 : i32
    %c0_i32_0 = arith.constant 0 : i32
    return %arg0, %c0_i32 : i32, i32
  }
}

module attributes {stable_mosaic.version = 11 : i64} {
  func.func @_fused_conv_kernel(%arg0: i32, %arg1: memref<256x1152xbf16, #tpu.memory_space<vmem>>, %arg2: memref<1152x128xbf16, #tpu.memory_space<vmem>>, %arg3: memref<1x128xf32, #tpu.memory_space<vmem>>, %arg4: memref<256x128xf32, #tpu.memory_space<vmem>>, %arg5: memref<1x128xf32, #tpu.memory_space<vmem>>, %arg6: memref<1x128xf32, #tpu.memory_space<vmem>>, %arg7: memref<256x128xf32, #tpu.memory_space<vmem>>, %arg8: memref<256x128xf32, #tpu.memory_space<vmem>>) attributes {dimension_semantics = [#tpu.dimension_semantics<parallel>], iteration_bounds = array<i64: 2>, scalar_prefetch = 0 : i64, scratch_operands = 0 : i64, tpu.core_type = #tpu.core_type<tc>, window_params = [{transform_indices = @transform_0, window_bounds = array<i64: 256, 1152>}, {pipeline_mode = #tpu.pipeline_mode<synchronous>, transform_indices = @transform_1, window_bounds = array<i64: 1152, 128>}, {pipeline_mode = #tpu.pipeline_mode<synchronous>, transform_indices = @transform_2, window_bounds = array<i64: 1, 128>}, {transform_indices = @transform_3, window_bounds = array<i64: 256, 128>}, {pipeline_mode = #tpu.pipeline_mode<synchronous>, transform_indices = @transform_4, window_bounds = array<i64: 1, 128>}, {pipeline_mode = #tpu.pipeline_mode<synchronous>, transform_indices = @transform_5, window_bounds = array<i64: 1, 128>}, {transform_indices = @transform_6, window_bounds = array<i64: 256, 128>}, {transform_indices = @transform_7, window_bounds = array<i64: 256, 128>}]} {
    %c0 = arith.constant 0 : index
    %c0_0 = arith.constant 0 : index
    %0 = vector.load %arg1[%c0, %c0_0] : memref<256x1152xbf16, #tpu.memory_space<vmem>>, vector<256x1152xbf16>
    %c0_1 = arith.constant 0 : index
    %c0_2 = arith.constant 0 : index
    %1 = vector.load %arg2[%c0_1, %c0_2] : memref<1152x128xbf16, #tpu.memory_space<vmem>>, vector<1152x128xbf16>
    %cst = arith.constant dense<0.000000e+00> : vector<256x128xf32>
    %2 = tpu.matmul %0, %1, %cst {dimension_numbers = #tpu.dot_dimension_numbers<[1], [0], [0], [1], [0, 0, 1, 1], [], []>} : vector<256x1152xbf16>, vector<1152x128xbf16>, vector<256x128xf32> -> vector<256x128xf32>
    %c0_3 = arith.constant 0 : index
    %c0_4 = arith.constant 0 : index
    %3 = vector.load %arg3[%c0_3, %c0_4] : memref<1x128xf32, #tpu.memory_space<vmem>>, vector<1x128xf32>
    %4 = vector.broadcast %3 : vector<1x128xf32> to vector<256x128xf32>
    %5 = arith.addf %2, %4 : vector<256x128xf32>
    %c0_5 = arith.constant 0 : index
    %c0_6 = arith.constant 0 : index
    %6 = vector.load %arg4[%c0_5, %c0_6] : memref<256x128xf32, #tpu.memory_space<vmem>>, vector<256x128xf32>
    %7 = arith.addf %5, %6 : vector<256x128xf32>
    %c0_7 = arith.constant 0 : index
    %c0_8 = arith.constant 0 : index
    %8 = vector.load %arg7[%c0_7, %c0_8] : memref<256x128xf32, #tpu.memory_space<vmem>>, vector<256x128xf32>
    tpu.vector_store %arg7[%c0_7, %c0_8], %7 {strides = array<i32>} : memref<256x128xf32, #tpu.memory_space<vmem>>, vector<256x128xf32>,
    %c0_9 = arith.constant 0 : index
    %c0_10 = arith.constant 0 : index
    %9 = vector.load %arg5[%c0_9, %c0_10] : memref<1x128xf32, #tpu.memory_space<vmem>>, vector<1x128xf32>
    %10 = vector.broadcast %9 : vector<1x128xf32> to vector<256x128xf32>
    %11 = arith.mulf %7, %10 : vector<256x128xf32>
    %c0_11 = arith.constant 0 : index
    %c0_12 = arith.constant 0 : index
    %12 = vector.load %arg6[%c0_11, %c0_12] : memref<1x128xf32, #tpu.memory_space<vmem>>, vector<1x128xf32>
    %13 = vector.broadcast %12 : vector<1x128xf32> to vector<256x128xf32>
    %14 = arith.addf %11, %13 : vector<256x128xf32>
    %cst_13 = arith.constant 0.000000e+00 : f32
    %15 = vector.broadcast %cst_13 : f32 to vector<256x128xf32>
    %16 = arith.maximumf %14, %15 : vector<256x128xf32>
    %c0_14 = arith.constant 0 : index
    %c0_15 = arith.constant 0 : index
    %17 = vector.load %arg8[%c0_14, %c0_15] : memref<256x128xf32, #tpu.memory_space<vmem>>, vector<256x128xf32>
    tpu.vector_store %arg8[%c0_14, %c0_15], %16 {strides = array<i32>} : memref<256x128xf32, #tpu.memory_space<vmem>>, vector<256x128xf32>,
    return
  }
  func.func @transform_0(%arg0: i32) -> (i32, i32) {
    %c0_i32 = arith.constant 0 : i32
    %c0_i32_0 = arith.constant 0 : i32
    return %arg0, %c0_i32 : i32, i32
  }
  func.func @transform_1(%arg0: i32) -> (i32, i32) {
    %c0_i32 = arith.constant 0 : i32
    %c0_i32_0 = arith.constant 0 : i32
    %c0_i32_1 = arith.constant 0 : i32
    return %c0_i32, %c0_i32_0 : i32, i32
  }
  func.func @transform_2(%arg0: i32) -> (i32, i32) {
    %c0_i32 = arith.constant 0 : i32
    %c0_i32_0 = arith.constant 0 : i32
    %c0_i32_1 = arith.constant 0 : i32
    return %c0_i32, %c0_i32_0 : i32, i32
  }
  func.func @transform_3(%arg0: i32) -> (i32, i32) {
    %c0_i32 = arith.constant 0 : i32
    %c0_i32_0 = arith.constant 0 : i32
    return %arg0, %c0_i32 : i32, i32
  }
  func.func @transform_4(%arg0: i32) -> (i32, i32) {
    %c0_i32 = arith.constant 0 : i32
    %c0_i32_0 = arith.constant 0 : i32
    %c0_i32_1 = arith.constant 0 : i32
    return %c0_i32, %c0_i32_0 : i32, i32
  }
  func.func @transform_5(%arg0: i32) -> (i32, i32) {
    %c0_i32 = arith.constant 0 : i32
    %c0_i32_0 = arith.constant 0 : i32
    %c0_i32_1 = arith.constant 0 : i32
    return %c0_i32, %c0_i32_0 : i32, i32
  }
  func.func @transform_6(%arg0: i32) -> (i32, i32) {
    %c0_i32 = arith.constant 0 : i32
    %c0_i32_0 = arith.constant 0 : i32
    return %arg0, %c0_i32 : i32, i32
  }
  func.func @transform_7(%arg0: i32) -> (i32, i32) {
    %c0_i32 = arith.constant 0 : i32
    %c0_i32_0 = arith.constant 0 : i32
    return %arg0, %c0_i32 : i32, i32
  }
}

module attributes {stable_mosaic.version = 11 : i64} {
  func.func @_fused_conv_kernel(%arg0: i32, %arg1: memref<128x128xbf16, #tpu.memory_space<vmem>>, %arg2: memref<128x128xbf16, #tpu.memory_space<vmem>>, %arg3: memref<1x128xf32, #tpu.memory_space<vmem>>, %arg4: memref<128x128xf32, #tpu.memory_space<vmem>>) attributes {dimension_semantics = [#tpu.dimension_semantics<parallel>], iteration_bounds = array<i64: 1>, scalar_prefetch = 0 : i64, scratch_operands = 0 : i64, tpu.core_type = #tpu.core_type<tc>, window_params = [{transform_indices = @transform_0, window_bounds = array<i64: 128, 128>}, {pipeline_mode = #tpu.pipeline_mode<synchronous>, transform_indices = @transform_1, window_bounds = array<i64: 128, 128>}, {pipeline_mode = #tpu.pipeline_mode<synchronous>, transform_indices = @transform_2, window_bounds = array<i64: 1, 128>}, {transform_indices = @transform_3, window_bounds = array<i64: 128, 128>}]} {
    %c0 = arith.constant 0 : index
    %c0_0 = arith.constant 0 : index
    %0 = vector.load %arg1[%c0, %c0_0] : memref<128x128xbf16, #tpu.memory_space<vmem>>, vector<128x128xbf16>
    %c0_1 = arith.constant 0 : index
    %c0_2 = arith.constant 0 : index
    %1 = vector.load %arg2[%c0_1, %c0_2] : memref<128x128xbf16, #tpu.memory_space<vmem>>, vector<128x128xbf16>
    %cst = arith.constant dense<0.000000e+00> : vector<128x128xf32>
    %2 = tpu.matmul %0, %1, %cst {dimension_numbers = #tpu.dot_dimension_numbers<[1], [0], [0], [1], [0, 0, 1, 1], [], []>} : vector<128x128xbf16>, vector<128x128xbf16>, vector<128x128xf32> -> vector<128x128xf32>
    %c0_3 = arith.constant 0 : index
    %c0_4 = arith.constant 0 : index
    %3 = vector.load %arg3[%c0_3, %c0_4] : memref<1x128xf32, #tpu.memory_space<vmem>>, vector<1x128xf32>
    %4 = vector.broadcast %3 : vector<1x128xf32> to vector<128x128xf32>
    %5 = arith.addf %2, %4 : vector<128x128xf32>
    %c0_5 = arith.constant 0 : index
    %c0_6 = arith.constant 0 : index
    %6 = vector.load %arg4[%c0_5, %c0_6] : memref<128x128xf32, #tpu.memory_space<vmem>>, vector<128x128xf32>
    tpu.vector_store %arg4[%c0_5, %c0_6], %5 {strides = array<i32>} : memref<128x128xf32, #tpu.memory_space<vmem>>, vector<128x128xf32>,
    return
  }
  func.func @transform_0(%arg0: i32) -> (i32, i32) {
    %c0_i32 = arith.constant 0 : i32
    %c0_i32_0 = arith.constant 0 : i32
    return %arg0, %c0_i32 : i32, i32
  }
  func.func @transform_1(%arg0: i32) -> (i32, i32) {
    %c0_i32 = arith.constant 0 : i32
    %c0_i32_0 = arith.constant 0 : i32
    %c0_i32_1 = arith.constant 0 : i32
    return %c0_i32, %c0_i32_0 : i32, i32
  }
  func.func @transform_2(%arg0: i32) -> (i32, i32) {
    %c0_i32 = arith.constant 0 : i32
    %c0_i32_0 = arith.constant 0 : i32
    %c0_i32_1 = arith.constant 0 : i32
    return %c0_i32, %c0_i32_0 : i32, i32
  }
  func.func @transform_3(%arg0: i32) -> (i32, i32) {
    %c0_i32 = arith.constant 0 : i32
    %c0_i32_0 = arith.constant 0 : i32
    return %arg0, %c0_i32 : i32, i32
  }
}

module attributes {stable_mosaic.version = 11 : i64} {
  func.func @_fused_conv_kernel(%arg0: i32, %arg1: memref<128x1152xbf16, #tpu.memory_space<vmem>>, %arg2: memref<1152x128xbf16, #tpu.memory_space<vmem>>, %arg3: memref<1x128xf32, #tpu.memory_space<vmem>>, %arg4: memref<1x128xf32, #tpu.memory_space<vmem>>, %arg5: memref<1x128xf32, #tpu.memory_space<vmem>>, %arg6: memref<128x128xf32, #tpu.memory_space<vmem>>) attributes {dimension_semantics = [#tpu.dimension_semantics<parallel>], iteration_bounds = array<i64: 1>, scalar_prefetch = 0 : i64, scratch_operands = 0 : i64, tpu.core_type = #tpu.core_type<tc>, window_params = [{transform_indices = @transform_0, window_bounds = array<i64: 128, 1152>}, {pipeline_mode = #tpu.pipeline_mode<synchronous>, transform_indices = @transform_1, window_bounds = array<i64: 1152, 128>}, {pipeline_mode = #tpu.pipeline_mode<synchronous>, transform_indices = @transform_2, window_bounds = array<i64: 1, 128>}, {pipeline_mode = #tpu.pipeline_mode<synchronous>, transform_indices = @transform_3, window_bounds = array<i64: 1, 128>}, {pipeline_mode = #tpu.pipeline_mode<synchronous>, transform_indices = @transform_4, window_bounds = array<i64: 1, 128>}, {transform_indices = @transform_5, window_bounds = array<i64: 128, 128>}]} {
    %c0 = arith.constant 0 : index
    %c0_0 = arith.constant 0 : index
    %0 = vector.load %arg1[%c0, %c0_0] : memref<128x1152xbf16, #tpu.memory_space<vmem>>, vector<128x1152xbf16>
    %c0_1 = arith.constant 0 : index
    %c0_2 = arith.constant 0 : index
    %1 = vector.load %arg2[%c0_1, %c0_2] : memref<1152x128xbf16, #tpu.memory_space<vmem>>, vector<1152x128xbf16>
    %cst = arith.constant dense<0.000000e+00> : vector<128x128xf32>
    %2 = tpu.matmul %0, %1, %cst {dimension_numbers = #tpu.dot_dimension_numbers<[1], [0], [0], [1], [0, 0, 1, 1], [], []>} : vector<128x1152xbf16>, vector<1152x128xbf16>, vector<128x128xf32> -> vector<128x128xf32>
    %c0_3 = arith.constant 0 : index
    %c0_4 = arith.constant 0 : index
    %3 = vector.load %arg3[%c0_3, %c0_4] : memref<1x128xf32, #tpu.memory_space<vmem>>, vector<1x128xf32>
    %4 = vector.broadcast %3 : vector<1x128xf32> to vector<128x128xf32>
    %5 = arith.addf %2, %4 : vector<128x128xf32>
    %c0_5 = arith.constant 0 : index
    %c0_6 = arith.constant 0 : index
    %6 = vector.load %arg4[%c0_5, %c0_6] : memref<1x128xf32, #tpu.memory_space<vmem>>, vector<1x128xf32>
    %7 = vector.broadcast %6 : vector<1x128xf32> to vector<128x128xf32>
    %8 = arith.mulf %5, %7 : vector<128x128xf32>
    %c0_7 = arith.constant 0 : index
    %c0_8 = arith.constant 0 : index
    %9 = vector.load %arg5[%c0_7, %c0_8] : memref<1x128xf32, #tpu.memory_space<vmem>>, vector<1x128xf32>
    %10 = vector.broadcast %9 : vector<1x128xf32> to vector<128x128xf32>
    %11 = arith.addf %8, %10 : vector<128x128xf32>
    %cst_9 = arith.constant 0.000000e+00 : f32
    %12 = vector.broadcast %cst_9 : f32 to vector<128x128xf32>
    %13 = arith.maximumf %11, %12 : vector<128x128xf32>
    %c0_10 = arith.constant 0 : index
    %c0_11 = arith.constant 0 : index
    %14 = vector.load %arg6[%c0_10, %c0_11] : memref<128x128xf32, #tpu.memory_space<vmem>>, vector<128x128xf32>
    tpu.vector_store %arg6[%c0_10, %c0_11], %13 {strides = array<i32>} : memref<128x128xf32, #tpu.memory_space<vmem>>, vector<128x128xf32>,
    return
  }
  func.func @transform_0(%arg0: i32) -> (i32, i32) {
    %c0_i32 = arith.constant 0 : i32
    %c0_i32_0 = arith.constant 0 : i32
    return %arg0, %c0_i32 : i32, i32
  }
  func.func @transform_1(%arg0: i32) -> (i32, i32) {
    %c0_i32 = arith.constant 0 : i32
    %c0_i32_0 = arith.constant 0 : i32
    %c0_i32_1 = arith.constant 0 : i32
    return %c0_i32, %c0_i32_0 : i32, i32
  }
  func.func @transform_2(%arg0: i32) -> (i32, i32) {
    %c0_i32 = arith.constant 0 : i32
    %c0_i32_0 = arith.constant 0 : i32
    %c0_i32_1 = arith.constant 0 : i32
    return %c0_i32, %c0_i32_0 : i32, i32
  }
  func.func @transform_3(%arg0: i32) -> (i32, i32) {
    %c0_i32 = arith.constant 0 : i32
    %c0_i32_0 = arith.constant 0 : i32
    %c0_i32_1 = arith.constant 0 : i32
    return %c0_i32, %c0_i32_0 : i32, i32
  }
  func.func @transform_4(%arg0: i32) -> (i32, i32) {
    %c0_i32 = arith.constant 0 : i32
    %c0_i32_0 = arith.constant 0 : i32
    %c0_i32_1 = arith.constant 0 : i32
    return %c0_i32, %c0_i32_0 : i32, i32
  }
  func.func @transform_5(%arg0: i32) -> (i32, i32) {
    %c0_i32 = arith.constant 0 : i32
    %c0_i32_0 = arith.constant 0 : i32
    return %arg0, %c0_i32 : i32, i32
  }
}

module attributes {stable_mosaic.version = 11 : i64} {
  func.func @_fused_conv_kernel(%arg0: i32, %arg1: memref<128x1152xbf16, #tpu.memory_space<vmem>>, %arg2: memref<1152x128xbf16, #tpu.memory_space<vmem>>, %arg3: memref<1x128xf32, #tpu.memory_space<vmem>>, %arg4: memref<128x128xf32, #tpu.memory_space<vmem>>, %arg5: memref<1x128xf32, #tpu.memory_space<vmem>>, %arg6: memref<1x128xf32, #tpu.memory_space<vmem>>, %arg7: memref<128x128xf32, #tpu.memory_space<vmem>>, %arg8: memref<128x128xf32, #tpu.memory_space<vmem>>) attributes {dimension_semantics = [#tpu.dimension_semantics<parallel>], iteration_bounds = array<i64: 1>, scalar_prefetch = 0 : i64, scratch_operands = 0 : i64, tpu.core_type = #tpu.core_type<tc>, window_params = [{transform_indices = @transform_0, window_bounds = array<i64: 128, 1152>}, {pipeline_mode = #tpu.pipeline_mode<synchronous>, transform_indices = @transform_1, window_bounds = array<i64: 1152, 128>}, {pipeline_mode = #tpu.pipeline_mode<synchronous>, transform_indices = @transform_2, window_bounds = array<i64: 1, 128>}, {transform_indices = @transform_3, window_bounds = array<i64: 128, 128>}, {pipeline_mode = #tpu.pipeline_mode<synchronous>, transform_indices = @transform_4, window_bounds = array<i64: 1, 128>}, {pipeline_mode = #tpu.pipeline_mode<synchronous>, transform_indices = @transform_5, window_bounds = array<i64: 1, 128>}, {transform_indices = @transform_6, window_bounds = array<i64: 128, 128>}, {transform_indices = @transform_7, window_bounds = array<i64: 128, 128>}]} {
    %c0 = arith.constant 0 : index
    %c0_0 = arith.constant 0 : index
    %0 = vector.load %arg1[%c0, %c0_0] : memref<128x1152xbf16, #tpu.memory_space<vmem>>, vector<128x1152xbf16>
    %c0_1 = arith.constant 0 : index
    %c0_2 = arith.constant 0 : index
    %1 = vector.load %arg2[%c0_1, %c0_2] : memref<1152x128xbf16, #tpu.memory_space<vmem>>, vector<1152x128xbf16>
    %cst = arith.constant dense<0.000000e+00> : vector<128x128xf32>
    %2 = tpu.matmul %0, %1, %cst {dimension_numbers = #tpu.dot_dimension_numbers<[1], [0], [0], [1], [0, 0, 1, 1], [], []>} : vector<128x1152xbf16>, vector<1152x128xbf16>, vector<128x128xf32> -> vector<128x128xf32>
    %c0_3 = arith.constant 0 : index
    %c0_4 = arith.constant 0 : index
    %3 = vector.load %arg3[%c0_3, %c0_4] : memref<1x128xf32, #tpu.memory_space<vmem>>, vector<1x128xf32>
    %4 = vector.broadcast %3 : vector<1x128xf32> to vector<128x128xf32>
    %5 = arith.addf %2, %4 : vector<128x128xf32>
    %c0_5 = arith.constant 0 : index
    %c0_6 = arith.constant 0 : index
    %6 = vector.load %arg4[%c0_5, %c0_6] : memref<128x128xf32, #tpu.memory_space<vmem>>, vector<128x128xf32>
    %7 = arith.addf %5, %6 : vector<128x128xf32>
    %c0_7 = arith.constant 0 : index
    %c0_8 = arith.constant 0 : index
    %8 = vector.load %arg7[%c0_7, %c0_8] : memref<128x128xf32, #tpu.memory_space<vmem>>, vector<128x128xf32>
    tpu.vector_store %arg7[%c0_7, %c0_8], %7 {strides = array<i32>} : memref<128x128xf32, #tpu.memory_space<vmem>>, vector<128x128xf32>,
    %c0_9 = arith.constant 0 : index
    %c0_10 = arith.constant 0 : index
    %9 = vector.load %arg5[%c0_9, %c0_10] : memref<1x128xf32, #tpu.memory_space<vmem>>, vector<1x128xf32>
    %10 = vector.broadcast %9 : vector<1x128xf32> to vector<128x128xf32>
    %11 = arith.mulf %7, %10 : vector<128x128xf32>
    %c0_11 = arith.constant 0 : index
    %c0_12 = arith.constant 0 : index
    %12 = vector.load %arg6[%c0_11, %c0_12] : memref<1x128xf32, #tpu.memory_space<vmem>>, vector<1x128xf32>
    %13 = vector.broadcast %12 : vector<1x128xf32> to vector<128x128xf32>
    %14 = arith.addf %11, %13 : vector<128x128xf32>
    %cst_13 = arith.constant 0.000000e+00 : f32
    %15 = vector.broadcast %cst_13 : f32 to vector<128x128xf32>
    %16 = arith.maximumf %14, %15 : vector<128x128xf32>
    %c0_14 = arith.constant 0 : index
    %c0_15 = arith.constant 0 : index
    %17 = vector.load %arg8[%c0_14, %c0_15] : memref<128x128xf32, #tpu.memory_space<vmem>>, vector<128x128xf32>
    tpu.vector_store %arg8[%c0_14, %c0_15], %16 {strides = array<i32>} : memref<128x128xf32, #tpu.memory_space<vmem>>, vector<128x128xf32>,
    return
  }
  func.func @transform_0(%arg0: i32) -> (i32, i32) {
    %c0_i32 = arith.constant 0 : i32
    %c0_i32_0 = arith.constant 0 : i32
    return %arg0, %c0_i32 : i32, i32
  }
  func.func @transform_1(%arg0: i32) -> (i32, i32) {
    %c0_i32 = arith.constant 0 : i32
    %c0_i32_0 = arith.constant 0 : i32
    %c0_i32_1 = arith.constant 0 : i32
    return %c0_i32, %c0_i32_0 : i32, i32
  }
  func.func @transform_2(%arg0: i32) -> (i32, i32) {
    %c0_i32 = arith.constant 0 : i32
    %c0_i32_0 = arith.constant 0 : i32
    %c0_i32_1 = arith.constant 0 : i32
    return %c0_i32, %c0_i32_0 : i32, i32
  }
  func.func @transform_3(%arg0: i32) -> (i32, i32) {
    %c0_i32 = arith.constant 0 : i32
    %c0_i32_0 = arith.constant 0 : i32
    return %arg0, %c0_i32 : i32, i32
  }
  func.func @transform_4(%arg0: i32) -> (i32, i32) {
    %c0_i32 = arith.constant 0 : i32
    %c0_i32_0 = arith.constant 0 : i32
    %c0_i32_1 = arith.constant 0 : i32
    return %c0_i32, %c0_i32_0 : i32, i32
  }
  func.func @transform_5(%arg0: i32) -> (i32, i32) {
    %c0_i32 = arith.constant 0 : i32
    %c0_i32_0 = arith.constant 0 : i32
    %c0_i32_1 = arith.constant 0 : i32
    return %c0_i32, %c0_i32_0 : i32, i32
  }
  func.func @transform_6(%arg0: i32) -> (i32, i32) {
    %c0_i32 = arith.constant 0 : i32
    %c0_i32_0 = arith.constant 0 : i32
    return %arg0, %c0_i32 : i32, i32
  }
  func.func @transform_7(%arg0: i32) -> (i32, i32) {
    %c0_i32 = arith.constant 0 : i32
    %c0_i32_0 = arith.constant 0 : i32
    return %arg0, %c0_i32 : i32, i32
  }
}

module attributes {stable_mosaic.version = 11 : i64} {
  func.func @_fused_conv_kernel(%arg0: i32, %arg1: memref<32x128xbf16, #tpu.memory_space<vmem>>, %arg2: memref<128x128xbf16, #tpu.memory_space<vmem>>, %arg3: memref<1x128xf32, #tpu.memory_space<vmem>>, %arg4: memref<32x128xf32, #tpu.memory_space<vmem>>) attributes {dimension_semantics = [#tpu.dimension_semantics<parallel>], iteration_bounds = array<i64: 1>, scalar_prefetch = 0 : i64, scratch_operands = 0 : i64, tpu.core_type = #tpu.core_type<tc>, window_params = [{transform_indices = @transform_0, window_bounds = array<i64: 32, 128>}, {pipeline_mode = #tpu.pipeline_mode<synchronous>, transform_indices = @transform_1, window_bounds = array<i64: 128, 128>}, {pipeline_mode = #tpu.pipeline_mode<synchronous>, transform_indices = @transform_2, window_bounds = array<i64: 1, 128>}, {transform_indices = @transform_3, window_bounds = array<i64: 32, 128>}]} {
    %c0 = arith.constant 0 : index
    %c0_0 = arith.constant 0 : index
    %0 = vector.load %arg1[%c0, %c0_0] : memref<32x128xbf16, #tpu.memory_space<vmem>>, vector<32x128xbf16>
    %c0_1 = arith.constant 0 : index
    %c0_2 = arith.constant 0 : index
    %1 = vector.load %arg2[%c0_1, %c0_2] : memref<128x128xbf16, #tpu.memory_space<vmem>>, vector<128x128xbf16>
    %cst = arith.constant dense<0.000000e+00> : vector<32x128xf32>
    %2 = tpu.matmul %0, %1, %cst {dimension_numbers = #tpu.dot_dimension_numbers<[1], [0], [0], [1], [0, 0, 1, 1], [], []>} : vector<32x128xbf16>, vector<128x128xbf16>, vector<32x128xf32> -> vector<32x128xf32>
    %c0_3 = arith.constant 0 : index
    %c0_4 = arith.constant 0 : index
    %3 = vector.load %arg3[%c0_3, %c0_4] : memref<1x128xf32, #tpu.memory_space<vmem>>, vector<1x128xf32>
    %4 = vector.broadcast %3 : vector<1x128xf32> to vector<32x128xf32>
    %5 = arith.addf %2, %4 : vector<32x128xf32>
    %c0_5 = arith.constant 0 : index
    %c0_6 = arith.constant 0 : index
    %6 = vector.load %arg4[%c0_5, %c0_6] : memref<32x128xf32, #tpu.memory_space<vmem>>, vector<32x128xf32>
    tpu.vector_store %arg4[%c0_5, %c0_6], %5 {strides = array<i32>} : memref<32x128xf32, #tpu.memory_space<vmem>>, vector<32x128xf32>,
    return
  }
  func.func @transform_0(%arg0: i32) -> (i32, i32) {
    %c0_i32 = arith.constant 0 : i32
    %c0_i32_0 = arith.constant 0 : i32
    return %arg0, %c0_i32 : i32, i32
  }
  func.func @transform_1(%arg0: i32) -> (i32, i32) {
    %c0_i32 = arith.constant 0 : i32
    %c0_i32_0 = arith.constant 0 : i32
    %c0_i32_1 = arith.constant 0 : i32
    return %c0_i32, %c0_i32_0 : i32, i32
  }
  func.func @transform_2(%arg0: i32) -> (i32, i32) {
    %c0_i32 = arith.constant 0 : i32
    %c0_i32_0 = arith.constant 0 : i32
    %c0_i32_1 = arith.constant 0 : i32
    return %c0_i32, %c0_i32_0 : i32, i32
  }
  func.func @transform_3(%arg0: i32) -> (i32, i32) {
    %c0_i32 = arith.constant 0 : i32
    %c0_i32_0 = arith.constant 0 : i32
    return %arg0, %c0_i32 : i32, i32
  }
}

module attributes {stable_mosaic.version = 11 : i64} {
  func.func @_fused_conv_kernel(%arg0: i32, %arg1: memref<32x1152xbf16, #tpu.memory_space<vmem>>, %arg2: memref<1152x128xbf16, #tpu.memory_space<vmem>>, %arg3: memref<1x128xf32, #tpu.memory_space<vmem>>, %arg4: memref<1x128xf32, #tpu.memory_space<vmem>>, %arg5: memref<1x128xf32, #tpu.memory_space<vmem>>, %arg6: memref<32x128xf32, #tpu.memory_space<vmem>>) attributes {dimension_semantics = [#tpu.dimension_semantics<parallel>], iteration_bounds = array<i64: 1>, scalar_prefetch = 0 : i64, scratch_operands = 0 : i64, tpu.core_type = #tpu.core_type<tc>, window_params = [{transform_indices = @transform_0, window_bounds = array<i64: 32, 1152>}, {pipeline_mode = #tpu.pipeline_mode<synchronous>, transform_indices = @transform_1, window_bounds = array<i64: 1152, 128>}, {pipeline_mode = #tpu.pipeline_mode<synchronous>, transform_indices = @transform_2, window_bounds = array<i64: 1, 128>}, {pipeline_mode = #tpu.pipeline_mode<synchronous>, transform_indices = @transform_3, window_bounds = array<i64: 1, 128>}, {pipeline_mode = #tpu.pipeline_mode<synchronous>, transform_indices = @transform_4, window_bounds = array<i64: 1, 128>}, {transform_indices = @transform_5, window_bounds = array<i64: 32, 128>}]} {
    %c0 = arith.constant 0 : index
    %c0_0 = arith.constant 0 : index
    %0 = vector.load %arg1[%c0, %c0_0] : memref<32x1152xbf16, #tpu.memory_space<vmem>>, vector<32x1152xbf16>
    %c0_1 = arith.constant 0 : index
    %c0_2 = arith.constant 0 : index
    %1 = vector.load %arg2[%c0_1, %c0_2] : memref<1152x128xbf16, #tpu.memory_space<vmem>>, vector<1152x128xbf16>
    %cst = arith.constant dense<0.000000e+00> : vector<32x128xf32>
    %2 = tpu.matmul %0, %1, %cst {dimension_numbers = #tpu.dot_dimension_numbers<[1], [0], [0], [1], [0, 0, 1, 1], [], []>} : vector<32x1152xbf16>, vector<1152x128xbf16>, vector<32x128xf32> -> vector<32x128xf32>
    %c0_3 = arith.constant 0 : index
    %c0_4 = arith.constant 0 : index
    %3 = vector.load %arg3[%c0_3, %c0_4] : memref<1x128xf32, #tpu.memory_space<vmem>>, vector<1x128xf32>
    %4 = vector.broadcast %3 : vector<1x128xf32> to vector<32x128xf32>
    %5 = arith.addf %2, %4 : vector<32x128xf32>
    %c0_5 = arith.constant 0 : index
    %c0_6 = arith.constant 0 : index
    %6 = vector.load %arg4[%c0_5, %c0_6] : memref<1x128xf32, #tpu.memory_space<vmem>>, vector<1x128xf32>
    %7 = vector.broadcast %6 : vector<1x128xf32> to vector<32x128xf32>
    %8 = arith.mulf %5, %7 : vector<32x128xf32>
    %c0_7 = arith.constant 0 : index
    %c0_8 = arith.constant 0 : index
    %9 = vector.load %arg5[%c0_7, %c0_8] : memref<1x128xf32, #tpu.memory_space<vmem>>, vector<1x128xf32>
    %10 = vector.broadcast %9 : vector<1x128xf32> to vector<32x128xf32>
    %11 = arith.addf %8, %10 : vector<32x128xf32>
    %cst_9 = arith.constant 0.000000e+00 : f32
    %12 = vector.broadcast %cst_9 : f32 to vector<32x128xf32>
    %13 = arith.maximumf %11, %12 : vector<32x128xf32>
    %c0_10 = arith.constant 0 : index
    %c0_11 = arith.constant 0 : index
    %14 = vector.load %arg6[%c0_10, %c0_11] : memref<32x128xf32, #tpu.memory_space<vmem>>, vector<32x128xf32>
    tpu.vector_store %arg6[%c0_10, %c0_11], %13 {strides = array<i32>} : memref<32x128xf32, #tpu.memory_space<vmem>>, vector<32x128xf32>,
    return
  }
  func.func @transform_0(%arg0: i32) -> (i32, i32) {
    %c0_i32 = arith.constant 0 : i32
    %c0_i32_0 = arith.constant 0 : i32
    return %arg0, %c0_i32 : i32, i32
  }
  func.func @transform_1(%arg0: i32) -> (i32, i32) {
    %c0_i32 = arith.constant 0 : i32
    %c0_i32_0 = arith.constant 0 : i32
    %c0_i32_1 = arith.constant 0 : i32
    return %c0_i32, %c0_i32_0 : i32, i32
  }
  func.func @transform_2(%arg0: i32) -> (i32, i32) {
    %c0_i32 = arith.constant 0 : i32
    %c0_i32_0 = arith.constant 0 : i32
    %c0_i32_1 = arith.constant 0 : i32
    return %c0_i32, %c0_i32_0 : i32, i32
  }
  func.func @transform_3(%arg0: i32) -> (i32, i32) {
    %c0_i32 = arith.constant 0 : i32
    %c0_i32_0 = arith.constant 0 : i32
    %c0_i32_1 = arith.constant 0 : i32
    return %c0_i32, %c0_i32_0 : i32, i32
  }
  func.func @transform_4(%arg0: i32) -> (i32, i32) {
    %c0_i32 = arith.constant 0 : i32
    %c0_i32_0 = arith.constant 0 : i32
    %c0_i32_1 = arith.constant 0 : i32
    return %c0_i32, %c0_i32_0 : i32, i32
  }
  func.func @transform_5(%arg0: i32) -> (i32, i32) {
    %c0_i32 = arith.constant 0 : i32
    %c0_i32_0 = arith.constant 0 : i32
    return %arg0, %c0_i32 : i32, i32
  }
}

module attributes {stable_mosaic.version = 11 : i64} {
  func.func @_fused_conv_kernel(%arg0: i32, %arg1: memref<32x1152xbf16, #tpu.memory_space<vmem>>, %arg2: memref<1152x128xbf16, #tpu.memory_space<vmem>>, %arg3: memref<1x128xf32, #tpu.memory_space<vmem>>, %arg4: memref<32x128xf32, #tpu.memory_space<vmem>>, %arg5: memref<1x128xf32, #tpu.memory_space<vmem>>, %arg6: memref<1x128xf32, #tpu.memory_space<vmem>>, %arg7: memref<32x128xf32, #tpu.memory_space<vmem>>, %arg8: memref<32x128xf32, #tpu.memory_space<vmem>>) attributes {dimension_semantics = [#tpu.dimension_semantics<parallel>], iteration_bounds = array<i64: 1>, scalar_prefetch = 0 : i64, scratch_operands = 0 : i64, tpu.core_type = #tpu.core_type<tc>, window_params = [{transform_indices = @transform_0, window_bounds = array<i64: 32, 1152>}, {pipeline_mode = #tpu.pipeline_mode<synchronous>, transform_indices = @transform_1, window_bounds = array<i64: 1152, 128>}, {pipeline_mode = #tpu.pipeline_mode<synchronous>, transform_indices = @transform_2, window_bounds = array<i64: 1, 128>}, {transform_indices = @transform_3, window_bounds = array<i64: 32, 128>}, {pipeline_mode = #tpu.pipeline_mode<synchronous>, transform_indices = @transform_4, window_bounds = array<i64: 1, 128>}, {pipeline_mode = #tpu.pipeline_mode<synchronous>, transform_indices = @transform_5, window_bounds = array<i64: 1, 128>}, {transform_indices = @transform_6, window_bounds = array<i64: 32, 128>}, {transform_indices = @transform_7, window_bounds = array<i64: 32, 128>}]} {
    %c0 = arith.constant 0 : index
    %c0_0 = arith.constant 0 : index
    %0 = vector.load %arg1[%c0, %c0_0] : memref<32x1152xbf16, #tpu.memory_space<vmem>>, vector<32x1152xbf16>
    %c0_1 = arith.constant 0 : index
    %c0_2 = arith.constant 0 : index
    %1 = vector.load %arg2[%c0_1, %c0_2] : memref<1152x128xbf16, #tpu.memory_space<vmem>>, vector<1152x128xbf16>
    %cst = arith.constant dense<0.000000e+00> : vector<32x128xf32>
    %2 = tpu.matmul %0, %1, %cst {dimension_numbers = #tpu.dot_dimension_numbers<[1], [0], [0], [1], [0, 0, 1, 1], [], []>} : vector<32x1152xbf16>, vector<1152x128xbf16>, vector<32x128xf32> -> vector<32x128xf32>
    %c0_3 = arith.constant 0 : index
    %c0_4 = arith.constant 0 : index
    %3 = vector.load %arg3[%c0_3, %c0_4] : memref<1x128xf32, #tpu.memory_space<vmem>>, vector<1x128xf32>
    %4 = vector.broadcast %3 : vector<1x128xf32> to vector<32x128xf32>
    %5 = arith.addf %2, %4 : vector<32x128xf32>
    %c0_5 = arith.constant 0 : index
    %c0_6 = arith.constant 0 : index
    %6 = vector.load %arg4[%c0_5, %c0_6] : memref<32x128xf32, #tpu.memory_space<vmem>>, vector<32x128xf32>
    %7 = arith.addf %5, %6 : vector<32x128xf32>
    %c0_7 = arith.constant 0 : index
    %c0_8 = arith.constant 0 : index
    %8 = vector.load %arg7[%c0_7, %c0_8] : memref<32x128xf32, #tpu.memory_space<vmem>>, vector<32x128xf32>
    tpu.vector_store %arg7[%c0_7, %c0_8], %7 {strides = array<i32>} : memref<32x128xf32, #tpu.memory_space<vmem>>, vector<32x128xf32>,
    %c0_9 = arith.constant 0 : index
    %c0_10 = arith.constant 0 : index
    %9 = vector.load %arg5[%c0_9, %c0_10] : memref<1x128xf32, #tpu.memory_space<vmem>>, vector<1x128xf32>
    %10 = vector.broadcast %9 : vector<1x128xf32> to vector<32x128xf32>
    %11 = arith.mulf %7, %10 : vector<32x128xf32>
    %c0_11 = arith.constant 0 : index
    %c0_12 = arith.constant 0 : index
    %12 = vector.load %arg6[%c0_11, %c0_12] : memref<1x128xf32, #tpu.memory_space<vmem>>, vector<1x128xf32>
    %13 = vector.broadcast %12 : vector<1x128xf32> to vector<32x128xf32>
    %14 = arith.addf %11, %13 : vector<32x128xf32>
    %cst_13 = arith.constant 0.000000e+00 : f32
    %15 = vector.broadcast %cst_13 : f32 to vector<32x128xf32>
    %16 = arith.maximumf %14, %15 : vector<32x128xf32>
    %c0_14 = arith.constant 0 : index
    %c0_15 = arith.constant 0 : index
    %17 = vector.load %arg8[%c0_14, %c0_15] : memref<32x128xf32, #tpu.memory_space<vmem>>, vector<32x128xf32>
    tpu.vector_store %arg8[%c0_14, %c0_15], %16 {strides = array<i32>} : memref<32x128xf32, #tpu.memory_space<vmem>>, vector<32x128xf32>,
    return
  }
  func.func @transform_0(%arg0: i32) -> (i32, i32) {
    %c0_i32 = arith.constant 0 : i32
    %c0_i32_0 = arith.constant 0 : i32
    return %arg0, %c0_i32 : i32, i32
  }
  func.func @transform_1(%arg0: i32) -> (i32, i32) {
    %c0_i32 = arith.constant 0 : i32
    %c0_i32_0 = arith.constant 0 : i32
    %c0_i32_1 = arith.constant 0 : i32
    return %c0_i32, %c0_i32_0 : i32, i32
  }
  func.func @transform_2(%arg0: i32) -> (i32, i32) {
    %c0_i32 = arith.constant 0 : i32
    %c0_i32_0 = arith.constant 0 : i32
    %c0_i32_1 = arith.constant 0 : i32
    return %c0_i32, %c0_i32_0 : i32, i32
  }
  func.func @transform_3(%arg0: i32) -> (i32, i32) {
    %c0_i32 = arith.constant 0 : i32
    %c0_i32_0 = arith.constant 0 : i32
    return %arg0, %c0_i32 : i32, i32
  }
  func.func @transform_4(%arg0: i32) -> (i32, i32) {
    %c0_i32 = arith.constant 0 : i32
    %c0_i32_0 = arith.constant 0 : i32
    %c0_i32_1 = arith.constant 0 : i32
    return %c0_i32, %c0_i32_0 : i32, i32
  }
  func.func @transform_5(%arg0: i32) -> (i32, i32) {
    %c0_i32 = arith.constant 0 : i32
    %c0_i32_0 = arith.constant 0 : i32
    %c0_i32_1 = arith.constant 0 : i32
    return %c0_i32, %c0_i32_0 : i32, i32
  }
  func.func @transform_6(%arg0: i32) -> (i32, i32) {
    %c0_i32 = arith.constant 0 : i32
    %c0_i32_0 = arith.constant 0 : i32
    return %arg0, %c0_i32 : i32, i32
  }
  func.func @transform_7(%arg0: i32) -> (i32, i32) {
    %c0_i32 = arith.constant 0 : i32
    %c0_i32_0 = arith.constant 0 : i32
    return %arg0, %c0_i32 : i32, i32
  }
}

module attributes {stable_mosaic.version = 11 : i64} {
  func.func @_head_kernel(%arg0: memref<2x16x128xf32, #tpu.memory_space<vmem>>, %arg1: memref<128x128xf32, #tpu.memory_space<vmem>>, %arg2: memref<1x128xf32, #tpu.memory_space<vmem>>, %arg3: memref<2x128xf32, #tpu.memory_space<vmem>>) attributes {dimension_semantics = [], scalar_prefetch = 0 : i64, scratch_operands = 0 : i64, tpu.core_type = #tpu.core_type<tc>} {
    %c0 = arith.constant 0 : index
    %c0_0 = arith.constant 0 : index
    %c0_1 = arith.constant 0 : index
    %0 = vector.load %arg0[%c0, %c0_0, %c0_1] : memref<2x16x128xf32, #tpu.memory_space<vmem>>, vector<2x16x128xf32>
    %cst = arith.constant dense<0.000000e+00> : vector<2x128xf32>
    %1 = vector.multi_reduction <add>, %0, %cst [1] : vector<2x16x128xf32> to vector<2x128xf32>
    %cst_2 = arith.constant 1.600000e+01 : f32
    %2 = vector.broadcast %cst_2 : f32 to vector<2x128xf32>
    %3 = arith.divf %1, %2 : vector<2x128xf32>
    %c0_3 = arith.constant 0 : index
    %c0_4 = arith.constant 0 : index
    %4 = vector.load %arg1[%c0_3, %c0_4] : memref<128x128xf32, #tpu.memory_space<vmem>>, vector<128x128xf32>
    %cst_5 = arith.constant dense<0.000000e+00> : vector<2x128xf32>
    %5 = tpu.matmul %3, %4, %cst_5 {dimension_numbers = #tpu.dot_dimension_numbers<[1], [0], [0], [1], [0, 0, 1, 1], [], []>} : vector<2x128xf32>, vector<128x128xf32>, vector<2x128xf32> -> vector<2x128xf32>
    %c0_6 = arith.constant 0 : index
    %c0_7 = arith.constant 0 : index
    %6 = vector.load %arg2[%c0_6, %c0_7] : memref<1x128xf32, #tpu.memory_space<vmem>>, vector<1x128xf32>
    %7 = vector.broadcast %6 : vector<1x128xf32> to vector<2x128xf32>
    %8 = arith.addf %5, %7 : vector<2x128xf32>
    %c0_8 = arith.constant 0 : index
    %c0_9 = arith.constant 0 : index
    %9 = vector.load %arg3[%c0_8, %c0_9] : memref<2x128xf32, #tpu.memory_space<vmem>>, vector<2x128xf32>
    tpu.vector_store %arg3[%c0_8, %c0_9], %8 {strides = array<i32>} : memref<2x128xf32, #tpu.memory_space<vmem>>, vector<2x128xf32>,
    return
  }
}

</mosaic_0001>

<bundles_post_ra>
// kernel: wideresnet_forward.10
= control target key start
LH: loop header
LB: loop body
LE: loop exit
PB: predicated region body
PF: predicated region fallthrough
CT: control target
= control target key end

     0   :  { %s3981_s21 = smov 0   ;;  %s4886_s0 = inlined_call_operand.vmem [shape: bf16[512,1152], index: 0, kind: input, shape index: {}]   ;;  %s4887_s1 = inlined_call_operand.vmem [shape: bf16[1152,128], index: 1, kind: input, shape index: {}]   ;;  %s4888_s2 = inlined_call_operand.vmem [shape: f32[1,128], index: 2, kind: input, shape index: {}]   ;;  %s4889_s3 = inlined_call_operand.vmem [shape: f32[1,128], index: 3, kind: input, shape index: {}]   ;;  %s4890_s4 = inlined_call_operand.vmem [shape: f32[1,128], index: 4, kind: input, shape index: {}]   ;;  %s4891_s5 = inlined_call_operand.vmem [shape: f32[512,128], index: 5, kind: output, shape index: {0}]   ;;  %s4892_s6 = inlined_call_operand.vmem [shape: f32[512,128], index: 6, kind: output, shape index: {1}]  }
   0x1 LB: > { %s2807_s22 = sadd.s32 4294967295, %s3944_s21   ;;  %p2811_p0 = scmp.ge.s32.totalorder %s3944_s21, 1  ;;  %s3944_s21 = sphi %s3981_s21, %s17_s21  }
   0x2   : > { %p217_p1 = scmp.lt.s32.totalorder %s3944_s21, 3 }
   0x4   : > { %p218_p2 = pnand %p2811_p0, %p217_p1 }
   0x5   : > { %s2812_s29 = sshll.u32 (!%p218_p2), %s2807_s22, 5 }
   0x6   : > { %221 = sbr.rel (%p218_p2) target bundleno = 756 (0x2f4), region = 40  ;;  %p254_p3 = scmp.lt.s32.totalorder (!%p218_p2), %s2812_s29, 63 }
   0xb   : > { %v3835_v0 = vld [vmem:[%s4887_s1 + $0x38] sm:$0xff]  ;;  %v3834_v1 = vld [vmem:[%s4887_s1 + $0x30] sm:$0xff]  ;;  %v3833_v2 = vld [vmem:[%s4887_s1 + $0x28] sm:$0xff]  ;;  %s4894_s29 = smov (!%p254_p3, %s2812_s29), 63 }
   0xc   : > { %3900 = vmatpush.bf16.msra.mxu1 %v3835_v0  ;;  %3901 = vmatpush.bf16.msra.mxu2 %v3835_v0  ;;  %v3832_v3 = vld [vmem:[%s4887_s1 + $0x20] sm:$0xff]  ;;  %v3831_v4 = vld [vmem:[%s4887_s1 + $0x18] sm:$0xff]  ;;  %v3830_v5 = vld [vmem:[%s4887_s1 + $0x10] sm:$0xff]  ;;  %s3924_s12 = smul.u32 36, %s4894_s29  ;;  %s2815_s25 = sshll.u32 %s4894_s29, 3 }
   0xd   : > { %3902 = vmatpush.bf16.msra.mxu3 %v3835_v0  ;;  %1748 = vmatpush.bf16.msra.mxu0 %v3835_v0  ;;  %v3829_v6 = vld [vmem:[%s4887_s1 + $0x8] sm:$0xff]  ;;  %v3828_v7 = vld [vmem:[%s4887_s1] sm:$0xff]  ;;  %v3851_v16 = vld [vmem:[%s4887_s1 + $0xb8] sm:$0xff]  ;;  %s4652_s7 = scalar_lea.vmem %s4891_s5, %s2815_s25  ;;  %s4674_s11 = scalar_lea.vmem %s4892_s6, %s2815_s25 }
   0xe   : > { %s4016_s17 = scalar_lea.vmem %s4886_s0, %s3924_s12  ;;  %v3859_v17 = vld [vmem:[%s4887_s1 + $0xf8] sm:$0xff]  ;;  %v3850_v24 = vld [vmem:[%s4887_s1 + $0xb0] sm:$0xff]  ;;  %v3849_v28 = vld [vmem:[%s4887_s1 + $0xa8] sm:$0xff] }
   0xf   : > { %v2964_v8 = vld [vmem:[%s4016_s17 + $0x120] sm:$0xf]  ;;  %v3724_v9 = vld [vmem:[%s4016_s17 + $0x140] sm:$0xf0]  ;;  %v3843_v22 = vld [vmem:[%s4887_s1 + $0x78] sm:$0xff] }
  0x10   : > { %3903 = vmatpush.bf16.msra.mxu1 %v3834_v1  ;;  %3904 = vmatpush.bf16.msra.mxu2 %v3834_v1  ;;  %v3108_v10 = vld [vmem:[%s4016_s17 + $0x240] sm:$0xf]  ;;  %v3760_v11 = vld [vmem:[%s4016_s17 + $0x260] sm:$0xf0]  ;;  %v2965_v18 = vor.u32 %v3724_v9, %v2964_v8  ;;  %v3867_v23 = vld [vmem:[%s4887_s1 + $0x138] sm:$0xff] }
  0x11   : > { %3905 = vmatpush.bf16.msra.mxu3 %v3834_v1  ;;  %1749 = vmatpush.bf16.msra.mxu0 %v3834_v1  ;;  %v3252_v12 = vld [vmem:[%s4016_s17 + $0x360] sm:$0xf]  ;;  %v3796_v13 = vld [vmem:[%s4016_s17 + $0x380] sm:$0xf0]  ;;  %v3109_v19 = vor.u32 %v3760_v11, %v3108_v10  ;;  %v3858_v25 = vld [vmem:[%s4887_s1 + $0xf0] sm:$0xff] }
  0x12   : > { %v2820_v14 = vld [vmem:[%s4016_s17] sm:$0xf]  ;;  %v3688_v15 = vld [vmem:[%s4016_s17 + $0x20] sm:$0xf0]  ;;  %v3253_v20 = vor.u32 %v3796_v13, %v3252_v12  ;;  %v3842_v26 = vld [vmem:[%s4887_s1 + $0x70] sm:$0xff] }
  0x13   : > { %v2821_v21 = vor.u32 %v3688_v15, %v2820_v14  ;;  %v3866_v27 = vld [vmem:[%s4887_s1 + $0x130] sm:$0xff]  ;;  %v3857_v29 = vld [vmem:[%s4887_s1 + $0xe8] sm:$0xff]  ;;  %v3848_v33 = vld [vmem:[%s4887_s1 + $0xa0] sm:$0xff] }
  0x14   : > { %3906 = vmatpush.bf16.msra.mxu1 %v3833_v2  ;;  %3907 = vmatpush.bf16.msra.mxu2 %v3833_v2  ;;  %v3841_v30 = vld [vmem:[%s4887_s1 + $0x68] sm:$0xff]  ;;  %v3856_v34 = vld [vmem:[%s4887_s1 + $0xe0] sm:$0xff]  ;;  %v3847_v44 = vld [vmem:[%s4887_s1 + $0x98] sm:$0xff] }
  0x15   : > { %3908 = vmatpush.bf16.msra.mxu3 %v3833_v2  ;;  %1750 = vmatpush.bf16.msra.mxu0 %v3833_v2  ;;  %v3865_v31 = vld [vmem:[%s4887_s1 + $0x128] sm:$0xff]  ;;  %v3840_v42 = vld [vmem:[%s4887_s1 + $0x60] sm:$0xff]  ;;  %v3855_v45 = vld [vmem:[%s4887_s1 + $0xd8] sm:$0xff] }
  0x16   : > { %v3000_v32 = vld [vmem:[%s4016_s17 + $0x168] sm:$0xf]  ;;  %v3733_v35 = vld [vmem:[%s4016_s17 + $0x188] sm:$0xf0]  ;;  %v3864_v43 = vld [vmem:[%s4887_s1 + $0x120] sm:$0xff] }
  0x17   : > { %v3144_v36 = vld [vmem:[%s4016_s17 + $0x288] sm:$0xf]  ;;  %v3769_v37 = vld [vmem:[%s4016_s17 + $0x2a8] sm:$0xf0]  ;;  %v3001_v46 = vor.u32 %v3733_v35, %v3000_v32  ;;  %v3839_v50 = vld [vmem:[%s4887_s1 + $0x58] sm:$0xff] }
  0x18   : > { %3909 = vmatpush.bf16.msra.mxu1 %v3832_v3  ;;  %3910 = vmatpush.bf16.msra.mxu2 %v3832_v3  ;;  %v3288_v38 = vld [vmem:[%s4016_s17 + $0x3a8] sm:$0xf]  ;;  %v3805_v39 = vld [vmem:[%s4016_s17 + $0x3c8] sm:$0xf0]  ;;  %v3145_v47 = vor.u32 %v3769_v37, %v3144_v36  ;;  %v3863_v51 = vld [vmem:[%s4887_s1 + $0x118] sm:$0xff] }
  0x19   : > { %3911 = vmatpush.bf16.msra.mxu3 %v3832_v3  ;;  %1751 = vmatpush.bf16.msra.mxu0 %v3832_v3  ;;  %v2856_v40 = vld [vmem:[%s4016_s17 + $0x48] sm:$0xf]  ;;  %v3697_v41 = vld [vmem:[%s4016_s17 + $0x68] sm:$0xf0]  ;;  %v3289_v48 = vor.u32 %v3805_v39, %v3288_v38  ;;  %v3846_v52 = vld [vmem:[%s4887_s1 + $0x90] sm:$0xff] }
  0x1a   : > { %v2857_v49 = vor.u32 %v3697_v41, %v2856_v40  ;;  %v3854_v53 = vld [vmem:[%s4887_s1 + $0xd0] sm:$0xff]  ;;  %v3845_v56 = vld [vmem:[%s4887_s1 + $0x88] sm:$0xff]  ;;  %v3844_v61 = vld [vmem:[%s4887_s1 + $0x80] sm:$0xff] }
  0x1b   : > { %v3838_v54 = vld [vmem:[%s4887_s1 + $0x50] sm:$0xff]  ;;  %v3853_v57 = vld [vmem:[%s4887_s1 + $0xc8] sm:$0xff]  ;;  %v3852_v62 = vld [vmem:[%s4887_s1 + $0xc0] sm:$0xff] }
  0x1c   : > { %3912 = vmatpush.bf16.msra.mxu1 %v3831_v4  ;;  %3913 = vmatpush.bf16.msra.mxu2 %v3831_v4  ;;  %v3862_v55 = vld [vmem:[%s4887_s1 + $0x110] sm:$0xff]  ;;  %v3837_v58 = vld [vmem:[%s4887_s1 + $0x48] sm:$0xff]  ;;  %v3883_v12 = vld [vmem:[%s4887_s1 + $0x1b8] sm:$0xff] }
  0x1d   : > { %3914 = vmatpush.bf16.msra.mxu3 %v3831_v4  ;;  %1752 = vmatpush.bf16.msra.mxu0 %v3831_v4  ;;  %v3861_v59 = vld [vmem:[%s4887_s1 + $0x108] sm:$0xff]  ;;  %v3036_v60 = vld [vmem:[%s4016_s17 + $0x1b0] sm:$0xf]  ;;  %v3742_v63 = vld [vmem:[%s4016_s17 + $0x1d0] sm:$0xf0] }
  0x1e   : > { %v3180_v0 = vld [vmem:[%s4016_s17 + $0x2d0] sm:$0xf]  ;;  %v3778_v1 = vld [vmem:[%s4016_s17 + $0x2f0] sm:$0xf0]  ;;  %v3037_v8 = vor.u32 %v3742_v63, %v3036_v60  ;;  %v3891_v13 = vld [vmem:[%s4887_s1 + $0x1f8] sm:$0xff] }
  0x1f   : > { %v3324_v2 = vld [vmem:[%s4016_s17 + $0x3f0] sm:$0xf]  ;;  %v3814_v3 = vld [vmem:[%s4016_s17 + $0x410] sm:$0xf0]  ;;  %v3181_v9 = vor.u32 %v3778_v1, %v3180_v0  ;;  %v3875_v14 = vld [vmem:[%s4887_s1 + $0x178] sm:$0xff] }
  0x20   : > { %3915 = vmatpush.bf16.msra.mxu1 %v3830_v5  ;;  %3916 = vmatpush.bf16.msra.mxu2 %v3830_v5  ;;  %v2892_v4 = vld [vmem:[%s4016_s17 + $0x90] sm:$0xf]  ;;  %v3325_v10 = vor.u32 %v3814_v3, %v3324_v2  ;;  %v3899_v15 = vld [vmem:[%s4887_s1 + $0x238] sm:$0xff]  ;;  %v3685_v32 = vld [vmem:[%s4016_s17 + $0xc] sm:$0xf] }
  0x21   : > { %3917 = vmatpush.bf16.msra.mxu3 %v3830_v5  ;;  %1753 = vmatpush.bf16.msra.mxu0 %v3830_v5  ;;  %v3706_v5 = vld [vmem:[%s4016_s17 + $0xb0] sm:$0xf0]  ;;  %v3703_v60 = vld [vmem:[%s4016_s17 + $0x9c] sm:$0xf]  ;;  %v3708_v63 = vld [vmem:[%s4016_s17 + $0xc0] sm:$0xf0] }
  0x22   : > { %v2893_v11 = vor.u32 %v3706_v5, %v2892_v4  ;;  %v3690_v35 = vld [vmem:[%s4016_s17 + $0x30] sm:$0xf0]  ;;  %v3881_v4 = vld [vmem:[%s4887_s1 + $0x1a8] sm:$0xff] }
  0x23   : > { %v3882_v40 = vld [vmem:[%s4887_s1 + $0x1b0] sm:$0xff]  ;;  %v3889_v5 = vld [vmem:[%s4887_s1 + $0x1e8] sm:$0xff] }
  0x24   : > { %3918 = vmatpush.bf16.msra.mxu1 %v3829_v6  ;;  %3919 = vmatpush.bf16.msra.mxu2 %v3829_v6  ;;  %v3890_v41 = vld [vmem:[%s4887_s1 + $0x1f0] sm:$0xff] }
  0x25   : > { %3920 = vmatpush.bf16.msra.mxu3 %v3829_v6  ;;  %1754 = vmatpush.bf16.msra.mxu0 %v3829_v6  ;;  %v3836_v6 = vld [vmem:[%s4887_s1 + $0x40] sm:$0xff] }
  0x28   : > { %3921 = vmatpush.bf16.msra.mxu1 %v3828_v7  ;;  %3922 = vmatpush.bf16.msra.mxu2 %v3828_v7 }
  0x29   : > { %3923 = vmatpush.bf16.msra.mxu3 %v3828_v7  ;;  %1755 = vmatpush.bf16.msra.mxu0 %v3828_v7  ;;  %v3860_v7 = vld [vmem:[%s4887_s1 + $0x100] sm:$0xff] }
  0x2b   : > { %1776 = vmatmul.bf16.vlgmr.msra.gmra.mxu1 %v2965_v18  ;;  %1796 = vmatmul.bf16.vlgmr.msra.gmra.mxu2 %v3109_v19  ;;  %v3216_v18 = vld [vmem:[%s4016_s17 + $0x318] sm:$0xf]  ;;  %v3787_v19 = vld [vmem:[%s4016_s17 + $0x338] sm:$0xf0] }
  0x2c   : > { %1926 = vmatpush.bf16.msrb.mxu2 %v3851_v16  ;;  %1816 = vmatmul.bf16.vlgmr.msra.gmra.mxu3 %v3253_v20  ;;  %v3072_v16 = vld [vmem:[%s4016_s17 + $0x1f8] sm:$0xf] }
  0x2d   : > { %2015 = vmatpush.bf16.msrb.mxu3 %v3859_v17  ;;  %1756 = vmatmul.bf16.vlgmr.msra.gmra.mxu0 %v2821_v21  ;;  %v3751_v17 = vld [vmem:[%s4016_s17 + $0x218] sm:$0xf0]  ;;  %v3360_v20 = vld [vmem:[%s4016_s17 + $0x438] sm:$0xf] }
  0x2e   : > { %1837 = vmatpush.bf16.msrb.mxu1 %v3843_v22  ;;  %2104 = vmatpush.bf16.msrb.mxu0 %v3867_v23  ;;  %v3823_v21 = vld [vmem:[%s4016_s17 + $0x458] sm:$0xf0]  ;;  %v2928_v22 = vld [vmem:[%s4016_s17 + $0xd8] sm:$0xf] }
  0x2f   : > { %v3715_v23 = vld [vmem:[%s4016_s17 + $0xf8] sm:$0xf0] }
  0x30   : > { %1927 = vmatpush.bf16.msrb.mxu2 %v3850_v24  ;;  %v3073_v24 = vor.u32 %v3751_v17, %v3072_v16 }
  0x31   : > { %2016 = vmatpush.bf16.msrb.mxu3 %v3858_v25  ;;  %v3217_v25 = vor.u32 %v3787_v19, %v3216_v18 }
  0x32   : > { %1838 = vmatpush.bf16.msrb.mxu1 %v3842_v26  ;;  %2105 = vmatpush.bf16.msrb.mxu0 %v3866_v27  ;;  %v3361_v26 = vor.u32 %v3823_v21, %v3360_v20  ;;  %v2929_v27 = vor.u32 %v3715_v23, %v2928_v22  ;;  %v4220_v20 = vld [vmem:[%s4888_s2] ss:$0 sm:$0xff]  ;;  %v3720_v21 = vld [vmem:[%s4016_s17 + $0x124] sm:$0xf]  ;;  %v2966_v22 = vld [vmem:[%s4016_s17 + $0x144] sm:$0xf0] }
  0x33   : > { %v2972_v23 = vld [vmem:[%s4016_s17 + $0x128] sm:$0xf] }
  0x34   : > { %1928 = vmatpush.bf16.msrb.mxu2 %v3849_v28  ;;  %v3684_v28 = vld [vmem:[%s4016_s17 + $0x4] sm:$0xf] }
  0x35   : > { %2017 = vmatpush.bf16.msrb.mxu3 %v3857_v29  ;;  %v2822_v29 = vld [vmem:[%s4016_s17 + $0x24] sm:$0xf0] }
  0x36   : > { %1839 = vmatpush.bf16.msrb.mxu1 %v3841_v30  ;;  %2106 = vmatpush.bf16.msrb.mxu0 %v3865_v31  ;;  %v2828_v30 = vld [vmem:[%s4016_s17 + $0x8] sm:$0xf]  ;;  %v3689_v31 = vld [vmem:[%s4016_s17 + $0x28] sm:$0xf0]  ;;  %v2825_v36 = vor.u32 %v3684_v28, %v2822_v29  ;;  %v3726_v28 = vld [vmem:[%s4016_s17 + $0x150] sm:$0xf0]  ;;  %v2969_v29 = vor.u32 %v3720_v21, %v2966_v22 }
  0x37   : > { %v2829_v37 = vor.u32 %v3689_v31, %v2828_v30 }
  0x38   : > { %1929 = vmatpush.bf16.msrb.mxu2 %v3848_v33  ;;  %v2830_v33 = vld [vmem:[%s4016_s17 + $0x2c] sm:$0xf0] }
  0x39   : > { %2018 = vmatpush.bf16.msrb.mxu3 %v3856_v34  ;;  %v2836_v34 = vld [vmem:[%s4016_s17 + $0x10] sm:$0xf]  ;;  %v2833_v38 = vor.u32 %v3685_v32, %v2830_v33 }
  0x3a   : > { %1840 = vmatpush.bf16.msrb.mxu1 %v3840_v42  ;;  %2107 = vmatpush.bf16.msrb.mxu0 %v3864_v43  ;;  %v2837_v39 = vor.u32 %v3690_v35, %v2836_v34  ;;  %v3874_v42 = vld [vmem:[%s4887_s1 + $0x170] sm:$0xff] }
  0x3b   : > { %1781 = vmatmul.bf16.gmra.mxu1 %v3001_v46  ;;  %1801 = vmatmul.bf16.gmra.mxu2 %v3145_v47  ;;  %v3898_v43 = vld [vmem:[%s4887_s1 + $0x230] sm:$0xff] }
  0x3c   : > { %1930 = vmatpush.bf16.msrb.mxu2 %v3847_v44  ;;  %1821 = vmatmul.bf16.gmra.mxu3 %v3289_v48  ;;  %v3693_v44 = vld [vmem:[%s4016_s17 + $0x4c] sm:$0xf]  ;;  %v2864_v46 = vld [vmem:[%s4016_s17 + $0x50] sm:$0xf]  ;;  %v3698_v47 = vld [vmem:[%s4016_s17 + $0x70] sm:$0xf0] }
  0x3d   : > { %2019 = vmatpush.bf16.msrb.mxu3 %v3855_v45  ;;  %1761 = vmatmul.bf16.gmra.mxu0 %v2857_v49  ;;  %v2858_v45 = vld [vmem:[%s4016_s17 + $0x6c] sm:$0xf0]  ;;  %v3694_v48 = vld [vmem:[%s4016_s17 + $0x54] sm:$0xf]  ;;  %v2866_v49 = vld [vmem:[%s4016_s17 + $0x74] sm:$0xf0] }
  0x3e   : > { %1841 = vmatpush.bf16.msrb.mxu1 %v3839_v50  ;;  %2108 = vmatpush.bf16.msrb.mxu0 %v3863_v51  ;;  %v2872_v50 = vld [vmem:[%s4016_s17 + $0x58] sm:$0xf]  ;;  %v3699_v51 = vld [vmem:[%s4016_s17 + $0x78] sm:$0xf0] }
  0x40   : > { %1931 = vmatpush.bf16.msrb.mxu2 %v3846_v52  ;;  %v2861_v52 = vor.u32 %v3693_v44, %v2858_v45 }
  0x41   : > { %2020 = vmatpush.bf16.msrb.mxu3 %v3854_v53  ;;  %v2865_v53 = vor.u32 %v3698_v47, %v2864_v46  ;;  %v3896_v46 = vld [vmem:[%s4887_s1 + $0x220] sm:$0xff]  ;;  %v3729_v47 = vld [vmem:[%s4016_s17 + $0x16c] sm:$0xf] }
  0x42   : > { %1842 = vmatpush.bf16.msrb.mxu1 %v3838_v54  ;;  %2109 = vmatpush.bf16.msrb.mxu0 %v3862_v55  ;;  %v2869_v54 = vor.u32 %v3694_v48, %v2866_v49  ;;  %v2873_v55 = vor.u32 %v3699_v51, %v2872_v50  ;;  %v3002_v48 = vld [vmem:[%s4016_s17 + $0x18c] sm:$0xf0]  ;;  %v3734_v50 = vld [vmem:[%s4016_s17 + $0x190] sm:$0xf0] }
  0x43   : > { %v3008_v49 = vld [vmem:[%s4016_s17 + $0x170] sm:$0xf]  ;;  %v3730_v51 = vld [vmem:[%s4016_s17 + $0x174] sm:$0xf] }
  0x44   : > { %1932 = vmatpush.bf16.msrb.mxu2 %v3845_v56  ;;  %v3702_v56 = vld [vmem:[%s4016_s17 + $0x94] sm:$0xf] }
  0x45   : > { %2021 = vmatpush.bf16.msrb.mxu3 %v3853_v57  ;;  %v2894_v57 = vld [vmem:[%s4016_s17 + $0xb4] sm:$0xf0] }
  0x46   : > { %1843 = vmatpush.bf16.msrb.mxu1 %v3837_v58  ;;  %2110 = vmatpush.bf16.msrb.mxu0 %v3861_v59  ;;  %v2900_v58 = vld [vmem:[%s4016_s17 + $0x98] sm:$0xf]  ;;  %v3707_v59 = vld [vmem:[%s4016_s17 + $0xb8] sm:$0xf0]  ;;  %v2897_v0 = vor.u32 %v3702_v56, %v2894_v57 }
  0x47   : > { %v2901_v1 = vor.u32 %v3707_v59, %v2900_v58  ;;  %v3005_v58 = vor.u32 %v3729_v47, %v3002_v48  ;;  %v3009_v59 = vor.u32 %v3734_v50, %v3008_v49  ;;  %v3074_v47 = vld [vmem:[%s4016_s17 + $0x21c] sm:$0xf0]  ;;  %v3752_v49 = vld [vmem:[%s4016_s17 + $0x220] sm:$0xf0] }
  0x48   : > { %1933 = vmatpush.bf16.msrb.mxu2 %v3844_v61  ;;  %v2902_v61 = vld [vmem:[%s4016_s17 + $0xbc] sm:$0xf0]  ;;  %v3748_v50 = vld [vmem:[%s4016_s17 + $0x204] sm:$0xf] }
  0x49   : > { %2022 = vmatpush.bf16.msrb.mxu3 %v3852_v62  ;;  %v2908_v62 = vld [vmem:[%s4016_s17 + $0xa0] sm:$0xf]  ;;  %v2905_v2 = vor.u32 %v3703_v60, %v2902_v61 }
  0x4a   : > { %1844 = vmatpush.bf16.msrb.mxu1 %v3836_v6  ;;  %2111 = vmatpush.bf16.msrb.mxu0 %v3860_v7  ;;  %v2909_v3 = vor.u32 %v3708_v63, %v2908_v62  ;;  %v3873_v6 = vld [vmem:[%s4887_s1 + $0x168] sm:$0xff]  ;;  %v3080_v48 = vld [vmem:[%s4016_s17 + $0x200] sm:$0xf] }
  0x4b   : > { %1786 = vmatmul.bf16.gmra.mxu1 %v3037_v8  ;;  %1806 = vmatmul.bf16.gmra.mxu2 %v3181_v9  ;;  %v3897_v7 = vld [vmem:[%s4887_s1 + $0x228] sm:$0xff]  ;;  %v3711_v8 = vld [vmem:[%s4016_s17 + $0xdc] sm:$0xf]  ;;  %v2930_v9 = vld [vmem:[%s4016_s17 + $0xfc] sm:$0xf0] }
  0x4c   : > { %1826 = vmatmul.bf16.gmra.mxu3 %v3325_v10  ;;  %2282 = vmatpush.bf16.msra.mxu2 %v3883_v12  ;;  %v2936_v10 = vld [vmem:[%s4016_s17 + $0xe0] sm:$0xf]  ;;  %v3712_v12 = vld [vmem:[%s4016_s17 + $0xe4] sm:$0xf]  ;;  %v2933_v16 = vor.u32 %v3711_v8, %v2930_v9  ;;  %v3738_v9 = vld [vmem:[%s4016_s17 + $0x1b4] sm:$0xf] }
  0x4d   : > { %1766 = vmatmul.bf16.gmra.mxu0 %v2893_v11  ;;  %2371 = vmatpush.bf16.msra.mxu3 %v3891_v13  ;;  %v3716_v11 = vld [vmem:[%s4016_s17 + $0x100] sm:$0xf0]  ;;  %v2938_v13 = vld [vmem:[%s4016_s17 + $0x104] sm:$0xf0] }
  0x4e   : > { %2193 = vmatpush.bf16.msra.mxu1 %v3875_v14  ;;  %2460 = vmatpush.bf16.msra.mxu0 %v3899_v15  ;;  %v2944_v14 = vld [vmem:[%s4016_s17 + $0xe8] sm:$0xf]  ;;  %v3717_v15 = vld [vmem:[%s4016_s17 + $0x108] sm:$0xf0]  ;;  %v2937_v17 = vor.u32 %v3716_v11, %v2936_v10  ;;  %v2941_v18 = vor.u32 %v3712_v12, %v2938_v13  ;;  %v3038_v10 = vld [vmem:[%s4016_s17 + $0x1d4] sm:$0xf0] }
  0x4f   : > { %v2945_v19 = vor.u32 %v3717_v15, %v2944_v14  ;;  %v3044_v11 = vld [vmem:[%s4016_s17 + $0x1b8] sm:$0xf]  ;;  %v3743_v12 = vld [vmem:[%s4016_s17 + $0x1d8] sm:$0xf0]  ;;  %v3046_v14 = vld [vmem:[%s4016_s17 + $0x1dc] sm:$0xf0]  ;;  %v3041_v21 = vor.u32 %v3738_v9, %v3038_v10 }
  0x50   : > { %2283 = vmatpush.bf16.msra.mxu2 %v3882_v40  ;;  %v3739_v13 = vld [vmem:[%s4016_s17 + $0x1bc] sm:$0xf]  ;;  %v3052_v15 = vld [vmem:[%s4016_s17 + $0x1c0] sm:$0xf]  ;;  %v3045_v22 = vor.u32 %v3743_v12, %v3044_v11 }
  0x51   : > { %2372 = vmatpush.bf16.msra.mxu3 %v3890_v41 }
  0x52   : > { %2194 = vmatpush.bf16.msra.mxu1 %v3874_v42  ;;  %2461 = vmatpush.bf16.msra.mxu0 %v3898_v43  ;;  %v3872_v43 = vld [vmem:[%s4887_s1 + $0x160] sm:$0xff] }
  0x54   : > { %2284 = vmatpush.bf16.msra.mxu2 %v3881_v4 }
  0x55   : > { %2373 = vmatpush.bf16.msra.mxu3 %v3889_v5 }
  0x56   : > { %2195 = vmatpush.bf16.msra.mxu1 %v3873_v6  ;;  %2462 = vmatpush.bf16.msra.mxu0 %v3897_v7 }
  0x5a   : > { %2196 = vmatpush.bf16.msra.mxu1 %v3872_v43  ;;  %2463 = vmatpush.bf16.msra.mxu0 %v3896_v46  ;;  %v3895_v43 = vld [vmem:[%s4887_s1 + $0x218] sm:$0xff] }
  0x5b   : > { %1791 = vmatmul.bf16.gmra.mxu1 %v3073_v24  ;;  %1811 = vmatmul.bf16.gmra.mxu2 %v3217_v25  ;;  %v3725_v24 = vld [vmem:[%s4016_s17 + $0x148] sm:$0xf0]  ;;  %v3747_v46 = vld [vmem:[%s4016_s17 + $0x1fc] sm:$0xf] }
  0x5c   : > { %1831 = vmatmul.bf16.gmra.mxu3 %v3361_v26  ;;  %v3721_v25 = vld [vmem:[%s4016_s17 + $0x12c] sm:$0xf]  ;;  %v2974_v26 = vld [vmem:[%s4016_s17 + $0x14c] sm:$0xf0]  ;;  %v2973_v30 = vor.u32 %v3725_v24, %v2972_v23 }
  0x5d   : > { %1771 = vmatmul.bf16.gmra.mxu0 %v2929_v27  ;;  %v2980_v27 = vld [vmem:[%s4016_s17 + $0x130] sm:$0xf]  ;;  %v2977_v32 = vor.u32 %v3721_v25, %v2974_v26  ;;  %v3049_v25 = vor.u32 %v3739_v13, %v3046_v14 }
  0x5e   : > { %v2981_v33 = vor.u32 %v3726_v28, %v2980_v27  ;;  %2464 = vmatpush.bf16.msra.mxu0 %v3895_v43 }
  0x6b   : > { %1845 = vmatmul.bf16.vlgmr.msrb.gmra.mxu1 %v2825_v36  ;;  %1934 = vmatmul.bf16.vlgmr.msrb.gmra.mxu2 %v2829_v37  ;;  %v3880_v36 = vld [vmem:[%s4887_s1 + $0x1a0] sm:$0xff] }
  0x6c   : > { %2023 = vmatmul.bf16.vlgmr.msrb.gmra.mxu3 %v2833_v38  ;;  %v3888_v37 = vld [vmem:[%s4887_s1 + $0x1e0] sm:$0xff]  ;;  %2285 = vmatpush.bf16.msra.mxu2 %v3880_v36 }
  0x6d   : > { %2112 = vmatmul.bf16.vlgmr.msrb.gmra.mxu0 %v2837_v39  ;;  %2374 = vmatpush.bf16.msra.mxu3 %v3888_v37 }
  0x7b   : > { %1850 = vmatmul.bf16.gmra.mxu1 %v2861_v52  ;;  %1939 = vmatmul.bf16.gmra.mxu2 %v2865_v53  ;;  %v3010_v52 = vld [vmem:[%s4016_s17 + $0x194] sm:$0xf0] }
  0x7c   : > { %2028 = vmatmul.bf16.gmra.mxu3 %v2869_v54  ;;  %v3016_v53 = vld [vmem:[%s4016_s17 + $0x178] sm:$0xf]  ;;  %v3735_v54 = vld [vmem:[%s4016_s17 + $0x198] sm:$0xf0]  ;;  %v3013_v62 = vor.u32 %v3730_v51, %v3010_v52  ;;  %v3082_v51 = vld [vmem:[%s4016_s17 + $0x224] sm:$0xf0] }
  0x7d   : > { %2117 = vmatmul.bf16.gmra.mxu0 %v2873_v55  ;;  %v3017_v63 = vor.u32 %v3735_v54, %v3016_v53  ;;  %v3088_v52 = vld [vmem:[%s4016_s17 + $0x208] sm:$0xf]  ;;  %v3753_v53 = vld [vmem:[%s4016_s17 + $0x228] sm:$0xf0] }
  0x8b   : > { %1855 = vmatmul.bf16.gmra.mxu1 %v2897_v0  ;;  %1944 = vmatmul.bf16.gmra.mxu2 %v2901_v1 }
  0x8c   : > { %2033 = vmatmul.bf16.gmra.mxu3 %v2905_v2 }
  0x8d   : > { %2122 = vmatmul.bf16.gmra.mxu0 %v2909_v3 }
  0x9b   : > { %1860 = vmatmul.bf16.gmra.mxu1 %v2933_v16  ;;  %1949 = vmatmul.bf16.gmra.mxu2 %v2937_v17  ;;  %v3744_v16 = vld [vmem:[%s4016_s17 + $0x1e0] sm:$0xf0] }
  0x9c   : > { %2038 = vmatmul.bf16.gmra.mxu3 %v2941_v18  ;;  %v3053_v26 = vor.u32 %v3744_v16, %v3052_v15  ;;  %v3756_v16 = vld [vmem:[%s4016_s17 + $0x244] sm:$0xf] }
  0x9d   : > { %2127 = vmatmul.bf16.gmra.mxu0 %v2945_v19 }
  0xa8   : > { %v1777_v31 = vpop.f32.mrf.mxu1 }
  0xa9   : > { %v4231_v34 = vadd.f32 %v4220_v20, %v1777_v31 }
  0xaa   : > { %v4233_v35 = vpop.f32.mrf.mxu0 }
  0xab   : > { %1865 = vmatmul.bf16.gmra.mxu1 %v2969_v29  ;;  %1954 = vmatmul.bf16.gmra.mxu2 %v2973_v30  ;;  %v3879_v29 = vld [vmem:[%s4887_s1 + $0x198] sm:$0xff] }
  0xac   : > { %2043 = vmatmul.bf16.gmra.mxu3 %v2977_v32  ;;  %v3887_v30 = vld [vmem:[%s4887_s1 + $0x1d8] sm:$0xff]  ;;  %2286 = vmatpush.bf16.msra.mxu2 %v3879_v29 }
  0xad   : > { %2132 = vmatmul.bf16.gmra.mxu0 %v2981_v33  ;;  %2375 = vmatpush.bf16.msra.mxu3 %v3887_v30  ;;  %v1758_v30 = vadd.f32 %v4220_v20, %v4233_v35  ;;  %v3878_v35 = vld [vmem:[%s4887_s1 + $0x190] sm:$0xff] }
  0xae   : > { %v1797_v38 = vpop.f32.mrf.mxu2 }
  0xaf   : > { %v4242_v39 = vadd.f32 %v4220_v20, %v1797_v38  ;;  %v1817_v40 = vpop.f32.mrf.mxu3 }
  0xb0   : > { %v4245_v41 = vadd.f32 %v4220_v20, %v1817_v40  ;;  %v1779_v42 = vpop.f32.mrf.mxu1  ;;  %2287 = vmatpush.bf16.msra.mxu2 %v3878_v35 }
  0xb1   : > { %v4251_v44 = vadd.f32 %v4220_v20, %v1779_v42  ;;  %v3871_v42 = vld [vmem:[%s4887_s1 + $0x158] sm:$0xff] }
  0xb2   : > { %v4253_v45 = vpop.f32.mrf.mxu0  ;;  %2197 = vmatpush.bf16.msra.mxu1 %v3871_v42 }
  0xb6   : > { %v1799_v55 = vpop.f32.mrf.mxu2 }
  0xb7   : > { %v4267_v56 = vadd.f32 %v4220_v20, %v1799_v55  ;;  %v1819_v57 = vpop.f32.mrf.mxu3 }
  0xb8   : > { %v4270_v60 = vadd.f32 %v4220_v20, %v1819_v57  ;;  %v1782_v61 = vpop.f32.mrf.mxu1 }
  0xb9   : > { %v4273_v0 = vadd.f32 %v4220_v20, %v1782_v61 }
  0xba   : > { %v4275_v1 = vpop.f32.mrf.mxu0 }
  0xbb   : > { %1870 = vmatmul.bf16.gmra.mxu1 %v3005_v58  ;;  %1959 = vmatmul.bf16.gmra.mxu2 %v3009_v59  ;;  %v3077_v58 = vor.u32 %v3747_v46, %v3074_v47  ;;  %v3081_v59 = vor.u32 %v3752_v49, %v3080_v48 }
  0xbc   : > { %2048 = vmatmul.bf16.gmra.mxu3 %v3013_v62 }
  0xbd   : > { %2137 = vmatmul.bf16.gmra.mxu0 %v3017_v63  ;;  %v3085_v63 = vor.u32 %v3748_v50, %v3082_v51  ;;  %v3886_v51 = vld [vmem:[%s4887_s1 + $0x1d0] sm:$0xff] }
  0xbe   : > { %v1802_v2 = vpop.f32.mrf.mxu2  ;;  %2376 = vmatpush.bf16.msra.mxu3 %v3886_v51 }
  0xbf   : > { %v4278_v3 = vadd.f32 %v4220_v20, %v1802_v2  ;;  %v1822_v4 = vpop.f32.mrf.mxu3  ;;  %v3089_v2 = vor.u32 %v3753_v53, %v3088_v52  ;;  %v1760_v53 = vadd.f32 %v4220_v20, %v4253_v45  ;;  %v3146_v45 = vld [vmem:[%s4016_s17 + $0x2ac] sm:$0xf0] }
  0xc0   : > { %v4281_v5 = vadd.f32 %v4220_v20, %v1822_v4  ;;  %v1784_v6 = vpop.f32.mrf.mxu1 }
  0xc1   : > { %v4284_v7 = vadd.f32 %v4220_v20, %v1784_v6 }
  0xc2   : > { %v4286_v8 = vpop.f32.mrf.mxu0 }
  0xc3   : > { %v1765_v51 = vadd.f32 %v4220_v20, %v4286_v8 }
  0xc6   : > { %v1804_v17 = vpop.f32.mrf.mxu2 }
  0xc7   : > { %v4297_v18 = vadd.f32 %v4220_v20, %v1804_v17  ;;  %v1824_v19 = vpop.f32.mrf.mxu3  ;;  %v3110_v17 = vld [vmem:[%s4016_s17 + $0x264] sm:$0xf0] }
  0xc8   : > { %v4300_v23 = vadd.f32 %v4220_v20, %v1824_v19  ;;  %v1787_v24 = vpop.f32.mrf.mxu1  ;;  %v3116_v19 = vld [vmem:[%s4016_s17 + $0x248] sm:$0xf] }
  0xc9   : > { %v4303_v27 = vadd.f32 %v4220_v20, %v1787_v24  ;;  %v3118_v24 = vld [vmem:[%s4016_s17 + $0x26c] sm:$0xf0] }
  0xca   : > { %v4305_v28 = vpop.f32.mrf.mxu0 }
  0xcb   : > { %1875 = vmatmul.bf16.gmra.mxu1 %v3041_v21  ;;  %1964 = vmatmul.bf16.gmra.mxu2 %v3045_v22  ;;  %v3761_v21 = vld [vmem:[%s4016_s17 + $0x268] sm:$0xf0]  ;;  %v1768_v8 = vadd.f32 %v4220_v20, %v4305_v28 }
  0xcc   : > { %2053 = vmatmul.bf16.gmra.mxu3 %v3049_v25  ;;  %v3757_v22 = vld [vmem:[%s4016_s17 + $0x24c] sm:$0xf]  ;;  %v3124_v25 = vld [vmem:[%s4016_s17 + $0x250] sm:$0xf]  ;;  %v3117_v42 = vor.u32 %v3761_v21, %v3116_v19  ;;  %v3766_v19 = vld [vmem:[%s4016_s17 + $0x294] sm:$0xf] }
  0xcd   : > { %2142 = vmatmul.bf16.gmra.mxu0 %v3053_v26  ;;  %v3762_v26 = vld [vmem:[%s4016_s17 + $0x270] sm:$0xf0]  ;;  %v3121_v47 = vor.u32 %v3757_v22, %v3118_v24  ;;  %v3154_v21 = vld [vmem:[%s4016_s17 + $0x2b4] sm:$0xf0]  ;;  %v3771_v24 = vld [vmem:[%s4016_s17 + $0x2b8] sm:$0xf0] }
  0xce   : > { %v1807_v31 = vpop.f32.mrf.mxu2  ;;  %v3125_v48 = vor.u32 %v3762_v26, %v3124_v25  ;;  %v3160_v22 = vld [vmem:[%s4016_s17 + $0x298] sm:$0xf]  ;;  %v1763_v26 = vadd.f32 %v4220_v20, %v4275_v1  ;;  %v3877_v28 = vld [vmem:[%s4887_s1 + $0x188] sm:$0xff] }
  0xcf   : > { %v4314_v32 = vadd.f32 %v4220_v20, %v1807_v31  ;;  %v1827_v33 = vpop.f32.mrf.mxu3  ;;  %2288 = vmatpush.bf16.msra.mxu2 %v3877_v28 }
  0xd0   : > { %v4317_v36 = vadd.f32 %v4220_v20, %v1827_v33  ;;  %v1789_v37 = vpop.f32.mrf.mxu1 }
  0xd1   : > { %v4320_v38 = vadd.f32 %v4220_v20, %v1789_v37  ;;  %v3113_v37 = vor.u32 %v3756_v16, %v3110_v17  ;;  %v3152_v16 = vld [vmem:[%s4016_s17 + $0x290] sm:$0xf]  ;;  %v3770_v17 = vld [vmem:[%s4016_s17 + $0x2b0] sm:$0xf0] }
  0xd2   : > { %v4322_v40 = vpop.f32.mrf.mxu0 }
  0xd6   : > { %v1809_v54 = vpop.f32.mrf.mxu2 }
  0xd7   : > { %v4339_v55 = vadd.f32 %v4220_v20, %v1809_v54  ;;  %v1829_v57 = vpop.f32.mrf.mxu3 }
  0xd8   : > { %v4342_v61 = vadd.f32 %v4220_v20, %v1829_v57  ;;  %v1792_v62 = vpop.f32.mrf.mxu1 }
  0xd9   : > { %v4345_v4 = vadd.f32 %v4220_v20, %v1792_v62 }
  0xda   : > { %v4347_v6 = vpop.f32.mrf.mxu0 }
  0xdb   : > { %1880 = vmatmul.bf16.gmra.mxu1 %v3077_v58  ;;  %1969 = vmatmul.bf16.gmra.mxu2 %v3081_v59 }
  0xdc   : > { %2058 = vmatmul.bf16.gmra.mxu3 %v3085_v63 }
  0xdd   : > { %2147 = vmatmul.bf16.gmra.mxu0 %v3089_v2  ;;  %v3870_v2 = vld [vmem:[%s4887_s1 + $0x150] sm:$0xff] }
  0xde   : > { %v1812_v9 = vpop.f32.mrf.mxu2  ;;  %2198 = vmatpush.bf16.msra.mxu1 %v3870_v2  ;;  %v3182_v2 = vld [vmem:[%s4016_s17 + $0x2f4] sm:$0xf0] }
  0xdf   : > { %v4350_v10 = vadd.f32 %v4220_v20, %v1812_v9  ;;  %v1832_v11 = vpop.f32.mrf.mxu3  ;;  %v3894_v9 = vld [vmem:[%s4887_s1 + $0x210] sm:$0xff] }
  0xe0   : > { %v4353_v12 = vadd.f32 %v4220_v20, %v1832_v11  ;;  %v1794_v13 = vpop.f32.mrf.mxu1  ;;  %v3765_v11 = vld [vmem:[%s4016_s17 + $0x28c] sm:$0xf]  ;;  %2465 = vmatpush.bf16.msra.mxu0 %v3894_v9  ;;  %v3188_v9 = vld [vmem:[%s4016_s17 + $0x2d8] sm:$0xf] }
  0xe1   : > { %v4356_v14 = vadd.f32 %v4220_v20, %v1794_v13 }
  0xe2   : > { %v4358_v15 = vpop.f32.mrf.mxu0 }
  0xe6   : > { %v1814_v29 = vpop.f32.mrf.mxu2 }
  0xe7   : > { %v4371_v31 = vadd.f32 %v4220_v20, %v1814_v29  ;;  %v1834_v33 = vpop.f32.mrf.mxu3 }
  0xe8   : > { %v4374_v43 = vadd.f32 %v4220_v20, %v1834_v33  ;;  %v1846_v46 = vpop.f32.mrf.mxu1  ;;  %v3149_v33 = vor.u32 %v3765_v11, %v3146_v45  ;;  %v3779_v11 = vld [vmem:[%s4016_s17 + $0x2f8] sm:$0xf0] }
  0xe9   : > { %v1847_v49 = vadd.f32 %v1846_v46, %v1758_v30  ;;  %v3157_v46 = vor.u32 %v3766_v19, %v3154_v21  ;;  %v3775_v45 = vld [vmem:[%s4016_s17 + $0x2dc] sm:$0xf]  ;;  %v3780_v19 = vld [vmem:[%s4016_s17 + $0x300] sm:$0xf0] }
  0xea   : > { %v2113_v50 = vpop.f32.mrf.mxu0 }
  0xeb   : > { %1885 = vmatmul.bf16.gmra.mxu1 %v3113_v37  ;;  %1974 = vmatmul.bf16.gmra.mxu2 %v3117_v42  ;;  %v3153_v37 = vor.u32 %v3770_v17, %v3152_v16  ;;  %v3190_v16 = vld [vmem:[%s4016_s17 + $0x2fc] sm:$0xf0] }
  0xec   : > { %2063 = vmatmul.bf16.gmra.mxu3 %v3121_v47  ;;  %v3161_v47 = vor.u32 %v3771_v24, %v3160_v22  ;;  %v3196_v17 = vld [vmem:[%s4016_s17 + $0x2e0] sm:$0xf] }
  0xed   : > { %2152 = vmatmul.bf16.gmra.mxu0 %v3125_v48 }
  0xee   : > { %v1935_v52 = vpop.f32.mrf.mxu2 }
  0xef   : > { %v1936_v54 = vadd.f32 %v1935_v52, %v1847_v49  ;;  %v2024_v57 = vpop.f32.mrf.mxu3 }
  0xf0   : > { %v1848_v58 = vpop.f32.mrf.mxu1 }
  0xf1   : > { %v2025_v59 = vadd.f32 %v2024_v57, %v1936_v54  ;;  %v1849_v62 = vadd.f32 %v1848_v58, %v1760_v53 }
  0xf2   : > { %v2115_v63 = vpop.f32.mrf.mxu0 }
  0xf3   : > { %v4392_v13 = vadd.f32 %v2113_v50, %v2025_v59 }
  0xf6   : > { %v1937_v25 = vpop.f32.mrf.mxu2 }
  0xf7   : > { %v1938_v29 = vadd.f32 %v1937_v25, %v1849_v62  ;;  %v2026_v30 = vpop.f32.mrf.mxu3  ;;  %v3774_v62 = vld [vmem:[%s4016_s17 + $0x2d4] sm:$0xf] }
  0xf8   : > { %v1851_v42 = vpop.f32.mrf.mxu1  ;;  %v3185_v25 = vor.u32 %v3774_v62, %v3182_v2  ;;  %v3783_v62 = vld [vmem:[%s4016_s17 + $0x31c] sm:$0xf] }
  0xf9   : > { %v2027_v48 = vadd.f32 %v2026_v30, %v1938_v29  ;;  %v1852_v49 = vadd.f32 %v1851_v42, %v1763_v26  ;;  %v3189_v26 = vor.u32 %v3779_v11, %v3188_v9  ;;  %v3193_v30 = vor.u32 %v3775_v45, %v3190_v16  ;;  %v3224_v9 = vld [vmem:[%s4016_s17 + $0x320] sm:$0xf]  ;;  %v3788_v11 = vld [vmem:[%s4016_s17 + $0x340] sm:$0xf0]  ;;  %v3226_v16 = vld [vmem:[%s4016_s17 + $0x344] sm:$0xf0] }
  0xfa   : > { %v2118_v50 = vpop.f32.mrf.mxu0  ;;  %v3784_v45 = vld [vmem:[%s4016_s17 + $0x324] sm:$0xf] }
  0xfb   : > { %1890 = vmatmul.bf16.gmra.mxu1 %v3149_v33  ;;  %1979 = vmatmul.bf16.gmra.mxu2 %v3153_v37  ;;  %v4402_v35 = vadd.f32 %v2115_v63, %v2027_v48  ;;  %v3197_v33 = vor.u32 %v3780_v19, %v3196_v17  ;;  %v3885_v48 = vld [vmem:[%s4887_s1 + $0x1c8] sm:$0xff] }
  0xfc   : > { %2068 = vmatmul.bf16.gmra.mxu3 %v3157_v46  ;;  %v3232_v17 = vld [vmem:[%s4016_s17 + $0x328] sm:$0xf]  ;;  %v3789_v19 = vld [vmem:[%s4016_s17 + $0x348] sm:$0xf0] }
  0xfd   : > { %2157 = vmatmul.bf16.gmra.mxu0 %v3161_v47  ;;  %2377 = vmatpush.bf16.msra.mxu3 %v3885_v48  ;;  %v1775_v48 = vadd.f32 %v4220_v20, %v4358_v15 }
  0xfe   : > { %v1940_v1 = vpop.f32.mrf.mxu2 }
  0xff   : > { %v1941_v52 = vadd.f32 %v1940_v1, %v1852_v49  ;;  %v2029_v53 = vpop.f32.mrf.mxu3 }
 0x100   : > { %v1853_v54 = vpop.f32.mrf.mxu1 }
 0x101   : > { %v2030_v57 = vadd.f32 %v2029_v53, %v1941_v52  ;;  %v1854_v58 = vadd.f32 %v1853_v54, %v1765_v51 }
 0x102   : > { %v2120_v59 = vpop.f32.mrf.mxu0 }
 0x103   : > { %v4408_v63 = vadd.f32 %v2118_v50, %v2030_v57  ;;  %v1770_v50 = vadd.f32 %v4220_v20, %v4322_v40  ;;  %v3218_v40 = vld [vmem:[%s4016_s17 + $0x33c] sm:$0xf0] }
 0x106   : > { %v1942_v21 = vpop.f32.mrf.mxu2 }
 0x107   : > { %v1943_v22 = vadd.f32 %v1942_v21, %v1854_v58  ;;  %v2031_v24 = vpop.f32.mrf.mxu3  ;;  %v3869_v58 = vld [vmem:[%s4887_s1 + $0x148] sm:$0xff] }
 0x108   : > { %v1856_v29 = vpop.f32.mrf.mxu1  ;;  %2199 = vmatpush.bf16.msra.mxu1 %v3869_v58  ;;  %v3254_v58 = vld [vmem:[%s4016_s17 + $0x384] sm:$0xf0] }
 0x109   : > { %v2032_v37 = vadd.f32 %v2031_v24, %v1943_v22  ;;  %v1857_v42 = vadd.f32 %v1856_v29, %v1768_v8  ;;  %v1773_v8 = vadd.f32 %v4220_v20, %v4347_v6 }
 0x10a   : > { %v2123_v46 = vpop.f32.mrf.mxu0 }
 0x10b   : > { %1895 = vmatmul.bf16.gmra.mxu1 %v3185_v25  ;;  %1984 = vmatmul.bf16.gmra.mxu2 %v3189_v26  ;;  %v4418_v47 = vadd.f32 %v2120_v59, %v2032_v37  ;;  %v3893_v59 = vld [vmem:[%s4887_s1 + $0x208] sm:$0xff]  ;;  %v3221_v25 = vor.u32 %v3783_v62, %v3218_v40  ;;  %v3225_v26 = vor.u32 %v3788_v11, %v3224_v9  ;;  %v3262_v9 = vld [vmem:[%s4016_s17 + $0x38c] sm:$0xf0] }
 0x10c   : > { %2073 = vmatmul.bf16.gmra.mxu3 %v3193_v30  ;;  %2466 = vmatpush.bf16.msra.mxu0 %v3893_v59  ;;  %v3229_v30 = vor.u32 %v3784_v45, %v3226_v16  ;;  %v3260_v59 = vld [vmem:[%s4016_s17 + $0x368] sm:$0xf]  ;;  %v3797_v62 = vld [vmem:[%s4016_s17 + $0x388] sm:$0xf0]  ;;  %v3268_v11 = vld [vmem:[%s4016_s17 + $0x370] sm:$0xf] }
 0x10d   : > { %2162 = vmatmul.bf16.gmra.mxu0 %v3197_v33  ;;  %v3233_v33 = vor.u32 %v3789_v19, %v3232_v17  ;;  %v3793_v40 = vld [vmem:[%s4016_s17 + $0x36c] sm:$0xf]  ;;  %v3798_v45 = vld [vmem:[%s4016_s17 + $0x390] sm:$0xf0]  ;;  %v3261_v15 = vor.u32 %v3797_v62, %v3260_v59  ;;  %v3298_v62 = vld [vmem:[%s4016_s17 + $0x3d4] sm:$0xf0] }
 0x10e   : > { %v1945_v49 = vpop.f32.mrf.mxu2  ;;  %v3802_v59 = vld [vmem:[%s4016_s17 + $0x3b4] sm:$0xf] }
 0x10f   : > { %v1946_v1 = vadd.f32 %v1945_v49, %v1857_v42  ;;  %v2034_v51 = vpop.f32.mrf.mxu3 }
 0x110   : > { %v1858_v52 = vpop.f32.mrf.mxu1 }
 0x111   : > { %v2035_v53 = vadd.f32 %v2034_v51, %v1946_v1  ;;  %v1859_v54 = vadd.f32 %v1858_v52, %v1770_v50 }
 0x112   : > { %v2125_v57 = vpop.f32.mrf.mxu0 }
 0x113   : > { %v4436_v2 = vadd.f32 %v2123_v46, %v2035_v53 }
 0x116   : > { %v1947_v21 = vpop.f32.mrf.mxu2 }
 0x117   : > { %v1948_v22 = vadd.f32 %v1947_v21, %v1859_v54  ;;  %v2036_v24 = vpop.f32.mrf.mxu3  ;;  %v3792_v54 = vld [vmem:[%s4016_s17 + $0x364] sm:$0xf] }
 0x118   : > { %v1861_v29 = vpop.f32.mrf.mxu1  ;;  %v3257_v20 = vor.u32 %v3792_v54, %v3254_v58  ;;  %v3296_v54 = vld [vmem:[%s4016_s17 + $0x3b0] sm:$0xf]  ;;  %v3806_v58 = vld [vmem:[%s4016_s17 + $0x3d0] sm:$0xf0] }
 0x119   : > { %v2037_v37 = vadd.f32 %v2036_v24, %v1948_v22  ;;  %v1862_v42 = vadd.f32 %v1861_v29, %v1773_v8  ;;  %v3265_v8 = vor.u32 %v3793_v40, %v3262_v9  ;;  %v3269_v22 = vor.u32 %v3798_v45, %v3268_v11  ;;  %v3807_v40 = vld [vmem:[%s4016_s17 + $0x3d8] sm:$0xf0] }
 0x11a   : > { %v2128_v46 = vpop.f32.mrf.mxu0 }
 0x11b   : > { %1900 = vmatmul.bf16.gmra.mxu1 %v3221_v25  ;;  %1989 = vmatmul.bf16.gmra.mxu2 %v3225_v26  ;;  %v4446_v28 = vadd.f32 %v2125_v57, %v2037_v37 }
 0x11c   : > { %2078 = vmatmul.bf16.gmra.mxu3 %v3229_v30  ;;  %v3876_v30 = vld [vmem:[%s4887_s1 + $0x180] sm:$0xff] }
 0x11d   : > { %2167 = vmatmul.bf16.gmra.mxu0 %v3233_v33  ;;  %v3884_v33 = vld [vmem:[%s4887_s1 + $0x1c0] sm:$0xff]  ;;  %2289 = vmatpush.bf16.msra.mxu2 %v3876_v30 }
 0x11e   : > { %v1950_v6 = vpop.f32.mrf.mxu2  ;;  %2378 = vmatpush.bf16.msra.mxu3 %v3884_v33 }
 0x11f   : > { %v1951_v49 = vadd.f32 %v1950_v6, %v1862_v42  ;;  %v2039_v50 = vpop.f32.mrf.mxu3 }
 0x120   : > { %v1863_v1 = vpop.f32.mrf.mxu1 }
 0x121   : > { %v2040_v51 = vadd.f32 %v2039_v50, %v1951_v49  ;;  %v1864_v52 = vadd.f32 %v1863_v1, %v1775_v48  ;;  %v3868_v50 = vld [vmem:[%s4887_s1 + $0x140] sm:$0xff] }
 0x122   : > { %v2130_v53 = vpop.f32.mrf.mxu0  ;;  %v3892_v1 = vld [vmem:[%s4887_s1 + $0x200] sm:$0xff]  ;;  %2200 = vmatpush.bf16.msra.mxu1 %v3868_v50  ;;  %v3811_v50 = vld [vmem:[%s4016_s17 + $0x3fc] sm:$0xf] }
 0x123   : > { %v4452_v57 = vadd.f32 %v2128_v46, %v2040_v51  ;;  %v3801_v51 = vld [vmem:[%s4016_s17 + $0x3ac] sm:$0xf]  ;;  %2467 = vmatpush.bf16.msra.mxu0 %v3892_v1  ;;  %v3334_v1 = vld [vmem:[%s4016_s17 + $0x41c] sm:$0xf0] }
 0x126   : > { %v1952_v16 = vpop.f32.mrf.mxu2 }
 0x127   : > { %v1953_v17 = vadd.f32 %v1952_v16, %v1864_v52  ;;  %v2041_v19 = vpop.f32.mrf.mxu3  ;;  %v3290_v52 = vld [vmem:[%s4016_s17 + $0x3cc] sm:$0xf0] }
 0x128   : > { %v1866_v21 = vpop.f32.mrf.mxu1  ;;  %v3293_v16 = vor.u32 %v3801_v51, %v3290_v52  ;;  %v3340_v51 = vld [vmem:[%s4016_s17 + $0x400] sm:$0xf]  ;;  %v3816_v52 = vld [vmem:[%s4016_s17 + $0x420] sm:$0xf0] }
 0x129   : > { %v2042_v24 = vadd.f32 %v2041_v19, %v1953_v17  ;;  %v1867_v25 = vadd.f32 %v1866_v21, %v4231_v34  ;;  %v3297_v17 = vor.u32 %v3806_v58, %v3296_v54 }
 0x12a   : > { %v2133_v26 = vpop.f32.mrf.mxu0 }
 0x12b   : > { %1905 = vmatmul.bf16.gmra.mxu1 %v3257_v20  ;;  %1994 = vmatmul.bf16.gmra.mxu2 %v3261_v15  ;;  %v4461_v29 = vadd.f32 %v2130_v53, %v2042_v24  ;;  %v3301_v20 = vor.u32 %v3802_v59, %v3298_v62 }
 0x12c   : > { %2083 = vmatmul.bf16.gmra.mxu3 %v3265_v8 }
 0x12d   : > { %2172 = vmatmul.bf16.gmra.mxu0 %v3269_v22 }
 0x12e   : > { %v1955_v37 = vpop.f32.mrf.mxu2 }
 0x12f   : > { %v1956_v34 = vadd.f32 %v1955_v37, %v1867_v25  ;;  %v2044_v42 = vpop.f32.mrf.mxu3 }
 0x130   : > { %v1868_v46 = vpop.f32.mrf.mxu1 }
 0x131   : > { %v2045_v6 = vadd.f32 %v2044_v42, %v1956_v34  ;;  %v1869_v48 = vadd.f32 %v1868_v46, %v4251_v44  ;;  %v3304_v44 = vld [vmem:[%s4016_s17 + $0x3b8] sm:$0xf]  ;;  %v3810_v42 = vld [vmem:[%s4016_s17 + $0x3f4] sm:$0xf] }
 0x132   : > { %v2135_v49 = vpop.f32.mrf.mxu0  ;;  %v3305_v15 = vor.u32 %v3807_v40, %v3304_v44  ;;  %v3326_v46 = vld [vmem:[%s4016_s17 + $0x414] sm:$0xf0] }
 0x133   : > { %v4478_v53 = vadd.f32 %v2133_v26, %v2045_v6  ;;  %v3329_v62 = vor.u32 %v3810_v42, %v3326_v46  ;;  %v3376_v42 = vld [vmem:[%s4016_s17 + $0x448] sm:$0xf]  ;;  %v3825_v46 = vld [vmem:[%s4016_s17 + $0x468] sm:$0xf0] }
 0x136   : > { %v1957_v9 = vpop.f32.mrf.mxu2 }
 0x137   : > { %v1958_v11 = vadd.f32 %v1957_v9, %v1869_v48  ;;  %v2046_v45 = vpop.f32.mrf.mxu3  ;;  %v3332_v48 = vld [vmem:[%s4016_s17 + $0x3f8] sm:$0xf]  ;;  %v3337_v9 = vor.u32 %v3811_v50, %v3334_v1 }
 0x138   : > { %v1871_v19 = vpop.f32.mrf.mxu1 }
 0x139   : > { %v2047_v21 = vadd.f32 %v2046_v45, %v1958_v11  ;;  %v1872_v8 = vadd.f32 %v1871_v19, %v4273_v0  ;;  %v3341_v11 = vor.u32 %v3816_v52, %v3340_v51 }
 0x13a   : > { %v2138_v22 = vpop.f32.mrf.mxu0 }
 0x13b   : > { %1910 = vmatmul.bf16.gmra.mxu1 %v3293_v16  ;;  %1999 = vmatmul.bf16.gmra.mxu2 %v3297_v17  ;;  %v4487_v24 = vadd.f32 %v2135_v49, %v2047_v21  ;;  %v3815_v49 = vld [vmem:[%s4016_s17 + $0x418] sm:$0xf0] }
 0x13c   : > { %2088 = vmatmul.bf16.gmra.mxu3 %v3301_v20  ;;  %v3333_v44 = vor.u32 %v3815_v49, %v3332_v48 }
 0x13d   : > { %2177 = vmatmul.bf16.gmra.mxu0 %v3305_v15 }
 0x13e   : > { %v1960_v25 = vpop.f32.mrf.mxu2 }
 0x13f   : > { %v1961_v26 = vadd.f32 %v1960_v25, %v1872_v8  ;;  %v2049_v30 = vpop.f32.mrf.mxu3  ;;  %v3819_v25 = vld [vmem:[%s4016_s17 + $0x43c] sm:$0xf] }
 0x140   : > { %v1873_v33 = vpop.f32.mrf.mxu1 }
 0x141   : > { %v2050_v37 = vadd.f32 %v2049_v30, %v1961_v26  ;;  %v1874_v0 = vadd.f32 %v1873_v33, %v4284_v7  ;;  %v3362_v26 = vld [vmem:[%s4016_s17 + $0x45c] sm:$0xf0] }
 0x142   : > { %v2140_v34 = vpop.f32.mrf.mxu0  ;;  %v3368_v33 = vld [vmem:[%s4016_s17 + $0x440] sm:$0xf]  ;;  %v3365_v1 = vor.u32 %v3819_v25, %v3362_v26  ;;  %v3692_v26 = vld [vmem:[%s4016_s17 + $0x40] sm:$0xf0] }
 0x143   : > { %v4492_v6 = vadd.f32 %v2138_v22, %v2050_v37  ;;  %v3824_v37 = vld [vmem:[%s4016_s17 + $0x460] sm:$0xf0]  ;;  %v2852_v25 = vld [vmem:[%s4016_s17 + $0x20] sm:$0xf] }
 0x144   : > { %v3369_v51 = vor.u32 %v3824_v37, %v3368_v33 }
 0x146   : > { %v1962_v54 = vpop.f32.mrf.mxu2 }
 0x147   : > { %v1963_v58 = vadd.f32 %v1962_v54, %v1874_v0  ;;  %v2051_v59 = vpop.f32.mrf.mxu3  ;;  %v3820_v0 = vld [vmem:[%s4016_s17 + $0x444] sm:$0xf] }
 0x148   : > { %v1876_v40 = vpop.f32.mrf.mxu1 }
 0x149   : > { %v2052_v7 = vadd.f32 %v2051_v59, %v1963_v58  ;;  %v1877_v45 = vadd.f32 %v1876_v40, %v4303_v27  ;;  %v3377_v58 = vor.u32 %v3825_v46, %v3376_v42 }
 0x14a   : > { %v2143_v16 = vpop.f32.mrf.mxu0 }
 0x14b   : > { %1915 = vmatmul.bf16.gmra.mxu1 %v3329_v62  ;;  %2004 = vmatmul.bf16.gmra.mxu2 %v3333_v44  ;;  %v4501_v17 = vadd.f32 %v2140_v34, %v2052_v7  ;;  %v3370_v34 = vld [vmem:[%s4016_s17 + $0x464] sm:$0xf0] }
 0x14c   : > { %2093 = vmatmul.bf16.gmra.mxu3 %v3337_v9  ;;  %v3373_v54 = vor.u32 %v3820_v0, %v3370_v34 }
 0x14d   : > { %2182 = vmatmul.bf16.gmra.mxu0 %v3341_v11 }
 0x14e   : > { %v1965_v19 = vpop.f32.mrf.mxu2 }
 0x14f   : > { %v1966_v20 = vadd.f32 %v1965_v19, %v1877_v45  ;;  %v2054_v15 = vpop.f32.mrf.mxu3  ;;  %v3686_v19 = vld [vmem:[%s4016_s17 + $0x14] sm:$0xf] }
 0x150   : > { %v1878_v21 = vpop.f32.mrf.mxu1 }
 0x151   : > { %v2055_v8 = vadd.f32 %v2054_v15, %v1966_v20  ;;  %v1879_v27 = vadd.f32 %v1878_v21, %v4320_v38  ;;  %v2838_v20 = vld [vmem:[%s4016_s17 + $0x34] sm:$0xf0] }
 0x152   : > { %v2145_v22 = vpop.f32.mrf.mxu0  ;;  %v2844_v21 = vld [vmem:[%s4016_s17 + $0x18] sm:$0xf]  ;;  %v2841_v34 = vor.u32 %v3686_v19, %v2838_v20  ;;  %v2888_v19 = vld [vmem:[%s4016_s17 + $0x68] sm:$0xf]  ;;  %v3701_v20 = vld [vmem:[%s4016_s17 + $0x88] sm:$0xf0] }
 0x153   : > { %v4506_v30 = vadd.f32 %v2143_v16, %v2055_v8  ;;  %v3691_v8 = vld [vmem:[%s4016_s17 + $0x38] sm:$0xf0] }
 0x154   : > { %v2845_v42 = vor.u32 %v3691_v8, %v2844_v21 }
 0x156   : > { %v1967_v48 = vpop.f32.mrf.mxu2 }
 0x157   : > { %v1968_v49 = vadd.f32 %v1967_v48, %v1879_v27  ;;  %v2056_v50 = vpop.f32.mrf.mxu3  ;;  %v3687_v27 = vld [vmem:[%s4016_s17 + $0x1c] sm:$0xf] }
 0x158   : > { %v1881_v52 = vpop.f32.mrf.mxu1 }
 0x159   : > { %v2057_v38 = vadd.f32 %v2056_v50, %v1968_v49  ;;  %v1882_v59 = vadd.f32 %v1881_v52, %v4345_v4  ;;  %v2853_v49 = vor.u32 %v3692_v26, %v2852_v25 }
 0x15a   : > { %v2148_v62 = vpop.f32.mrf.mxu0 }
 0x15b   : > { %1920 = vmatmul.bf16.gmra.mxu1 %v3365_v1  ;;  %2009 = vmatmul.bf16.gmra.mxu2 %v3369_v51  ;;  %v4515_v44 = vadd.f32 %v2145_v22, %v2057_v38  ;;  %v2846_v22 = vld [vmem:[%s4016_s17 + $0x3c] sm:$0xf0] }
 0x15c   : > { %2098 = vmatmul.bf16.gmra.mxu3 %v3373_v54  ;;  %v2849_v48 = vor.u32 %v3687_v27, %v2846_v22 }
 0x15d   : > { %2187 = vmatmul.bf16.gmra.mxu0 %v3377_v58 }
 0x15e   : > { %v1970_v40 = vpop.f32.mrf.mxu2 }
 0x15f   : > { %v1971_v9 = vadd.f32 %v1970_v40, %v1882_v59  ;;  %v2059_v11 = vpop.f32.mrf.mxu3  ;;  %v3695_v40 = vld [vmem:[%s4016_s17 + $0x5c] sm:$0xf] }
 0x160   : > { %v1883_v7 = vpop.f32.mrf.mxu1 }
 0x161   : > { %v2060_v45 = vadd.f32 %v2059_v11, %v1971_v9  ;;  %v1884_v4 = vadd.f32 %v1883_v7, %v4356_v14  ;;  %v2874_v9 = vld [vmem:[%s4016_s17 + $0x7c] sm:$0xf0] }
 0x162   : > { %v2150_v16 = vpop.f32.mrf.mxu0  ;;  %v2880_v7 = vld [vmem:[%s4016_s17 + $0x60] sm:$0xf]  ;;  %v2877_v22 = vor.u32 %v3695_v40, %v2874_v9  ;;  %v2924_v40 = vld [vmem:[%s4016_s17 + $0xb0] sm:$0xf]  ;;  %v3710_v9 = vld [vmem:[%s4016_s17 + $0xd0] sm:$0xf0] }
 0x163   : > { %v4520_v15 = vadd.f32 %v2148_v62, %v2060_v45  ;;  %v3700_v45 = vld [vmem:[%s4016_s17 + $0x80] sm:$0xf0] }
 0x164   : > { %v2881_v25 = vor.u32 %v3700_v45, %v2880_v7 }
 0x166   : > { %v1972_v33 = vpop.f32.mrf.mxu2 }
 0x167   : > { %v1973_v37 = vadd.f32 %v1972_v33, %v1884_v4  ;;  %v2061_v0 = vpop.f32.mrf.mxu3  ;;  %v3696_v4 = vld [vmem:[%s4016_s17 + $0x64] sm:$0xf] }
 0x168   : > { %v1886_v46 = vpop.f32.mrf.mxu1 }
 0x169   : > { %v2062_v14 = vadd.f32 %v2061_v0, %v1973_v37  ;;  %v1887_v50 = vadd.f32 %v1886_v46, %v4242_v39  ;;  %v2889_v37 = vor.u32 %v3701_v20, %v2888_v19 }
 0x16a   : > { %v2153_v1 = vpop.f32.mrf.mxu0 }
 0x16b   : > { %2201 = vmatmul.bf16.vlgmr.msra.gmra.mxu1 %v2841_v34  ;;  %2290 = vmatmul.bf16.vlgmr.msra.gmra.mxu2 %v2845_v42  ;;  %v4529_v51 = vadd.f32 %v2150_v16, %v2062_v14  ;;  %v2882_v16 = vld [vmem:[%s4016_s17 + $0x84] sm:$0xf0] }
 0x16c   : > { %2379 = vmatmul.bf16.vlgmr.msra.gmra.mxu3 %v2849_v48  ;;  %v2885_v33 = vor.u32 %v3696_v4, %v2882_v16 }
 0x16d   : > { %2468 = vmatmul.bf16.vlgmr.msra.gmra.mxu0 %v2853_v49 }
 0x16e   : > { %v1975_v52 = vpop.f32.mrf.mxu2 }
 0x16f   : > { %v1976_v54 = vadd.f32 %v1975_v52, %v1887_v50  ;;  %v2064_v58 = vpop.f32.mrf.mxu3  ;;  %v3704_v52 = vld [vmem:[%s4016_s17 + $0xa4] sm:$0xf] }
 0x170   : > { %v1888_v38 = vpop.f32.mrf.mxu1 }
 0x171   : > { %v2065_v59 = vadd.f32 %v2064_v58, %v1976_v54  ;;  %v1889_v39 = vadd.f32 %v1888_v38, %v4267_v56  ;;  %v2910_v54 = vld [vmem:[%s4016_s17 + $0xc4] sm:$0xf0] }
 0x172   : > { %v2155_v62 = vpop.f32.mrf.mxu0  ;;  %v2916_v38 = vld [vmem:[%s4016_s17 + $0xa8] sm:$0xf]  ;;  %v2913_v16 = vor.u32 %v3704_v52, %v2910_v54  ;;  %v2960_v52 = vld [vmem:[%s4016_s17 + $0xf8] sm:$0xf]  ;;  %v3719_v54 = vld [vmem:[%s4016_s17 + $0x118] sm:$0xf0] }
 0x173   : > { %v4534_v11 = vadd.f32 %v2153_v1, %v2065_v59  ;;  %v3709_v59 = vld [vmem:[%s4016_s17 + $0xc8] sm:$0xf0] }
 0x174   : > { %v2917_v19 = vor.u32 %v3709_v59, %v2916_v38 }
 0x176   : > { %v1977_v21 = vpop.f32.mrf.mxu2 }
 0x177   : > { %v1978_v8 = vadd.f32 %v1977_v21, %v1889_v39  ;;  %v2066_v27 = vpop.f32.mrf.mxu3  ;;  %v3705_v39 = vld [vmem:[%s4016_s17 + $0xac] sm:$0xf] }
 0x178   : > { %v1891_v26 = vpop.f32.mrf.mxu1 }
 0x179   : > { %v2067_v56 = vadd.f32 %v2066_v27, %v1978_v8  ;;  %v1892_v0 = vadd.f32 %v1891_v26, %v4278_v3  ;;  %v2925_v8 = vor.u32 %v3710_v9, %v2924_v40 }
 0x17a   : > { %v2158_v34 = vpop.f32.mrf.mxu0 }
 0x17b   : > { %2206 = vmatmul.bf16.gmra.mxu1 %v2877_v22  ;;  %2295 = vmatmul.bf16.gmra.mxu2 %v2881_v25  ;;  %v4543_v42 = vadd.f32 %v2155_v62, %v2067_v56  ;;  %v2918_v62 = vld [vmem:[%s4016_s17 + $0xcc] sm:$0xf0] }
 0x17c   : > { %2384 = vmatmul.bf16.gmra.mxu3 %v2885_v33  ;;  %v2921_v21 = vor.u32 %v3705_v39, %v2918_v62 }
 0x17d   : > { %2473 = vmatmul.bf16.gmra.mxu0 %v2889_v37 }
 0x17e   : > { %v1980_v46 = vpop.f32.mrf.mxu2 }
 0x17f   : > { %v1981_v48 = vadd.f32 %v1980_v46, %v1892_v0  ;;  %v2069_v49 = vpop.f32.mrf.mxu3  ;;  %v3713_v46 = vld [vmem:[%s4016_s17 + $0xec] sm:$0xf] }
 0x180   : > { %v1893_v14 = vpop.f32.mrf.mxu1 }
 0x181   : > { %v2070_v50 = vadd.f32 %v2069_v49, %v1981_v48  ;;  %v1894_v3 = vadd.f32 %v1893_v14, %v4297_v18  ;;  %v2946_v48 = vld [vmem:[%s4016_s17 + $0x10c] sm:$0xf0] }
 0x182   : > { %v2160_v1 = vpop.f32.mrf.mxu0  ;;  %v2952_v14 = vld [vmem:[%s4016_s17 + $0xf0] sm:$0xf]  ;;  %v2949_v62 = vor.u32 %v3713_v46, %v2946_v48  ;;  %v2996_v46 = vld [vmem:[%s4016_s17 + $0x140] sm:$0xf]  ;;  %v3728_v48 = vld [vmem:[%s4016_s17 + $0x160] sm:$0xf0] }
 0x183   : > { %v4548_v58 = vadd.f32 %v2158_v34, %v2070_v50  ;;  %v3718_v50 = vld [vmem:[%s4016_s17 + $0x110] sm:$0xf0] }
 0x184   : > { %v2953_v40 = vor.u32 %v3718_v50, %v2952_v14 }
 0x186   : > { %v1982_v7 = vpop.f32.mrf.mxu2 }
 0x187   : > { %v1983_v45 = vadd.f32 %v1982_v7, %v1894_v3  ;;  %v2071_v4 = vpop.f32.mrf.mxu3  ;;  %v3714_v3 = vld [vmem:[%s4016_s17 + $0xf4] sm:$0xf] }
 0x188   : > { %v1896_v20 = vpop.f32.mrf.mxu1 }
 0x189   : > { %v2072_v18 = vadd.f32 %v2071_v4, %v1983_v45  ;;  %v1897_v27 = vadd.f32 %v1896_v20, %v4314_v32  ;;  %v2961_v45 = vor.u32 %v3719_v54, %v2960_v52 }
 0x18a   : > { %v2163_v22 = vpop.f32.mrf.mxu0 }
 0x18b   : > { %2211 = vmatmul.bf16.gmra.mxu1 %v2913_v16  ;;  %2300 = vmatmul.bf16.gmra.mxu2 %v2917_v19  ;;  %v4557_v25 = vadd.f32 %v2160_v1, %v2072_v18  ;;  %v2954_v1 = vld [vmem:[%s4016_s17 + $0x114] sm:$0xf0] }
 0x18c   : > { %2389 = vmatmul.bf16.gmra.mxu3 %v2921_v21  ;;  %v2957_v7 = vor.u32 %v3714_v3, %v2954_v1 }
 0x18d   : > { %2478 = vmatmul.bf16.gmra.mxu0 %v2925_v8 }
 0x18e   : > { %v1985_v26 = vpop.f32.mrf.mxu2 }
 0x18f   : > { %v1986_v33 = vadd.f32 %v1985_v26, %v1897_v27  ;;  %v2074_v37 = vpop.f32.mrf.mxu3  ;;  %v3722_v26 = vld [vmem:[%s4016_s17 + $0x134] sm:$0xf] }
 0x190   : > { %v1898_v56 = vpop.f32.mrf.mxu1 }
 0x191   : > { %v2075_v0 = vadd.f32 %v2074_v37, %v1986_v33  ;;  %v1899_v32 = vadd.f32 %v1898_v56, %v4339_v55  ;;  %v2982_v33 = vld [vmem:[%s4016_s17 + $0x154] sm:$0xf0] }
 0x192   : > { %v2165_v34 = vpop.f32.mrf.mxu0  ;;  %v2988_v56 = vld [vmem:[%s4016_s17 + $0x138] sm:$0xf]  ;;  %v2985_v1 = vor.u32 %v3722_v26, %v2982_v33  ;;  %v3032_v26 = vld [vmem:[%s4016_s17 + $0x188] sm:$0xf]  ;;  %v3737_v33 = vld [vmem:[%s4016_s17 + $0x1a8] sm:$0xf0] }
 0x193   : > { %v4562_v49 = vadd.f32 %v2163_v22, %v2075_v0  ;;  %v3727_v0 = vld [vmem:[%s4016_s17 + $0x158] sm:$0xf0] }
 0x194   : > { %v2989_v52 = vor.u32 %v3727_v0, %v2988_v56 }
 0x196   : > { %v1987_v38 = vpop.f32.mrf.mxu2 }
 0x197   : > { %v1988_v59 = vadd.f32 %v1987_v38, %v1899_v32  ;;  %v2076_v39 = vpop.f32.mrf.mxu3  ;;  %v3723_v32 = vld [vmem:[%s4016_s17 + $0x13c] sm:$0xf] }
 0x198   : > { %v1901_v9 = vpop.f32.mrf.mxu1 }
 0x199   : > { %v2077_v55 = vadd.f32 %v2076_v39, %v1988_v59  ;;  %v1902_v4 = vadd.f32 %v1901_v9, %v4350_v10  ;;  %v2997_v59 = vor.u32 %v3728_v48, %v2996_v46 }
 0x19a   : > { %v2168_v16 = vpop.f32.mrf.mxu0 }
 0x19b   : > { %2216 = vmatmul.bf16.gmra.mxu1 %v2949_v62  ;;  %2305 = vmatmul.bf16.gmra.mxu2 %v2953_v40  ;;  %v4571_v19 = vadd.f32 %v2165_v34, %v2077_v55  ;;  %v2990_v34 = vld [vmem:[%s4016_s17 + $0x15c] sm:$0xf0] }
 0x19c   : > { %2394 = vmatmul.bf16.gmra.mxu3 %v2957_v7  ;;  %v2993_v38 = vor.u32 %v3723_v32, %v2990_v34 }
 0x19d   : > { %2483 = vmatmul.bf16.gmra.mxu0 %v2961_v45 }
 0x19e   : > { %v1990_v20 = vpop.f32.mrf.mxu2 }
 0x19f   : > { %v1991_v21 = vadd.f32 %v1990_v20, %v1902_v4  ;;  %v2079_v8 = vpop.f32.mrf.mxu3  ;;  %v3731_v20 = vld [vmem:[%s4016_s17 + $0x17c] sm:$0xf] }
 0x1a0   : > { %v1903_v18 = vpop.f32.mrf.mxu1 }
 0x1a1   : > { %v2080_v27 = vadd.f32 %v2079_v8, %v1991_v21  ;;  %v1904_v10 = vadd.f32 %v1903_v18, %v4371_v31  ;;  %v3018_v21 = vld [vmem:[%s4016_s17 + $0x19c] sm:$0xf0] }
 0x1a2   : > { %v2170_v22 = vpop.f32.mrf.mxu0  ;;  %v3024_v18 = vld [vmem:[%s4016_s17 + $0x180] sm:$0xf]  ;;  %v3021_v34 = vor.u32 %v3731_v20, %v3018_v21  ;;  %v3068_v20 = vld [vmem:[%s4016_s17 + $0x1d0] sm:$0xf]  ;;  %v3746_v21 = vld [vmem:[%s4016_s17 + $0x1f0] sm:$0xf0] }
 0x1a3   : > { %v4576_v37 = vadd.f32 %v2168_v16, %v2080_v27  ;;  %v3736_v27 = vld [vmem:[%s4016_s17 + $0x1a0] sm:$0xf0] }
 0x1a4   : > { %v3025_v46 = vor.u32 %v3736_v27, %v3024_v18 }
 0x1a6   : > { %v1992_v14 = vpop.f32.mrf.mxu2 }
 0x1a7   : > { %v1993_v50 = vadd.f32 %v1992_v14, %v1904_v10  ;;  %v2081_v3 = vpop.f32.mrf.mxu3  ;;  %v3732_v10 = vld [vmem:[%s4016_s17 + $0x184] sm:$0xf] }
 0x1a8   : > { %v1906_v54 = vpop.f32.mrf.mxu1 }
 0x1a9   : > { %v2082_v31 = vadd.f32 %v2081_v3, %v1993_v50  ;;  %v1907_v39 = vadd.f32 %v1906_v54, %v4245_v41  ;;  %v3033_v50 = vor.u32 %v3737_v33, %v3032_v26 }
 0x1aa   : > { %v2173_v62 = vpop.f32.mrf.mxu0 }
 0x1ab   : > { %2221 = vmatmul.bf16.gmra.mxu1 %v2985_v1  ;;  %2310 = vmatmul.bf16.gmra.mxu2 %v2989_v52  ;;  %v4585_v40 = vadd.f32 %v2170_v22, %v2082_v31  ;;  %v3026_v22 = vld [vmem:[%s4016_s17 + $0x1a4] sm:$0xf0] }
 0x1ac   : > { %2399 = vmatmul.bf16.gmra.mxu3 %v2993_v38  ;;  %v3029_v14 = vor.u32 %v3732_v10, %v3026_v22 }
 0x1ad   : > { %2488 = vmatmul.bf16.gmra.mxu0 %v2997_v59 }
 0x1ae   : > { %v1995_v9 = vpop.f32.mrf.mxu2 }
 0x1af   : > { %v1996_v7 = vadd.f32 %v1995_v9, %v1907_v39  ;;  %v2084_v45 = vpop.f32.mrf.mxu3  ;;  %v3740_v9 = vld [vmem:[%s4016_s17 + $0x1c4] sm:$0xf] }
 0x1b0   : > { %v1908_v55 = vpop.f32.mrf.mxu1 }
 0x1b1   : > { %v2085_v4 = vadd.f32 %v2084_v45, %v1996_v7  ;;  %v1909_v41 = vadd.f32 %v1908_v55, %v4270_v60  ;;  %v3054_v7 = vld [vmem:[%s4016_s17 + $0x1e4] sm:$0xf0] }
 0x1b2   : > { %v2175_v16 = vpop.f32.mrf.mxu0  ;;  %v3060_v55 = vld [vmem:[%s4016_s17 + $0x1c8] sm:$0xf]  ;;  %v3057_v22 = vor.u32 %v3740_v9, %v3054_v7  ;;  %v3104_v9 = vld [vmem:[%s4016_s17 + $0x218] sm:$0xf]  ;;  %v3755_v7 = vld [vmem:[%s4016_s17 + $0x238] sm:$0xf0] }
 0x1b3   : > { %v4590_v8 = vadd.f32 %v2173_v62, %v2085_v4  ;;  %v3745_v4 = vld [vmem:[%s4016_s17 + $0x1e8] sm:$0xf0] }
 0x1b4   : > { %v3061_v26 = vor.u32 %v3745_v4, %v3060_v55 }
 0x1b6   : > { %v1997_v56 = vpop.f32.mrf.mxu2 }
 0x1b7   : > { %v1998_v0 = vadd.f32 %v1997_v56, %v1909_v41  ;;  %v2086_v32 = vpop.f32.mrf.mxu3  ;;  %v3741_v41 = vld [vmem:[%s4016_s17 + $0x1cc] sm:$0xf] }
 0x1b8   : > { %v1911_v48 = vpop.f32.mrf.mxu1 }
 0x1b9   : > { %v2087_v60 = vadd.f32 %v2086_v32, %v1998_v0  ;;  %v1912_v3 = vadd.f32 %v1911_v48, %v4281_v5  ;;  %v3069_v0 = vor.u32 %v3746_v21, %v3068_v20 }
 0x1ba   : > { %v2178_v1 = vpop.f32.mrf.mxu0 }
 0x1bb   : > { %2226 = vmatmul.bf16.gmra.mxu1 %v3021_v34  ;;  %2315 = vmatmul.bf16.gmra.mxu2 %v3025_v46  ;;  %v4599_v52 = vadd.f32 %v2175_v16, %v2087_v60  ;;  %v3062_v16 = vld [vmem:[%s4016_s17 + $0x1ec] sm:$0xf0] }
 0x1bc   : > { %2404 = vmatmul.bf16.gmra.mxu3 %v3029_v14  ;;  %v3065_v56 = vor.u32 %v3741_v41, %v3062_v16 }
 0x1bd   : > { %2493 = vmatmul.bf16.gmra.mxu0 %v3033_v50 }
 0x1be   : > { %v2000_v54 = vpop.f32.mrf.mxu2 }
 0x1bf   : > { %v2001_v38 = vadd.f32 %v2000_v54, %v1912_v3  ;;  %v2089_v59 = vpop.f32.mrf.mxu3  ;;  %v3749_v54 = vld [vmem:[%s4016_s17 + $0x20c] sm:$0xf] }
 0x1c0   : > { %v1913_v31 = vpop.f32.mrf.mxu1 }
 0x1c1   : > { %v2090_v39 = vadd.f32 %v2089_v59, %v2001_v38  ;;  %v1914_v5 = vadd.f32 %v1913_v31, %v4300_v23  ;;  %v3090_v38 = vld [vmem:[%s4016_s17 + $0x22c] sm:$0xf0] }
 0x1c2   : > { %v2180_v62 = vpop.f32.mrf.mxu0  ;;  %v3096_v31 = vld [vmem:[%s4016_s17 + $0x210] sm:$0xf]  ;;  %v3093_v16 = vor.u32 %v3749_v54, %v3090_v38  ;;  %v3140_v54 = vld [vmem:[%s4016_s17 + $0x260] sm:$0xf]  ;;  %v3764_v38 = vld [vmem:[%s4016_s17 + $0x280] sm:$0xf0] }
 0x1c3   : > { %v4604_v45 = vadd.f32 %v2178_v1, %v2090_v39  ;;  %v3754_v39 = vld [vmem:[%s4016_s17 + $0x230] sm:$0xf0] }
 0x1c4   : > { %v3097_v20 = vor.u32 %v3754_v39, %v3096_v31 }
 0x1c6   : > { %v2002_v18 = vpop.f32.mrf.mxu2 }
 0x1c7   : > { %v2003_v27 = vadd.f32 %v2002_v18, %v1914_v5  ;;  %v2091_v10 = vpop.f32.mrf.mxu3  ;;  %v3750_v5 = vld [vmem:[%s4016_s17 + $0x214] sm:$0xf] }
 0x1c8   : > { %v1916_v33 = vpop.f32.mrf.mxu1 }
 0x1c9   : > { %v2092_v23 = vadd.f32 %v2091_v10, %v2003_v27  ;;  %v1917_v32 = vadd.f32 %v1916_v33, %v4317_v36  ;;  %v3105_v27 = vor.u32 %v3755_v7, %v3104_v9 }
 0x1ca   : > { %v2183_v34 = vpop.f32.mrf.mxu0 }
 0x1cb   : > { %2231 = vmatmul.bf16.gmra.mxu1 %v3057_v22  ;;  %2320 = vmatmul.bf16.gmra.mxu2 %v3061_v26  ;;  %v4613_v46 = vadd.f32 %v2180_v62, %v2092_v23  ;;  %v3098_v62 = vld [vmem:[%s4016_s17 + $0x234] sm:$0xf0] }
 0x1cc   : > { %2409 = vmatmul.bf16.gmra.mxu3 %v3065_v56  ;;  %v3101_v18 = vor.u32 %v3750_v5, %v3098_v62 }
 0x1cd   : > { %2498 = vmatmul.bf16.gmra.mxu0 %v3069_v0 }
 0x1ce   : > { %v2005_v48 = vpop.f32.mrf.mxu2 }
 0x1cf   : > { %v2006_v14 = vadd.f32 %v2005_v48, %v1917_v32  ;;  %v2094_v50 = vpop.f32.mrf.mxu3  ;;  %v3758_v48 = vld [vmem:[%s4016_s17 + $0x254] sm:$0xf] }
 0x1d0   : > { %v1918_v60 = vpop.f32.mrf.mxu1 }
 0x1d1   : > { %v2095_v3 = vadd.f32 %v2094_v50, %v2006_v14  ;;  %v1919_v36 = vadd.f32 %v1918_v60, %v4342_v61  ;;  %v3126_v14 = vld [vmem:[%s4016_s17 + $0x274] sm:$0xf0] }
 0x1d2   : > { %v2185_v1 = vpop.f32.mrf.mxu0  ;;  %v3132_v60 = vld [vmem:[%s4016_s17 + $0x258] sm:$0xf]  ;;  %v3129_v62 = vor.u32 %v3758_v48, %v3126_v14 }
 0x1d3   : > { %v4618_v59 = vadd.f32 %v2183_v34, %v2095_v3  ;;  %v3763_v3 = vld [vmem:[%s4016_s17 + $0x278] sm:$0xf0] }
 0x1d4   : > { %v3133_v9 = vor.u32 %v3763_v3, %v3132_v60  ;;  %v3170_v60 = vld [vmem:[%s4016_s17 + $0x2c4] sm:$0xf0] }
 0x1d5   : > { %v3176_v3 = vld [vmem:[%s4016_s17 + $0x2a8] sm:$0xf] }
 0x1d6   : > { %v2007_v55 = vpop.f32.mrf.mxu2 }
 0x1d7   : > { %v2008_v4 = vadd.f32 %v2007_v55, %v1919_v36  ;;  %v2096_v41 = vpop.f32.mrf.mxu3  ;;  %v3759_v36 = vld [vmem:[%s4016_s17 + $0x25c] sm:$0xf] }
 0x1d8   : > { %v1921_v21 = vpop.f32.mrf.mxu1 }
 0x1d9   : > { %v2097_v61 = vadd.f32 %v2096_v41, %v2008_v4  ;;  %v1922_v10 = vadd.f32 %v1921_v21, %v4353_v12 }
 0x1da   : > { %v2188_v22 = vpop.f32.mrf.mxu0 }
 0x1db   : > { %2236 = vmatmul.bf16.gmra.mxu1 %v3093_v16  ;;  %2325 = vmatmul.bf16.gmra.mxu2 %v3097_v20  ;;  %v4627_v26 = vadd.f32 %v2185_v1, %v2097_v61  ;;  %v3134_v1 = vld [vmem:[%s4016_s17 + $0x27c] sm:$0xf0] }
 0x1dc   : > { %2414 = vmatmul.bf16.gmra.mxu3 %v3101_v18  ;;  %v3137_v55 = vor.u32 %v3759_v36, %v3134_v1  ;;  %v3773_v36 = vld [vmem:[%s4016_s17 + $0x2c8] sm:$0xf0] }
 0x1dd   : > { %2503 = vmatmul.bf16.gmra.mxu0 %v3105_v27 }
 0x1de   : > { %v2010_v33 = vpop.f32.mrf.mxu2 }
 0x1df   : > { %v2011_v56 = vadd.f32 %v2010_v33, %v1922_v10  ;;  %v2099_v0 = vpop.f32.mrf.mxu3 }
 0x1e0   : > { %v1923_v23 = vpop.f32.mrf.mxu1 }
 0x1e1   : > { %v2100_v32 = vadd.f32 %v2099_v0, %v2011_v56  ;;  %v1924_v12 = vadd.f32 %v1923_v23, %v4374_v43  ;;  %v3141_v43 = vor.u32 %v3764_v38, %v3140_v54  ;;  %v4657_v56 = vld [vmem:[%s4890_s4] ss:$0 sm:$0xff]  ;;  %v3767_v0 = vld [vmem:[%s4016_s17 + $0x29c] sm:$0xf] }
 0x1e2   : > { %v2190_v34 = vpop.f32.mrf.mxu0  ;;  %v3162_v23 = vld [vmem:[%s4016_s17 + $0x2bc] sm:$0xf0] }
 0x1e3   : > { %v4632_v50 = vadd.f32 %v2188_v22, %v2100_v32  ;;  %v4647_v22 = vld [vmem:[%s4889_s3] ss:$0 sm:$0xff] }
 0x1e4   : > { %v3168_v32 = vld [vmem:[%s4016_s17 + $0x2a0] sm:$0xf] }
 0x1e6   : > { %v2012_v31 = vpop.f32.mrf.mxu2 }
 0x1e7   : > { %v2013_v39 = vadd.f32 %v2012_v31, %v1924_v12  ;;  %v2101_v5 = vpop.f32.mrf.mxu3  ;;  %v3772_v12 = vld [vmem:[%s4016_s17 + $0x2c0] sm:$0xf0] }
 0x1e8   : > { %v2202_v7 = vpop.f32.mrf.mxu1 }
 0x1e9   : > { %v2102_v4 = vadd.f32 %v2101_v5, %v2013_v39  ;;  %v2203_v20 = vadd.f32 %v2202_v7, %v4392_v13  ;;  %v3165_v39 = vor.u32 %v3767_v0, %v3162_v23  ;;  %v3169_v5 = vor.u32 %v3772_v12, %v3168_v32  ;;  %v3776_v23 = vld [vmem:[%s4016_s17 + $0x2e4] sm:$0xf]  ;;  %v3198_v12 = vld [vmem:[%s4016_s17 + $0x304] sm:$0xf0] }
 0x1ea   : > { %v2469_v41 = vpop.f32.mrf.mxu0 }
 0x1eb   : > { %2241 = vmatmul.bf16.gmra.mxu1 %v3129_v62  ;;  %2330 = vmatmul.bf16.gmra.mxu2 %v3133_v9  ;;  %v4640_v16 = vadd.f32 %v2190_v34, %v2102_v4  ;;  %v3768_v34 = vld [vmem:[%s4016_s17 + $0x2a4] sm:$0xf] }
 0x1ec   : > { %2419 = vmatmul.bf16.gmra.mxu3 %v3137_v55  ;;  %v3173_v9 = vor.u32 %v3768_v34, %v3170_v60  ;;  %v3204_v34 = vld [vmem:[%s4016_s17 + $0x2e8] sm:$0xf] }
 0x1ed   : > { %2508 = vmatmul.bf16.gmra.mxu0 %v3141_v43 }
 0x1ee   : > { %v2291_v21 = vpop.f32.mrf.mxu2 }
 0x1ef   : > { %v2292_v18 = vadd.f32 %v2291_v21, %v2203_v20  ;;  %v2380_v27 = vpop.f32.mrf.mxu3 }
 0x1f0   : > { %v2204_v61 = vpop.f32.mrf.mxu1 }
 0x1f1   : > { %v2381_v10 = vadd.f32 %v2380_v27, %v2292_v18  ;;  %v2205_v14 = vadd.f32 %v2204_v61, %v4402_v35  ;;  %v3177_v35 = vor.u32 %v3773_v36, %v3176_v3  ;;  %v3212_v36 = vld [vmem:[%s4016_s17 + $0x2f0] sm:$0xf] }
 0x1f2   : > { %v2471_v33 = vpop.f32.mrf.mxu0 }
 0x1f3   : > { %v2470_v13 = vadd.f32 %v2469_v41, %v2381_v10 }
 0x1f5   : > { %2549 = vst [vmem:[%s4652_s7] sm:$0xff] %v2470_v13  ;;  %v2585_v48 = vmul.f32 %v4647_v22, %v2470_v13 }
 0x1f6   : > { %v2293_v1 = vpop.f32.mrf.mxu2 }
 0x1f7   : > { %v2621_v54 = vadd.f32 %v4657_v56, %v2585_v48  ;;  %v2294_v38 = vadd.f32 %v2293_v1, %v2205_v14  ;;  %v2382_v31 = vpop.f32.mrf.mxu3  ;;  %v3781_v48 = vld [vmem:[%s4016_s17 + $0x308] sm:$0xf0]  ;;  %v3206_v14 = vld [vmem:[%s4016_s17 + $0x30c] sm:$0xf0]  ;;  %v3782_v1 = vld [vmem:[%s4016_s17 + $0x310] sm:$0xf0] }
 0x1f8   : > { %v2207_v62 = vpop.f32.mrf.mxu1 }
 0x1f9   : > { %v2653_v7 = vmax.f32 %v2621_v54, 0.0  ;;  %v2383_v55 = vadd.f32 %v2382_v31, %v2294_v38  ;;  %v2208_v20 = vadd.f32 %v2207_v62, %v4408_v63  ;;  %v3777_v63 = vld [vmem:[%s4016_s17 + $0x2ec] sm:$0xf]  ;;  %v3205_v62 = vor.u32 %v3781_v48, %v3204_v34  ;;  %v3240_v34 = vld [vmem:[%s4016_s17 + $0x330] sm:$0xf] }
 0x1fa   : > { %v2474_v43 = vpop.f32.mrf.mxu0  ;;  %v3790_v48 = vld [vmem:[%s4016_s17 + $0x350] sm:$0xf0] }
 0x1fb   : > { %2685 = vst [vmem:[%s4674_s11] sm:$0xff] %v2653_v7  ;;  %v2472_v4 = vadd.f32 %v2471_v33, %v2383_v55  ;;  %2246 = vmatmul.bf16.gmra.mxu1 %v3165_v39  ;;  %2335 = vmatmul.bf16.gmra.mxu2 %v3169_v5  ;;  %v3201_v5 = vor.u32 %v3776_v23, %v3198_v12  ;;  %v3785_v23 = vld [vmem:[%s4016_s17 + $0x32c] sm:$0xf]  ;;  %v3234_v12 = vld [vmem:[%s4016_s17 + $0x34c] sm:$0xf0] }
 0x1fc   : > { %2424 = vmatmul.bf16.gmra.mxu3 %v3173_v9  ;;  %v3213_v7 = vor.u32 %v3782_v1, %v3212_v36  ;;  %v3791_v36 = vld [vmem:[%s4016_s17 + $0x358] sm:$0xf0] }
 0x1fd   : > { %2513 = vmatmul.bf16.gmra.mxu0 %v3177_v35  ;;  %2550 = vst [vmem:[%s4652_s7 + $0x8] sm:$0xff] %v2472_v4  ;;  %v2586_v41 = vmul.f32 %v4647_v22, %v2472_v4  ;;  %v3209_v35 = vor.u32 %v3777_v63, %v3206_v14  ;;  %v3242_v63 = vld [vmem:[%s4016_s17 + $0x354] sm:$0xf0] }
 0x1fe   : > { %v2296_v21 = vpop.f32.mrf.mxu2 }
 0x1ff   : > { %v2622_v18 = vadd.f32 %v4657_v56, %v2586_v41  ;;  %v2297_v27 = vadd.f32 %v2296_v21, %v2208_v20  ;;  %v2385_v61 = vpop.f32.mrf.mxu3 }
 0x200   : > { %v2209_v10 = vpop.f32.mrf.mxu1 }
 0x201   : > { %v2654_v33 = vmax.f32 %v2622_v18, 0.0  ;;  %v2386_v13 = vadd.f32 %v2385_v61, %v2297_v27  ;;  %v2210_v3 = vadd.f32 %v2209_v10, %v4418_v47 }
 0x202   : > { %v2476_v0 = vpop.f32.mrf.mxu0 }
 0x203   : > { %2686 = vst [vmem:[%s4674_s11 + $0x8] sm:$0xff] %v2654_v33  ;;  %v2475_v32 = vadd.f32 %v2474_v43, %v2386_v13 }
 0x205   : > { %2551 = vst [vmem:[%s4652_s7 + $0x10] sm:$0xff] %v2475_v32  ;;  %v2587_v60 = vmul.f32 %v4647_v22, %v2475_v32 }
 0x206   : > { %v2298_v54 = vpop.f32.mrf.mxu2 }
 0x207   : > { %v2623_v38 = vadd.f32 %v4657_v56, %v2587_v60  ;;  %v2299_v31 = vadd.f32 %v2298_v54, %v2210_v3  ;;  %v2387_v39 = vpop.f32.mrf.mxu3  ;;  %v3248_v3 = vld [vmem:[%s4016_s17 + $0x338] sm:$0xf] }
 0x208   : > { %v2212_v9 = vpop.f32.mrf.mxu1 }
 0x209   : > { %v2655_v55 = vmax.f32 %v2623_v38, 0.0  ;;  %v2388_v43 = vadd.f32 %v2387_v39, %v2299_v31  ;;  %v2213_v20 = vadd.f32 %v2212_v9, %v4436_v2  ;;  %v3786_v2 = vld [vmem:[%s4016_s17 + $0x334] sm:$0xf]  ;;  %v3237_v39 = vor.u32 %v3785_v23, %v3234_v12  ;;  %v3270_v23 = vld [vmem:[%s4016_s17 + $0x394] sm:$0xf0] }
 0x20a   : > { %v2479_v4 = vpop.f32.mrf.mxu0  ;;  %v3245_v9 = vor.u32 %v3786_v2, %v3242_v63  ;;  %v3799_v12 = vld [vmem:[%s4016_s17 + $0x398] sm:$0xf0]  ;;  %v3284_v63 = vld [vmem:[%s4016_s17 + $0x380] sm:$0xf] }
 0x20b   : > { %2687 = vst [vmem:[%s4674_s11 + $0x10] sm:$0xff] %v2655_v55  ;;  %v2477_v41 = vadd.f32 %v2476_v0, %v2388_v43  ;;  %2251 = vmatmul.bf16.gmra.mxu1 %v3201_v5  ;;  %2340 = vmatmul.bf16.gmra.mxu2 %v3205_v62  ;;  %v3241_v5 = vor.u32 %v3790_v48, %v3240_v34  ;;  %v3278_v34 = vld [vmem:[%s4016_s17 + $0x39c] sm:$0xf0] }
 0x20c   : > { %2429 = vmatmul.bf16.gmra.mxu3 %v3209_v35  ;;  %v3249_v35 = vor.u32 %v3791_v36, %v3248_v3 }
 0x20d   : > { %2518 = vmatmul.bf16.gmra.mxu0 %v3213_v7  ;;  %2552 = vst [vmem:[%s4652_s7 + $0x18] sm:$0xff] %v2477_v41  ;;  %v2588_v47 = vmul.f32 %v4647_v22, %v2477_v41 }
 0x20e   : > { %v2301_v21 = vpop.f32.mrf.mxu2 }
 0x20f   : > { %v2624_v18 = vadd.f32 %v4657_v56, %v2588_v47  ;;  %v2302_v27 = vadd.f32 %v2301_v21, %v2213_v20  ;;  %v2390_v61 = vpop.f32.mrf.mxu3 }
 0x210   : > { %v2214_v10 = vpop.f32.mrf.mxu1 }
 0x211   : > { %v2656_v33 = vmax.f32 %v2624_v18, 0.0  ;;  %v2391_v13 = vadd.f32 %v2390_v61, %v2302_v27  ;;  %v2215_v60 = vadd.f32 %v2214_v10, %v4446_v28 }
 0x212   : > { %v2481_v0 = vpop.f32.mrf.mxu0 }
 0x213   : > { %2688 = vst [vmem:[%s4674_s11 + $0x18] sm:$0xff] %v2656_v33  ;;  %v2480_v32 = vadd.f32 %v2479_v4, %v2391_v13  ;;  %v3794_v13 = vld [vmem:[%s4016_s17 + $0x374] sm:$0xf] }
 0x215   : > { %2553 = vst [vmem:[%s4652_s7 + $0x20] sm:$0xff] %v2480_v32  ;;  %v2589_v14 = vmul.f32 %v4647_v22, %v2480_v32  ;;  %v3276_v32 = vld [vmem:[%s4016_s17 + $0x378] sm:$0xf] }
 0x216   : > { %v2303_v1 = vpop.f32.mrf.mxu2 }
 0x217   : > { %v2625_v54 = vadd.f32 %v4657_v56, %v2589_v14  ;;  %v2304_v38 = vadd.f32 %v2303_v1, %v2215_v60  ;;  %v2392_v31 = vpop.f32.mrf.mxu3  ;;  %v3800_v14 = vld [vmem:[%s4016_s17 + $0x3a0] sm:$0xf0] }
 0x218   : > { %v2217_v62 = vpop.f32.mrf.mxu1 }
 0x219   : > { %v2657_v7 = vmax.f32 %v2625_v54, 0.0  ;;  %v2393_v55 = vadd.f32 %v2392_v31, %v2304_v38  ;;  %v2218_v41 = vadd.f32 %v2217_v62, %v4452_v57  ;;  %v3795_v57 = vld [vmem:[%s4016_s17 + $0x37c] sm:$0xf]  ;;  %v3273_v54 = vor.u32 %v3794_v13, %v3270_v23  ;;  %v3808_v13 = vld [vmem:[%s4016_s17 + $0x3e0] sm:$0xf0] }
 0x21a   : > { %v2484_v43 = vpop.f32.mrf.mxu0  ;;  %v3277_v38 = vor.u32 %v3799_v12, %v3276_v32  ;;  %v3320_v12 = vld [vmem:[%s4016_s17 + $0x3c8] sm:$0xf] }
 0x21b   : > { %2689 = vst [vmem:[%s4674_s11 + $0x20] sm:$0xff] %v2657_v7  ;;  %v2482_v4 = vadd.f32 %v2481_v0, %v2393_v55  ;;  %2256 = vmatmul.bf16.gmra.mxu1 %v3237_v39  ;;  %2345 = vmatmul.bf16.gmra.mxu2 %v3241_v5  ;;  %v3281_v39 = vor.u32 %v3795_v57, %v3278_v34  ;;  %v3809_v57 = vld [vmem:[%s4016_s17 + $0x3e8] sm:$0xf0] }
 0x21c   : > { %2434 = vmatmul.bf16.gmra.mxu3 %v3245_v9  ;;  %v3285_v5 = vor.u32 %v3800_v14, %v3284_v63 }
 0x21d   : > { %2523 = vmatmul.bf16.gmra.mxu0 %v3249_v35  ;;  %2554 = vst [vmem:[%s4652_s7 + $0x28] sm:$0xff] %v2482_v4  ;;  %v2590_v28 = vmul.f32 %v4647_v22, %v2482_v4 }
 0x21e   : > { %v2306_v47 = vpop.f32.mrf.mxu2 }
 0x21f   : > { %v2626_v20 = vadd.f32 %v4657_v56, %v2590_v28  ;;  %v2307_v21 = vadd.f32 %v2306_v47, %v2218_v41  ;;  %v2395_v18 = vpop.f32.mrf.mxu3 }
 0x220   : > { %v2219_v27 = vpop.f32.mrf.mxu1 }
 0x221   : > { %v2658_v61 = vmax.f32 %v2626_v20, 0.0  ;;  %v2396_v10 = vadd.f32 %v2395_v18, %v2307_v21  ;;  %v2220_v2 = vadd.f32 %v2219_v27, %v4461_v29  ;;  %v3803_v27 = vld [vmem:[%s4016_s17 + $0x3bc] sm:$0xf] }
 0x222   : > { %v2486_v33 = vpop.f32.mrf.mxu0 }
 0x223   : > { %2690 = vst [vmem:[%s4674_s11 + $0x28] sm:$0xff] %v2658_v61  ;;  %v2485_v0 = vadd.f32 %v2484_v43, %v2396_v10  ;;  %v3306_v10 = vld [vmem:[%s4016_s17 + $0x3dc] sm:$0xf0] }
 0x224   : > { %v3309_v14 = vor.u32 %v3803_v27, %v3306_v10  ;;  %v3356_v10 = vld [vmem:[%s4016_s17 + $0x410] sm:$0xf] }
 0x225   : > { %2555 = vst [vmem:[%s4652_s7 + $0x30] sm:$0xff] %v2485_v0  ;;  %v2591_v48 = vmul.f32 %v4647_v22, %v2485_v0  ;;  %v3314_v0 = vld [vmem:[%s4016_s17 + $0x3e4] sm:$0xf0] }
 0x226   : > { %v2308_v60 = vpop.f32.mrf.mxu2 }
 0x227   : > { %v2627_v3 = vadd.f32 %v4657_v56, %v2591_v48  ;;  %v2309_v36 = vadd.f32 %v2308_v60, %v2220_v2  ;;  %v2397_v1 = vpop.f32.mrf.mxu3 }
 0x228   : > { %v2222_v31 = vpop.f32.mrf.mxu1 }
 0x229   : > { %v2659_v62 = vmax.f32 %v2627_v3, 0.0  ;;  %v2398_v9 = vadd.f32 %v2397_v1, %v2309_v36  ;;  %v2223_v55 = vadd.f32 %v2222_v31, %v4478_v53  ;;  %v3804_v53 = vld [vmem:[%s4016_s17 + $0x3c4] sm:$0xf]  ;;  %v3321_v1 = vor.u32 %v3809_v57, %v3320_v12 }
 0x22a   : > { %v2489_v35 = vpop.f32.mrf.mxu0  ;;  %v3317_v36 = vor.u32 %v3804_v53, %v3314_v0 }
 0x22b   : > { %2691 = vst [vmem:[%s4674_s11 + $0x30] sm:$0xff] %v2659_v62  ;;  %v2487_v7 = vadd.f32 %v2486_v33, %v2398_v9  ;;  %2261 = vmatmul.bf16.gmra.mxu1 %v3273_v54  ;;  %2350 = vmatmul.bf16.gmra.mxu2 %v3277_v38  ;;  %v3312_v33 = vld [vmem:[%s4016_s17 + $0x3c0] sm:$0xf] }
 0x22c   : > { %2439 = vmatmul.bf16.gmra.mxu3 %v3281_v39  ;;  %v3313_v60 = vor.u32 %v3808_v13, %v3312_v33  ;;  %v3818_v33 = vld [vmem:[%s4016_s17 + $0x430] sm:$0xf0] }
 0x22d   : > { %2528 = vmatmul.bf16.gmra.mxu0 %v3285_v5  ;;  %2556 = vst [vmem:[%s4652_s7 + $0x38] sm:$0xff] %v2487_v7  ;;  %v2592_v29 = vmul.f32 %v4647_v22, %v2487_v7 }
 0x22e   : > { %v2311_v43 = vpop.f32.mrf.mxu2 }
 0x22f   : > { %v2628_v4 = vadd.f32 %v4657_v56, %v2592_v29  ;;  %v2312_v28 = vadd.f32 %v2311_v43, %v2223_v55  ;;  %v2400_v41 = vpop.f32.mrf.mxu3 }
 0x230   : > { %v2224_v47 = vpop.f32.mrf.mxu1 }
 0x231   : > { %v2660_v20 = vmax.f32 %v2628_v4, 0.0  ;;  %v2401_v21 = vadd.f32 %v2400_v41, %v2312_v28  ;;  %v2225_v32 = vadd.f32 %v2224_v47, %v4487_v24  ;;  %v3812_v28 = vld [vmem:[%s4016_s17 + $0x404] sm:$0xf]  ;;  %v3342_v47 = vld [vmem:[%s4016_s17 + $0x424] sm:$0xf0] }
 0x232   : > { %v2491_v18 = vpop.f32.mrf.mxu0 }
 0x233   : > { %2692 = vst [vmem:[%s4674_s11 + $0x38] sm:$0xff] %v2660_v20  ;;  %v2490_v61 = vadd.f32 %v2489_v35, %v2401_v21  ;;  %v3348_v20 = vld [vmem:[%s4016_s17 + $0x408] sm:$0xf]  ;;  %v3817_v21 = vld [vmem:[%s4016_s17 + $0x428] sm:$0xf0] }
 0x234   : > { %v3349_v12 = vor.u32 %v3817_v21, %v3348_v20 }
 0x235   : > { %2557 = vst [vmem:[%s4652_s7 + $0x40] sm:$0xff] %v2490_v61  ;;  %v2593_v23 = vmul.f32 %v4647_v22, %v2490_v61 }
 0x236   : > { %v2313_v34 = vpop.f32.mrf.mxu2 }
 0x237   : > { %v2629_v48 = vadd.f32 %v4657_v56, %v2593_v23  ;;  %v2314_v2 = vadd.f32 %v2313_v34, %v2225_v32  ;;  %v2402_v63 = vpop.f32.mrf.mxu3  ;;  %v3345_v32 = vor.u32 %v3812_v28, %v3342_v47  ;;  %v3392_v28 = vld [vmem:[%s4016_s17 + $0x458] sm:$0xf] }
 0x238   : > { %v2227_v3 = vpop.f32.mrf.mxu1 }
 0x239   : > { %v2661_v54 = vmax.f32 %v2629_v48, 0.0  ;;  %v2403_v38 = vadd.f32 %v2402_v63, %v2314_v2  ;;  %v2228_v5 = vadd.f32 %v2227_v3, %v4492_v6  ;;  %v3813_v6 = vld [vmem:[%s4016_s17 + $0x40c] sm:$0xf]  ;;  %v3357_v48 = vor.u32 %v3818_v33, %v3356_v10 }
 0x23a   : > { %v2494_v31 = vpop.f32.mrf.mxu0 }
 0x23b   : > { %2693 = vst [vmem:[%s4674_s11 + $0x40] sm:$0xff] %v2661_v54  ;;  %v2492_v39 = vadd.f32 %v2491_v18, %v2403_v38  ;;  %2266 = vmatmul.bf16.gmra.mxu1 %v3309_v14  ;;  %2355 = vmatmul.bf16.gmra.mxu2 %v3313_v60  ;;  %v3350_v18 = vld [vmem:[%s4016_s17 + $0x42c] sm:$0xf0] }
 0x23c   : > { %2444 = vmatmul.bf16.gmra.mxu3 %v3317_v36  ;;  %v3353_v34 = vor.u32 %v3813_v6, %v3350_v18 }
 0x23d   : > { %2533 = vmatmul.bf16.gmra.mxu0 %v3321_v1  ;;  %2558 = vst [vmem:[%s4652_s7 + $0x48] sm:$0xff] %v2492_v39  ;;  %v2594_v24 = vmul.f32 %v4647_v22, %v2492_v39 }
 0x23e   : > { %v2316_v62 = vpop.f32.mrf.mxu2 }
 0x23f   : > { %v2630_v9 = vadd.f32 %v4657_v56, %v2594_v24  ;;  %v2317_v35 = vadd.f32 %v2316_v62, %v2228_v5  ;;  %v2405_v7 = vpop.f32.mrf.mxu3  ;;  %v3821_v62 = vld [vmem:[%s4016_s17 + $0x44c] sm:$0xf] }
 0x240   : > { %v2229_v29 = vpop.f32.mrf.mxu1 }
 0x241   : > { %v2662_v55 = vmax.f32 %v2630_v9, 0.0  ;;  %v2406_v43 = vadd.f32 %v2405_v7, %v2317_v35  ;;  %v2230_v61 = vadd.f32 %v2229_v29, %v4501_v17  ;;  %v3378_v35 = vld [vmem:[%s4016_s17 + $0x46c] sm:$0xf0]  ;;  %v3826_v29 = vld [vmem:[%s4016_s17 + $0x470] sm:$0xf0] }
 0x242   : > { %v2496_v4 = vpop.f32.mrf.mxu0  ;;  %v3384_v7 = vld [vmem:[%s4016_s17 + $0x450] sm:$0xf]  ;;  %v3381_v18 = vor.u32 %v3821_v62, %v3378_v35 }
 0x243   : > { %2694 = vst [vmem:[%s4674_s11 + $0x48] sm:$0xff] %v2662_v55  ;;  %v2495_v41 = vadd.f32 %v2494_v31, %v2406_v43  ;;  %v3386_v55 = vld [vmem:[%s4016_s17 + $0x474] sm:$0xf0] }
 0x245   : > { %2559 = vst [vmem:[%s4652_s7 + $0x50] sm:$0xff] %v2495_v41  ;;  %v2595_v27 = vmul.f32 %v4647_v22, %v2495_v41  ;;  %v3827_v41 = vld [vmem:[%s4016_s17 + $0x478] sm:$0xf0] }
 0x246   : > { %v2318_v13 = vpop.f32.mrf.mxu2  ;;  %v3393_v33 = vor.u32 %v3827_v41, %v3392_v28 }
 0x247   : > { %v2631_v53 = vadd.f32 %v4657_v56, %v2595_v27  ;;  %v2319_v0 = vadd.f32 %v2318_v13, %v2230_v61  ;;  %v2407_v23 = vpop.f32.mrf.mxu3  ;;  %v3385_v27 = vor.u32 %v3826_v29, %v3384_v7 }
 0x248   : > { %v2232_v57 = vpop.f32.mrf.mxu1 }
 0x249   : > { %v2663_v2 = vmax.f32 %v2631_v53, 0.0  ;;  %v2408_v63 = vadd.f32 %v2407_v23, %v2319_v0  ;;  %v2233_v3 = vadd.f32 %v2232_v57, %v4506_v30  ;;  %v3822_v30 = vld [vmem:[%s4016_s17 + $0x454] sm:$0xf] }
 0x24a   : > { %v2499_v14 = vpop.f32.mrf.mxu0  ;;  %v3389_v10 = vor.u32 %v3822_v30, %v3386_v55 }
 0x24b   : > { %2695 = vst [vmem:[%s4674_s11 + $0x50] sm:$0xff] %v2663_v2  ;;  %v2497_v60 = vadd.f32 %v2496_v4, %v2408_v63  ;;  %2271 = vmatmul.bf16.gmra.mxu1 %v3345_v32  ;;  %2360 = vmatmul.bf16.gmra.mxu2 %v3349_v12 }
 0x24c   : > { %2449 = vmatmul.bf16.gmra.mxu3 %v3353_v34 }
 0x24d   : > { %2538 = vmatmul.bf16.gmra.mxu0 %v3357_v48  ;;  %2560 = vst [vmem:[%s4652_s7 + $0x58] sm:$0xff] %v2497_v60  ;;  %v2596_v17 = vmul.f32 %v4647_v22, %v2497_v60 }
 0x24e   : > { %v2321_v36 = vpop.f32.mrf.mxu2 }
 0x24f   : > { %v2632_v1 = vadd.f32 %v4657_v56, %v2596_v17  ;;  %v2322_v54 = vadd.f32 %v2321_v36, %v2233_v3  ;;  %v2410_v38 = vpop.f32.mrf.mxu3 }
 0x250   : > { %v2234_v31 = vpop.f32.mrf.mxu1 }
 0x251   : > { %v2664_v39 = vmax.f32 %v2632_v1, 0.0  ;;  %v2411_v24 = vadd.f32 %v2410_v38, %v2322_v54  ;;  %v2235_v4 = vadd.f32 %v2234_v31, %v4515_v44 }
 0x252   : > { %v2501_v5 = vpop.f32.mrf.mxu0 }
 0x253   : > { %2696 = vst [vmem:[%s4674_s11 + $0x58] sm:$0xff] %v2664_v39  ;;  %v2500_v9 = vadd.f32 %v2499_v14, %v2411_v24 }
 0x255   : > { %2561 = vst [vmem:[%s4652_s7 + $0x60] sm:$0xff] %v2500_v9  ;;  %v2597_v43 = vmul.f32 %v4647_v22, %v2500_v9 }
 0x256   : > { %v2323_v47 = vpop.f32.mrf.mxu2 }
 0x257   : > { %v2633_v20 = vadd.f32 %v4657_v56, %v2597_v43  ;;  %v2324_v21 = vadd.f32 %v2323_v47, %v2235_v4  ;;  %v2412_v6 = vpop.f32.mrf.mxu3 }
 0x258   : > { %v2237_v61 = vpop.f32.mrf.mxu1 }
 0x259   : > { %v2665_v13 = vmax.f32 %v2633_v20, 0.0  ;;  %v2413_v53 = vadd.f32 %v2412_v6, %v2324_v21  ;;  %v2238_v32 = vadd.f32 %v2237_v61, %v4520_v15 }
 0x25a   : > { %v2504_v0 = vpop.f32.mrf.mxu0 }
 0x25b   : > { %2697 = vst [vmem:[%s4674_s11 + $0x60] sm:$0xff] %v2665_v13  ;;  %v2502_v23 = vadd.f32 %v2501_v5, %v2413_v53  ;;  %2276 = vmatmul.bf16.gmra.mxu1 %v3381_v18  ;;  %2365 = vmatmul.bf16.gmra.mxu2 %v3385_v27 }
 0x25c   : > { %2454 = vmatmul.bf16.gmra.mxu3 %v3389_v10 }
 0x25d   : > { %2543 = vmatmul.bf16.gmra.mxu0 %v3393_v33  ;;  %2562 = vst [vmem:[%s4652_s7 + $0x68] sm:$0xff] %v2502_v23  ;;  %v2598_v44 = vmul.f32 %v4647_v22, %v2502_v23 }
 0x25e   : > { %v2326_v12 = vpop.f32.mrf.mxu2 }
 0x25f   : > { %v2634_v57 = vadd.f32 %v4657_v56, %v2598_v44  ;;  %v2327_v34 = vadd.f32 %v2326_v12, %v2238_v32  ;;  %v2415_v48 = vpop.f32.mrf.mxu3 }
 0x260   : > { %v2239_v2 = vpop.f32.mrf.mxu1 }
 0x261   : > { %v2666_v63 = vmax.f32 %v2634_v57, 0.0  ;;  %v2416_v14 = vadd.f32 %v2415_v48, %v2327_v34  ;;  %v2240_v36 = vadd.f32 %v2239_v2, %v4529_v51 }
 0x262   : > { %v2506_v60 = vpop.f32.mrf.mxu0 }
 0x263   : > { %2698 = vst [vmem:[%s4674_s11 + $0x68] sm:$0xff] %v2666_v63  ;;  %v2505_v17 = vadd.f32 %v2504_v0, %v2416_v14 }
 0x265   : > { %2563 = vst [vmem:[%s4652_s7 + $0x70] sm:$0xff] %v2505_v17  ;;  %v2599_v3 = vmul.f32 %v4647_v22, %v2505_v17 }
 0x266   : > { %v2328_v1 = vpop.f32.mrf.mxu2 }
 0x267   : > { %v2635_v15 = vadd.f32 %v4657_v56, %v2599_v3  ;;  %v2329_v54 = vadd.f32 %v2328_v1, %v2240_v36  ;;  %v2417_v38 = vpop.f32.mrf.mxu3 }
 0x268   : > { %v2242_v31 = vpop.f32.mrf.mxu1 }
 0x269   : > { %v2667_v39 = vmax.f32 %v2635_v15, 0.0  ;;  %v2418_v24 = vadd.f32 %v2417_v38, %v2329_v54  ;;  %v2243_v35 = vadd.f32 %v2242_v31, %v4534_v11 }
 0x26a   : > { %v2509_v5 = vpop.f32.mrf.mxu0 }
 0x26b   : > { %2699 = vst [vmem:[%s4674_s11 + $0x70] sm:$0xff] %v2667_v39  ;;  %v2507_v62 = vadd.f32 %v2506_v60, %v2418_v24 }
 0x26d   : > { %2564 = vst [vmem:[%s4652_s7 + $0x78] sm:$0xff] %v2507_v62  ;;  %v2600_v9 = vmul.f32 %v4647_v22, %v2507_v62 }
 0x26e   : > { %v2331_v7 = vpop.f32.mrf.mxu2 }
 0x26f   : > { %v2636_v51 = vadd.f32 %v4657_v56, %v2600_v9  ;;  %v2332_v29 = vadd.f32 %v2331_v7, %v2243_v35  ;;  %v2420_v30 = vpop.f32.mrf.mxu3 }
 0x270   : > { %v2244_v55 = vpop.f32.mrf.mxu1 }
 0x271   : > { %v2668_v43 = vmax.f32 %v2636_v51, 0.0  ;;  %v2421_v4 = vadd.f32 %v2420_v30, %v2332_v29  ;;  %v2245_v20 = vadd.f32 %v2244_v55, %v4543_v42 }
 0x272   : > { %v2511_v28 = vpop.f32.mrf.mxu0 }
 0x273   : > { %2700 = vst [vmem:[%s4674_s11 + $0x78] sm:$0xff] %v2668_v43  ;;  %v2510_v41 = vadd.f32 %v2509_v5, %v2421_v4 }
 0x275   : > { %2565 = vst [vmem:[%s4652_s7 + $0x80] sm:$0xff] %v2510_v41  ;;  %v2601_v47 = vmul.f32 %v4647_v22, %v2510_v41 }
 0x276   : > { %v2333_v21 = vpop.f32.mrf.mxu2 }
 0x277   : > { %v2637_v11 = vadd.f32 %v4657_v56, %v2601_v47  ;;  %v2334_v6 = vadd.f32 %v2333_v21, %v2245_v20  ;;  %v2422_v18 = vpop.f32.mrf.mxu3 }
 0x278   : > { %v2247_v27 = vpop.f32.mrf.mxu1 }
 0x279   : > { %v2669_v61 = vmax.f32 %v2637_v11, 0.0  ;;  %v2423_v10 = vadd.f32 %v2422_v18, %v2334_v6  ;;  %v2248_v0 = vadd.f32 %v2247_v27, %v4548_v58 }
 0x27a   : > { %v2514_v33 = vpop.f32.mrf.mxu0 }
 0x27b   : > { %2701 = vst [vmem:[%s4674_s11 + $0x80] sm:$0xff] %v2669_v61  ;;  %v2512_v13 = vadd.f32 %v2511_v28, %v2423_v10 }
 0x27d   : > { %2566 = vst [vmem:[%s4652_s7 + $0x88] sm:$0xff] %v2512_v13  ;;  %v2602_v53 = vmul.f32 %v4647_v22, %v2512_v13 }
 0x27e   : > { %v2336_v23 = vpop.f32.mrf.mxu2 }
 0x27f   : > { %v2638_v42 = vadd.f32 %v4657_v56, %v2602_v53  ;;  %v2337_v44 = vadd.f32 %v2336_v23, %v2248_v0  ;;  %v2425_v32 = vpop.f32.mrf.mxu3 }
 0x280   : > { %v2249_v12 = vpop.f32.mrf.mxu1 }
 0x281   : > { %v2670_v57 = vmax.f32 %v2638_v42, 0.0  ;;  %v2426_v34 = vadd.f32 %v2425_v32, %v2337_v44  ;;  %v2250_v14 = vadd.f32 %v2249_v12, %v4557_v25 }
 0x282   : > { %v2516_v48 = vpop.f32.mrf.mxu0 }
 0x283   : > { %2702 = vst [vmem:[%s4674_s11 + $0x88] sm:$0xff] %v2670_v57  ;;  %v2515_v2 = vadd.f32 %v2514_v33, %v2426_v34 }
 0x285   : > { %2567 = vst [vmem:[%s4652_s7 + $0x90] sm:$0xff] %v2515_v2  ;;  %v2603_v63 = vmul.f32 %v4647_v22, %v2515_v2 }
 0x286   : > { %v2338_v60 = vpop.f32.mrf.mxu2 }
 0x287   : > { %v2639_v58 = vadd.f32 %v4657_v56, %v2603_v63  ;;  %v2339_v17 = vadd.f32 %v2338_v60, %v2250_v14  ;;  %v2427_v3 = vpop.f32.mrf.mxu3 }
 0x288   : > { %v2252_v36 = vpop.f32.mrf.mxu1 }
 0x289   : > { %v2671_v1 = vmax.f32 %v2639_v58, 0.0  ;;  %v2428_v15 = vadd.f32 %v2427_v3, %v2339_v17  ;;  %v2253_v39 = vadd.f32 %v2252_v36, %v4562_v49 }
 0x28a   : > { %v2519_v54 = vpop.f32.mrf.mxu0 }
 0x28b   : > { %2703 = vst [vmem:[%s4674_s11 + $0x90] sm:$0xff] %v2671_v1  ;;  %v2517_v38 = vadd.f32 %v2516_v48, %v2428_v15 }
 0x28d   : > { %2568 = vst [vmem:[%s4652_s7 + $0x98] sm:$0xff] %v2517_v38  ;;  %v2604_v31 = vmul.f32 %v4647_v22, %v2517_v38 }
 0x28e   : > { %v2341_v24 = vpop.f32.mrf.mxu2 }
 0x28f   : > { %v2640_v25 = vadd.f32 %v4657_v56, %v2604_v31  ;;  %v2342_v5 = vadd.f32 %v2341_v24, %v2253_v39  ;;  %v2430_v62 = vpop.f32.mrf.mxu3 }
 0x290   : > { %v2254_v9 = vpop.f32.mrf.mxu1 }
 0x291   : > { %v2672_v35 = vmax.f32 %v2640_v25, 0.0  ;;  %v2431_v7 = vadd.f32 %v2430_v62, %v2342_v5  ;;  %v2255_v55 = vadd.f32 %v2254_v9, %v4571_v19 }
 0x292   : > { %v2521_v51 = vpop.f32.mrf.mxu0 }
 0x293   : > { %2704 = vst [vmem:[%s4674_s11 + $0x98] sm:$0xff] %v2672_v35  ;;  %v2520_v29 = vadd.f32 %v2519_v54, %v2431_v7 }
 0x295   : > { %2569 = vst [vmem:[%s4652_s7 + $0xa0] sm:$0xff] %v2520_v29  ;;  %v2605_v30 = vmul.f32 %v4647_v22, %v2520_v29 }
 0x296   : > { %v2343_v43 = vpop.f32.mrf.mxu2 }
 0x297   : > { %v2641_v49 = vadd.f32 %v4657_v56, %v2605_v30  ;;  %v2344_v4 = vadd.f32 %v2343_v43, %v2255_v55  ;;  %v2432_v28 = vpop.f32.mrf.mxu3 }
 0x298   : > { %v2257_v41 = vpop.f32.mrf.mxu1 }
 0x299   : > { %v2673_v47 = vmax.f32 %v2641_v49, 0.0  ;;  %v2433_v20 = vadd.f32 %v2432_v28, %v2344_v4  ;;  %v2258_v18 = vadd.f32 %v2257_v41, %v4576_v37 }
 0x29a   : > { %v2524_v21 = vpop.f32.mrf.mxu0 }
 0x29b   : > { %2705 = vst [vmem:[%s4674_s11 + $0xa0] sm:$0xff] %v2673_v47  ;;  %v2522_v11 = vadd.f32 %v2521_v51, %v2433_v20 }
 0x29d   : > { %2570 = vst [vmem:[%s4652_s7 + $0xa8] sm:$0xff] %v2522_v11  ;;  %v2606_v6 = vmul.f32 %v4647_v22, %v2522_v11 }
 0x29e   : > { %v2346_v27 = vpop.f32.mrf.mxu2 }
 0x29f   : > { %v2642_v19 = vadd.f32 %v4657_v56, %v2606_v6  ;;  %v2347_v61 = vadd.f32 %v2346_v27, %v2258_v18  ;;  %v2435_v10 = vpop.f32.mrf.mxu3 }
 0x2a0   : > { %v2259_v33 = vpop.f32.mrf.mxu1 }
 0x2a1   : > { %v2674_v13 = vmax.f32 %v2642_v19, 0.0  ;;  %v2436_v53 = vadd.f32 %v2435_v10, %v2347_v61  ;;  %v2260_v44 = vadd.f32 %v2259_v33, %v4585_v40 }
 0x2a2   : > { %v2526_v0 = vpop.f32.mrf.mxu0 }
 0x2a3   : > { %2706 = vst [vmem:[%s4674_s11 + $0xa8] sm:$0xff] %v2674_v13  ;;  %v2525_v23 = vadd.f32 %v2524_v21, %v2436_v53 }
 0x2a5   : > { %2571 = vst [vmem:[%s4652_s7 + $0xb0] sm:$0xff] %v2525_v23  ;;  %v2607_v42 = vmul.f32 %v4647_v22, %v2525_v23 }
 0x2a6   : > { %v2348_v32 = vpop.f32.mrf.mxu2 }
 0x2a7   : > { %v2643_v37 = vadd.f32 %v4657_v56, %v2607_v42  ;;  %v2349_v12 = vadd.f32 %v2348_v32, %v2260_v44  ;;  %v2437_v57 = vpop.f32.mrf.mxu3 }
 0x2a8   : > { %v2262_v34 = vpop.f32.mrf.mxu1 }
 0x2a9   : > { %v2675_v48 = vmax.f32 %v2643_v37, 0.0  ;;  %v2438_v2 = vadd.f32 %v2437_v57, %v2349_v12  ;;  %v2263_v58 = vadd.f32 %v2262_v34, %v4590_v8 }
 0x2aa   : > { %v2529_v63 = vpop.f32.mrf.mxu0 }
 0x2ab   : > { %2707 = vst [vmem:[%s4674_s11 + $0xb0] sm:$0xff] %v2675_v48  ;;  %v2527_v14 = vadd.f32 %v2526_v0, %v2438_v2 }
 0x2ad   : > { %2572 = vst [vmem:[%s4652_s7 + $0xb8] sm:$0xff] %v2527_v14  ;;  %v2608_v60 = vmul.f32 %v4647_v22, %v2527_v14 }
 0x2ae   : > { %v2351_v17 = vpop.f32.mrf.mxu2 }
 0x2af   : > { %v2644_v40 = vadd.f32 %v4657_v56, %v2608_v60  ;;  %v2352_v3 = vadd.f32 %v2351_v17, %v2263_v58  ;;  %v2440_v36 = vpop.f32.mrf.mxu3 }
 0x2b0   : > { %v2264_v1 = vpop.f32.mrf.mxu1 }
 0x2b1   : > { %v2676_v15 = vmax.f32 %v2644_v40, 0.0  ;;  %v2441_v54 = vadd.f32 %v2440_v36, %v2352_v3  ;;  %v2265_v24 = vadd.f32 %v2264_v1, %v4599_v52 }
 0x2b2   : > { %v2531_v38 = vpop.f32.mrf.mxu0 }
 0x2b3   : > { %2708 = vst [vmem:[%s4674_s11 + $0xb8] sm:$0xff] %v2676_v15  ;;  %v2530_v31 = vadd.f32 %v2529_v63, %v2441_v54 }
 0x2b5   : > { %2573 = vst [vmem:[%s4652_s7 + $0xc0] sm:$0xff] %v2530_v31  ;;  %v2609_v39 = vmul.f32 %v4647_v22, %v2530_v31 }
 0x2b6   : > { %v2353_v25 = vpop.f32.mrf.mxu2 }
 0x2b7   : > { %v2645_v8 = vadd.f32 %v4657_v56, %v2609_v39  ;;  %v2354_v5 = vadd.f32 %v2353_v25, %v2265_v24  ;;  %v2442_v62 = vpop.f32.mrf.mxu3 }
 0x2b8   : > { %v2267_v9 = vpop.f32.mrf.mxu1 }
 0x2b9   : > { %v2677_v35 = vmax.f32 %v2645_v8, 0.0  ;;  %v2443_v7 = vadd.f32 %v2442_v62, %v2354_v5  ;;  %v2268_v55 = vadd.f32 %v2267_v9, %v4604_v45 }
 0x2ba   : > { %v2534_v51 = vpop.f32.mrf.mxu0 }
 0x2bb   : > { %2709 = vst [vmem:[%s4674_s11 + $0xc0] sm:$0xff] %v2677_v35  ;;  %v2532_v29 = vadd.f32 %v2531_v38, %v2443_v7 }
 0x2bd   : > { %2574 = vst [vmem:[%s4652_s7 + $0xc8] sm:$0xff] %v2532_v29  ;;  %v2610_v30 = vmul.f32 %v4647_v22, %v2532_v29 }
 0x2be   : > { %v2356_v43 = vpop.f32.mrf.mxu2 }
 0x2bf   : > { %v2646_v52 = vadd.f32 %v4657_v56, %v2610_v30  ;;  %v2357_v49 = vadd.f32 %v2356_v43, %v2268_v55  ;;  %v2445_v4 = vpop.f32.mrf.mxu3 }
 0x2c0   : > { %v2269_v28 = vpop.f32.mrf.mxu1 }
 0x2c1   : > { %v2678_v41 = vmax.f32 %v2646_v52, 0.0  ;;  %v2446_v47 = vadd.f32 %v2445_v4, %v2357_v49  ;;  %v2270_v6 = vadd.f32 %v2269_v28, %v4613_v46  ;;  %v3936_v52 = vld [vmem:[%s4889_s3] ss:$0 sm:$0xff] }
 0x2c2   : > { %v2536_v20 = vpop.f32.mrf.mxu0 }
 0x2c3   : > { %2710 = vst [vmem:[%s4674_s11 + $0xc8] sm:$0xff] %v2678_v41  ;;  %v2535_v21 = vadd.f32 %v2534_v51, %v2446_v47 }
 0x2c5   : > { %2575 = vst [vmem:[%s4652_s7 + $0xd0] sm:$0xff] %v2535_v21  ;;  %v2611_v11 = vmul.f32 %v4647_v22, %v2535_v21 }
 0x2c6   : > { %v2358_v18 = vpop.f32.mrf.mxu2 }
 0x2c7   : > { %v2647_v45 = vadd.f32 %v4657_v56, %v2611_v11  ;;  %v2359_v27 = vadd.f32 %v2358_v18, %v2270_v6  ;;  %v2447_v19 = vpop.f32.mrf.mxu3 }
 0x2c8   : > { %v2272_v61 = vpop.f32.mrf.mxu1 }
 0x2c9   : > { %v2679_v10 = vmax.f32 %v2647_v45, 0.0  ;;  %v2448_v33 = vadd.f32 %v2447_v19, %v2359_v27  ;;  %v2273_v23 = vadd.f32 %v2272_v61, %v4618_v59 }
 0x2ca   : > { %v2539_v53 = vpop.f32.mrf.mxu0 }
 0x2cb   : > { %2711 = vst [vmem:[%s4674_s11 + $0xd0] sm:$0xff] %v2679_v10  ;;  %v2537_v13 = vadd.f32 %v2536_v20, %v2448_v33 }
 0x2cd   : > { %2576 = vst [vmem:[%s4652_s7 + $0xd8] sm:$0xff] %v2537_v13  ;;  %v2612_v0 = vmul.f32 %v4647_v22, %v2537_v13 }
 0x2ce   : > { %v2361_v42 = vpop.f32.mrf.mxu2 }
 0x2cf   : > { %v2648_v46 = vadd.f32 %v4657_v56, %v2612_v0  ;;  %v2362_v44 = vadd.f32 %v2361_v42, %v2273_v23  ;;  %v2450_v32 = vpop.f32.mrf.mxu3 }
 0x2d0   : > { %v2274_v37 = vpop.f32.mrf.mxu1 }
 0x2d1   : > { %v2680_v12 = vmax.f32 %v2648_v46, 0.0  ;;  %v2451_v57 = vadd.f32 %v2450_v32, %v2362_v44  ;;  %v2275_v2 = vadd.f32 %v2274_v37, %v4627_v26 }
 0x2d2   : > { %v2541_v63 = vpop.f32.mrf.mxu0 }
 0x2d3   : > { %2712 = vst [vmem:[%s4674_s11 + $0xd8] sm:$0xff] %v2680_v12  ;;  %v2540_v34 = vadd.f32 %v2539_v53, %v2451_v57 }
 0x2d5   : > { %2577 = vst [vmem:[%s4652_s7 + $0xe0] sm:$0xff] %v2540_v34  ;;  %v2613_v48 = vmul.f32 %v4647_v22, %v2540_v34 }
 0x2d6   : > { %v2363_v14 = vpop.f32.mrf.mxu2 }
 0x2d7   : > { %v2649_v59 = vadd.f32 %v4657_v56, %v2613_v48  ;;  %v2364_v60 = vadd.f32 %v2363_v14, %v2275_v2  ;;  %v2452_v58 = vpop.f32.mrf.mxu3 }
 0x2d8   : > { %v2277_v17 = vpop.f32.mrf.mxu1 }
 0x2d9   : > { %v2681_v40 = vmax.f32 %v2649_v59, 0.0  ;;  %v2453_v3 = vadd.f32 %v2452_v58, %v2364_v60  ;;  %v2278_v15 = vadd.f32 %v2277_v17, %v4632_v50 }
 0x2da   : > { %v2544_v39 = vpop.f32.mrf.mxu0 }
 0x2db   : > { %2713 = vst [vmem:[%s4674_s11 + $0xe0] sm:$0xff] %v2681_v40  ;;  %v2542_v36 = vadd.f32 %v2541_v63, %v2453_v3 }
 0x2dd   : > { %2578 = vst [vmem:[%s4652_s7 + $0xe8] sm:$0xff] %v2542_v36  ;;  %v2614_v1 = vmul.f32 %v4647_v22, %v2542_v36 }
 0x2de   : > { %v2366_v54 = vpop.f32.mrf.mxu2 }
 0x2df   : > { %v2650_v26 = vadd.f32 %v4657_v56, %v2614_v1  ;;  %v2367_v38 = vadd.f32 %v2366_v54, %v2278_v15  ;;  %v2455_v31 = vpop.f32.mrf.mxu3 }
 0x2e0   : > { %v2279_v8 = vpop.f32.mrf.mxu1 }
 0x2e1   : > { %v2682_v24 = vmax.f32 %v2650_v26, 0.0  ;;  %v2456_v25 = vadd.f32 %v2455_v31, %v2367_v38  ;;  %v2280_v9 = vadd.f32 %v2279_v8, %v4640_v16  ;;  %v3937_v16 = vld [vmem:[%s4890_s4] ss:$0 sm:$0xff] }
 0x2e2   : > { %v2546_v55 = vpop.f32.mrf.mxu0 }
 0x2e3   : > { %2714 = vst [vmem:[%s4674_s11 + $0xe8] sm:$0xff] %v2682_v24  ;;  %v2545_v5 = vadd.f32 %v2544_v39, %v2456_v25 }
 0x2e5   : > { %2579 = vst [vmem:[%s4652_s7 + $0xf0] sm:$0xff] %v2545_v5  ;;  %v2615_v62 = vmul.f32 %v4647_v22, %v2545_v5 }
 0x2e6   : > { %v2368_v50 = vpop.f32.mrf.mxu2 }
 0x2e7   : > { %v2651_v35 = vadd.f32 %v4657_v56, %v2615_v62  ;;  %v2369_v7 = vadd.f32 %v2368_v50, %v2280_v9  ;;  %v2457_v51 = vpop.f32.mrf.mxu3 }
 0x2e9   : > { %v2683_v29 = vmax.f32 %v2651_v35, 0.0  ;;  %v2458_v30 = vadd.f32 %v2457_v51, %v2369_v7 }
 0x2eb   : > { %2715 = vst [vmem:[%s4674_s11 + $0xf0] sm:$0xff] %v2683_v29  ;;  %v2547_v43 = vadd.f32 %v2546_v55, %v2458_v30 }
 0x2ed   : > { %2580 = vst [vmem:[%s4652_s7 + $0xf8] sm:$0xff] %v2547_v43  ;;  %v2616_v49 = vmul.f32 %v3936_v52, %v2547_v43 }
 0x2ef   : > { %v2652_v22 = vadd.f32 %v3937_v16, %v2616_v49 }
 0x2f1   : > { %v2684_v4 = vmax.f32 %v2652_v22, 0.0 }
 0x2f3   : > { %2716 = vst [vmem:[%s4674_s11 + $0xf8] sm:$0xff] %v2684_v4 }
 0x2f4 PF: > { %s17_s21 = sadd.s32 1, %s3944_s21  }
 0x2f5   : > { %p14_p4 = scmp.ge.s32.totalorder %s17_s21, 4  }
 0x2f7   :  { %16 = sbr.rel (!%p14_p4) target bundleno = 1 (0x1), region = 82 }

// kernel: wideresnet_forward.11
= control target key start
LH: loop header
LB: loop body
LE: loop exit
PB: predicated region body
PF: predicated region fallthrough
CT: control target
= control target key end

     0   :  { %s3865_s18 = smov 0   ;;  %s4729_s0 = inlined_call_operand.vmem [shape: bf16[512,1152], index: 0, kind: input, shape index: {}]   ;;  %s4730_s1 = inlined_call_operand.vmem [shape: bf16[1152,128], index: 1, kind: input, shape index: {}]   ;;  %s4731_s2 = inlined_call_operand.vmem [shape: f32[1,128], index: 2, kind: input, shape index: {}]   ;;  %s4732_s3 = inlined_call_operand.vmem [shape: f32[1,128], index: 3, kind: input, shape index: {}]   ;;  %s4733_s4 = inlined_call_operand.vmem [shape: f32[1,128], index: 4, kind: input, shape index: {}]   ;;  %s4734_s5 = inlined_call_operand.vmem [shape: f32[512,128], index: 5, kind: output, shape index: {}]  }
   0x1 LB: > { %s2700_s19 = sadd.s32 4294967295, %s3833_s18   ;;  %p2704_p0 = scmp.ge.s32.totalorder %s3833_s18, 1  ;;  %s3833_s18 = sphi %s3865_s18, %s15_s18  }
   0x2   : > { %p189_p1 = scmp.lt.s32.totalorder %s3833_s18, 3 }
   0x4   : > { %p190_p2 = pnand %p2704_p0, %p189_p1 }
   0x5   : > { %s2705_s26 = sshll.u32 (!%p190_p2), %s2700_s19, 5 }
   0x6   : > { %193 = sbr.rel (%p190_p2) target bundleno = 756 (0x2f4), region = 40  ;;  %p219_p3 = scmp.lt.s32.totalorder (!%p190_p2), %s2705_s26, 63 }
   0xb   : > { %v3726_v0 = vld [vmem:[%s4730_s1 + $0x38] sm:$0xff]  ;;  %v3725_v1 = vld [vmem:[%s4730_s1 + $0x30] sm:$0xff]  ;;  %v3724_v2 = vld [vmem:[%s4730_s1 + $0x28] sm:$0xff]  ;;  %s4736_s26 = smov (!%p219_p3, %s2705_s26), 63 }
   0xc   : > { %3791 = vmatpush.bf16.msra.mxu1 %v3726_v0  ;;  %3792 = vmatpush.bf16.msra.mxu2 %v3726_v0  ;;  %v3723_v3 = vld [vmem:[%s4730_s1 + $0x20] sm:$0xff]  ;;  %v3722_v4 = vld [vmem:[%s4730_s1 + $0x18] sm:$0xff]  ;;  %v3721_v5 = vld [vmem:[%s4730_s1 + $0x10] sm:$0xff]  ;;  %s3815_s8 = smul.u32 36, %s4736_s26  ;;  %s2708_s16 = sshll.u32 %s4736_s26, 3 }
   0xd   : > { %3793 = vmatpush.bf16.msra.mxu3 %v3726_v0  ;;  %1707 = vmatpush.bf16.msra.mxu0 %v3726_v0  ;;  %v3720_v6 = vld [vmem:[%s4730_s1 + $0x8] sm:$0xff]  ;;  %v3719_v7 = vld [vmem:[%s4730_s1] sm:$0xff]  ;;  %v3742_v16 = vld [vmem:[%s4730_s1 + $0xb8] sm:$0xff]  ;;  %s4552_s21 = scalar_lea.vmem %s4734_s5, %s2708_s16 }
   0xe   : > { %s3900_s13 = scalar_lea.vmem %s4729_s0, %s3815_s8  ;;  %v3750_v17 = vld [vmem:[%s4730_s1 + $0xf8] sm:$0xff]  ;;  %v3741_v24 = vld [vmem:[%s4730_s1 + $0xb0] sm:$0xff]  ;;  %v3740_v28 = vld [vmem:[%s4730_s1 + $0xa8] sm:$0xff] }
   0xf   : > { %v2855_v8 = vld [vmem:[%s3900_s13 + $0x120] sm:$0xf]  ;;  %v3615_v9 = vld [vmem:[%s3900_s13 + $0x140] sm:$0xf0]  ;;  %v3734_v22 = vld [vmem:[%s4730_s1 + $0x78] sm:$0xff] }
  0x10   : > { %3794 = vmatpush.bf16.msra.mxu1 %v3725_v1  ;;  %3795 = vmatpush.bf16.msra.mxu2 %v3725_v1  ;;  %v2999_v10 = vld [vmem:[%s3900_s13 + $0x240] sm:$0xf]  ;;  %v3651_v11 = vld [vmem:[%s3900_s13 + $0x260] sm:$0xf0]  ;;  %v2856_v18 = vor.u32 %v3615_v9, %v2855_v8  ;;  %v3758_v23 = vld [vmem:[%s4730_s1 + $0x138] sm:$0xff] }
  0x11   : > { %3796 = vmatpush.bf16.msra.mxu3 %v3725_v1  ;;  %1708 = vmatpush.bf16.msra.mxu0 %v3725_v1  ;;  %v3143_v12 = vld [vmem:[%s3900_s13 + $0x360] sm:$0xf]  ;;  %v3687_v13 = vld [vmem:[%s3900_s13 + $0x380] sm:$0xf0]  ;;  %v3000_v19 = vor.u32 %v3651_v11, %v2999_v10  ;;  %v3749_v25 = vld [vmem:[%s4730_s1 + $0xf0] sm:$0xff] }
  0x12   : > { %v2711_v14 = vld [vmem:[%s3900_s13] sm:$0xf]  ;;  %v3579_v15 = vld [vmem:[%s3900_s13 + $0x20] sm:$0xf0]  ;;  %v3144_v20 = vor.u32 %v3687_v13, %v3143_v12  ;;  %v3733_v26 = vld [vmem:[%s4730_s1 + $0x70] sm:$0xff] }
  0x13   : > { %v2712_v21 = vor.u32 %v3579_v15, %v2711_v14  ;;  %v3757_v27 = vld [vmem:[%s4730_s1 + $0x130] sm:$0xff]  ;;  %v3748_v29 = vld [vmem:[%s4730_s1 + $0xe8] sm:$0xff]  ;;  %v3739_v33 = vld [vmem:[%s4730_s1 + $0xa0] sm:$0xff] }
  0x14   : > { %3797 = vmatpush.bf16.msra.mxu1 %v3724_v2  ;;  %3798 = vmatpush.bf16.msra.mxu2 %v3724_v2  ;;  %v3732_v30 = vld [vmem:[%s4730_s1 + $0x68] sm:$0xff]  ;;  %v3747_v34 = vld [vmem:[%s4730_s1 + $0xe0] sm:$0xff]  ;;  %v3738_v44 = vld [vmem:[%s4730_s1 + $0x98] sm:$0xff] }
  0x15   : > { %3799 = vmatpush.bf16.msra.mxu3 %v3724_v2  ;;  %1709 = vmatpush.bf16.msra.mxu0 %v3724_v2  ;;  %v3756_v31 = vld [vmem:[%s4730_s1 + $0x128] sm:$0xff]  ;;  %v3731_v42 = vld [vmem:[%s4730_s1 + $0x60] sm:$0xff]  ;;  %v3746_v45 = vld [vmem:[%s4730_s1 + $0xd8] sm:$0xff] }
  0x16   : > { %v2891_v32 = vld [vmem:[%s3900_s13 + $0x168] sm:$0xf]  ;;  %v3624_v35 = vld [vmem:[%s3900_s13 + $0x188] sm:$0xf0]  ;;  %v3755_v43 = vld [vmem:[%s4730_s1 + $0x120] sm:$0xff] }
  0x17   : > { %v3035_v36 = vld [vmem:[%s3900_s13 + $0x288] sm:$0xf]  ;;  %v3660_v37 = vld [vmem:[%s3900_s13 + $0x2a8] sm:$0xf0]  ;;  %v2892_v46 = vor.u32 %v3624_v35, %v2891_v32  ;;  %v3730_v50 = vld [vmem:[%s4730_s1 + $0x58] sm:$0xff] }
  0x18   : > { %3800 = vmatpush.bf16.msra.mxu1 %v3723_v3  ;;  %3801 = vmatpush.bf16.msra.mxu2 %v3723_v3  ;;  %v3179_v38 = vld [vmem:[%s3900_s13 + $0x3a8] sm:$0xf]  ;;  %v3696_v39 = vld [vmem:[%s3900_s13 + $0x3c8] sm:$0xf0]  ;;  %v3036_v47 = vor.u32 %v3660_v37, %v3035_v36  ;;  %v3754_v51 = vld [vmem:[%s4730_s1 + $0x118] sm:$0xff] }
  0x19   : > { %3802 = vmatpush.bf16.msra.mxu3 %v3723_v3  ;;  %1710 = vmatpush.bf16.msra.mxu0 %v3723_v3  ;;  %v2747_v40 = vld [vmem:[%s3900_s13 + $0x48] sm:$0xf]  ;;  %v3588_v41 = vld [vmem:[%s3900_s13 + $0x68] sm:$0xf0]  ;;  %v3180_v48 = vor.u32 %v3696_v39, %v3179_v38  ;;  %v3737_v52 = vld [vmem:[%s4730_s1 + $0x90] sm:$0xff] }
  0x1a   : > { %v2748_v49 = vor.u32 %v3588_v41, %v2747_v40  ;;  %v3745_v53 = vld [vmem:[%s4730_s1 + $0xd0] sm:$0xff]  ;;  %v3736_v56 = vld [vmem:[%s4730_s1 + $0x88] sm:$0xff]  ;;  %v3735_v61 = vld [vmem:[%s4730_s1 + $0x80] sm:$0xff] }
  0x1b   : > { %v3729_v54 = vld [vmem:[%s4730_s1 + $0x50] sm:$0xff]  ;;  %v3744_v57 = vld [vmem:[%s4730_s1 + $0xc8] sm:$0xff]  ;;  %v3743_v62 = vld [vmem:[%s4730_s1 + $0xc0] sm:$0xff] }
  0x1c   : > { %3803 = vmatpush.bf16.msra.mxu1 %v3722_v4  ;;  %3804 = vmatpush.bf16.msra.mxu2 %v3722_v4  ;;  %v3753_v55 = vld [vmem:[%s4730_s1 + $0x110] sm:$0xff]  ;;  %v3728_v58 = vld [vmem:[%s4730_s1 + $0x48] sm:$0xff]  ;;  %v3774_v12 = vld [vmem:[%s4730_s1 + $0x1b8] sm:$0xff] }
  0x1d   : > { %3805 = vmatpush.bf16.msra.mxu3 %v3722_v4  ;;  %1711 = vmatpush.bf16.msra.mxu0 %v3722_v4  ;;  %v3752_v59 = vld [vmem:[%s4730_s1 + $0x108] sm:$0xff]  ;;  %v2927_v60 = vld [vmem:[%s3900_s13 + $0x1b0] sm:$0xf]  ;;  %v3633_v63 = vld [vmem:[%s3900_s13 + $0x1d0] sm:$0xf0] }
  0x1e   : > { %v3071_v0 = vld [vmem:[%s3900_s13 + $0x2d0] sm:$0xf]  ;;  %v3669_v1 = vld [vmem:[%s3900_s13 + $0x2f0] sm:$0xf0]  ;;  %v2928_v8 = vor.u32 %v3633_v63, %v2927_v60  ;;  %v3782_v13 = vld [vmem:[%s4730_s1 + $0x1f8] sm:$0xff] }
  0x1f   : > { %v3215_v2 = vld [vmem:[%s3900_s13 + $0x3f0] sm:$0xf]  ;;  %v3705_v3 = vld [vmem:[%s3900_s13 + $0x410] sm:$0xf0]  ;;  %v3072_v9 = vor.u32 %v3669_v1, %v3071_v0  ;;  %v3766_v14 = vld [vmem:[%s4730_s1 + $0x178] sm:$0xff] }
  0x20   : > { %3806 = vmatpush.bf16.msra.mxu1 %v3721_v5  ;;  %3807 = vmatpush.bf16.msra.mxu2 %v3721_v5  ;;  %v2783_v4 = vld [vmem:[%s3900_s13 + $0x90] sm:$0xf]  ;;  %v3216_v10 = vor.u32 %v3705_v3, %v3215_v2  ;;  %v3790_v15 = vld [vmem:[%s4730_s1 + $0x238] sm:$0xff]  ;;  %v3576_v32 = vld [vmem:[%s3900_s13 + $0xc] sm:$0xf] }
  0x21   : > { %3808 = vmatpush.bf16.msra.mxu3 %v3721_v5  ;;  %1712 = vmatpush.bf16.msra.mxu0 %v3721_v5  ;;  %v3597_v5 = vld [vmem:[%s3900_s13 + $0xb0] sm:$0xf0]  ;;  %v3594_v60 = vld [vmem:[%s3900_s13 + $0x9c] sm:$0xf]  ;;  %v3599_v63 = vld [vmem:[%s3900_s13 + $0xc0] sm:$0xf0] }
  0x22   : > { %v2784_v11 = vor.u32 %v3597_v5, %v2783_v4  ;;  %v3581_v35 = vld [vmem:[%s3900_s13 + $0x30] sm:$0xf0]  ;;  %v3772_v4 = vld [vmem:[%s4730_s1 + $0x1a8] sm:$0xff] }
  0x23   : > { %v3773_v40 = vld [vmem:[%s4730_s1 + $0x1b0] sm:$0xff]  ;;  %v3780_v5 = vld [vmem:[%s4730_s1 + $0x1e8] sm:$0xff] }
  0x24   : > { %3809 = vmatpush.bf16.msra.mxu1 %v3720_v6  ;;  %3810 = vmatpush.bf16.msra.mxu2 %v3720_v6  ;;  %v3781_v41 = vld [vmem:[%s4730_s1 + $0x1f0] sm:$0xff] }
  0x25   : > { %3811 = vmatpush.bf16.msra.mxu3 %v3720_v6  ;;  %1713 = vmatpush.bf16.msra.mxu0 %v3720_v6  ;;  %v3727_v6 = vld [vmem:[%s4730_s1 + $0x40] sm:$0xff] }
  0x28   : > { %3812 = vmatpush.bf16.msra.mxu1 %v3719_v7  ;;  %3813 = vmatpush.bf16.msra.mxu2 %v3719_v7 }
  0x29   : > { %3814 = vmatpush.bf16.msra.mxu3 %v3719_v7  ;;  %1714 = vmatpush.bf16.msra.mxu0 %v3719_v7  ;;  %v3751_v7 = vld [vmem:[%s4730_s1 + $0x100] sm:$0xff] }
  0x2b   : > { %1735 = vmatmul.bf16.vlgmr.msra.gmra.mxu1 %v2856_v18  ;;  %1755 = vmatmul.bf16.vlgmr.msra.gmra.mxu2 %v3000_v19  ;;  %v3107_v18 = vld [vmem:[%s3900_s13 + $0x318] sm:$0xf]  ;;  %v3678_v19 = vld [vmem:[%s3900_s13 + $0x338] sm:$0xf0] }
  0x2c   : > { %1885 = vmatpush.bf16.msrb.mxu2 %v3742_v16  ;;  %1775 = vmatmul.bf16.vlgmr.msra.gmra.mxu3 %v3144_v20  ;;  %v2963_v16 = vld [vmem:[%s3900_s13 + $0x1f8] sm:$0xf] }
  0x2d   : > { %1974 = vmatpush.bf16.msrb.mxu3 %v3750_v17  ;;  %1715 = vmatmul.bf16.vlgmr.msra.gmra.mxu0 %v2712_v21  ;;  %v3642_v17 = vld [vmem:[%s3900_s13 + $0x218] sm:$0xf0]  ;;  %v3251_v20 = vld [vmem:[%s3900_s13 + $0x438] sm:$0xf] }
  0x2e   : > { %1796 = vmatpush.bf16.msrb.mxu1 %v3734_v22  ;;  %2063 = vmatpush.bf16.msrb.mxu0 %v3758_v23  ;;  %v3714_v21 = vld [vmem:[%s3900_s13 + $0x458] sm:$0xf0]  ;;  %v2819_v22 = vld [vmem:[%s3900_s13 + $0xd8] sm:$0xf] }
  0x2f   : > { %v3606_v23 = vld [vmem:[%s3900_s13 + $0xf8] sm:$0xf0] }
  0x30   : > { %1886 = vmatpush.bf16.msrb.mxu2 %v3741_v24  ;;  %v2964_v24 = vor.u32 %v3642_v17, %v2963_v16 }
  0x31   : > { %1975 = vmatpush.bf16.msrb.mxu3 %v3749_v25  ;;  %v3108_v25 = vor.u32 %v3678_v19, %v3107_v18 }
  0x32   : > { %1797 = vmatpush.bf16.msrb.mxu1 %v3733_v26  ;;  %2064 = vmatpush.bf16.msrb.mxu0 %v3757_v27  ;;  %v3252_v26 = vor.u32 %v3714_v21, %v3251_v20  ;;  %v2820_v27 = vor.u32 %v3606_v23, %v2819_v22  ;;  %v4104_v20 = vld [vmem:[%s4731_s2] ss:$0 sm:$0xff]  ;;  %v3611_v21 = vld [vmem:[%s3900_s13 + $0x124] sm:$0xf]  ;;  %v2857_v22 = vld [vmem:[%s3900_s13 + $0x144] sm:$0xf0] }
  0x33   : > { %v2863_v23 = vld [vmem:[%s3900_s13 + $0x128] sm:$0xf] }
  0x34   : > { %1887 = vmatpush.bf16.msrb.mxu2 %v3740_v28  ;;  %v3575_v28 = vld [vmem:[%s3900_s13 + $0x4] sm:$0xf] }
  0x35   : > { %1976 = vmatpush.bf16.msrb.mxu3 %v3748_v29  ;;  %v2713_v29 = vld [vmem:[%s3900_s13 + $0x24] sm:$0xf0] }
  0x36   : > { %1798 = vmatpush.bf16.msrb.mxu1 %v3732_v30  ;;  %2065 = vmatpush.bf16.msrb.mxu0 %v3756_v31  ;;  %v2719_v30 = vld [vmem:[%s3900_s13 + $0x8] sm:$0xf]  ;;  %v3580_v31 = vld [vmem:[%s3900_s13 + $0x28] sm:$0xf0]  ;;  %v2716_v36 = vor.u32 %v3575_v28, %v2713_v29  ;;  %v3617_v28 = vld [vmem:[%s3900_s13 + $0x150] sm:$0xf0]  ;;  %v2860_v29 = vor.u32 %v3611_v21, %v2857_v22 }
  0x37   : > { %v2720_v37 = vor.u32 %v3580_v31, %v2719_v30 }
  0x38   : > { %1888 = vmatpush.bf16.msrb.mxu2 %v3739_v33  ;;  %v2721_v33 = vld [vmem:[%s3900_s13 + $0x2c] sm:$0xf0] }
  0x39   : > { %1977 = vmatpush.bf16.msrb.mxu3 %v3747_v34  ;;  %v2727_v34 = vld [vmem:[%s3900_s13 + $0x10] sm:$0xf]  ;;  %v2724_v38 = vor.u32 %v3576_v32, %v2721_v33 }
  0x3a   : > { %1799 = vmatpush.bf16.msrb.mxu1 %v3731_v42  ;;  %2066 = vmatpush.bf16.msrb.mxu0 %v3755_v43  ;;  %v2728_v39 = vor.u32 %v3581_v35, %v2727_v34  ;;  %v3765_v42 = vld [vmem:[%s4730_s1 + $0x170] sm:$0xff] }
  0x3b   : > { %1740 = vmatmul.bf16.gmra.mxu1 %v2892_v46  ;;  %1760 = vmatmul.bf16.gmra.mxu2 %v3036_v47  ;;  %v3789_v43 = vld [vmem:[%s4730_s1 + $0x230] sm:$0xff] }
  0x3c   : > { %1889 = vmatpush.bf16.msrb.mxu2 %v3738_v44  ;;  %1780 = vmatmul.bf16.gmra.mxu3 %v3180_v48  ;;  %v3584_v44 = vld [vmem:[%s3900_s13 + $0x4c] sm:$0xf]  ;;  %v2755_v46 = vld [vmem:[%s3900_s13 + $0x50] sm:$0xf]  ;;  %v3589_v47 = vld [vmem:[%s3900_s13 + $0x70] sm:$0xf0] }
  0x3d   : > { %1978 = vmatpush.bf16.msrb.mxu3 %v3746_v45  ;;  %1720 = vmatmul.bf16.gmra.mxu0 %v2748_v49  ;;  %v2749_v45 = vld [vmem:[%s3900_s13 + $0x6c] sm:$0xf0]  ;;  %v3585_v48 = vld [vmem:[%s3900_s13 + $0x54] sm:$0xf]  ;;  %v2757_v49 = vld [vmem:[%s3900_s13 + $0x74] sm:$0xf0] }
  0x3e   : > { %1800 = vmatpush.bf16.msrb.mxu1 %v3730_v50  ;;  %2067 = vmatpush.bf16.msrb.mxu0 %v3754_v51  ;;  %v2763_v50 = vld [vmem:[%s3900_s13 + $0x58] sm:$0xf]  ;;  %v3590_v51 = vld [vmem:[%s3900_s13 + $0x78] sm:$0xf0] }
  0x40   : > { %1890 = vmatpush.bf16.msrb.mxu2 %v3737_v52  ;;  %v2752_v52 = vor.u32 %v3584_v44, %v2749_v45 }
  0x41   : > { %1979 = vmatpush.bf16.msrb.mxu3 %v3745_v53  ;;  %v2756_v53 = vor.u32 %v3589_v47, %v2755_v46  ;;  %v3787_v46 = vld [vmem:[%s4730_s1 + $0x220] sm:$0xff]  ;;  %v3620_v47 = vld [vmem:[%s3900_s13 + $0x16c] sm:$0xf] }
  0x42   : > { %1801 = vmatpush.bf16.msrb.mxu1 %v3729_v54  ;;  %2068 = vmatpush.bf16.msrb.mxu0 %v3753_v55  ;;  %v2760_v54 = vor.u32 %v3585_v48, %v2757_v49  ;;  %v2764_v55 = vor.u32 %v3590_v51, %v2763_v50  ;;  %v2893_v48 = vld [vmem:[%s3900_s13 + $0x18c] sm:$0xf0]  ;;  %v3625_v50 = vld [vmem:[%s3900_s13 + $0x190] sm:$0xf0] }
  0x43   : > { %v2899_v49 = vld [vmem:[%s3900_s13 + $0x170] sm:$0xf]  ;;  %v3621_v51 = vld [vmem:[%s3900_s13 + $0x174] sm:$0xf] }
  0x44   : > { %1891 = vmatpush.bf16.msrb.mxu2 %v3736_v56  ;;  %v3593_v56 = vld [vmem:[%s3900_s13 + $0x94] sm:$0xf] }
  0x45   : > { %1980 = vmatpush.bf16.msrb.mxu3 %v3744_v57  ;;  %v2785_v57 = vld [vmem:[%s3900_s13 + $0xb4] sm:$0xf0] }
  0x46   : > { %1802 = vmatpush.bf16.msrb.mxu1 %v3728_v58  ;;  %2069 = vmatpush.bf16.msrb.mxu0 %v3752_v59  ;;  %v2791_v58 = vld [vmem:[%s3900_s13 + $0x98] sm:$0xf]  ;;  %v3598_v59 = vld [vmem:[%s3900_s13 + $0xb8] sm:$0xf0]  ;;  %v2788_v0 = vor.u32 %v3593_v56, %v2785_v57 }
  0x47   : > { %v2792_v1 = vor.u32 %v3598_v59, %v2791_v58  ;;  %v2896_v58 = vor.u32 %v3620_v47, %v2893_v48  ;;  %v2900_v59 = vor.u32 %v3625_v50, %v2899_v49  ;;  %v2965_v47 = vld [vmem:[%s3900_s13 + $0x21c] sm:$0xf0]  ;;  %v3643_v49 = vld [vmem:[%s3900_s13 + $0x220] sm:$0xf0] }
  0x48   : > { %1892 = vmatpush.bf16.msrb.mxu2 %v3735_v61  ;;  %v2793_v61 = vld [vmem:[%s3900_s13 + $0xbc] sm:$0xf0]  ;;  %v3639_v50 = vld [vmem:[%s3900_s13 + $0x204] sm:$0xf] }
  0x49   : > { %1981 = vmatpush.bf16.msrb.mxu3 %v3743_v62  ;;  %v2799_v62 = vld [vmem:[%s3900_s13 + $0xa0] sm:$0xf]  ;;  %v2796_v2 = vor.u32 %v3594_v60, %v2793_v61 }
  0x4a   : > { %1803 = vmatpush.bf16.msrb.mxu1 %v3727_v6  ;;  %2070 = vmatpush.bf16.msrb.mxu0 %v3751_v7  ;;  %v2800_v3 = vor.u32 %v3599_v63, %v2799_v62  ;;  %v3764_v6 = vld [vmem:[%s4730_s1 + $0x168] sm:$0xff]  ;;  %v2971_v48 = vld [vmem:[%s3900_s13 + $0x200] sm:$0xf] }
  0x4b   : > { %1745 = vmatmul.bf16.gmra.mxu1 %v2928_v8  ;;  %1765 = vmatmul.bf16.gmra.mxu2 %v3072_v9  ;;  %v3788_v7 = vld [vmem:[%s4730_s1 + $0x228] sm:$0xff]  ;;  %v3602_v8 = vld [vmem:[%s3900_s13 + $0xdc] sm:$0xf]  ;;  %v2821_v9 = vld [vmem:[%s3900_s13 + $0xfc] sm:$0xf0] }
  0x4c   : > { %1785 = vmatmul.bf16.gmra.mxu3 %v3216_v10  ;;  %2241 = vmatpush.bf16.msra.mxu2 %v3774_v12  ;;  %v2827_v10 = vld [vmem:[%s3900_s13 + $0xe0] sm:$0xf]  ;;  %v3603_v12 = vld [vmem:[%s3900_s13 + $0xe4] sm:$0xf]  ;;  %v2824_v16 = vor.u32 %v3602_v8, %v2821_v9  ;;  %v3629_v9 = vld [vmem:[%s3900_s13 + $0x1b4] sm:$0xf] }
  0x4d   : > { %1725 = vmatmul.bf16.gmra.mxu0 %v2784_v11  ;;  %2330 = vmatpush.bf16.msra.mxu3 %v3782_v13  ;;  %v3607_v11 = vld [vmem:[%s3900_s13 + $0x100] sm:$0xf0]  ;;  %v2829_v13 = vld [vmem:[%s3900_s13 + $0x104] sm:$0xf0] }
  0x4e   : > { %2152 = vmatpush.bf16.msra.mxu1 %v3766_v14  ;;  %2419 = vmatpush.bf16.msra.mxu0 %v3790_v15  ;;  %v2835_v14 = vld [vmem:[%s3900_s13 + $0xe8] sm:$0xf]  ;;  %v3608_v15 = vld [vmem:[%s3900_s13 + $0x108] sm:$0xf0]  ;;  %v2828_v17 = vor.u32 %v3607_v11, %v2827_v10  ;;  %v2832_v18 = vor.u32 %v3603_v12, %v2829_v13  ;;  %v2929_v10 = vld [vmem:[%s3900_s13 + $0x1d4] sm:$0xf0] }
  0x4f   : > { %v2836_v19 = vor.u32 %v3608_v15, %v2835_v14  ;;  %v2935_v11 = vld [vmem:[%s3900_s13 + $0x1b8] sm:$0xf]  ;;  %v3634_v12 = vld [vmem:[%s3900_s13 + $0x1d8] sm:$0xf0]  ;;  %v2937_v14 = vld [vmem:[%s3900_s13 + $0x1dc] sm:$0xf0]  ;;  %v2932_v21 = vor.u32 %v3629_v9, %v2929_v10 }
  0x50   : > { %2242 = vmatpush.bf16.msra.mxu2 %v3773_v40  ;;  %v3630_v13 = vld [vmem:[%s3900_s13 + $0x1bc] sm:$0xf]  ;;  %v2943_v15 = vld [vmem:[%s3900_s13 + $0x1c0] sm:$0xf]  ;;  %v2936_v22 = vor.u32 %v3634_v12, %v2935_v11 }
  0x51   : > { %2331 = vmatpush.bf16.msra.mxu3 %v3781_v41 }
  0x52   : > { %2153 = vmatpush.bf16.msra.mxu1 %v3765_v42  ;;  %2420 = vmatpush.bf16.msra.mxu0 %v3789_v43  ;;  %v3763_v43 = vld [vmem:[%s4730_s1 + $0x160] sm:$0xff] }
  0x54   : > { %2243 = vmatpush.bf16.msra.mxu2 %v3772_v4 }
  0x55   : > { %2332 = vmatpush.bf16.msra.mxu3 %v3780_v5 }
  0x56   : > { %2154 = vmatpush.bf16.msra.mxu1 %v3764_v6  ;;  %2421 = vmatpush.bf16.msra.mxu0 %v3788_v7 }
  0x5a   : > { %2155 = vmatpush.bf16.msra.mxu1 %v3763_v43  ;;  %2422 = vmatpush.bf16.msra.mxu0 %v3787_v46  ;;  %v3786_v43 = vld [vmem:[%s4730_s1 + $0x218] sm:$0xff] }
  0x5b   : > { %1750 = vmatmul.bf16.gmra.mxu1 %v2964_v24  ;;  %1770 = vmatmul.bf16.gmra.mxu2 %v3108_v25  ;;  %v3616_v24 = vld [vmem:[%s3900_s13 + $0x148] sm:$0xf0]  ;;  %v3638_v46 = vld [vmem:[%s3900_s13 + $0x1fc] sm:$0xf] }
  0x5c   : > { %1790 = vmatmul.bf16.gmra.mxu3 %v3252_v26  ;;  %v3612_v25 = vld [vmem:[%s3900_s13 + $0x12c] sm:$0xf]  ;;  %v2865_v26 = vld [vmem:[%s3900_s13 + $0x14c] sm:$0xf0]  ;;  %v2864_v30 = vor.u32 %v3616_v24, %v2863_v23 }
  0x5d   : > { %1730 = vmatmul.bf16.gmra.mxu0 %v2820_v27  ;;  %v2871_v27 = vld [vmem:[%s3900_s13 + $0x130] sm:$0xf]  ;;  %v2868_v32 = vor.u32 %v3612_v25, %v2865_v26  ;;  %v2940_v25 = vor.u32 %v3630_v13, %v2937_v14 }
  0x5e   : > { %v2872_v33 = vor.u32 %v3617_v28, %v2871_v27  ;;  %2423 = vmatpush.bf16.msra.mxu0 %v3786_v43 }
  0x6b   : > { %1804 = vmatmul.bf16.vlgmr.msrb.gmra.mxu1 %v2716_v36  ;;  %1893 = vmatmul.bf16.vlgmr.msrb.gmra.mxu2 %v2720_v37  ;;  %v3771_v36 = vld [vmem:[%s4730_s1 + $0x1a0] sm:$0xff] }
  0x6c   : > { %1982 = vmatmul.bf16.vlgmr.msrb.gmra.mxu3 %v2724_v38  ;;  %v3779_v37 = vld [vmem:[%s4730_s1 + $0x1e0] sm:$0xff]  ;;  %2244 = vmatpush.bf16.msra.mxu2 %v3771_v36 }
  0x6d   : > { %2071 = vmatmul.bf16.vlgmr.msrb.gmra.mxu0 %v2728_v39  ;;  %2333 = vmatpush.bf16.msra.mxu3 %v3779_v37 }
  0x7b   : > { %1809 = vmatmul.bf16.gmra.mxu1 %v2752_v52  ;;  %1898 = vmatmul.bf16.gmra.mxu2 %v2756_v53  ;;  %v2901_v52 = vld [vmem:[%s3900_s13 + $0x194] sm:$0xf0] }
  0x7c   : > { %1987 = vmatmul.bf16.gmra.mxu3 %v2760_v54  ;;  %v2907_v53 = vld [vmem:[%s3900_s13 + $0x178] sm:$0xf]  ;;  %v3626_v54 = vld [vmem:[%s3900_s13 + $0x198] sm:$0xf0]  ;;  %v2904_v62 = vor.u32 %v3621_v51, %v2901_v52  ;;  %v2973_v51 = vld [vmem:[%s3900_s13 + $0x224] sm:$0xf0] }
  0x7d   : > { %2076 = vmatmul.bf16.gmra.mxu0 %v2764_v55  ;;  %v2908_v63 = vor.u32 %v3626_v54, %v2907_v53  ;;  %v2979_v52 = vld [vmem:[%s3900_s13 + $0x208] sm:$0xf]  ;;  %v3644_v53 = vld [vmem:[%s3900_s13 + $0x228] sm:$0xf0] }
  0x8b   : > { %1814 = vmatmul.bf16.gmra.mxu1 %v2788_v0  ;;  %1903 = vmatmul.bf16.gmra.mxu2 %v2792_v1 }
  0x8c   : > { %1992 = vmatmul.bf16.gmra.mxu3 %v2796_v2 }
  0x8d   : > { %2081 = vmatmul.bf16.gmra.mxu0 %v2800_v3 }
  0x9b   : > { %1819 = vmatmul.bf16.gmra.mxu1 %v2824_v16  ;;  %1908 = vmatmul.bf16.gmra.mxu2 %v2828_v17  ;;  %v3635_v16 = vld [vmem:[%s3900_s13 + $0x1e0] sm:$0xf0] }
  0x9c   : > { %1997 = vmatmul.bf16.gmra.mxu3 %v2832_v18  ;;  %v2944_v26 = vor.u32 %v3635_v16, %v2943_v15  ;;  %v3647_v16 = vld [vmem:[%s3900_s13 + $0x244] sm:$0xf] }
  0x9d   : > { %2086 = vmatmul.bf16.gmra.mxu0 %v2836_v19 }
  0xa8   : > { %v1736_v31 = vpop.f32.mrf.mxu1 }
  0xa9   : > { %v4115_v34 = vadd.f32 %v4104_v20, %v1736_v31 }
  0xaa   : > { %v4117_v35 = vpop.f32.mrf.mxu0 }
  0xab   : > { %1824 = vmatmul.bf16.gmra.mxu1 %v2860_v29  ;;  %1913 = vmatmul.bf16.gmra.mxu2 %v2864_v30  ;;  %v3770_v29 = vld [vmem:[%s4730_s1 + $0x198] sm:$0xff] }
  0xac   : > { %2002 = vmatmul.bf16.gmra.mxu3 %v2868_v32  ;;  %v3778_v30 = vld [vmem:[%s4730_s1 + $0x1d8] sm:$0xff]  ;;  %2245 = vmatpush.bf16.msra.mxu2 %v3770_v29 }
  0xad   : > { %2091 = vmatmul.bf16.gmra.mxu0 %v2872_v33  ;;  %2334 = vmatpush.bf16.msra.mxu3 %v3778_v30  ;;  %v1717_v30 = vadd.f32 %v4104_v20, %v4117_v35  ;;  %v3769_v35 = vld [vmem:[%s4730_s1 + $0x190] sm:$0xff] }
  0xae   : > { %v1756_v38 = vpop.f32.mrf.mxu2 }
  0xaf   : > { %v4126_v39 = vadd.f32 %v4104_v20, %v1756_v38  ;;  %v1776_v40 = vpop.f32.mrf.mxu3 }
  0xb0   : > { %v4129_v41 = vadd.f32 %v4104_v20, %v1776_v40  ;;  %v1738_v42 = vpop.f32.mrf.mxu1  ;;  %2246 = vmatpush.bf16.msra.mxu2 %v3769_v35 }
  0xb1   : > { %v4135_v44 = vadd.f32 %v4104_v20, %v1738_v42  ;;  %v3762_v42 = vld [vmem:[%s4730_s1 + $0x158] sm:$0xff] }
  0xb2   : > { %v4137_v45 = vpop.f32.mrf.mxu0  ;;  %2156 = vmatpush.bf16.msra.mxu1 %v3762_v42 }
  0xb6   : > { %v1758_v55 = vpop.f32.mrf.mxu2 }
  0xb7   : > { %v4151_v56 = vadd.f32 %v4104_v20, %v1758_v55  ;;  %v1778_v57 = vpop.f32.mrf.mxu3 }
  0xb8   : > { %v4154_v60 = vadd.f32 %v4104_v20, %v1778_v57  ;;  %v1741_v61 = vpop.f32.mrf.mxu1 }
  0xb9   : > { %v4157_v0 = vadd.f32 %v4104_v20, %v1741_v61 }
  0xba   : > { %v4159_v1 = vpop.f32.mrf.mxu0 }
  0xbb   : > { %1829 = vmatmul.bf16.gmra.mxu1 %v2896_v58  ;;  %1918 = vmatmul.bf16.gmra.mxu2 %v2900_v59  ;;  %v2968_v58 = vor.u32 %v3638_v46, %v2965_v47  ;;  %v2972_v59 = vor.u32 %v3643_v49, %v2971_v48 }
  0xbc   : > { %2007 = vmatmul.bf16.gmra.mxu3 %v2904_v62 }
  0xbd   : > { %2096 = vmatmul.bf16.gmra.mxu0 %v2908_v63  ;;  %v2976_v63 = vor.u32 %v3639_v50, %v2973_v51  ;;  %v3777_v51 = vld [vmem:[%s4730_s1 + $0x1d0] sm:$0xff] }
  0xbe   : > { %v1761_v2 = vpop.f32.mrf.mxu2  ;;  %2335 = vmatpush.bf16.msra.mxu3 %v3777_v51 }
  0xbf   : > { %v4162_v3 = vadd.f32 %v4104_v20, %v1761_v2  ;;  %v1781_v4 = vpop.f32.mrf.mxu3  ;;  %v2980_v2 = vor.u32 %v3644_v53, %v2979_v52  ;;  %v1719_v53 = vadd.f32 %v4104_v20, %v4137_v45  ;;  %v3037_v45 = vld [vmem:[%s3900_s13 + $0x2ac] sm:$0xf0] }
  0xc0   : > { %v4165_v5 = vadd.f32 %v4104_v20, %v1781_v4  ;;  %v1743_v6 = vpop.f32.mrf.mxu1 }
  0xc1   : > { %v4168_v7 = vadd.f32 %v4104_v20, %v1743_v6 }
  0xc2   : > { %v4170_v8 = vpop.f32.mrf.mxu0 }
  0xc3   : > { %v1724_v51 = vadd.f32 %v4104_v20, %v4170_v8 }
  0xc6   : > { %v1763_v17 = vpop.f32.mrf.mxu2 }
  0xc7   : > { %v4181_v18 = vadd.f32 %v4104_v20, %v1763_v17  ;;  %v1783_v19 = vpop.f32.mrf.mxu3  ;;  %v3001_v17 = vld [vmem:[%s3900_s13 + $0x264] sm:$0xf0] }
  0xc8   : > { %v4184_v23 = vadd.f32 %v4104_v20, %v1783_v19  ;;  %v1746_v24 = vpop.f32.mrf.mxu1  ;;  %v3007_v19 = vld [vmem:[%s3900_s13 + $0x248] sm:$0xf] }
  0xc9   : > { %v4187_v27 = vadd.f32 %v4104_v20, %v1746_v24  ;;  %v3009_v24 = vld [vmem:[%s3900_s13 + $0x26c] sm:$0xf0] }
  0xca   : > { %v4189_v28 = vpop.f32.mrf.mxu0 }
  0xcb   : > { %1834 = vmatmul.bf16.gmra.mxu1 %v2932_v21  ;;  %1923 = vmatmul.bf16.gmra.mxu2 %v2936_v22  ;;  %v3652_v21 = vld [vmem:[%s3900_s13 + $0x268] sm:$0xf0]  ;;  %v1727_v8 = vadd.f32 %v4104_v20, %v4189_v28 }
  0xcc   : > { %2012 = vmatmul.bf16.gmra.mxu3 %v2940_v25  ;;  %v3648_v22 = vld [vmem:[%s3900_s13 + $0x24c] sm:$0xf]  ;;  %v3015_v25 = vld [vmem:[%s3900_s13 + $0x250] sm:$0xf]  ;;  %v3008_v42 = vor.u32 %v3652_v21, %v3007_v19  ;;  %v3657_v19 = vld [vmem:[%s3900_s13 + $0x294] sm:$0xf] }
  0xcd   : > { %2101 = vmatmul.bf16.gmra.mxu0 %v2944_v26  ;;  %v3653_v26 = vld [vmem:[%s3900_s13 + $0x270] sm:$0xf0]  ;;  %v3012_v47 = vor.u32 %v3648_v22, %v3009_v24  ;;  %v3045_v21 = vld [vmem:[%s3900_s13 + $0x2b4] sm:$0xf0]  ;;  %v3662_v24 = vld [vmem:[%s3900_s13 + $0x2b8] sm:$0xf0] }
  0xce   : > { %v1766_v31 = vpop.f32.mrf.mxu2  ;;  %v3016_v48 = vor.u32 %v3653_v26, %v3015_v25  ;;  %v3051_v22 = vld [vmem:[%s3900_s13 + $0x298] sm:$0xf]  ;;  %v1722_v26 = vadd.f32 %v4104_v20, %v4159_v1  ;;  %v3768_v28 = vld [vmem:[%s4730_s1 + $0x188] sm:$0xff] }
  0xcf   : > { %v4198_v32 = vadd.f32 %v4104_v20, %v1766_v31  ;;  %v1786_v33 = vpop.f32.mrf.mxu3  ;;  %2247 = vmatpush.bf16.msra.mxu2 %v3768_v28 }
  0xd0   : > { %v4201_v36 = vadd.f32 %v4104_v20, %v1786_v33  ;;  %v1748_v37 = vpop.f32.mrf.mxu1 }
  0xd1   : > { %v4204_v38 = vadd.f32 %v4104_v20, %v1748_v37  ;;  %v3004_v37 = vor.u32 %v3647_v16, %v3001_v17  ;;  %v3043_v16 = vld [vmem:[%s3900_s13 + $0x290] sm:$0xf]  ;;  %v3661_v17 = vld [vmem:[%s3900_s13 + $0x2b0] sm:$0xf0] }
  0xd2   : > { %v4206_v40 = vpop.f32.mrf.mxu0 }
  0xd6   : > { %v1768_v54 = vpop.f32.mrf.mxu2 }
  0xd7   : > { %v4223_v55 = vadd.f32 %v4104_v20, %v1768_v54  ;;  %v1788_v57 = vpop.f32.mrf.mxu3 }
  0xd8   : > { %v4226_v61 = vadd.f32 %v4104_v20, %v1788_v57  ;;  %v1751_v62 = vpop.f32.mrf.mxu1 }
  0xd9   : > { %v4229_v4 = vadd.f32 %v4104_v20, %v1751_v62 }
  0xda   : > { %v4231_v6 = vpop.f32.mrf.mxu0 }
  0xdb   : > { %1839 = vmatmul.bf16.gmra.mxu1 %v2968_v58  ;;  %1928 = vmatmul.bf16.gmra.mxu2 %v2972_v59 }
  0xdc   : > { %2017 = vmatmul.bf16.gmra.mxu3 %v2976_v63 }
  0xdd   : > { %2106 = vmatmul.bf16.gmra.mxu0 %v2980_v2  ;;  %v3761_v2 = vld [vmem:[%s4730_s1 + $0x150] sm:$0xff] }
  0xde   : > { %v1771_v9 = vpop.f32.mrf.mxu2  ;;  %2157 = vmatpush.bf16.msra.mxu1 %v3761_v2  ;;  %v3073_v2 = vld [vmem:[%s3900_s13 + $0x2f4] sm:$0xf0] }
  0xdf   : > { %v4234_v10 = vadd.f32 %v4104_v20, %v1771_v9  ;;  %v1791_v11 = vpop.f32.mrf.mxu3  ;;  %v3785_v9 = vld [vmem:[%s4730_s1 + $0x210] sm:$0xff] }
  0xe0   : > { %v4237_v12 = vadd.f32 %v4104_v20, %v1791_v11  ;;  %v1753_v13 = vpop.f32.mrf.mxu1  ;;  %v3656_v11 = vld [vmem:[%s3900_s13 + $0x28c] sm:$0xf]  ;;  %2424 = vmatpush.bf16.msra.mxu0 %v3785_v9  ;;  %v3079_v9 = vld [vmem:[%s3900_s13 + $0x2d8] sm:$0xf] }
  0xe1   : > { %v4240_v14 = vadd.f32 %v4104_v20, %v1753_v13 }
  0xe2   : > { %v4242_v15 = vpop.f32.mrf.mxu0 }
  0xe6   : > { %v1773_v29 = vpop.f32.mrf.mxu2 }
  0xe7   : > { %v4255_v31 = vadd.f32 %v4104_v20, %v1773_v29  ;;  %v1793_v33 = vpop.f32.mrf.mxu3 }
  0xe8   : > { %v4258_v43 = vadd.f32 %v4104_v20, %v1793_v33  ;;  %v1805_v46 = vpop.f32.mrf.mxu1  ;;  %v3040_v33 = vor.u32 %v3656_v11, %v3037_v45  ;;  %v3670_v11 = vld [vmem:[%s3900_s13 + $0x2f8] sm:$0xf0] }
  0xe9   : > { %v1806_v49 = vadd.f32 %v1805_v46, %v1717_v30  ;;  %v3048_v46 = vor.u32 %v3657_v19, %v3045_v21  ;;  %v3666_v45 = vld [vmem:[%s3900_s13 + $0x2dc] sm:$0xf]  ;;  %v3671_v19 = vld [vmem:[%s3900_s13 + $0x300] sm:$0xf0] }
  0xea   : > { %v2072_v50 = vpop.f32.mrf.mxu0 }
  0xeb   : > { %1844 = vmatmul.bf16.gmra.mxu1 %v3004_v37  ;;  %1933 = vmatmul.bf16.gmra.mxu2 %v3008_v42  ;;  %v3044_v37 = vor.u32 %v3661_v17, %v3043_v16  ;;  %v3081_v16 = vld [vmem:[%s3900_s13 + $0x2fc] sm:$0xf0] }
  0xec   : > { %2022 = vmatmul.bf16.gmra.mxu3 %v3012_v47  ;;  %v3052_v47 = vor.u32 %v3662_v24, %v3051_v22  ;;  %v3087_v17 = vld [vmem:[%s3900_s13 + $0x2e0] sm:$0xf] }
  0xed   : > { %2111 = vmatmul.bf16.gmra.mxu0 %v3016_v48 }
  0xee   : > { %v1894_v52 = vpop.f32.mrf.mxu2 }
  0xef   : > { %v1895_v54 = vadd.f32 %v1894_v52, %v1806_v49  ;;  %v1983_v57 = vpop.f32.mrf.mxu3 }
  0xf0   : > { %v1807_v58 = vpop.f32.mrf.mxu1 }
  0xf1   : > { %v1984_v59 = vadd.f32 %v1983_v57, %v1895_v54  ;;  %v1808_v62 = vadd.f32 %v1807_v58, %v1719_v53 }
  0xf2   : > { %v2074_v63 = vpop.f32.mrf.mxu0 }
  0xf3   : > { %v4276_v13 = vadd.f32 %v2072_v50, %v1984_v59 }
  0xf6   : > { %v1896_v25 = vpop.f32.mrf.mxu2 }
  0xf7   : > { %v1897_v29 = vadd.f32 %v1896_v25, %v1808_v62  ;;  %v1985_v30 = vpop.f32.mrf.mxu3  ;;  %v3665_v62 = vld [vmem:[%s3900_s13 + $0x2d4] sm:$0xf] }
  0xf8   : > { %v1810_v42 = vpop.f32.mrf.mxu1  ;;  %v3076_v25 = vor.u32 %v3665_v62, %v3073_v2  ;;  %v3674_v62 = vld [vmem:[%s3900_s13 + $0x31c] sm:$0xf] }
  0xf9   : > { %v1986_v48 = vadd.f32 %v1985_v30, %v1897_v29  ;;  %v1811_v49 = vadd.f32 %v1810_v42, %v1722_v26  ;;  %v3080_v26 = vor.u32 %v3670_v11, %v3079_v9  ;;  %v3084_v30 = vor.u32 %v3666_v45, %v3081_v16  ;;  %v3115_v9 = vld [vmem:[%s3900_s13 + $0x320] sm:$0xf]  ;;  %v3679_v11 = vld [vmem:[%s3900_s13 + $0x340] sm:$0xf0]  ;;  %v3117_v16 = vld [vmem:[%s3900_s13 + $0x344] sm:$0xf0] }
  0xfa   : > { %v2077_v50 = vpop.f32.mrf.mxu0  ;;  %v3675_v45 = vld [vmem:[%s3900_s13 + $0x324] sm:$0xf] }
  0xfb   : > { %1849 = vmatmul.bf16.gmra.mxu1 %v3040_v33  ;;  %1938 = vmatmul.bf16.gmra.mxu2 %v3044_v37  ;;  %v4286_v35 = vadd.f32 %v2074_v63, %v1986_v48  ;;  %v3088_v33 = vor.u32 %v3671_v19, %v3087_v17  ;;  %v3776_v48 = vld [vmem:[%s4730_s1 + $0x1c8] sm:$0xff] }
  0xfc   : > { %2027 = vmatmul.bf16.gmra.mxu3 %v3048_v46  ;;  %v3123_v17 = vld [vmem:[%s3900_s13 + $0x328] sm:$0xf]  ;;  %v3680_v19 = vld [vmem:[%s3900_s13 + $0x348] sm:$0xf0] }
  0xfd   : > { %2116 = vmatmul.bf16.gmra.mxu0 %v3052_v47  ;;  %2336 = vmatpush.bf16.msra.mxu3 %v3776_v48  ;;  %v1734_v48 = vadd.f32 %v4104_v20, %v4242_v15 }
  0xfe   : > { %v1899_v1 = vpop.f32.mrf.mxu2 }
  0xff   : > { %v1900_v52 = vadd.f32 %v1899_v1, %v1811_v49  ;;  %v1988_v53 = vpop.f32.mrf.mxu3 }
 0x100   : > { %v1812_v54 = vpop.f32.mrf.mxu1 }
 0x101   : > { %v1989_v57 = vadd.f32 %v1988_v53, %v1900_v52  ;;  %v1813_v58 = vadd.f32 %v1812_v54, %v1724_v51 }
 0x102   : > { %v2079_v59 = vpop.f32.mrf.mxu0 }
 0x103   : > { %v4292_v63 = vadd.f32 %v2077_v50, %v1989_v57  ;;  %v1729_v50 = vadd.f32 %v4104_v20, %v4206_v40  ;;  %v3109_v40 = vld [vmem:[%s3900_s13 + $0x33c] sm:$0xf0] }
 0x106   : > { %v1901_v21 = vpop.f32.mrf.mxu2 }
 0x107   : > { %v1902_v22 = vadd.f32 %v1901_v21, %v1813_v58  ;;  %v1990_v24 = vpop.f32.mrf.mxu3  ;;  %v3760_v58 = vld [vmem:[%s4730_s1 + $0x148] sm:$0xff] }
 0x108   : > { %v1815_v29 = vpop.f32.mrf.mxu1  ;;  %2158 = vmatpush.bf16.msra.mxu1 %v3760_v58  ;;  %v3145_v58 = vld [vmem:[%s3900_s13 + $0x384] sm:$0xf0] }
 0x109   : > { %v1991_v37 = vadd.f32 %v1990_v24, %v1902_v22  ;;  %v1816_v42 = vadd.f32 %v1815_v29, %v1727_v8  ;;  %v1732_v8 = vadd.f32 %v4104_v20, %v4231_v6 }
 0x10a   : > { %v2082_v46 = vpop.f32.mrf.mxu0 }
 0x10b   : > { %1854 = vmatmul.bf16.gmra.mxu1 %v3076_v25  ;;  %1943 = vmatmul.bf16.gmra.mxu2 %v3080_v26  ;;  %v4302_v47 = vadd.f32 %v2079_v59, %v1991_v37  ;;  %v3784_v59 = vld [vmem:[%s4730_s1 + $0x208] sm:$0xff]  ;;  %v3112_v25 = vor.u32 %v3674_v62, %v3109_v40  ;;  %v3116_v26 = vor.u32 %v3679_v11, %v3115_v9  ;;  %v3153_v9 = vld [vmem:[%s3900_s13 + $0x38c] sm:$0xf0] }
 0x10c   : > { %2032 = vmatmul.bf16.gmra.mxu3 %v3084_v30  ;;  %2425 = vmatpush.bf16.msra.mxu0 %v3784_v59  ;;  %v3120_v30 = vor.u32 %v3675_v45, %v3117_v16  ;;  %v3151_v59 = vld [vmem:[%s3900_s13 + $0x368] sm:$0xf]  ;;  %v3688_v62 = vld [vmem:[%s3900_s13 + $0x388] sm:$0xf0]  ;;  %v3159_v11 = vld [vmem:[%s3900_s13 + $0x370] sm:$0xf] }
 0x10d   : > { %2121 = vmatmul.bf16.gmra.mxu0 %v3088_v33  ;;  %v3124_v33 = vor.u32 %v3680_v19, %v3123_v17  ;;  %v3684_v40 = vld [vmem:[%s3900_s13 + $0x36c] sm:$0xf]  ;;  %v3689_v45 = vld [vmem:[%s3900_s13 + $0x390] sm:$0xf0]  ;;  %v3152_v15 = vor.u32 %v3688_v62, %v3151_v59  ;;  %v3189_v62 = vld [vmem:[%s3900_s13 + $0x3d4] sm:$0xf0] }
 0x10e   : > { %v1904_v49 = vpop.f32.mrf.mxu2  ;;  %v3693_v59 = vld [vmem:[%s3900_s13 + $0x3b4] sm:$0xf] }
 0x10f   : > { %v1905_v1 = vadd.f32 %v1904_v49, %v1816_v42  ;;  %v1993_v51 = vpop.f32.mrf.mxu3 }
 0x110   : > { %v1817_v52 = vpop.f32.mrf.mxu1 }
 0x111   : > { %v1994_v53 = vadd.f32 %v1993_v51, %v1905_v1  ;;  %v1818_v54 = vadd.f32 %v1817_v52, %v1729_v50 }
 0x112   : > { %v2084_v57 = vpop.f32.mrf.mxu0 }
 0x113   : > { %v4320_v2 = vadd.f32 %v2082_v46, %v1994_v53 }
 0x116   : > { %v1906_v21 = vpop.f32.mrf.mxu2 }
 0x117   : > { %v1907_v22 = vadd.f32 %v1906_v21, %v1818_v54  ;;  %v1995_v24 = vpop.f32.mrf.mxu3  ;;  %v3683_v54 = vld [vmem:[%s3900_s13 + $0x364] sm:$0xf] }
 0x118   : > { %v1820_v29 = vpop.f32.mrf.mxu1  ;;  %v3148_v20 = vor.u32 %v3683_v54, %v3145_v58  ;;  %v3187_v54 = vld [vmem:[%s3900_s13 + $0x3b0] sm:$0xf]  ;;  %v3697_v58 = vld [vmem:[%s3900_s13 + $0x3d0] sm:$0xf0] }
 0x119   : > { %v1996_v37 = vadd.f32 %v1995_v24, %v1907_v22  ;;  %v1821_v42 = vadd.f32 %v1820_v29, %v1732_v8  ;;  %v3156_v8 = vor.u32 %v3684_v40, %v3153_v9  ;;  %v3160_v22 = vor.u32 %v3689_v45, %v3159_v11  ;;  %v3698_v40 = vld [vmem:[%s3900_s13 + $0x3d8] sm:$0xf0] }
 0x11a   : > { %v2087_v46 = vpop.f32.mrf.mxu0 }
 0x11b   : > { %1859 = vmatmul.bf16.gmra.mxu1 %v3112_v25  ;;  %1948 = vmatmul.bf16.gmra.mxu2 %v3116_v26  ;;  %v4330_v28 = vadd.f32 %v2084_v57, %v1996_v37 }
 0x11c   : > { %2037 = vmatmul.bf16.gmra.mxu3 %v3120_v30  ;;  %v3767_v30 = vld [vmem:[%s4730_s1 + $0x180] sm:$0xff] }
 0x11d   : > { %2126 = vmatmul.bf16.gmra.mxu0 %v3124_v33  ;;  %v3775_v33 = vld [vmem:[%s4730_s1 + $0x1c0] sm:$0xff]  ;;  %2248 = vmatpush.bf16.msra.mxu2 %v3767_v30 }
 0x11e   : > { %v1909_v6 = vpop.f32.mrf.mxu2  ;;  %2337 = vmatpush.bf16.msra.mxu3 %v3775_v33 }
 0x11f   : > { %v1910_v49 = vadd.f32 %v1909_v6, %v1821_v42  ;;  %v1998_v50 = vpop.f32.mrf.mxu3 }
 0x120   : > { %v1822_v1 = vpop.f32.mrf.mxu1 }
 0x121   : > { %v1999_v51 = vadd.f32 %v1998_v50, %v1910_v49  ;;  %v1823_v52 = vadd.f32 %v1822_v1, %v1734_v48  ;;  %v3759_v50 = vld [vmem:[%s4730_s1 + $0x140] sm:$0xff] }
 0x122   : > { %v2089_v53 = vpop.f32.mrf.mxu0  ;;  %v3783_v1 = vld [vmem:[%s4730_s1 + $0x200] sm:$0xff]  ;;  %2159 = vmatpush.bf16.msra.mxu1 %v3759_v50  ;;  %v3702_v50 = vld [vmem:[%s3900_s13 + $0x3fc] sm:$0xf] }
 0x123   : > { %v4336_v57 = vadd.f32 %v2087_v46, %v1999_v51  ;;  %v3692_v51 = vld [vmem:[%s3900_s13 + $0x3ac] sm:$0xf]  ;;  %2426 = vmatpush.bf16.msra.mxu0 %v3783_v1  ;;  %v3225_v1 = vld [vmem:[%s3900_s13 + $0x41c] sm:$0xf0] }
 0x126   : > { %v1911_v16 = vpop.f32.mrf.mxu2 }
 0x127   : > { %v1912_v17 = vadd.f32 %v1911_v16, %v1823_v52  ;;  %v2000_v19 = vpop.f32.mrf.mxu3  ;;  %v3181_v52 = vld [vmem:[%s3900_s13 + $0x3cc] sm:$0xf0] }
 0x128   : > { %v1825_v21 = vpop.f32.mrf.mxu1  ;;  %v3184_v16 = vor.u32 %v3692_v51, %v3181_v52  ;;  %v3231_v51 = vld [vmem:[%s3900_s13 + $0x400] sm:$0xf]  ;;  %v3707_v52 = vld [vmem:[%s3900_s13 + $0x420] sm:$0xf0] }
 0x129   : > { %v2001_v24 = vadd.f32 %v2000_v19, %v1912_v17  ;;  %v1826_v25 = vadd.f32 %v1825_v21, %v4115_v34  ;;  %v3188_v17 = vor.u32 %v3697_v58, %v3187_v54 }
 0x12a   : > { %v2092_v26 = vpop.f32.mrf.mxu0 }
 0x12b   : > { %1864 = vmatmul.bf16.gmra.mxu1 %v3148_v20  ;;  %1953 = vmatmul.bf16.gmra.mxu2 %v3152_v15  ;;  %v4345_v29 = vadd.f32 %v2089_v53, %v2001_v24  ;;  %v3192_v20 = vor.u32 %v3693_v59, %v3189_v62 }
 0x12c   : > { %2042 = vmatmul.bf16.gmra.mxu3 %v3156_v8 }
 0x12d   : > { %2131 = vmatmul.bf16.gmra.mxu0 %v3160_v22 }
 0x12e   : > { %v1914_v37 = vpop.f32.mrf.mxu2 }
 0x12f   : > { %v1915_v34 = vadd.f32 %v1914_v37, %v1826_v25  ;;  %v2003_v42 = vpop.f32.mrf.mxu3 }
 0x130   : > { %v1827_v46 = vpop.f32.mrf.mxu1 }
 0x131   : > { %v2004_v6 = vadd.f32 %v2003_v42, %v1915_v34  ;;  %v1828_v48 = vadd.f32 %v1827_v46, %v4135_v44  ;;  %v3195_v44 = vld [vmem:[%s3900_s13 + $0x3b8] sm:$0xf]  ;;  %v3701_v42 = vld [vmem:[%s3900_s13 + $0x3f4] sm:$0xf] }
 0x132   : > { %v2094_v49 = vpop.f32.mrf.mxu0  ;;  %v3196_v15 = vor.u32 %v3698_v40, %v3195_v44  ;;  %v3217_v46 = vld [vmem:[%s3900_s13 + $0x414] sm:$0xf0] }
 0x133   : > { %v4362_v53 = vadd.f32 %v2092_v26, %v2004_v6  ;;  %v3220_v62 = vor.u32 %v3701_v42, %v3217_v46  ;;  %v3267_v42 = vld [vmem:[%s3900_s13 + $0x448] sm:$0xf]  ;;  %v3716_v46 = vld [vmem:[%s3900_s13 + $0x468] sm:$0xf0] }
 0x136   : > { %v1916_v9 = vpop.f32.mrf.mxu2 }
 0x137   : > { %v1917_v11 = vadd.f32 %v1916_v9, %v1828_v48  ;;  %v2005_v45 = vpop.f32.mrf.mxu3  ;;  %v3223_v48 = vld [vmem:[%s3900_s13 + $0x3f8] sm:$0xf]  ;;  %v3228_v9 = vor.u32 %v3702_v50, %v3225_v1 }
 0x138   : > { %v1830_v19 = vpop.f32.mrf.mxu1 }
 0x139   : > { %v2006_v21 = vadd.f32 %v2005_v45, %v1917_v11  ;;  %v1831_v8 = vadd.f32 %v1830_v19, %v4157_v0  ;;  %v3232_v11 = vor.u32 %v3707_v52, %v3231_v51 }
 0x13a   : > { %v2097_v22 = vpop.f32.mrf.mxu0 }
 0x13b   : > { %1869 = vmatmul.bf16.gmra.mxu1 %v3184_v16  ;;  %1958 = vmatmul.bf16.gmra.mxu2 %v3188_v17  ;;  %v4371_v24 = vadd.f32 %v2094_v49, %v2006_v21  ;;  %v3706_v49 = vld [vmem:[%s3900_s13 + $0x418] sm:$0xf0] }
 0x13c   : > { %2047 = vmatmul.bf16.gmra.mxu3 %v3192_v20  ;;  %v3224_v44 = vor.u32 %v3706_v49, %v3223_v48 }
 0x13d   : > { %2136 = vmatmul.bf16.gmra.mxu0 %v3196_v15 }
 0x13e   : > { %v1919_v25 = vpop.f32.mrf.mxu2 }
 0x13f   : > { %v1920_v26 = vadd.f32 %v1919_v25, %v1831_v8  ;;  %v2008_v30 = vpop.f32.mrf.mxu3  ;;  %v3710_v25 = vld [vmem:[%s3900_s13 + $0x43c] sm:$0xf] }
 0x140   : > { %v1832_v33 = vpop.f32.mrf.mxu1 }
 0x141   : > { %v2009_v37 = vadd.f32 %v2008_v30, %v1920_v26  ;;  %v1833_v0 = vadd.f32 %v1832_v33, %v4168_v7  ;;  %v3253_v26 = vld [vmem:[%s3900_s13 + $0x45c] sm:$0xf0] }
 0x142   : > { %v2099_v34 = vpop.f32.mrf.mxu0  ;;  %v3259_v33 = vld [vmem:[%s3900_s13 + $0x440] sm:$0xf]  ;;  %v3256_v1 = vor.u32 %v3710_v25, %v3253_v26  ;;  %v3583_v26 = vld [vmem:[%s3900_s13 + $0x40] sm:$0xf0] }
 0x143   : > { %v4376_v6 = vadd.f32 %v2097_v22, %v2009_v37  ;;  %v3715_v37 = vld [vmem:[%s3900_s13 + $0x460] sm:$0xf0]  ;;  %v2743_v25 = vld [vmem:[%s3900_s13 + $0x20] sm:$0xf] }
 0x144   : > { %v3260_v51 = vor.u32 %v3715_v37, %v3259_v33 }
 0x146   : > { %v1921_v54 = vpop.f32.mrf.mxu2 }
 0x147   : > { %v1922_v58 = vadd.f32 %v1921_v54, %v1833_v0  ;;  %v2010_v59 = vpop.f32.mrf.mxu3  ;;  %v3711_v0 = vld [vmem:[%s3900_s13 + $0x444] sm:$0xf] }
 0x148   : > { %v1835_v40 = vpop.f32.mrf.mxu1 }
 0x149   : > { %v2011_v7 = vadd.f32 %v2010_v59, %v1922_v58  ;;  %v1836_v45 = vadd.f32 %v1835_v40, %v4187_v27  ;;  %v3268_v58 = vor.u32 %v3716_v46, %v3267_v42 }
 0x14a   : > { %v2102_v16 = vpop.f32.mrf.mxu0 }
 0x14b   : > { %1874 = vmatmul.bf16.gmra.mxu1 %v3220_v62  ;;  %1963 = vmatmul.bf16.gmra.mxu2 %v3224_v44  ;;  %v4385_v17 = vadd.f32 %v2099_v34, %v2011_v7  ;;  %v3261_v34 = vld [vmem:[%s3900_s13 + $0x464] sm:$0xf0] }
 0x14c   : > { %2052 = vmatmul.bf16.gmra.mxu3 %v3228_v9  ;;  %v3264_v54 = vor.u32 %v3711_v0, %v3261_v34 }
 0x14d   : > { %2141 = vmatmul.bf16.gmra.mxu0 %v3232_v11 }
 0x14e   : > { %v1924_v19 = vpop.f32.mrf.mxu2 }
 0x14f   : > { %v1925_v20 = vadd.f32 %v1924_v19, %v1836_v45  ;;  %v2013_v15 = vpop.f32.mrf.mxu3  ;;  %v3577_v19 = vld [vmem:[%s3900_s13 + $0x14] sm:$0xf] }
 0x150   : > { %v1837_v21 = vpop.f32.mrf.mxu1 }
 0x151   : > { %v2014_v8 = vadd.f32 %v2013_v15, %v1925_v20  ;;  %v1838_v27 = vadd.f32 %v1837_v21, %v4204_v38  ;;  %v2729_v20 = vld [vmem:[%s3900_s13 + $0x34] sm:$0xf0] }
 0x152   : > { %v2104_v22 = vpop.f32.mrf.mxu0  ;;  %v2735_v21 = vld [vmem:[%s3900_s13 + $0x18] sm:$0xf]  ;;  %v2732_v34 = vor.u32 %v3577_v19, %v2729_v20  ;;  %v2779_v19 = vld [vmem:[%s3900_s13 + $0x68] sm:$0xf]  ;;  %v3592_v20 = vld [vmem:[%s3900_s13 + $0x88] sm:$0xf0] }
 0x153   : > { %v4390_v30 = vadd.f32 %v2102_v16, %v2014_v8  ;;  %v3582_v8 = vld [vmem:[%s3900_s13 + $0x38] sm:$0xf0] }
 0x154   : > { %v2736_v42 = vor.u32 %v3582_v8, %v2735_v21 }
 0x156   : > { %v1926_v48 = vpop.f32.mrf.mxu2 }
 0x157   : > { %v1927_v49 = vadd.f32 %v1926_v48, %v1838_v27  ;;  %v2015_v50 = vpop.f32.mrf.mxu3  ;;  %v3578_v27 = vld [vmem:[%s3900_s13 + $0x1c] sm:$0xf] }
 0x158   : > { %v1840_v52 = vpop.f32.mrf.mxu1 }
 0x159   : > { %v2016_v38 = vadd.f32 %v2015_v50, %v1927_v49  ;;  %v1841_v59 = vadd.f32 %v1840_v52, %v4229_v4  ;;  %v2744_v49 = vor.u32 %v3583_v26, %v2743_v25 }
 0x15a   : > { %v2107_v62 = vpop.f32.mrf.mxu0 }
 0x15b   : > { %1879 = vmatmul.bf16.gmra.mxu1 %v3256_v1  ;;  %1968 = vmatmul.bf16.gmra.mxu2 %v3260_v51  ;;  %v4399_v44 = vadd.f32 %v2104_v22, %v2016_v38  ;;  %v2737_v22 = vld [vmem:[%s3900_s13 + $0x3c] sm:$0xf0] }
 0x15c   : > { %2057 = vmatmul.bf16.gmra.mxu3 %v3264_v54  ;;  %v2740_v48 = vor.u32 %v3578_v27, %v2737_v22 }
 0x15d   : > { %2146 = vmatmul.bf16.gmra.mxu0 %v3268_v58 }
 0x15e   : > { %v1929_v40 = vpop.f32.mrf.mxu2 }
 0x15f   : > { %v1930_v9 = vadd.f32 %v1929_v40, %v1841_v59  ;;  %v2018_v11 = vpop.f32.mrf.mxu3  ;;  %v3586_v40 = vld [vmem:[%s3900_s13 + $0x5c] sm:$0xf] }
 0x160   : > { %v1842_v7 = vpop.f32.mrf.mxu1 }
 0x161   : > { %v2019_v45 = vadd.f32 %v2018_v11, %v1930_v9  ;;  %v1843_v4 = vadd.f32 %v1842_v7, %v4240_v14  ;;  %v2765_v9 = vld [vmem:[%s3900_s13 + $0x7c] sm:$0xf0] }
 0x162   : > { %v2109_v16 = vpop.f32.mrf.mxu0  ;;  %v2771_v7 = vld [vmem:[%s3900_s13 + $0x60] sm:$0xf]  ;;  %v2768_v22 = vor.u32 %v3586_v40, %v2765_v9  ;;  %v2815_v40 = vld [vmem:[%s3900_s13 + $0xb0] sm:$0xf]  ;;  %v3601_v9 = vld [vmem:[%s3900_s13 + $0xd0] sm:$0xf0] }
 0x163   : > { %v4404_v15 = vadd.f32 %v2107_v62, %v2019_v45  ;;  %v3591_v45 = vld [vmem:[%s3900_s13 + $0x80] sm:$0xf0] }
 0x164   : > { %v2772_v25 = vor.u32 %v3591_v45, %v2771_v7 }
 0x166   : > { %v1931_v33 = vpop.f32.mrf.mxu2 }
 0x167   : > { %v1932_v37 = vadd.f32 %v1931_v33, %v1843_v4  ;;  %v2020_v0 = vpop.f32.mrf.mxu3  ;;  %v3587_v4 = vld [vmem:[%s3900_s13 + $0x64] sm:$0xf] }
 0x168   : > { %v1845_v46 = vpop.f32.mrf.mxu1 }
 0x169   : > { %v2021_v14 = vadd.f32 %v2020_v0, %v1932_v37  ;;  %v1846_v50 = vadd.f32 %v1845_v46, %v4126_v39  ;;  %v2780_v37 = vor.u32 %v3592_v20, %v2779_v19 }
 0x16a   : > { %v2112_v1 = vpop.f32.mrf.mxu0 }
 0x16b   : > { %2160 = vmatmul.bf16.vlgmr.msra.gmra.mxu1 %v2732_v34  ;;  %2249 = vmatmul.bf16.vlgmr.msra.gmra.mxu2 %v2736_v42  ;;  %v4413_v51 = vadd.f32 %v2109_v16, %v2021_v14  ;;  %v2773_v16 = vld [vmem:[%s3900_s13 + $0x84] sm:$0xf0] }
 0x16c   : > { %2338 = vmatmul.bf16.vlgmr.msra.gmra.mxu3 %v2740_v48  ;;  %v2776_v33 = vor.u32 %v3587_v4, %v2773_v16 }
 0x16d   : > { %2427 = vmatmul.bf16.vlgmr.msra.gmra.mxu0 %v2744_v49 }
 0x16e   : > { %v1934_v52 = vpop.f32.mrf.mxu2 }
 0x16f   : > { %v1935_v54 = vadd.f32 %v1934_v52, %v1846_v50  ;;  %v2023_v58 = vpop.f32.mrf.mxu3  ;;  %v3595_v52 = vld [vmem:[%s3900_s13 + $0xa4] sm:$0xf] }
 0x170   : > { %v1847_v38 = vpop.f32.mrf.mxu1 }
 0x171   : > { %v2024_v59 = vadd.f32 %v2023_v58, %v1935_v54  ;;  %v1848_v39 = vadd.f32 %v1847_v38, %v4151_v56  ;;  %v2801_v54 = vld [vmem:[%s3900_s13 + $0xc4] sm:$0xf0] }
 0x172   : > { %v2114_v62 = vpop.f32.mrf.mxu0  ;;  %v2807_v38 = vld [vmem:[%s3900_s13 + $0xa8] sm:$0xf]  ;;  %v2804_v16 = vor.u32 %v3595_v52, %v2801_v54  ;;  %v2851_v52 = vld [vmem:[%s3900_s13 + $0xf8] sm:$0xf]  ;;  %v3610_v54 = vld [vmem:[%s3900_s13 + $0x118] sm:$0xf0] }
 0x173   : > { %v4418_v11 = vadd.f32 %v2112_v1, %v2024_v59  ;;  %v3600_v59 = vld [vmem:[%s3900_s13 + $0xc8] sm:$0xf0] }
 0x174   : > { %v2808_v19 = vor.u32 %v3600_v59, %v2807_v38 }
 0x176   : > { %v1936_v21 = vpop.f32.mrf.mxu2 }
 0x177   : > { %v1937_v8 = vadd.f32 %v1936_v21, %v1848_v39  ;;  %v2025_v27 = vpop.f32.mrf.mxu3  ;;  %v3596_v39 = vld [vmem:[%s3900_s13 + $0xac] sm:$0xf] }
 0x178   : > { %v1850_v26 = vpop.f32.mrf.mxu1 }
 0x179   : > { %v2026_v56 = vadd.f32 %v2025_v27, %v1937_v8  ;;  %v1851_v0 = vadd.f32 %v1850_v26, %v4162_v3  ;;  %v2816_v8 = vor.u32 %v3601_v9, %v2815_v40 }
 0x17a   : > { %v2117_v34 = vpop.f32.mrf.mxu0 }
 0x17b   : > { %2165 = vmatmul.bf16.gmra.mxu1 %v2768_v22  ;;  %2254 = vmatmul.bf16.gmra.mxu2 %v2772_v25  ;;  %v4427_v42 = vadd.f32 %v2114_v62, %v2026_v56  ;;  %v2809_v62 = vld [vmem:[%s3900_s13 + $0xcc] sm:$0xf0] }
 0x17c   : > { %2343 = vmatmul.bf16.gmra.mxu3 %v2776_v33  ;;  %v2812_v21 = vor.u32 %v3596_v39, %v2809_v62 }
 0x17d   : > { %2432 = vmatmul.bf16.gmra.mxu0 %v2780_v37 }
 0x17e   : > { %v1939_v46 = vpop.f32.mrf.mxu2 }
 0x17f   : > { %v1940_v48 = vadd.f32 %v1939_v46, %v1851_v0  ;;  %v2028_v49 = vpop.f32.mrf.mxu3  ;;  %v3604_v46 = vld [vmem:[%s3900_s13 + $0xec] sm:$0xf] }
 0x180   : > { %v1852_v14 = vpop.f32.mrf.mxu1 }
 0x181   : > { %v2029_v50 = vadd.f32 %v2028_v49, %v1940_v48  ;;  %v1853_v3 = vadd.f32 %v1852_v14, %v4181_v18  ;;  %v2837_v48 = vld [vmem:[%s3900_s13 + $0x10c] sm:$0xf0] }
 0x182   : > { %v2119_v1 = vpop.f32.mrf.mxu0  ;;  %v2843_v14 = vld [vmem:[%s3900_s13 + $0xf0] sm:$0xf]  ;;  %v2840_v62 = vor.u32 %v3604_v46, %v2837_v48  ;;  %v2887_v46 = vld [vmem:[%s3900_s13 + $0x140] sm:$0xf]  ;;  %v3619_v48 = vld [vmem:[%s3900_s13 + $0x160] sm:$0xf0] }
 0x183   : > { %v4432_v58 = vadd.f32 %v2117_v34, %v2029_v50  ;;  %v3609_v50 = vld [vmem:[%s3900_s13 + $0x110] sm:$0xf0] }
 0x184   : > { %v2844_v40 = vor.u32 %v3609_v50, %v2843_v14 }
 0x186   : > { %v1941_v7 = vpop.f32.mrf.mxu2 }
 0x187   : > { %v1942_v45 = vadd.f32 %v1941_v7, %v1853_v3  ;;  %v2030_v4 = vpop.f32.mrf.mxu3  ;;  %v3605_v3 = vld [vmem:[%s3900_s13 + $0xf4] sm:$0xf] }
 0x188   : > { %v1855_v20 = vpop.f32.mrf.mxu1 }
 0x189   : > { %v2031_v18 = vadd.f32 %v2030_v4, %v1942_v45  ;;  %v1856_v27 = vadd.f32 %v1855_v20, %v4198_v32  ;;  %v2852_v45 = vor.u32 %v3610_v54, %v2851_v52 }
 0x18a   : > { %v2122_v22 = vpop.f32.mrf.mxu0 }
 0x18b   : > { %2170 = vmatmul.bf16.gmra.mxu1 %v2804_v16  ;;  %2259 = vmatmul.bf16.gmra.mxu2 %v2808_v19  ;;  %v4441_v25 = vadd.f32 %v2119_v1, %v2031_v18  ;;  %v2845_v1 = vld [vmem:[%s3900_s13 + $0x114] sm:$0xf0] }
 0x18c   : > { %2348 = vmatmul.bf16.gmra.mxu3 %v2812_v21  ;;  %v2848_v7 = vor.u32 %v3605_v3, %v2845_v1 }
 0x18d   : > { %2437 = vmatmul.bf16.gmra.mxu0 %v2816_v8 }
 0x18e   : > { %v1944_v26 = vpop.f32.mrf.mxu2 }
 0x18f   : > { %v1945_v33 = vadd.f32 %v1944_v26, %v1856_v27  ;;  %v2033_v37 = vpop.f32.mrf.mxu3  ;;  %v3613_v26 = vld [vmem:[%s3900_s13 + $0x134] sm:$0xf] }
 0x190   : > { %v1857_v56 = vpop.f32.mrf.mxu1 }
 0x191   : > { %v2034_v0 = vadd.f32 %v2033_v37, %v1945_v33  ;;  %v1858_v32 = vadd.f32 %v1857_v56, %v4223_v55  ;;  %v2873_v33 = vld [vmem:[%s3900_s13 + $0x154] sm:$0xf0] }
 0x192   : > { %v2124_v34 = vpop.f32.mrf.mxu0  ;;  %v2879_v56 = vld [vmem:[%s3900_s13 + $0x138] sm:$0xf]  ;;  %v2876_v1 = vor.u32 %v3613_v26, %v2873_v33  ;;  %v2923_v26 = vld [vmem:[%s3900_s13 + $0x188] sm:$0xf]  ;;  %v3628_v33 = vld [vmem:[%s3900_s13 + $0x1a8] sm:$0xf0] }
 0x193   : > { %v4446_v49 = vadd.f32 %v2122_v22, %v2034_v0  ;;  %v3618_v0 = vld [vmem:[%s3900_s13 + $0x158] sm:$0xf0] }
 0x194   : > { %v2880_v52 = vor.u32 %v3618_v0, %v2879_v56 }
 0x196   : > { %v1946_v38 = vpop.f32.mrf.mxu2 }
 0x197   : > { %v1947_v59 = vadd.f32 %v1946_v38, %v1858_v32  ;;  %v2035_v39 = vpop.f32.mrf.mxu3  ;;  %v3614_v32 = vld [vmem:[%s3900_s13 + $0x13c] sm:$0xf] }
 0x198   : > { %v1860_v9 = vpop.f32.mrf.mxu1 }
 0x199   : > { %v2036_v55 = vadd.f32 %v2035_v39, %v1947_v59  ;;  %v1861_v4 = vadd.f32 %v1860_v9, %v4234_v10  ;;  %v2888_v59 = vor.u32 %v3619_v48, %v2887_v46 }
 0x19a   : > { %v2127_v16 = vpop.f32.mrf.mxu0 }
 0x19b   : > { %2175 = vmatmul.bf16.gmra.mxu1 %v2840_v62  ;;  %2264 = vmatmul.bf16.gmra.mxu2 %v2844_v40  ;;  %v4455_v19 = vadd.f32 %v2124_v34, %v2036_v55  ;;  %v2881_v34 = vld [vmem:[%s3900_s13 + $0x15c] sm:$0xf0] }
 0x19c   : > { %2353 = vmatmul.bf16.gmra.mxu3 %v2848_v7  ;;  %v2884_v38 = vor.u32 %v3614_v32, %v2881_v34 }
 0x19d   : > { %2442 = vmatmul.bf16.gmra.mxu0 %v2852_v45 }
 0x19e   : > { %v1949_v20 = vpop.f32.mrf.mxu2 }
 0x19f   : > { %v1950_v21 = vadd.f32 %v1949_v20, %v1861_v4  ;;  %v2038_v8 = vpop.f32.mrf.mxu3  ;;  %v3622_v20 = vld [vmem:[%s3900_s13 + $0x17c] sm:$0xf] }
 0x1a0   : > { %v1862_v18 = vpop.f32.mrf.mxu1 }
 0x1a1   : > { %v2039_v27 = vadd.f32 %v2038_v8, %v1950_v21  ;;  %v1863_v10 = vadd.f32 %v1862_v18, %v4255_v31  ;;  %v2909_v21 = vld [vmem:[%s3900_s13 + $0x19c] sm:$0xf0] }
 0x1a2   : > { %v2129_v22 = vpop.f32.mrf.mxu0  ;;  %v2915_v18 = vld [vmem:[%s3900_s13 + $0x180] sm:$0xf]  ;;  %v2912_v34 = vor.u32 %v3622_v20, %v2909_v21  ;;  %v2959_v20 = vld [vmem:[%s3900_s13 + $0x1d0] sm:$0xf]  ;;  %v3637_v21 = vld [vmem:[%s3900_s13 + $0x1f0] sm:$0xf0] }
 0x1a3   : > { %v4460_v37 = vadd.f32 %v2127_v16, %v2039_v27  ;;  %v3627_v27 = vld [vmem:[%s3900_s13 + $0x1a0] sm:$0xf0] }
 0x1a4   : > { %v2916_v46 = vor.u32 %v3627_v27, %v2915_v18 }
 0x1a6   : > { %v1951_v14 = vpop.f32.mrf.mxu2 }
 0x1a7   : > { %v1952_v50 = vadd.f32 %v1951_v14, %v1863_v10  ;;  %v2040_v3 = vpop.f32.mrf.mxu3  ;;  %v3623_v10 = vld [vmem:[%s3900_s13 + $0x184] sm:$0xf] }
 0x1a8   : > { %v1865_v54 = vpop.f32.mrf.mxu1 }
 0x1a9   : > { %v2041_v31 = vadd.f32 %v2040_v3, %v1952_v50  ;;  %v1866_v39 = vadd.f32 %v1865_v54, %v4129_v41  ;;  %v2924_v50 = vor.u32 %v3628_v33, %v2923_v26 }
 0x1aa   : > { %v2132_v62 = vpop.f32.mrf.mxu0 }
 0x1ab   : > { %2180 = vmatmul.bf16.gmra.mxu1 %v2876_v1  ;;  %2269 = vmatmul.bf16.gmra.mxu2 %v2880_v52  ;;  %v4469_v40 = vadd.f32 %v2129_v22, %v2041_v31  ;;  %v2917_v22 = vld [vmem:[%s3900_s13 + $0x1a4] sm:$0xf0] }
 0x1ac   : > { %2358 = vmatmul.bf16.gmra.mxu3 %v2884_v38  ;;  %v2920_v14 = vor.u32 %v3623_v10, %v2917_v22 }
 0x1ad   : > { %2447 = vmatmul.bf16.gmra.mxu0 %v2888_v59 }
 0x1ae   : > { %v1954_v9 = vpop.f32.mrf.mxu2 }
 0x1af   : > { %v1955_v7 = vadd.f32 %v1954_v9, %v1866_v39  ;;  %v2043_v45 = vpop.f32.mrf.mxu3  ;;  %v3631_v9 = vld [vmem:[%s3900_s13 + $0x1c4] sm:$0xf] }
 0x1b0   : > { %v1867_v55 = vpop.f32.mrf.mxu1 }
 0x1b1   : > { %v2044_v4 = vadd.f32 %v2043_v45, %v1955_v7  ;;  %v1868_v41 = vadd.f32 %v1867_v55, %v4154_v60  ;;  %v2945_v7 = vld [vmem:[%s3900_s13 + $0x1e4] sm:$0xf0] }
 0x1b2   : > { %v2134_v16 = vpop.f32.mrf.mxu0  ;;  %v2951_v55 = vld [vmem:[%s3900_s13 + $0x1c8] sm:$0xf]  ;;  %v2948_v22 = vor.u32 %v3631_v9, %v2945_v7  ;;  %v2995_v9 = vld [vmem:[%s3900_s13 + $0x218] sm:$0xf]  ;;  %v3646_v7 = vld [vmem:[%s3900_s13 + $0x238] sm:$0xf0] }
 0x1b3   : > { %v4474_v8 = vadd.f32 %v2132_v62, %v2044_v4  ;;  %v3636_v4 = vld [vmem:[%s3900_s13 + $0x1e8] sm:$0xf0] }
 0x1b4   : > { %v2952_v26 = vor.u32 %v3636_v4, %v2951_v55 }
 0x1b6   : > { %v1956_v56 = vpop.f32.mrf.mxu2 }
 0x1b7   : > { %v1957_v0 = vadd.f32 %v1956_v56, %v1868_v41  ;;  %v2045_v32 = vpop.f32.mrf.mxu3  ;;  %v3632_v41 = vld [vmem:[%s3900_s13 + $0x1cc] sm:$0xf] }
 0x1b8   : > { %v1870_v48 = vpop.f32.mrf.mxu1 }
 0x1b9   : > { %v2046_v60 = vadd.f32 %v2045_v32, %v1957_v0  ;;  %v1871_v3 = vadd.f32 %v1870_v48, %v4165_v5  ;;  %v2960_v0 = vor.u32 %v3637_v21, %v2959_v20 }
 0x1ba   : > { %v2137_v1 = vpop.f32.mrf.mxu0 }
 0x1bb   : > { %2185 = vmatmul.bf16.gmra.mxu1 %v2912_v34  ;;  %2274 = vmatmul.bf16.gmra.mxu2 %v2916_v46  ;;  %v4483_v52 = vadd.f32 %v2134_v16, %v2046_v60  ;;  %v2953_v16 = vld [vmem:[%s3900_s13 + $0x1ec] sm:$0xf0] }
 0x1bc   : > { %2363 = vmatmul.bf16.gmra.mxu3 %v2920_v14  ;;  %v2956_v56 = vor.u32 %v3632_v41, %v2953_v16 }
 0x1bd   : > { %2452 = vmatmul.bf16.gmra.mxu0 %v2924_v50 }
 0x1be   : > { %v1959_v54 = vpop.f32.mrf.mxu2 }
 0x1bf   : > { %v1960_v38 = vadd.f32 %v1959_v54, %v1871_v3  ;;  %v2048_v59 = vpop.f32.mrf.mxu3  ;;  %v3640_v54 = vld [vmem:[%s3900_s13 + $0x20c] sm:$0xf] }
 0x1c0   : > { %v1872_v31 = vpop.f32.mrf.mxu1 }
 0x1c1   : > { %v2049_v39 = vadd.f32 %v2048_v59, %v1960_v38  ;;  %v1873_v5 = vadd.f32 %v1872_v31, %v4184_v23  ;;  %v2981_v38 = vld [vmem:[%s3900_s13 + $0x22c] sm:$0xf0] }
 0x1c2   : > { %v2139_v62 = vpop.f32.mrf.mxu0  ;;  %v2987_v31 = vld [vmem:[%s3900_s13 + $0x210] sm:$0xf]  ;;  %v2984_v16 = vor.u32 %v3640_v54, %v2981_v38  ;;  %v3031_v54 = vld [vmem:[%s3900_s13 + $0x260] sm:$0xf]  ;;  %v3655_v38 = vld [vmem:[%s3900_s13 + $0x280] sm:$0xf0] }
 0x1c3   : > { %v4488_v45 = vadd.f32 %v2137_v1, %v2049_v39  ;;  %v3645_v39 = vld [vmem:[%s3900_s13 + $0x230] sm:$0xf0] }
 0x1c4   : > { %v2988_v20 = vor.u32 %v3645_v39, %v2987_v31 }
 0x1c6   : > { %v1961_v18 = vpop.f32.mrf.mxu2 }
 0x1c7   : > { %v1962_v27 = vadd.f32 %v1961_v18, %v1873_v5  ;;  %v2050_v10 = vpop.f32.mrf.mxu3  ;;  %v3641_v5 = vld [vmem:[%s3900_s13 + $0x214] sm:$0xf] }
 0x1c8   : > { %v1875_v33 = vpop.f32.mrf.mxu1 }
 0x1c9   : > { %v2051_v23 = vadd.f32 %v2050_v10, %v1962_v27  ;;  %v1876_v32 = vadd.f32 %v1875_v33, %v4201_v36  ;;  %v2996_v27 = vor.u32 %v3646_v7, %v2995_v9 }
 0x1ca   : > { %v2142_v34 = vpop.f32.mrf.mxu0 }
 0x1cb   : > { %2190 = vmatmul.bf16.gmra.mxu1 %v2948_v22  ;;  %2279 = vmatmul.bf16.gmra.mxu2 %v2952_v26  ;;  %v4497_v46 = vadd.f32 %v2139_v62, %v2051_v23  ;;  %v2989_v62 = vld [vmem:[%s3900_s13 + $0x234] sm:$0xf0] }
 0x1cc   : > { %2368 = vmatmul.bf16.gmra.mxu3 %v2956_v56  ;;  %v2992_v18 = vor.u32 %v3641_v5, %v2989_v62 }
 0x1cd   : > { %2457 = vmatmul.bf16.gmra.mxu0 %v2960_v0 }
 0x1ce   : > { %v1964_v48 = vpop.f32.mrf.mxu2 }
 0x1cf   : > { %v1965_v14 = vadd.f32 %v1964_v48, %v1876_v32  ;;  %v2053_v50 = vpop.f32.mrf.mxu3  ;;  %v3649_v48 = vld [vmem:[%s3900_s13 + $0x254] sm:$0xf] }
 0x1d0   : > { %v1877_v60 = vpop.f32.mrf.mxu1 }
 0x1d1   : > { %v2054_v3 = vadd.f32 %v2053_v50, %v1965_v14  ;;  %v1878_v36 = vadd.f32 %v1877_v60, %v4226_v61  ;;  %v3017_v14 = vld [vmem:[%s3900_s13 + $0x274] sm:$0xf0] }
 0x1d2   : > { %v2144_v1 = vpop.f32.mrf.mxu0  ;;  %v3023_v60 = vld [vmem:[%s3900_s13 + $0x258] sm:$0xf]  ;;  %v3020_v62 = vor.u32 %v3649_v48, %v3017_v14 }
 0x1d3   : > { %v4502_v59 = vadd.f32 %v2142_v34, %v2054_v3  ;;  %v3654_v3 = vld [vmem:[%s3900_s13 + $0x278] sm:$0xf0] }
 0x1d4   : > { %v3024_v9 = vor.u32 %v3654_v3, %v3023_v60  ;;  %v3061_v60 = vld [vmem:[%s3900_s13 + $0x2c4] sm:$0xf0] }
 0x1d5   : > { %v3067_v3 = vld [vmem:[%s3900_s13 + $0x2a8] sm:$0xf] }
 0x1d6   : > { %v1966_v55 = vpop.f32.mrf.mxu2 }
 0x1d7   : > { %v1967_v4 = vadd.f32 %v1966_v55, %v1878_v36  ;;  %v2055_v41 = vpop.f32.mrf.mxu3  ;;  %v3650_v36 = vld [vmem:[%s3900_s13 + $0x25c] sm:$0xf] }
 0x1d8   : > { %v1880_v21 = vpop.f32.mrf.mxu1 }
 0x1d9   : > { %v2056_v61 = vadd.f32 %v2055_v41, %v1967_v4  ;;  %v1881_v10 = vadd.f32 %v1880_v21, %v4237_v12  ;;  %v3032_v4 = vor.u32 %v3655_v38, %v3031_v54 }
 0x1da   : > { %v2147_v22 = vpop.f32.mrf.mxu0 }
 0x1db   : > { %2195 = vmatmul.bf16.gmra.mxu1 %v2984_v16  ;;  %2284 = vmatmul.bf16.gmra.mxu2 %v2988_v20  ;;  %v4511_v26 = vadd.f32 %v2144_v1, %v2056_v61  ;;  %v3025_v1 = vld [vmem:[%s3900_s13 + $0x27c] sm:$0xf0] }
 0x1dc   : > { %2373 = vmatmul.bf16.gmra.mxu3 %v2992_v18  ;;  %v3028_v55 = vor.u32 %v3650_v36, %v3025_v1  ;;  %v3664_v36 = vld [vmem:[%s3900_s13 + $0x2c8] sm:$0xf0] }
 0x1dd   : > { %2462 = vmatmul.bf16.gmra.mxu0 %v2996_v27 }
 0x1de   : > { %v1969_v33 = vpop.f32.mrf.mxu2 }
 0x1df   : > { %v1970_v56 = vadd.f32 %v1969_v33, %v1881_v10  ;;  %v2058_v0 = vpop.f32.mrf.mxu3 }
 0x1e0   : > { %v1882_v23 = vpop.f32.mrf.mxu1 }
 0x1e1   : > { %v2059_v32 = vadd.f32 %v2058_v0, %v1970_v56  ;;  %v1883_v12 = vadd.f32 %v1882_v23, %v4258_v43  ;;  %v3658_v0 = vld [vmem:[%s3900_s13 + $0x29c] sm:$0xf]  ;;  %v3053_v23 = vld [vmem:[%s3900_s13 + $0x2bc] sm:$0xf0] }
 0x1e2   : > { %v2149_v34 = vpop.f32.mrf.mxu0 }
 0x1e3   : > { %v4516_v50 = vadd.f32 %v2147_v22, %v2059_v32  ;;  %v4530_v22 = vld [vmem:[%s4732_s3] ss:$0 sm:$0xff] }
 0x1e4   : > { %v3059_v32 = vld [vmem:[%s3900_s13 + $0x2a0] sm:$0xf] }
 0x1e6   : > { %v1971_v31 = vpop.f32.mrf.mxu2 }
 0x1e7   : > { %v1972_v39 = vadd.f32 %v1971_v31, %v1883_v12  ;;  %v2060_v5 = vpop.f32.mrf.mxu3  ;;  %v3663_v12 = vld [vmem:[%s3900_s13 + $0x2c0] sm:$0xf0] }
 0x1e8   : > { %v2161_v7 = vpop.f32.mrf.mxu1 }
 0x1e9   : > { %v2061_v43 = vadd.f32 %v2060_v5, %v1972_v39  ;;  %v2162_v20 = vadd.f32 %v2161_v7, %v4276_v13  ;;  %v4536_v13 = vld [vmem:[%s4733_s4] ss:$0 sm:$0xff]  ;;  %v3056_v39 = vor.u32 %v3658_v0, %v3053_v23  ;;  %v3060_v5 = vor.u32 %v3663_v12, %v3059_v32  ;;  %v3667_v32 = vld [vmem:[%s3900_s13 + $0x2e4] sm:$0xf]  ;;  %v3089_v12 = vld [vmem:[%s3900_s13 + $0x304] sm:$0xf0] }
 0x1ea   : > { %v2428_v41 = vpop.f32.mrf.mxu0  ;;  %v3068_v7 = vor.u32 %v3664_v36, %v3067_v3  ;;  %v3097_v3 = vld [vmem:[%s3900_s13 + $0x30c] sm:$0xf0] }
 0x1eb   : > { %2200 = vmatmul.bf16.gmra.mxu1 %v3020_v62  ;;  %2289 = vmatmul.bf16.gmra.mxu2 %v3024_v9  ;;  %v4524_v16 = vadd.f32 %v2149_v34, %v2061_v43  ;;  %v3659_v34 = vld [vmem:[%s3900_s13 + $0x2a4] sm:$0xf]  ;;  %v3103_v36 = vld [vmem:[%s3900_s13 + $0x2f0] sm:$0xf] }
 0x1ec   : > { %2378 = vmatmul.bf16.gmra.mxu3 %v3028_v55  ;;  %v3064_v9 = vor.u32 %v3659_v34, %v3061_v60  ;;  %v3095_v34 = vld [vmem:[%s3900_s13 + $0x2e8] sm:$0xf] }
 0x1ed   : > { %2467 = vmatmul.bf16.gmra.mxu0 %v3032_v4 }
 0x1ee   : > { %v2250_v21 = vpop.f32.mrf.mxu2 }
 0x1ef   : > { %v2251_v18 = vadd.f32 %v2250_v21, %v2162_v20  ;;  %v2339_v27 = vpop.f32.mrf.mxu3 }
 0x1f0   : > { %v2163_v61 = vpop.f32.mrf.mxu1 }
 0x1f1   : > { %v2340_v10 = vadd.f32 %v2339_v27, %v2251_v18  ;;  %v2164_v14 = vadd.f32 %v2163_v61, %v4286_v35 }
 0x1f2   : > { %v2430_v33 = vpop.f32.mrf.mxu0 }
 0x1f3   : > { %v2429_v56 = vadd.f32 %v2428_v41, %v2340_v10 }
 0x1f5   : > { %v2512_v48 = vmul.f32 %v4530_v22, %v2429_v56 }
 0x1f6   : > { %v2252_v1 = vpop.f32.mrf.mxu2 }
 0x1f7   : > { %v2548_v54 = vadd.f32 %v4536_v13, %v2512_v48  ;;  %v2253_v38 = vadd.f32 %v2252_v1, %v2164_v14  ;;  %v2341_v31 = vpop.f32.mrf.mxu3  ;;  %v3672_v48 = vld [vmem:[%s3900_s13 + $0x308] sm:$0xf0]  ;;  %v3673_v1 = vld [vmem:[%s3900_s13 + $0x310] sm:$0xf0] }
 0x1f8   : > { %v2166_v62 = vpop.f32.mrf.mxu1  ;;  %v3668_v14 = vld [vmem:[%s3900_s13 + $0x2ec] sm:$0xf] }
 0x1f9   : > { %v2580_v35 = vmax.f32 %v2548_v54, 0.0  ;;  %v2342_v55 = vadd.f32 %v2341_v31, %v2253_v38  ;;  %v2167_v20 = vadd.f32 %v2166_v62, %v4292_v63  ;;  %v3096_v62 = vor.u32 %v3672_v48, %v3095_v34  ;;  %v3131_v34 = vld [vmem:[%s3900_s13 + $0x330] sm:$0xf]  ;;  %v3681_v48 = vld [vmem:[%s3900_s13 + $0x350] sm:$0xf0] }
 0x1fa   : > { %v2433_v4 = vpop.f32.mrf.mxu0 }
 0x1fb   : > { %2612 = vst [vmem:[%s4552_s21] sm:$0xff] %v2580_v35  ;;  %v2431_v43 = vadd.f32 %v2430_v33, %v2342_v55  ;;  %2205 = vmatmul.bf16.gmra.mxu1 %v3056_v39  ;;  %2294 = vmatmul.bf16.gmra.mxu2 %v3060_v5  ;;  %v3092_v5 = vor.u32 %v3667_v32, %v3089_v12  ;;  %v3676_v32 = vld [vmem:[%s3900_s13 + $0x32c] sm:$0xf]  ;;  %v3125_v12 = vld [vmem:[%s3900_s13 + $0x34c] sm:$0xf0] }
 0x1fc   : > { %2383 = vmatmul.bf16.gmra.mxu3 %v3064_v9  ;;  %v3104_v35 = vor.u32 %v3673_v1, %v3103_v36  ;;  %v3682_v36 = vld [vmem:[%s3900_s13 + $0x358] sm:$0xf0] }
 0x1fd   : > { %2472 = vmatmul.bf16.gmra.mxu0 %v3068_v7  ;;  %v2513_v41 = vmul.f32 %v4530_v22, %v2431_v43  ;;  %v3100_v7 = vor.u32 %v3668_v14, %v3097_v3  ;;  %v3677_v14 = vld [vmem:[%s3900_s13 + $0x334] sm:$0xf]  ;;  %v3139_v3 = vld [vmem:[%s3900_s13 + $0x338] sm:$0xf] }
 0x1fe   : > { %v2255_v21 = vpop.f32.mrf.mxu2 }
 0x1ff   : > { %v2549_v18 = vadd.f32 %v4536_v13, %v2513_v41  ;;  %v2256_v27 = vadd.f32 %v2255_v21, %v2167_v20  ;;  %v2344_v61 = vpop.f32.mrf.mxu3 }
 0x200   : > { %v2168_v10 = vpop.f32.mrf.mxu1 }
 0x201   : > { %v2581_v33 = vmax.f32 %v2549_v18, 0.0  ;;  %v2345_v56 = vadd.f32 %v2344_v61, %v2256_v27  ;;  %v2169_v60 = vadd.f32 %v2168_v10, %v4302_v47 }
 0x202   : > { %v2435_v0 = vpop.f32.mrf.mxu0 }
 0x203   : > { %2613 = vst [vmem:[%s4552_s21 + $0x8] sm:$0xff] %v2581_v33  ;;  %v2434_v23 = vadd.f32 %v2433_v4, %v2345_v56 }
 0x205   : > { %v2514_v63 = vmul.f32 %v4530_v22, %v2434_v23 }
 0x206   : > { %v2257_v54 = vpop.f32.mrf.mxu2 }
 0x207   : > { %v2550_v38 = vadd.f32 %v4536_v13, %v2514_v63  ;;  %v2258_v31 = vadd.f32 %v2257_v54, %v2169_v60  ;;  %v2346_v39 = vpop.f32.mrf.mxu3  ;;  %v3133_v60 = vld [vmem:[%s3900_s13 + $0x354] sm:$0xf0] }
 0x208   : > { %v2171_v9 = vpop.f32.mrf.mxu1 }
 0x209   : > { %v2582_v55 = vmax.f32 %v2550_v38, 0.0  ;;  %v2347_v4 = vadd.f32 %v2346_v39, %v2258_v31  ;;  %v2172_v20 = vadd.f32 %v2171_v9, %v4320_v2  ;;  %v3128_v39 = vor.u32 %v3676_v32, %v3125_v12  ;;  %v3167_v32 = vld [vmem:[%s3900_s13 + $0x378] sm:$0xf]  ;;  %v3690_v12 = vld [vmem:[%s3900_s13 + $0x398] sm:$0xf0] }
 0x20a   : > { %v2438_v43 = vpop.f32.mrf.mxu0  ;;  %v3136_v9 = vor.u32 %v3677_v14, %v3133_v60  ;;  %v3169_v14 = vld [vmem:[%s3900_s13 + $0x39c] sm:$0xf0] }
 0x20b   : > { %2614 = vst [vmem:[%s4552_s21 + $0x10] sm:$0xff] %v2582_v55  ;;  %v2436_v47 = vadd.f32 %v2435_v0, %v2347_v4  ;;  %2210 = vmatmul.bf16.gmra.mxu1 %v3092_v5  ;;  %2299 = vmatmul.bf16.gmra.mxu2 %v3096_v62  ;;  %v3132_v5 = vor.u32 %v3681_v48, %v3131_v34  ;;  %v3686_v34 = vld [vmem:[%s3900_s13 + $0x37c] sm:$0xf] }
 0x20c   : > { %2388 = vmatmul.bf16.gmra.mxu3 %v3100_v7  ;;  %v3140_v7 = vor.u32 %v3682_v36, %v3139_v3 }
 0x20d   : > { %2477 = vmatmul.bf16.gmra.mxu0 %v3104_v35  ;;  %v2515_v41 = vmul.f32 %v4530_v22, %v2436_v47 }
 0x20e   : > { %v2260_v21 = vpop.f32.mrf.mxu2 }
 0x20f   : > { %v2551_v18 = vadd.f32 %v4536_v13, %v2515_v41  ;;  %v2261_v27 = vadd.f32 %v2260_v21, %v2172_v20  ;;  %v2349_v61 = vpop.f32.mrf.mxu3 }
 0x210   : > { %v2173_v10 = vpop.f32.mrf.mxu1 }
 0x211   : > { %v2583_v33 = vmax.f32 %v2551_v18, 0.0  ;;  %v2350_v56 = vadd.f32 %v2349_v61, %v2261_v27  ;;  %v2174_v63 = vadd.f32 %v2173_v10, %v4330_v28 }
 0x212   : > { %v2440_v0 = vpop.f32.mrf.mxu0 }
 0x213   : > { %2615 = vst [vmem:[%s4552_s21 + $0x18] sm:$0xff] %v2583_v33  ;;  %v2439_v23 = vadd.f32 %v2438_v43, %v2350_v56 }
 0x215   : > { %v2516_v2 = vmul.f32 %v4530_v22, %v2439_v23  ;;  %v3161_v23 = vld [vmem:[%s3900_s13 + $0x394] sm:$0xf0] }
 0x216   : > { %v2262_v1 = vpop.f32.mrf.mxu2 }
 0x217   : > { %v2552_v54 = vadd.f32 %v4536_v13, %v2516_v2  ;;  %v2263_v38 = vadd.f32 %v2262_v1, %v2174_v63  ;;  %v2351_v31 = vpop.f32.mrf.mxu3  ;;  %v3175_v2 = vld [vmem:[%s3900_s13 + $0x380] sm:$0xf]  ;;  %v3691_v63 = vld [vmem:[%s3900_s13 + $0x3a0] sm:$0xf0] }
 0x218   : > { %v2176_v62 = vpop.f32.mrf.mxu1 }
 0x219   : > { %v2584_v35 = vmax.f32 %v2552_v54, 0.0  ;;  %v2352_v55 = vadd.f32 %v2351_v31, %v2263_v38  ;;  %v2177_v47 = vadd.f32 %v2176_v62, %v4336_v57  ;;  %v3168_v38 = vor.u32 %v3690_v12, %v3167_v32  ;;  %v3205_v32 = vld [vmem:[%s3900_s13 + $0x3e4] sm:$0xf0] }
 0x21a   : > { %v2443_v4 = vpop.f32.mrf.mxu0  ;;  %v3211_v12 = vld [vmem:[%s3900_s13 + $0x3c8] sm:$0xf] }
 0x21b   : > { %2616 = vst [vmem:[%s4552_s21 + $0x20] sm:$0xff] %v2584_v35  ;;  %v2441_v28 = vadd.f32 %v2440_v0, %v2352_v55  ;;  %2215 = vmatmul.bf16.gmra.mxu1 %v3128_v39  ;;  %2304 = vmatmul.bf16.gmra.mxu2 %v3132_v5  ;;  %v3685_v0 = vld [vmem:[%s3900_s13 + $0x374] sm:$0xf]  ;;  %v3172_v39 = vor.u32 %v3686_v34, %v3169_v14  ;;  %v3700_v34 = vld [vmem:[%s3900_s13 + $0x3e8] sm:$0xf0] }
 0x21c   : > { %2393 = vmatmul.bf16.gmra.mxu3 %v3136_v9  ;;  %v3164_v54 = vor.u32 %v3685_v0, %v3161_v23  ;;  %v3176_v5 = vor.u32 %v3691_v63, %v3175_v2  ;;  %v3695_v0 = vld [vmem:[%s3900_s13 + $0x3c4] sm:$0xf] }
 0x21d   : > { %2482 = vmatmul.bf16.gmra.mxu0 %v3140_v7  ;;  %v2517_v43 = vmul.f32 %v4530_v22, %v2441_v28 }
 0x21e   : > { %v2265_v41 = vpop.f32.mrf.mxu2 }
 0x21f   : > { %v2553_v20 = vadd.f32 %v4536_v13, %v2517_v43  ;;  %v2266_v21 = vadd.f32 %v2265_v41, %v2177_v47  ;;  %v2354_v18 = vpop.f32.mrf.mxu3 }
 0x220   : > { %v2178_v27 = vpop.f32.mrf.mxu1 }
 0x221   : > { %v2585_v61 = vmax.f32 %v2553_v20, 0.0  ;;  %v2355_v10 = vadd.f32 %v2354_v18, %v2266_v21  ;;  %v2179_v48 = vadd.f32 %v2178_v27, %v4345_v29 }
 0x222   : > { %v2445_v33 = vpop.f32.mrf.mxu0 }
 0x223   : > { %2617 = vst [vmem:[%s4552_s21 + $0x28] sm:$0xff] %v2585_v61  ;;  %v2444_v56 = vadd.f32 %v2443_v4, %v2355_v10  ;;  %v3694_v61 = vld [vmem:[%s3900_s13 + $0x3bc] sm:$0xf]  ;;  %v3197_v10 = vld [vmem:[%s3900_s13 + $0x3dc] sm:$0xf0] }
 0x224   : > { %v3200_v63 = vor.u32 %v3694_v61, %v3197_v10  ;;  %v3241_v61 = vld [vmem:[%s3900_s13 + $0x42c] sm:$0xf0] }
 0x225   : > { %v2518_v57 = vmul.f32 %v4530_v22, %v2444_v56  ;;  %v3699_v56 = vld [vmem:[%s3900_s13 + $0x3e0] sm:$0xf0]  ;;  %v3247_v10 = vld [vmem:[%s3900_s13 + $0x410] sm:$0xf] }
 0x226   : > { %v2267_v60 = vpop.f32.mrf.mxu2 }
 0x227   : > { %v2554_v3 = vadd.f32 %v4536_v13, %v2518_v57  ;;  %v2268_v36 = vadd.f32 %v2267_v60, %v2179_v48  ;;  %v2356_v1 = vpop.f32.mrf.mxu3 }
 0x228   : > { %v2181_v31 = vpop.f32.mrf.mxu1 }
 0x229   : > { %v2586_v62 = vmax.f32 %v2554_v3, 0.0  ;;  %v2357_v9 = vadd.f32 %v2356_v1, %v2268_v36  ;;  %v2182_v55 = vadd.f32 %v2181_v31, %v4362_v53  ;;  %v3208_v36 = vor.u32 %v3695_v0, %v3205_v32 }
 0x22a   : > { %v2448_v7 = vpop.f32.mrf.mxu0  ;;  %v3212_v1 = vor.u32 %v3700_v34, %v3211_v12 }
 0x22b   : > { %2618 = vst [vmem:[%s4552_s21 + $0x30] sm:$0xff] %v2586_v62  ;;  %v2446_v29 = vadd.f32 %v2445_v33, %v2357_v9  ;;  %2220 = vmatmul.bf16.gmra.mxu1 %v3164_v54  ;;  %2309 = vmatmul.bf16.gmra.mxu2 %v3168_v38  ;;  %v3203_v33 = vld [vmem:[%s3900_s13 + $0x3c0] sm:$0xf] }
 0x22c   : > { %2398 = vmatmul.bf16.gmra.mxu3 %v3172_v39  ;;  %v3204_v60 = vor.u32 %v3699_v56, %v3203_v33  ;;  %v3709_v33 = vld [vmem:[%s3900_s13 + $0x430] sm:$0xf0] }
 0x22d   : > { %2487 = vmatmul.bf16.gmra.mxu0 %v3176_v5  ;;  %v2519_v35 = vmul.f32 %v4530_v22, %v2446_v29 }
 0x22e   : > { %v2270_v4 = vpop.f32.mrf.mxu2 }
 0x22f   : > { %v2555_v28 = vadd.f32 %v4536_v13, %v2519_v35  ;;  %v2271_v43 = vadd.f32 %v2270_v4, %v2182_v55  ;;  %v2359_v47 = vpop.f32.mrf.mxu3 }
 0x230   : > { %v2183_v41 = vpop.f32.mrf.mxu1 }
 0x231   : > { %v2587_v20 = vmax.f32 %v2555_v28, 0.0  ;;  %v2360_v21 = vadd.f32 %v2359_v47, %v2271_v43  ;;  %v2184_v23 = vadd.f32 %v2183_v41, %v4371_v24  ;;  %v3703_v47 = vld [vmem:[%s3900_s13 + $0x404] sm:$0xf]  ;;  %v3233_v41 = vld [vmem:[%s3900_s13 + $0x424] sm:$0xf0] }
 0x232   : > { %v2450_v18 = vpop.f32.mrf.mxu0  ;;  %v3236_v32 = vor.u32 %v3703_v47, %v3233_v41  ;;  %v3718_v47 = vld [vmem:[%s3900_s13 + $0x478] sm:$0xf0] }
 0x233   : > { %2619 = vst [vmem:[%s4552_s21 + $0x38] sm:$0xff] %v2587_v20  ;;  %v2449_v27 = vadd.f32 %v2448_v7, %v2360_v21  ;;  %v3239_v20 = vld [vmem:[%s3900_s13 + $0x408] sm:$0xf]  ;;  %v3708_v21 = vld [vmem:[%s3900_s13 + $0x428] sm:$0xf0] }
 0x234   : > { %v3240_v12 = vor.u32 %v3708_v21, %v3239_v20 }
 0x235   : > { %v2520_v53 = vmul.f32 %v4530_v22, %v2449_v27 }
 0x236   : > { %v2272_v57 = vpop.f32.mrf.mxu2 }
 0x237   : > { %v2556_v48 = vadd.f32 %v4536_v13, %v2520_v53  ;;  %v2273_v14 = vadd.f32 %v2272_v57, %v2184_v23  ;;  %v2361_v2 = vpop.f32.mrf.mxu3 }
 0x238   : > { %v2186_v3 = vpop.f32.mrf.mxu1 }
 0x239   : > { %v2588_v54 = vmax.f32 %v2556_v48, 0.0  ;;  %v2362_v38 = vadd.f32 %v2361_v2, %v2273_v14  ;;  %v2187_v5 = vadd.f32 %v2186_v3, %v4376_v6  ;;  %v3248_v48 = vor.u32 %v3709_v33, %v3247_v10 }
 0x23a   : > { %v2453_v31 = vpop.f32.mrf.mxu0 }
 0x23b   : > { %2620 = vst [vmem:[%s4552_s21 + $0x40] sm:$0xff] %v2588_v54  ;;  %v2451_v24 = vadd.f32 %v2450_v18, %v2362_v38  ;;  %2225 = vmatmul.bf16.gmra.mxu1 %v3200_v63  ;;  %2314 = vmatmul.bf16.gmra.mxu2 %v3204_v60  ;;  %v3704_v18 = vld [vmem:[%s3900_s13 + $0x40c] sm:$0xf] }
 0x23c   : > { %2403 = vmatmul.bf16.gmra.mxu3 %v3208_v36  ;;  %v3244_v57 = vor.u32 %v3704_v18, %v3241_v61 }
 0x23d   : > { %2492 = vmatmul.bf16.gmra.mxu0 %v3212_v1  ;;  %v2521_v39 = vmul.f32 %v4530_v22, %v2451_v24 }
 0x23e   : > { %v2275_v62 = vpop.f32.mrf.mxu2 }
 0x23f   : > { %v2557_v9 = vadd.f32 %v4536_v13, %v2521_v39  ;;  %v2276_v7 = vadd.f32 %v2275_v62, %v2187_v5  ;;  %v2364_v29 = vpop.f32.mrf.mxu3 }
 0x240   : > { %v2188_v35 = vpop.f32.mrf.mxu1 }
 0x241   : > { %v2589_v55 = vmax.f32 %v2557_v9, 0.0  ;;  %v2365_v4 = vadd.f32 %v2364_v29, %v2276_v7  ;;  %v2189_v27 = vadd.f32 %v2188_v35, %v4385_v17  ;;  %v3712_v9 = vld [vmem:[%s3900_s13 + $0x44c] sm:$0xf]  ;;  %v3269_v7 = vld [vmem:[%s3900_s13 + $0x46c] sm:$0xf0] }
 0x242   : > { %v2455_v28 = vpop.f32.mrf.mxu0  ;;  %v3275_v29 = vld [vmem:[%s3900_s13 + $0x450] sm:$0xf]  ;;  %v3717_v35 = vld [vmem:[%s3900_s13 + $0x470] sm:$0xf0] }
 0x243   : > { %2621 = vst [vmem:[%s4552_s21 + $0x48] sm:$0xff] %v2589_v55  ;;  %v2454_v43 = vadd.f32 %v2453_v31, %v2365_v4  ;;  %v3713_v55 = vld [vmem:[%s3900_s13 + $0x454] sm:$0xf] }
 0x245   : > { %v2522_v6 = vmul.f32 %v4530_v22, %v2454_v43  ;;  %v3283_v43 = vld [vmem:[%s3900_s13 + $0x458] sm:$0xf] }
 0x246   : > { %v2277_v56 = vpop.f32.mrf.mxu2  ;;  %v3284_v33 = vor.u32 %v3718_v47, %v3283_v43 }
 0x247   : > { %v2558_v0 = vadd.f32 %v4536_v13, %v2522_v6  ;;  %v2278_v53 = vadd.f32 %v2277_v56, %v2189_v27  ;;  %v2366_v23 = vpop.f32.mrf.mxu3  ;;  %v3272_v6 = vor.u32 %v3712_v9, %v3269_v7  ;;  %v3276_v27 = vor.u32 %v3717_v35, %v3275_v29 }
 0x248   : > { %v2191_v34 = vpop.f32.mrf.mxu1 }
 0x249   : > { %v2590_v14 = vmax.f32 %v2558_v0, 0.0  ;;  %v2367_v2 = vadd.f32 %v2366_v23, %v2278_v53  ;;  %v2192_v3 = vadd.f32 %v2191_v34, %v4390_v30 }
 0x24a   : > { %v2458_v63 = vpop.f32.mrf.mxu0 }
 0x24b   : > { %2622 = vst [vmem:[%s4552_s21 + $0x50] sm:$0xff] %v2590_v14  ;;  %v2456_v17 = vadd.f32 %v2455_v28, %v2367_v2  ;;  %2230 = vmatmul.bf16.gmra.mxu1 %v3236_v32  ;;  %2319 = vmatmul.bf16.gmra.mxu2 %v3240_v12  ;;  %v3277_v28 = vld [vmem:[%s3900_s13 + $0x474] sm:$0xf0] }
 0x24c   : > { %2408 = vmatmul.bf16.gmra.mxu3 %v3244_v57  ;;  %v3280_v10 = vor.u32 %v3713_v55, %v3277_v28 }
 0x24d   : > { %2497 = vmatmul.bf16.gmra.mxu0 %v3248_v48  ;;  %v2523_v60 = vmul.f32 %v4530_v22, %v2456_v17 }
 0x24e   : > { %v2280_v36 = vpop.f32.mrf.mxu2 }
 0x24f   : > { %v2559_v1 = vadd.f32 %v4536_v13, %v2523_v60  ;;  %v2281_v54 = vadd.f32 %v2280_v36, %v2192_v3  ;;  %v2369_v38 = vpop.f32.mrf.mxu3 }
 0x250   : > { %v2193_v31 = vpop.f32.mrf.mxu1 }
 0x251   : > { %v2591_v24 = vmax.f32 %v2559_v1, 0.0  ;;  %v2370_v39 = vadd.f32 %v2369_v38, %v2281_v54  ;;  %v2194_v4 = vadd.f32 %v2193_v31, %v4399_v44 }
 0x252   : > { %v2460_v5 = vpop.f32.mrf.mxu0 }
 0x253   : > { %2623 = vst [vmem:[%s4552_s21 + $0x58] sm:$0xff] %v2591_v24  ;;  %v2459_v62 = vadd.f32 %v2458_v63, %v2370_v39 }
 0x255   : > { %v2524_v30 = vmul.f32 %v4530_v22, %v2459_v62 }
 0x256   : > { %v2282_v41 = vpop.f32.mrf.mxu2 }
 0x257   : > { %v2560_v20 = vadd.f32 %v4536_v13, %v2524_v30  ;;  %v2283_v21 = vadd.f32 %v2282_v41, %v2194_v4  ;;  %v2371_v18 = vpop.f32.mrf.mxu3 }
 0x258   : > { %v2196_v61 = vpop.f32.mrf.mxu1 }
 0x259   : > { %v2592_v56 = vmax.f32 %v2560_v20, 0.0  ;;  %v2372_v0 = vadd.f32 %v2371_v18, %v2283_v21  ;;  %v2197_v32 = vadd.f32 %v2196_v61, %v4404_v15 }
 0x25a   : > { %v2463_v53 = vpop.f32.mrf.mxu0 }
 0x25b   : > { %2624 = vst [vmem:[%s4552_s21 + $0x60] sm:$0xff] %v2592_v56  ;;  %v2461_v44 = vadd.f32 %v2460_v5, %v2372_v0  ;;  %2235 = vmatmul.bf16.gmra.mxu1 %v3272_v6  ;;  %2324 = vmatmul.bf16.gmra.mxu2 %v3276_v27 }
 0x25c   : > { %2413 = vmatmul.bf16.gmra.mxu3 %v3280_v10 }
 0x25d   : > { %2502 = vmatmul.bf16.gmra.mxu0 %v3284_v33  ;;  %v2525_v23 = vmul.f32 %v4530_v22, %v2461_v44 }
 0x25e   : > { %v2285_v12 = vpop.f32.mrf.mxu2 }
 0x25f   : > { %v2561_v34 = vadd.f32 %v4536_v13, %v2525_v23  ;;  %v2286_v57 = vadd.f32 %v2285_v12, %v2197_v32  ;;  %v2374_v48 = vpop.f32.mrf.mxu3 }
 0x260   : > { %v2198_v14 = vpop.f32.mrf.mxu1 }
 0x261   : > { %v2593_v2 = vmax.f32 %v2561_v34, 0.0  ;;  %v2375_v63 = vadd.f32 %v2374_v48, %v2286_v57  ;;  %v2199_v36 = vadd.f32 %v2198_v14, %v4413_v51 }
 0x262   : > { %v2465_v17 = vpop.f32.mrf.mxu0 }
 0x263   : > { %2625 = vst [vmem:[%s4552_s21 + $0x68] sm:$0xff] %v2593_v2  ;;  %v2464_v60 = vadd.f32 %v2463_v53, %v2375_v63 }
 0x265   : > { %v2526_v3 = vmul.f32 %v4530_v22, %v2464_v60 }
 0x266   : > { %v2287_v1 = vpop.f32.mrf.mxu2 }
 0x267   : > { %v2562_v54 = vadd.f32 %v4536_v13, %v2526_v3  ;;  %v2288_v15 = vadd.f32 %v2287_v1, %v2199_v36  ;;  %v2376_v38 = vpop.f32.mrf.mxu3 }
 0x268   : > { %v2201_v31 = vpop.f32.mrf.mxu1 }
 0x269   : > { %v2594_v24 = vmax.f32 %v2562_v54, 0.0  ;;  %v2377_v39 = vadd.f32 %v2376_v38, %v2288_v15  ;;  %v2202_v7 = vadd.f32 %v2201_v31, %v4418_v11 }
 0x26a   : > { %v2468_v5 = vpop.f32.mrf.mxu0 }
 0x26b   : > { %2626 = vst [vmem:[%s4552_s21 + $0x70] sm:$0xff] %v2594_v24  ;;  %v2466_v62 = vadd.f32 %v2465_v17, %v2377_v39 }
 0x26d   : > { %v2527_v9 = vmul.f32 %v4530_v22, %v2466_v62 }
 0x26e   : > { %v2290_v29 = vpop.f32.mrf.mxu2 }
 0x26f   : > { %v2563_v35 = vadd.f32 %v4536_v13, %v2527_v9  ;;  %v2291_v51 = vadd.f32 %v2290_v29, %v2202_v7  ;;  %v2379_v55 = vpop.f32.mrf.mxu3 }
 0x270   : > { %v2203_v30 = vpop.f32.mrf.mxu1 }
 0x271   : > { %v2595_v4 = vmax.f32 %v2563_v35, 0.0  ;;  %v2380_v28 = vadd.f32 %v2379_v55, %v2291_v51  ;;  %v2204_v20 = vadd.f32 %v2203_v30, %v4427_v42 }
 0x272   : > { %v2470_v43 = vpop.f32.mrf.mxu0 }
 0x273   : > { %2627 = vst [vmem:[%s4552_s21 + $0x78] sm:$0xff] %v2595_v4  ;;  %v2469_v47 = vadd.f32 %v2468_v5, %v2380_v28 }
 0x275   : > { %v2528_v41 = vmul.f32 %v4530_v22, %v2469_v47 }
 0x276   : > { %v2292_v21 = vpop.f32.mrf.mxu2 }
 0x277   : > { %v2564_v18 = vadd.f32 %v4536_v13, %v2528_v41  ;;  %v2293_v11 = vadd.f32 %v2292_v21, %v2204_v20  ;;  %v2381_v6 = vpop.f32.mrf.mxu3 }
 0x278   : > { %v2206_v27 = vpop.f32.mrf.mxu1 }
 0x279   : > { %v2596_v61 = vmax.f32 %v2564_v18, 0.0  ;;  %v2382_v10 = vadd.f32 %v2381_v6, %v2293_v11  ;;  %v2207_v53 = vadd.f32 %v2206_v27, %v4432_v58 }
 0x27a   : > { %v2473_v33 = vpop.f32.mrf.mxu0 }
 0x27b   : > { %2628 = vst [vmem:[%s4552_s21 + $0x80] sm:$0xff] %v2596_v61  ;;  %v2471_v56 = vadd.f32 %v2470_v43, %v2382_v10 }
 0x27d   : > { %v2529_v0 = vmul.f32 %v4530_v22, %v2471_v56 }
 0x27e   : > { %v2295_v44 = vpop.f32.mrf.mxu2 }
 0x27f   : > { %v2565_v23 = vadd.f32 %v4536_v13, %v2529_v0  ;;  %v2296_v42 = vadd.f32 %v2295_v44, %v2207_v53  ;;  %v2384_v32 = vpop.f32.mrf.mxu3 }
 0x280   : > { %v2208_v12 = vpop.f32.mrf.mxu1 }
 0x281   : > { %v2597_v34 = vmax.f32 %v2565_v23, 0.0  ;;  %v2385_v57 = vadd.f32 %v2384_v32, %v2296_v42  ;;  %v2209_v63 = vadd.f32 %v2208_v12, %v4441_v25 }
 0x282   : > { %v2475_v48 = vpop.f32.mrf.mxu0 }
 0x283   : > { %2629 = vst [vmem:[%s4552_s21 + $0x88] sm:$0xff] %v2597_v34  ;;  %v2474_v14 = vadd.f32 %v2473_v33, %v2385_v57 }
 0x285   : > { %v2530_v2 = vmul.f32 %v4530_v22, %v2474_v14 }
 0x286   : > { %v2297_v17 = vpop.f32.mrf.mxu2 }
 0x287   : > { %v2566_v60 = vadd.f32 %v4536_v13, %v2530_v2  ;;  %v2298_v58 = vadd.f32 %v2297_v17, %v2209_v63  ;;  %v2386_v3 = vpop.f32.mrf.mxu3 }
 0x288   : > { %v2211_v36 = vpop.f32.mrf.mxu1 }
 0x289   : > { %v2598_v1 = vmax.f32 %v2566_v60, 0.0  ;;  %v2387_v54 = vadd.f32 %v2386_v3, %v2298_v58  ;;  %v2212_v24 = vadd.f32 %v2211_v36, %v4446_v49 }
 0x28a   : > { %v2478_v15 = vpop.f32.mrf.mxu0 }
 0x28b   : > { %2630 = vst [vmem:[%s4552_s21 + $0x90] sm:$0xff] %v2598_v1  ;;  %v2476_v38 = vadd.f32 %v2475_v48, %v2387_v54 }
 0x28d   : > { %v2531_v31 = vmul.f32 %v4530_v22, %v2476_v38 }
 0x28e   : > { %v2300_v39 = vpop.f32.mrf.mxu2 }
 0x28f   : > { %v2567_v5 = vadd.f32 %v4536_v13, %v2531_v31  ;;  %v2301_v25 = vadd.f32 %v2300_v39, %v2212_v24  ;;  %v2389_v62 = vpop.f32.mrf.mxu3 }
 0x290   : > { %v2213_v9 = vpop.f32.mrf.mxu1 }
 0x291   : > { %v2599_v7 = vmax.f32 %v2567_v5, 0.0  ;;  %v2390_v29 = vadd.f32 %v2389_v62, %v2301_v25  ;;  %v2214_v30 = vadd.f32 %v2213_v9, %v4455_v19 }
 0x292   : > { %v2480_v35 = vpop.f32.mrf.mxu0 }
 0x293   : > { %2631 = vst [vmem:[%s4552_s21 + $0x98] sm:$0xff] %v2599_v7  ;;  %v2479_v51 = vadd.f32 %v2478_v15, %v2390_v29 }
 0x295   : > { %v2532_v55 = vmul.f32 %v4530_v22, %v2479_v51 }
 0x296   : > { %v2302_v4 = vpop.f32.mrf.mxu2 }
 0x297   : > { %v2568_v28 = vadd.f32 %v4536_v13, %v2532_v55  ;;  %v2303_v49 = vadd.f32 %v2302_v4, %v2214_v30  ;;  %v2391_v43 = vpop.f32.mrf.mxu3 }
 0x298   : > { %v2216_v47 = vpop.f32.mrf.mxu1 }
 0x299   : > { %v2600_v41 = vmax.f32 %v2568_v28, 0.0  ;;  %v2392_v20 = vadd.f32 %v2391_v43, %v2303_v49  ;;  %v2217_v6 = vadd.f32 %v2216_v47, %v4460_v37 }
 0x29a   : > { %v2483_v21 = vpop.f32.mrf.mxu0 }
 0x29b   : > { %2632 = vst [vmem:[%s4552_s21 + $0xa0] sm:$0xff] %v2600_v41  ;;  %v2481_v18 = vadd.f32 %v2480_v35, %v2392_v20 }
 0x29d   : > { %v2533_v11 = vmul.f32 %v4530_v22, %v2481_v18 }
 0x29e   : > { %v2305_v27 = vpop.f32.mrf.mxu2 }
 0x29f   : > { %v2569_v61 = vadd.f32 %v4536_v13, %v2533_v11  ;;  %v2306_v19 = vadd.f32 %v2305_v27, %v2217_v6  ;;  %v2394_v10 = vpop.f32.mrf.mxu3 }
 0x2a0   : > { %v2218_v33 = vpop.f32.mrf.mxu1 }
 0x2a1   : > { %v2601_v56 = vmax.f32 %v2569_v61, 0.0  ;;  %v2395_v0 = vadd.f32 %v2394_v10, %v2306_v19  ;;  %v2219_v42 = vadd.f32 %v2218_v33, %v4469_v40 }
 0x2a2   : > { %v2485_v53 = vpop.f32.mrf.mxu0 }
 0x2a3   : > { %2633 = vst [vmem:[%s4552_s21 + $0xa8] sm:$0xff] %v2601_v56  ;;  %v2484_v44 = vadd.f32 %v2483_v21, %v2395_v0 }
 0x2a5   : > { %v2534_v23 = vmul.f32 %v4530_v22, %v2484_v44 }
 0x2a6   : > { %v2307_v32 = vpop.f32.mrf.mxu2 }
 0x2a7   : > { %v2570_v12 = vadd.f32 %v4536_v13, %v2534_v23  ;;  %v2308_v37 = vadd.f32 %v2307_v32, %v2219_v42  ;;  %v2396_v34 = vpop.f32.mrf.mxu3 }
 0x2a8   : > { %v2221_v57 = vpop.f32.mrf.mxu1 }
 0x2a9   : > { %v2602_v48 = vmax.f32 %v2570_v12, 0.0  ;;  %v2397_v14 = vadd.f32 %v2396_v34, %v2308_v37  ;;  %v2222_v60 = vadd.f32 %v2221_v57, %v4474_v8 }
 0x2aa   : > { %v2488_v2 = vpop.f32.mrf.mxu0 }
 0x2ab   : > { %2634 = vst [vmem:[%s4552_s21 + $0xb0] sm:$0xff] %v2602_v48  ;;  %v2486_v63 = vadd.f32 %v2485_v53, %v2397_v14 }
 0x2ad   : > { %v2535_v17 = vmul.f32 %v4530_v22, %v2486_v63 }
 0x2ae   : > { %v2310_v58 = vpop.f32.mrf.mxu2 }
 0x2af   : > { %v2571_v3 = vadd.f32 %v4536_v13, %v2535_v17  ;;  %v2311_v40 = vadd.f32 %v2310_v58, %v2222_v60  ;;  %v2399_v36 = vpop.f32.mrf.mxu3 }
 0x2b0   : > { %v2223_v1 = vpop.f32.mrf.mxu1 }
 0x2b1   : > { %v2603_v54 = vmax.f32 %v2571_v3, 0.0  ;;  %v2400_v15 = vadd.f32 %v2399_v36, %v2311_v40  ;;  %v2224_v39 = vadd.f32 %v2223_v1, %v4483_v52 }
 0x2b2   : > { %v2490_v38 = vpop.f32.mrf.mxu0 }
 0x2b3   : > { %2635 = vst [vmem:[%s4552_s21 + $0xb8] sm:$0xff] %v2603_v54  ;;  %v2489_v31 = vadd.f32 %v2488_v2, %v2400_v15 }
 0x2b5   : > { %v2536_v24 = vmul.f32 %v4530_v22, %v2489_v31 }
 0x2b6   : > { %v2312_v5 = vpop.f32.mrf.mxu2 }
 0x2b7   : > { %v2572_v25 = vadd.f32 %v4536_v13, %v2536_v24  ;;  %v2313_v8 = vadd.f32 %v2312_v5, %v2224_v39  ;;  %v2401_v62 = vpop.f32.mrf.mxu3 }
 0x2b8   : > { %v2226_v9 = vpop.f32.mrf.mxu1 }
 0x2b9   : > { %v2604_v7 = vmax.f32 %v2572_v25, 0.0  ;;  %v2402_v29 = vadd.f32 %v2401_v62, %v2313_v8  ;;  %v2227_v30 = vadd.f32 %v2226_v9, %v4488_v45 }
 0x2ba   : > { %v2493_v35 = vpop.f32.mrf.mxu0 }
 0x2bb   : > { %2636 = vst [vmem:[%s4552_s21 + $0xc0] sm:$0xff] %v2604_v7  ;;  %v2491_v51 = vadd.f32 %v2490_v38, %v2402_v29 }
 0x2bd   : > { %v2537_v55 = vmul.f32 %v4530_v22, %v2491_v51 }
 0x2be   : > { %v2315_v4 = vpop.f32.mrf.mxu2 }
 0x2bf   : > { %v2573_v28 = vadd.f32 %v4536_v13, %v2537_v55  ;;  %v2316_v52 = vadd.f32 %v2315_v4, %v2227_v30  ;;  %v2404_v49 = vpop.f32.mrf.mxu3 }
 0x2c0   : > { %v2228_v43 = vpop.f32.mrf.mxu1 }
 0x2c1   : > { %v2605_v47 = vmax.f32 %v2573_v28, 0.0  ;;  %v2405_v41 = vadd.f32 %v2404_v49, %v2316_v52  ;;  %v2229_v11 = vadd.f32 %v2228_v43, %v4497_v46 }
 0x2c2   : > { %v2495_v20 = vpop.f32.mrf.mxu0 }
 0x2c3   : > { %2637 = vst [vmem:[%s4552_s21 + $0xc8] sm:$0xff] %v2605_v47  ;;  %v2494_v21 = vadd.f32 %v2493_v35, %v2405_v41 }
 0x2c5   : > { %v2538_v18 = vmul.f32 %v4530_v22, %v2494_v21 }
 0x2c6   : > { %v2317_v6 = vpop.f32.mrf.mxu2 }
 0x2c7   : > { %v2574_v27 = vadd.f32 %v4536_v13, %v2538_v18  ;;  %v2318_v45 = vadd.f32 %v2317_v6, %v2229_v11  ;;  %v2406_v61 = vpop.f32.mrf.mxu3 }
 0x2c8   : > { %v2231_v19 = vpop.f32.mrf.mxu1 }
 0x2c9   : > { %v2606_v10 = vmax.f32 %v2574_v27, 0.0  ;;  %v2407_v33 = vadd.f32 %v2406_v61, %v2318_v45  ;;  %v2232_v44 = vadd.f32 %v2231_v19, %v4502_v59 }
 0x2ca   : > { %v2498_v0 = vpop.f32.mrf.mxu0 }
 0x2cb   : > { %2638 = vst [vmem:[%s4552_s21 + $0xd0] sm:$0xff] %v2606_v10  ;;  %v2496_v56 = vadd.f32 %v2495_v20, %v2407_v33 }
 0x2cd   : > { %v2539_v53 = vmul.f32 %v4530_v22, %v2496_v56 }
 0x2ce   : > { %v2320_v23 = vpop.f32.mrf.mxu2 }
 0x2cf   : > { %v2575_v42 = vadd.f32 %v4536_v13, %v2539_v53  ;;  %v2321_v46 = vadd.f32 %v2320_v23, %v2232_v44  ;;  %v2409_v32 = vpop.f32.mrf.mxu3 }
 0x2d0   : > { %v2233_v12 = vpop.f32.mrf.mxu1 }
 0x2d1   : > { %v2607_v37 = vmax.f32 %v2575_v42, 0.0  ;;  %v2410_v34 = vadd.f32 %v2409_v32, %v2321_v46  ;;  %v2234_v14 = vadd.f32 %v2233_v12, %v4511_v26 }
 0x2d2   : > { %v2500_v2 = vpop.f32.mrf.mxu0 }
 0x2d3   : > { %2639 = vst [vmem:[%s4552_s21 + $0xd8] sm:$0xff] %v2607_v37  ;;  %v2499_v57 = vadd.f32 %v2498_v0, %v2410_v34 }
 0x2d5   : > { %v2540_v48 = vmul.f32 %v4530_v22, %v2499_v57 }
 0x2d6   : > { %v2322_v63 = vpop.f32.mrf.mxu2 }
 0x2d7   : > { %v2576_v17 = vadd.f32 %v4536_v13, %v2540_v48  ;;  %v2323_v59 = vadd.f32 %v2322_v63, %v2234_v14  ;;  %v2411_v60 = vpop.f32.mrf.mxu3 }
 0x2d8   : > { %v2236_v58 = vpop.f32.mrf.mxu1 }
 0x2d9   : > { %v2608_v3 = vmax.f32 %v2576_v17, 0.0  ;;  %v2412_v40 = vadd.f32 %v2411_v60, %v2323_v59  ;;  %v2237_v54 = vadd.f32 %v2236_v58, %v4516_v50 }
 0x2da   : > { %v2503_v24 = vpop.f32.mrf.mxu0 }
 0x2db   : > { %2640 = vst [vmem:[%s4552_s21 + $0xe0] sm:$0xff] %v2608_v3  ;;  %v2501_v36 = vadd.f32 %v2500_v2, %v2412_v40 }
 0x2dd   : > { %v2541_v1 = vmul.f32 %v4530_v22, %v2501_v36 }
 0x2de   : > { %v2325_v15 = vpop.f32.mrf.mxu2 }
 0x2df   : > { %v2577_v38 = vadd.f32 %v4536_v13, %v2541_v1  ;;  %v2326_v26 = vadd.f32 %v2325_v15, %v2237_v54  ;;  %v2414_v31 = vpop.f32.mrf.mxu3 }
 0x2e0   : > { %v2238_v25 = vpop.f32.mrf.mxu1 }
 0x2e1   : > { %v2609_v39 = vmax.f32 %v2577_v38, 0.0  ;;  %v2415_v5 = vadd.f32 %v2414_v31, %v2326_v26  ;;  %v2239_v9 = vadd.f32 %v2238_v25, %v4524_v16 }
 0x2e2   : > { %v2505_v30 = vpop.f32.mrf.mxu0 }
 0x2e3   : > { %2641 = vst [vmem:[%s4552_s21 + $0xe8] sm:$0xff] %v2609_v39  ;;  %v2504_v8 = vadd.f32 %v2503_v24, %v2415_v5 }
 0x2e5   : > { %v2542_v62 = vmul.f32 %v4530_v22, %v2504_v8 }
 0x2e6   : > { %v2327_v7 = vpop.f32.mrf.mxu2 }
 0x2e7   : > { %v2578_v50 = vadd.f32 %v4536_v13, %v2542_v62  ;;  %v2328_v29 = vadd.f32 %v2327_v7, %v2239_v9  ;;  %v2416_v35 = vpop.f32.mrf.mxu3 }
 0x2e9   : > { %v2610_v51 = vmax.f32 %v2578_v50, 0.0  ;;  %v2417_v55 = vadd.f32 %v2416_v35, %v2328_v29 }
 0x2eb   : > { %2642 = vst [vmem:[%s4552_s21 + $0xf0] sm:$0xff] %v2610_v51  ;;  %v2506_v4 = vadd.f32 %v2505_v30, %v2417_v55 }
 0x2ed   : > { %v2543_v28 = vmul.f32 %v4530_v22, %v2506_v4 }
 0x2ef   : > { %v2579_v52 = vadd.f32 %v4536_v13, %v2543_v28 }
 0x2f1   : > { %v2611_v49 = vmax.f32 %v2579_v52, 0.0 }
 0x2f3   : > { %2643 = vst [vmem:[%s4552_s21 + $0xf8] sm:$0xff] %v2611_v49 }
 0x2f4 PF: > { %s15_s18 = sadd.s32 1, %s3833_s18  }
 0x2f5   : > { %p12_p4 = scmp.ge.s32.totalorder %s15_s18, 4  }
 0x2f7   :  { %14 = sbr.rel (!%p12_p4) target bundleno = 1 (0x1), region = 70 }

// kernel: wideresnet_forward.12
= control target key start
LH: loop header
LB: loop body
LE: loop exit
PB: predicated region body
PF: predicated region fallthrough
CT: control target
= control target key end

     0   :  { %s4113_s24 = smov 0   ;;  %s5059_s0 = inlined_call_operand.vmem [shape: bf16[512,1152], index: 0, kind: input, shape index: {}]   ;;  %s5060_s1 = inlined_call_operand.vmem [shape: bf16[1152,128], index: 1, kind: input, shape index: {}]   ;;  %s5061_s2 = inlined_call_operand.vmem [shape: f32[1,128], index: 2, kind: input, shape index: {}]   ;;  %s5062_s3 = inlined_call_operand.vmem [shape: f32[512,128], index: 3, kind: input, shape index: {}]   ;;  %s5063_s4 = inlined_call_operand.vmem [shape: f32[1,128], index: 4, kind: input, shape index: {}]   ;;  %s5064_s5 = inlined_call_operand.vmem [shape: f32[1,128], index: 5, kind: input, shape index: {}]   ;;  %s5065_s6 = inlined_call_operand.vmem [shape: f32[512,128], index: 6, kind: output, shape index: {0}]   ;;  %s5066_s7 = inlined_call_operand.vmem [shape: f32[512,128], index: 7, kind: output, shape index: {1}]  }
   0x1 LB: > { %s2932_s25 = sadd.s32 4294967295, %s4071_s24   ;;  %p2936_p0 = scmp.ge.s32.totalorder %s4071_s24, 1  ;;  %s4071_s24 = sphi %s4113_s24, %s18_s24  }
   0x2   : > { %p253_p1 = scmp.lt.s32.totalorder %s4071_s24, 3 }
   0x4   : > { %p254_p2 = pnand %p2936_p0, %p253_p1 }
   0x5   : > { %s2937_s9 = sshll.u32 (!%p254_p2), %s2932_s25, 5 }
   0x6   : > { %257 = sbr.rel (%p254_p2) target bundleno = 758 (0x2f6), region = 44  ;;  %p297_p3 = scmp.lt.s32.totalorder (!%p254_p2), %s2937_s9, 63 }
   0xb   : > { %v3962_v0 = vld [vmem:[%s5060_s1 + $0x38] sm:$0xff]  ;;  %v3961_v1 = vld [vmem:[%s5060_s1 + $0x30] sm:$0xff]  ;;  %v3960_v2 = vld [vmem:[%s5060_s1 + $0x28] sm:$0xff]  ;;  %s5068_s9 = smov (!%p297_p3, %s2937_s9), 63 }
   0xc   : > { %4027 = vmatpush.bf16.msra.mxu1 %v3962_v0  ;;  %4028 = vmatpush.bf16.msra.mxu2 %v3962_v0  ;;  %v3959_v3 = vld [vmem:[%s5060_s1 + $0x20] sm:$0xff]  ;;  %v3958_v4 = vld [vmem:[%s5060_s1 + $0x18] sm:$0xff]  ;;  %v3957_v5 = vld [vmem:[%s5060_s1 + $0x10] sm:$0xff]  ;;  %s4051_s16 = smul.u32 36, %s5068_s9  ;;  %s4775_s13 = sshll.u32 %s5068_s9, 3 }
   0xd   : > { %4029 = vmatpush.bf16.msra.mxu3 %v3962_v0  ;;  %1797 = vmatpush.bf16.msra.mxu0 %v3962_v0  ;;  %v3956_v6 = vld [vmem:[%s5060_s1 + $0x8] sm:$0xff]  ;;  %v3955_v7 = vld [vmem:[%s5060_s1] sm:$0xff]  ;;  %v3978_v16 = vld [vmem:[%s5060_s1 + $0xb8] sm:$0xff]  ;;  %s4801_s23 = scalar_lea.vmem %s5065_s6, %s4775_s13  ;;  %s4817_s27 = scalar_lea.vmem %s5066_s7, %s4775_s13 }
   0xe   : > { %s4148_s21 = scalar_lea.vmem %s5059_s0, %s4051_s16  ;;  %v3986_v17 = vld [vmem:[%s5060_s1 + $0xf8] sm:$0xff]  ;;  %v3977_v24 = vld [vmem:[%s5060_s1 + $0xb0] sm:$0xff]  ;;  %v3976_v28 = vld [vmem:[%s5060_s1 + $0xa8] sm:$0xff]  ;;  %s4782_s16 = scalar_lea.vmem %s5062_s3, %s4775_s13 }
   0xf   : > { %v3091_v8 = vld [vmem:[%s4148_s21 + $0x120] sm:$0xf]  ;;  %v3851_v9 = vld [vmem:[%s4148_s21 + $0x140] sm:$0xf0]  ;;  %v3970_v22 = vld [vmem:[%s5060_s1 + $0x78] sm:$0xff] }
  0x10   : > { %4030 = vmatpush.bf16.msra.mxu1 %v3961_v1  ;;  %4031 = vmatpush.bf16.msra.mxu2 %v3961_v1  ;;  %v3235_v10 = vld [vmem:[%s4148_s21 + $0x240] sm:$0xf]  ;;  %v3887_v11 = vld [vmem:[%s4148_s21 + $0x260] sm:$0xf0]  ;;  %v3092_v18 = vor.u32 %v3851_v9, %v3091_v8  ;;  %v3994_v23 = vld [vmem:[%s5060_s1 + $0x138] sm:$0xff] }
  0x11   : > { %4032 = vmatpush.bf16.msra.mxu3 %v3961_v1  ;;  %1798 = vmatpush.bf16.msra.mxu0 %v3961_v1  ;;  %v3379_v12 = vld [vmem:[%s4148_s21 + $0x360] sm:$0xf]  ;;  %v3923_v13 = vld [vmem:[%s4148_s21 + $0x380] sm:$0xf0]  ;;  %v3236_v19 = vor.u32 %v3887_v11, %v3235_v10  ;;  %v3985_v25 = vld [vmem:[%s5060_s1 + $0xf0] sm:$0xff] }
  0x12   : > { %v2947_v14 = vld [vmem:[%s4148_s21] sm:$0xf]  ;;  %v3815_v15 = vld [vmem:[%s4148_s21 + $0x20] sm:$0xf0]  ;;  %v3380_v20 = vor.u32 %v3923_v13, %v3379_v12  ;;  %v3969_v26 = vld [vmem:[%s5060_s1 + $0x70] sm:$0xff] }
  0x13   : > { %v2948_v21 = vor.u32 %v3815_v15, %v2947_v14  ;;  %v3993_v27 = vld [vmem:[%s5060_s1 + $0x130] sm:$0xff]  ;;  %v3984_v29 = vld [vmem:[%s5060_s1 + $0xe8] sm:$0xff]  ;;  %v3975_v33 = vld [vmem:[%s5060_s1 + $0xa0] sm:$0xff] }
  0x14   : > { %4033 = vmatpush.bf16.msra.mxu1 %v3960_v2  ;;  %4034 = vmatpush.bf16.msra.mxu2 %v3960_v2  ;;  %v3968_v30 = vld [vmem:[%s5060_s1 + $0x68] sm:$0xff]  ;;  %v3983_v34 = vld [vmem:[%s5060_s1 + $0xe0] sm:$0xff]  ;;  %v3974_v44 = vld [vmem:[%s5060_s1 + $0x98] sm:$0xff] }
  0x15   : > { %4035 = vmatpush.bf16.msra.mxu3 %v3960_v2  ;;  %1799 = vmatpush.bf16.msra.mxu0 %v3960_v2  ;;  %v3992_v31 = vld [vmem:[%s5060_s1 + $0x128] sm:$0xff]  ;;  %v3967_v42 = vld [vmem:[%s5060_s1 + $0x60] sm:$0xff]  ;;  %v3982_v45 = vld [vmem:[%s5060_s1 + $0xd8] sm:$0xff] }
  0x16   : > { %v3127_v32 = vld [vmem:[%s4148_s21 + $0x168] sm:$0xf]  ;;  %v3860_v35 = vld [vmem:[%s4148_s21 + $0x188] sm:$0xf0]  ;;  %v3991_v43 = vld [vmem:[%s5060_s1 + $0x120] sm:$0xff] }
  0x17   : > { %v3271_v36 = vld [vmem:[%s4148_s21 + $0x288] sm:$0xf]  ;;  %v3896_v37 = vld [vmem:[%s4148_s21 + $0x2a8] sm:$0xf0]  ;;  %v3128_v46 = vor.u32 %v3860_v35, %v3127_v32  ;;  %v3966_v50 = vld [vmem:[%s5060_s1 + $0x58] sm:$0xff] }
  0x18   : > { %4036 = vmatpush.bf16.msra.mxu1 %v3959_v3  ;;  %4037 = vmatpush.bf16.msra.mxu2 %v3959_v3  ;;  %v3415_v38 = vld [vmem:[%s4148_s21 + $0x3a8] sm:$0xf]  ;;  %v3932_v39 = vld [vmem:[%s4148_s21 + $0x3c8] sm:$0xf0]  ;;  %v3272_v47 = vor.u32 %v3896_v37, %v3271_v36  ;;  %v3990_v51 = vld [vmem:[%s5060_s1 + $0x118] sm:$0xff] }
  0x19   : > { %4038 = vmatpush.bf16.msra.mxu3 %v3959_v3  ;;  %1800 = vmatpush.bf16.msra.mxu0 %v3959_v3  ;;  %v2983_v40 = vld [vmem:[%s4148_s21 + $0x48] sm:$0xf]  ;;  %v3824_v41 = vld [vmem:[%s4148_s21 + $0x68] sm:$0xf0]  ;;  %v3416_v48 = vor.u32 %v3932_v39, %v3415_v38  ;;  %v3973_v52 = vld [vmem:[%s5060_s1 + $0x90] sm:$0xff] }
  0x1a   : > { %v2984_v49 = vor.u32 %v3824_v41, %v2983_v40  ;;  %v3981_v53 = vld [vmem:[%s5060_s1 + $0xd0] sm:$0xff]  ;;  %v3972_v56 = vld [vmem:[%s5060_s1 + $0x88] sm:$0xff]  ;;  %v3971_v61 = vld [vmem:[%s5060_s1 + $0x80] sm:$0xff] }
  0x1b   : > { %v3965_v54 = vld [vmem:[%s5060_s1 + $0x50] sm:$0xff]  ;;  %v3980_v57 = vld [vmem:[%s5060_s1 + $0xc8] sm:$0xff]  ;;  %v3979_v62 = vld [vmem:[%s5060_s1 + $0xc0] sm:$0xff] }
  0x1c   : > { %4039 = vmatpush.bf16.msra.mxu1 %v3958_v4  ;;  %4040 = vmatpush.bf16.msra.mxu2 %v3958_v4  ;;  %v3989_v55 = vld [vmem:[%s5060_s1 + $0x110] sm:$0xff]  ;;  %v3964_v58 = vld [vmem:[%s5060_s1 + $0x48] sm:$0xff]  ;;  %v4010_v12 = vld [vmem:[%s5060_s1 + $0x1b8] sm:$0xff] }
  0x1d   : > { %4041 = vmatpush.bf16.msra.mxu3 %v3958_v4  ;;  %1801 = vmatpush.bf16.msra.mxu0 %v3958_v4  ;;  %v3988_v59 = vld [vmem:[%s5060_s1 + $0x108] sm:$0xff]  ;;  %v3163_v60 = vld [vmem:[%s4148_s21 + $0x1b0] sm:$0xf]  ;;  %v3869_v63 = vld [vmem:[%s4148_s21 + $0x1d0] sm:$0xf0] }
  0x1e   : > { %v3307_v0 = vld [vmem:[%s4148_s21 + $0x2d0] sm:$0xf]  ;;  %v3905_v1 = vld [vmem:[%s4148_s21 + $0x2f0] sm:$0xf0]  ;;  %v3164_v8 = vor.u32 %v3869_v63, %v3163_v60  ;;  %v4018_v13 = vld [vmem:[%s5060_s1 + $0x1f8] sm:$0xff] }
  0x1f   : > { %v3451_v2 = vld [vmem:[%s4148_s21 + $0x3f0] sm:$0xf]  ;;  %v3941_v3 = vld [vmem:[%s4148_s21 + $0x410] sm:$0xf0]  ;;  %v3308_v9 = vor.u32 %v3905_v1, %v3307_v0  ;;  %v4002_v14 = vld [vmem:[%s5060_s1 + $0x178] sm:$0xff] }
  0x20   : > { %4042 = vmatpush.bf16.msra.mxu1 %v3957_v5  ;;  %4043 = vmatpush.bf16.msra.mxu2 %v3957_v5  ;;  %v3019_v4 = vld [vmem:[%s4148_s21 + $0x90] sm:$0xf]  ;;  %v3452_v10 = vor.u32 %v3941_v3, %v3451_v2  ;;  %v4026_v15 = vld [vmem:[%s5060_s1 + $0x238] sm:$0xff]  ;;  %v3812_v32 = vld [vmem:[%s4148_s21 + $0xc] sm:$0xf] }
  0x21   : > { %4044 = vmatpush.bf16.msra.mxu3 %v3957_v5  ;;  %1802 = vmatpush.bf16.msra.mxu0 %v3957_v5  ;;  %v3833_v5 = vld [vmem:[%s4148_s21 + $0xb0] sm:$0xf0]  ;;  %v3830_v60 = vld [vmem:[%s4148_s21 + $0x9c] sm:$0xf]  ;;  %v3835_v63 = vld [vmem:[%s4148_s21 + $0xc0] sm:$0xf0] }
  0x22   : > { %v3020_v11 = vor.u32 %v3833_v5, %v3019_v4  ;;  %v3817_v35 = vld [vmem:[%s4148_s21 + $0x30] sm:$0xf0]  ;;  %v4008_v4 = vld [vmem:[%s5060_s1 + $0x1a8] sm:$0xff] }
  0x23   : > { %v4009_v40 = vld [vmem:[%s5060_s1 + $0x1b0] sm:$0xff]  ;;  %v4016_v5 = vld [vmem:[%s5060_s1 + $0x1e8] sm:$0xff] }
  0x24   : > { %4045 = vmatpush.bf16.msra.mxu1 %v3956_v6  ;;  %4046 = vmatpush.bf16.msra.mxu2 %v3956_v6  ;;  %v4017_v41 = vld [vmem:[%s5060_s1 + $0x1f0] sm:$0xff] }
  0x25   : > { %4047 = vmatpush.bf16.msra.mxu3 %v3956_v6  ;;  %1803 = vmatpush.bf16.msra.mxu0 %v3956_v6  ;;  %v3963_v6 = vld [vmem:[%s5060_s1 + $0x40] sm:$0xff] }
  0x28   : > { %4048 = vmatpush.bf16.msra.mxu1 %v3955_v7  ;;  %4049 = vmatpush.bf16.msra.mxu2 %v3955_v7 }
  0x29   : > { %4050 = vmatpush.bf16.msra.mxu3 %v3955_v7  ;;  %1804 = vmatpush.bf16.msra.mxu0 %v3955_v7  ;;  %v3987_v7 = vld [vmem:[%s5060_s1 + $0x100] sm:$0xff] }
  0x2b   : > { %1825 = vmatmul.bf16.vlgmr.msra.gmra.mxu1 %v3092_v18  ;;  %1845 = vmatmul.bf16.vlgmr.msra.gmra.mxu2 %v3236_v19  ;;  %v3343_v18 = vld [vmem:[%s4148_s21 + $0x318] sm:$0xf]  ;;  %v3914_v19 = vld [vmem:[%s4148_s21 + $0x338] sm:$0xf0] }
  0x2c   : > { %1975 = vmatpush.bf16.msrb.mxu2 %v3978_v16  ;;  %1865 = vmatmul.bf16.vlgmr.msra.gmra.mxu3 %v3380_v20  ;;  %v3199_v16 = vld [vmem:[%s4148_s21 + $0x1f8] sm:$0xf] }
  0x2d   : > { %2064 = vmatpush.bf16.msrb.mxu3 %v3986_v17  ;;  %1805 = vmatmul.bf16.vlgmr.msra.gmra.mxu0 %v2948_v21  ;;  %v3878_v17 = vld [vmem:[%s4148_s21 + $0x218] sm:$0xf0]  ;;  %v3487_v20 = vld [vmem:[%s4148_s21 + $0x438] sm:$0xf] }
  0x2e   : > { %1886 = vmatpush.bf16.msrb.mxu1 %v3970_v22  ;;  %2153 = vmatpush.bf16.msrb.mxu0 %v3994_v23  ;;  %v3950_v21 = vld [vmem:[%s4148_s21 + $0x458] sm:$0xf0]  ;;  %v3055_v22 = vld [vmem:[%s4148_s21 + $0xd8] sm:$0xf] }
  0x2f   : > { %v3842_v23 = vld [vmem:[%s4148_s21 + $0xf8] sm:$0xf0] }
  0x30   : > { %1976 = vmatpush.bf16.msrb.mxu2 %v3977_v24  ;;  %v3200_v24 = vor.u32 %v3878_v17, %v3199_v16 }
  0x31   : > { %2065 = vmatpush.bf16.msrb.mxu3 %v3985_v25  ;;  %v3344_v25 = vor.u32 %v3914_v19, %v3343_v18 }
  0x32   : > { %1887 = vmatpush.bf16.msrb.mxu1 %v3969_v26  ;;  %2154 = vmatpush.bf16.msrb.mxu0 %v3993_v27  ;;  %v3488_v26 = vor.u32 %v3950_v21, %v3487_v20  ;;  %v3056_v27 = vor.u32 %v3842_v23, %v3055_v22  ;;  %v4352_v20 = vld [vmem:[%s5061_s2] ss:$0 sm:$0xff]  ;;  %v3847_v21 = vld [vmem:[%s4148_s21 + $0x124] sm:$0xf]  ;;  %v3093_v22 = vld [vmem:[%s4148_s21 + $0x144] sm:$0xf0] }
  0x33   : > { %v3099_v23 = vld [vmem:[%s4148_s21 + $0x128] sm:$0xf] }
  0x34   : > { %1977 = vmatpush.bf16.msrb.mxu2 %v3976_v28  ;;  %v3811_v28 = vld [vmem:[%s4148_s21 + $0x4] sm:$0xf] }
  0x35   : > { %2066 = vmatpush.bf16.msrb.mxu3 %v3984_v29  ;;  %v2949_v29 = vld [vmem:[%s4148_s21 + $0x24] sm:$0xf0] }
  0x36   : > { %1888 = vmatpush.bf16.msrb.mxu1 %v3968_v30  ;;  %2155 = vmatpush.bf16.msrb.mxu0 %v3992_v31  ;;  %v2955_v30 = vld [vmem:[%s4148_s21 + $0x8] sm:$0xf]  ;;  %v3816_v31 = vld [vmem:[%s4148_s21 + $0x28] sm:$0xf0]  ;;  %v2952_v36 = vor.u32 %v3811_v28, %v2949_v29  ;;  %v3853_v28 = vld [vmem:[%s4148_s21 + $0x150] sm:$0xf0]  ;;  %v3096_v29 = vor.u32 %v3847_v21, %v3093_v22 }
  0x37   : > { %v2956_v37 = vor.u32 %v3816_v31, %v2955_v30 }
  0x38   : > { %1978 = vmatpush.bf16.msrb.mxu2 %v3975_v33  ;;  %v2957_v33 = vld [vmem:[%s4148_s21 + $0x2c] sm:$0xf0] }
  0x39   : > { %2067 = vmatpush.bf16.msrb.mxu3 %v3983_v34  ;;  %v2963_v34 = vld [vmem:[%s4148_s21 + $0x10] sm:$0xf]  ;;  %v2960_v38 = vor.u32 %v3812_v32, %v2957_v33 }
  0x3a   : > { %1889 = vmatpush.bf16.msrb.mxu1 %v3967_v42  ;;  %2156 = vmatpush.bf16.msrb.mxu0 %v3991_v43  ;;  %v2964_v39 = vor.u32 %v3817_v35, %v2963_v34  ;;  %v4001_v42 = vld [vmem:[%s5060_s1 + $0x170] sm:$0xff] }
  0x3b   : > { %1830 = vmatmul.bf16.gmra.mxu1 %v3128_v46  ;;  %1850 = vmatmul.bf16.gmra.mxu2 %v3272_v47  ;;  %v4025_v43 = vld [vmem:[%s5060_s1 + $0x230] sm:$0xff] }
  0x3c   : > { %1979 = vmatpush.bf16.msrb.mxu2 %v3974_v44  ;;  %1870 = vmatmul.bf16.gmra.mxu3 %v3416_v48  ;;  %v3820_v44 = vld [vmem:[%s4148_s21 + $0x4c] sm:$0xf]  ;;  %v2991_v46 = vld [vmem:[%s4148_s21 + $0x50] sm:$0xf]  ;;  %v3825_v47 = vld [vmem:[%s4148_s21 + $0x70] sm:$0xf0] }
  0x3d   : > { %2068 = vmatpush.bf16.msrb.mxu3 %v3982_v45  ;;  %1810 = vmatmul.bf16.gmra.mxu0 %v2984_v49  ;;  %v2985_v45 = vld [vmem:[%s4148_s21 + $0x6c] sm:$0xf0]  ;;  %v3821_v48 = vld [vmem:[%s4148_s21 + $0x54] sm:$0xf]  ;;  %v2993_v49 = vld [vmem:[%s4148_s21 + $0x74] sm:$0xf0] }
  0x3e   : > { %1890 = vmatpush.bf16.msrb.mxu1 %v3966_v50  ;;  %2157 = vmatpush.bf16.msrb.mxu0 %v3990_v51  ;;  %v2999_v50 = vld [vmem:[%s4148_s21 + $0x58] sm:$0xf]  ;;  %v3826_v51 = vld [vmem:[%s4148_s21 + $0x78] sm:$0xf0] }
  0x40   : > { %1980 = vmatpush.bf16.msrb.mxu2 %v3973_v52  ;;  %v2988_v52 = vor.u32 %v3820_v44, %v2985_v45 }
  0x41   : > { %2069 = vmatpush.bf16.msrb.mxu3 %v3981_v53  ;;  %v2992_v53 = vor.u32 %v3825_v47, %v2991_v46  ;;  %v4023_v46 = vld [vmem:[%s5060_s1 + $0x220] sm:$0xff]  ;;  %v3856_v47 = vld [vmem:[%s4148_s21 + $0x16c] sm:$0xf] }
  0x42   : > { %1891 = vmatpush.bf16.msrb.mxu1 %v3965_v54  ;;  %2158 = vmatpush.bf16.msrb.mxu0 %v3989_v55  ;;  %v2996_v54 = vor.u32 %v3821_v48, %v2993_v49  ;;  %v3000_v55 = vor.u32 %v3826_v51, %v2999_v50  ;;  %v3129_v48 = vld [vmem:[%s4148_s21 + $0x18c] sm:$0xf0]  ;;  %v3861_v50 = vld [vmem:[%s4148_s21 + $0x190] sm:$0xf0] }
  0x43   : > { %v3135_v49 = vld [vmem:[%s4148_s21 + $0x170] sm:$0xf]  ;;  %v3857_v51 = vld [vmem:[%s4148_s21 + $0x174] sm:$0xf] }
  0x44   : > { %1981 = vmatpush.bf16.msrb.mxu2 %v3972_v56  ;;  %v3829_v56 = vld [vmem:[%s4148_s21 + $0x94] sm:$0xf] }
  0x45   : > { %2070 = vmatpush.bf16.msrb.mxu3 %v3980_v57  ;;  %v3021_v57 = vld [vmem:[%s4148_s21 + $0xb4] sm:$0xf0] }
  0x46   : > { %1892 = vmatpush.bf16.msrb.mxu1 %v3964_v58  ;;  %2159 = vmatpush.bf16.msrb.mxu0 %v3988_v59  ;;  %v3027_v58 = vld [vmem:[%s4148_s21 + $0x98] sm:$0xf]  ;;  %v3834_v59 = vld [vmem:[%s4148_s21 + $0xb8] sm:$0xf0]  ;;  %v3024_v0 = vor.u32 %v3829_v56, %v3021_v57 }
  0x47   : > { %v3028_v1 = vor.u32 %v3834_v59, %v3027_v58  ;;  %v3132_v58 = vor.u32 %v3856_v47, %v3129_v48  ;;  %v3136_v59 = vor.u32 %v3861_v50, %v3135_v49  ;;  %v3201_v47 = vld [vmem:[%s4148_s21 + $0x21c] sm:$0xf0]  ;;  %v3879_v49 = vld [vmem:[%s4148_s21 + $0x220] sm:$0xf0] }
  0x48   : > { %1982 = vmatpush.bf16.msrb.mxu2 %v3971_v61  ;;  %v3029_v61 = vld [vmem:[%s4148_s21 + $0xbc] sm:$0xf0]  ;;  %v3875_v50 = vld [vmem:[%s4148_s21 + $0x204] sm:$0xf] }
  0x49   : > { %2071 = vmatpush.bf16.msrb.mxu3 %v3979_v62  ;;  %v3035_v62 = vld [vmem:[%s4148_s21 + $0xa0] sm:$0xf]  ;;  %v3032_v2 = vor.u32 %v3830_v60, %v3029_v61 }
  0x4a   : > { %1893 = vmatpush.bf16.msrb.mxu1 %v3963_v6  ;;  %2160 = vmatpush.bf16.msrb.mxu0 %v3987_v7  ;;  %v3036_v3 = vor.u32 %v3835_v63, %v3035_v62  ;;  %v4000_v6 = vld [vmem:[%s5060_s1 + $0x168] sm:$0xff]  ;;  %v3207_v48 = vld [vmem:[%s4148_s21 + $0x200] sm:$0xf] }
  0x4b   : > { %1835 = vmatmul.bf16.gmra.mxu1 %v3164_v8  ;;  %1855 = vmatmul.bf16.gmra.mxu2 %v3308_v9  ;;  %v4024_v7 = vld [vmem:[%s5060_s1 + $0x228] sm:$0xff]  ;;  %v3838_v8 = vld [vmem:[%s4148_s21 + $0xdc] sm:$0xf]  ;;  %v3057_v9 = vld [vmem:[%s4148_s21 + $0xfc] sm:$0xf0] }
  0x4c   : > { %1875 = vmatmul.bf16.gmra.mxu3 %v3452_v10  ;;  %2331 = vmatpush.bf16.msra.mxu2 %v4010_v12  ;;  %v3063_v10 = vld [vmem:[%s4148_s21 + $0xe0] sm:$0xf]  ;;  %v3839_v12 = vld [vmem:[%s4148_s21 + $0xe4] sm:$0xf]  ;;  %v3060_v16 = vor.u32 %v3838_v8, %v3057_v9  ;;  %v3865_v9 = vld [vmem:[%s4148_s21 + $0x1b4] sm:$0xf] }
  0x4d   : > { %1815 = vmatmul.bf16.gmra.mxu0 %v3020_v11  ;;  %2420 = vmatpush.bf16.msra.mxu3 %v4018_v13  ;;  %v3843_v11 = vld [vmem:[%s4148_s21 + $0x100] sm:$0xf0]  ;;  %v3065_v13 = vld [vmem:[%s4148_s21 + $0x104] sm:$0xf0] }
  0x4e   : > { %2242 = vmatpush.bf16.msra.mxu1 %v4002_v14  ;;  %2509 = vmatpush.bf16.msra.mxu0 %v4026_v15  ;;  %v3071_v14 = vld [vmem:[%s4148_s21 + $0xe8] sm:$0xf]  ;;  %v3844_v15 = vld [vmem:[%s4148_s21 + $0x108] sm:$0xf0]  ;;  %v3064_v17 = vor.u32 %v3843_v11, %v3063_v10  ;;  %v3068_v18 = vor.u32 %v3839_v12, %v3065_v13  ;;  %v3165_v10 = vld [vmem:[%s4148_s21 + $0x1d4] sm:$0xf0] }
  0x4f   : > { %v3072_v19 = vor.u32 %v3844_v15, %v3071_v14  ;;  %v3171_v11 = vld [vmem:[%s4148_s21 + $0x1b8] sm:$0xf]  ;;  %v3870_v12 = vld [vmem:[%s4148_s21 + $0x1d8] sm:$0xf0]  ;;  %v3173_v14 = vld [vmem:[%s4148_s21 + $0x1dc] sm:$0xf0]  ;;  %v3168_v21 = vor.u32 %v3865_v9, %v3165_v10 }
  0x50   : > { %2332 = vmatpush.bf16.msra.mxu2 %v4009_v40  ;;  %v3866_v13 = vld [vmem:[%s4148_s21 + $0x1bc] sm:$0xf]  ;;  %v3179_v15 = vld [vmem:[%s4148_s21 + $0x1c0] sm:$0xf]  ;;  %v3172_v22 = vor.u32 %v3870_v12, %v3171_v11 }
  0x51   : > { %2421 = vmatpush.bf16.msra.mxu3 %v4017_v41 }
  0x52   : > { %2243 = vmatpush.bf16.msra.mxu1 %v4001_v42  ;;  %2510 = vmatpush.bf16.msra.mxu0 %v4025_v43  ;;  %v3999_v43 = vld [vmem:[%s5060_s1 + $0x160] sm:$0xff] }
  0x54   : > { %2333 = vmatpush.bf16.msra.mxu2 %v4008_v4 }
  0x55   : > { %2422 = vmatpush.bf16.msra.mxu3 %v4016_v5 }
  0x56   : > { %2244 = vmatpush.bf16.msra.mxu1 %v4000_v6  ;;  %2511 = vmatpush.bf16.msra.mxu0 %v4024_v7 }
  0x5a   : > { %2245 = vmatpush.bf16.msra.mxu1 %v3999_v43  ;;  %2512 = vmatpush.bf16.msra.mxu0 %v4023_v46  ;;  %v4022_v43 = vld [vmem:[%s5060_s1 + $0x218] sm:$0xff] }
  0x5b   : > { %1840 = vmatmul.bf16.gmra.mxu1 %v3200_v24  ;;  %1860 = vmatmul.bf16.gmra.mxu2 %v3344_v25  ;;  %v3852_v24 = vld [vmem:[%s4148_s21 + $0x148] sm:$0xf0]  ;;  %v3874_v46 = vld [vmem:[%s4148_s21 + $0x1fc] sm:$0xf] }
  0x5c   : > { %1880 = vmatmul.bf16.gmra.mxu3 %v3488_v26  ;;  %v3848_v25 = vld [vmem:[%s4148_s21 + $0x12c] sm:$0xf]  ;;  %v3101_v26 = vld [vmem:[%s4148_s21 + $0x14c] sm:$0xf0]  ;;  %v3100_v30 = vor.u32 %v3852_v24, %v3099_v23 }
  0x5d   : > { %1820 = vmatmul.bf16.gmra.mxu0 %v3056_v27  ;;  %v3107_v27 = vld [vmem:[%s4148_s21 + $0x130] sm:$0xf]  ;;  %v3104_v32 = vor.u32 %v3848_v25, %v3101_v26  ;;  %v3176_v25 = vor.u32 %v3866_v13, %v3173_v14 }
  0x5e   : > { %v3108_v33 = vor.u32 %v3853_v28, %v3107_v27  ;;  %2513 = vmatpush.bf16.msra.mxu0 %v4022_v43 }
  0x6b   : > { %1894 = vmatmul.bf16.vlgmr.msrb.gmra.mxu1 %v2952_v36  ;;  %1983 = vmatmul.bf16.vlgmr.msrb.gmra.mxu2 %v2956_v37  ;;  %v4007_v36 = vld [vmem:[%s5060_s1 + $0x1a0] sm:$0xff] }
  0x6c   : > { %2072 = vmatmul.bf16.vlgmr.msrb.gmra.mxu3 %v2960_v38  ;;  %v4015_v37 = vld [vmem:[%s5060_s1 + $0x1e0] sm:$0xff]  ;;  %2334 = vmatpush.bf16.msra.mxu2 %v4007_v36 }
  0x6d   : > { %2161 = vmatmul.bf16.vlgmr.msrb.gmra.mxu0 %v2964_v39  ;;  %2423 = vmatpush.bf16.msra.mxu3 %v4015_v37 }
  0x7b   : > { %1899 = vmatmul.bf16.gmra.mxu1 %v2988_v52  ;;  %1988 = vmatmul.bf16.gmra.mxu2 %v2992_v53  ;;  %v3137_v52 = vld [vmem:[%s4148_s21 + $0x194] sm:$0xf0] }
  0x7c   : > { %2077 = vmatmul.bf16.gmra.mxu3 %v2996_v54  ;;  %v3143_v53 = vld [vmem:[%s4148_s21 + $0x178] sm:$0xf]  ;;  %v3862_v54 = vld [vmem:[%s4148_s21 + $0x198] sm:$0xf0]  ;;  %v3140_v62 = vor.u32 %v3857_v51, %v3137_v52  ;;  %v3209_v51 = vld [vmem:[%s4148_s21 + $0x224] sm:$0xf0] }
  0x7d   : > { %2166 = vmatmul.bf16.gmra.mxu0 %v3000_v55  ;;  %v3144_v63 = vor.u32 %v3862_v54, %v3143_v53  ;;  %v3215_v52 = vld [vmem:[%s4148_s21 + $0x208] sm:$0xf]  ;;  %v3880_v53 = vld [vmem:[%s4148_s21 + $0x228] sm:$0xf0] }
  0x8b   : > { %1904 = vmatmul.bf16.gmra.mxu1 %v3024_v0  ;;  %1993 = vmatmul.bf16.gmra.mxu2 %v3028_v1 }
  0x8c   : > { %2082 = vmatmul.bf16.gmra.mxu3 %v3032_v2 }
  0x8d   : > { %2171 = vmatmul.bf16.gmra.mxu0 %v3036_v3 }
  0x9b   : > { %1909 = vmatmul.bf16.gmra.mxu1 %v3060_v16  ;;  %1998 = vmatmul.bf16.gmra.mxu2 %v3064_v17  ;;  %v3871_v16 = vld [vmem:[%s4148_s21 + $0x1e0] sm:$0xf0] }
  0x9c   : > { %2087 = vmatmul.bf16.gmra.mxu3 %v3068_v18  ;;  %v3180_v26 = vor.u32 %v3871_v16, %v3179_v15  ;;  %v3883_v16 = vld [vmem:[%s4148_s21 + $0x244] sm:$0xf] }
  0x9d   : > { %2176 = vmatmul.bf16.gmra.mxu0 %v3072_v19 }
  0xa8   : > { %v1826_v31 = vpop.f32.mrf.mxu1 }
  0xa9   : > { %v4363_v34 = vadd.f32 %v4352_v20, %v1826_v31 }
  0xaa   : > { %v4365_v35 = vpop.f32.mrf.mxu0 }
  0xab   : > { %1914 = vmatmul.bf16.gmra.mxu1 %v3096_v29  ;;  %2003 = vmatmul.bf16.gmra.mxu2 %v3100_v30  ;;  %v4006_v29 = vld [vmem:[%s5060_s1 + $0x198] sm:$0xff] }
  0xac   : > { %2092 = vmatmul.bf16.gmra.mxu3 %v3104_v32  ;;  %v4014_v30 = vld [vmem:[%s5060_s1 + $0x1d8] sm:$0xff]  ;;  %2335 = vmatpush.bf16.msra.mxu2 %v4006_v29 }
  0xad   : > { %2181 = vmatmul.bf16.gmra.mxu0 %v3108_v33  ;;  %2424 = vmatpush.bf16.msra.mxu3 %v4014_v30  ;;  %v1807_v30 = vadd.f32 %v4352_v20, %v4365_v35  ;;  %v4005_v35 = vld [vmem:[%s5060_s1 + $0x190] sm:$0xff] }
  0xae   : > { %v1846_v38 = vpop.f32.mrf.mxu2 }
  0xaf   : > { %v4374_v39 = vadd.f32 %v4352_v20, %v1846_v38  ;;  %v1866_v40 = vpop.f32.mrf.mxu3 }
  0xb0   : > { %v4377_v41 = vadd.f32 %v4352_v20, %v1866_v40  ;;  %v1828_v42 = vpop.f32.mrf.mxu1  ;;  %2336 = vmatpush.bf16.msra.mxu2 %v4005_v35 }
  0xb1   : > { %v4383_v44 = vadd.f32 %v4352_v20, %v1828_v42  ;;  %v3998_v42 = vld [vmem:[%s5060_s1 + $0x158] sm:$0xff] }
  0xb2   : > { %v4385_v45 = vpop.f32.mrf.mxu0  ;;  %2246 = vmatpush.bf16.msra.mxu1 %v3998_v42 }
  0xb6   : > { %v1848_v55 = vpop.f32.mrf.mxu2 }
  0xb7   : > { %v4399_v56 = vadd.f32 %v4352_v20, %v1848_v55  ;;  %v1868_v57 = vpop.f32.mrf.mxu3 }
  0xb8   : > { %v4402_v60 = vadd.f32 %v4352_v20, %v1868_v57  ;;  %v1831_v61 = vpop.f32.mrf.mxu1 }
  0xb9   : > { %v4405_v0 = vadd.f32 %v4352_v20, %v1831_v61 }
  0xba   : > { %v4407_v1 = vpop.f32.mrf.mxu0 }
  0xbb   : > { %1919 = vmatmul.bf16.gmra.mxu1 %v3132_v58  ;;  %2008 = vmatmul.bf16.gmra.mxu2 %v3136_v59  ;;  %v3204_v58 = vor.u32 %v3874_v46, %v3201_v47  ;;  %v3208_v59 = vor.u32 %v3879_v49, %v3207_v48 }
  0xbc   : > { %2097 = vmatmul.bf16.gmra.mxu3 %v3140_v62 }
  0xbd   : > { %2186 = vmatmul.bf16.gmra.mxu0 %v3144_v63  ;;  %v3212_v63 = vor.u32 %v3875_v50, %v3209_v51  ;;  %v4013_v51 = vld [vmem:[%s5060_s1 + $0x1d0] sm:$0xff] }
  0xbe   : > { %v1851_v2 = vpop.f32.mrf.mxu2  ;;  %2425 = vmatpush.bf16.msra.mxu3 %v4013_v51 }
  0xbf   : > { %v4410_v3 = vadd.f32 %v4352_v20, %v1851_v2  ;;  %v1871_v4 = vpop.f32.mrf.mxu3  ;;  %v3216_v2 = vor.u32 %v3880_v53, %v3215_v52  ;;  %v1809_v53 = vadd.f32 %v4352_v20, %v4385_v45  ;;  %v3273_v45 = vld [vmem:[%s4148_s21 + $0x2ac] sm:$0xf0] }
  0xc0   : > { %v4413_v5 = vadd.f32 %v4352_v20, %v1871_v4  ;;  %v1833_v6 = vpop.f32.mrf.mxu1 }
  0xc1   : > { %v4416_v7 = vadd.f32 %v4352_v20, %v1833_v6 }
  0xc2   : > { %v4418_v8 = vpop.f32.mrf.mxu0 }
  0xc3   : > { %v1814_v51 = vadd.f32 %v4352_v20, %v4418_v8 }
  0xc6   : > { %v1853_v17 = vpop.f32.mrf.mxu2 }
  0xc7   : > { %v4429_v18 = vadd.f32 %v4352_v20, %v1853_v17  ;;  %v1873_v19 = vpop.f32.mrf.mxu3  ;;  %v3237_v17 = vld [vmem:[%s4148_s21 + $0x264] sm:$0xf0] }
  0xc8   : > { %v4432_v23 = vadd.f32 %v4352_v20, %v1873_v19  ;;  %v1836_v24 = vpop.f32.mrf.mxu1  ;;  %v3243_v19 = vld [vmem:[%s4148_s21 + $0x248] sm:$0xf] }
  0xc9   : > { %v4435_v27 = vadd.f32 %v4352_v20, %v1836_v24  ;;  %v3245_v24 = vld [vmem:[%s4148_s21 + $0x26c] sm:$0xf0] }
  0xca   : > { %v4437_v28 = vpop.f32.mrf.mxu0 }
  0xcb   : > { %1924 = vmatmul.bf16.gmra.mxu1 %v3168_v21  ;;  %2013 = vmatmul.bf16.gmra.mxu2 %v3172_v22  ;;  %v3888_v21 = vld [vmem:[%s4148_s21 + $0x268] sm:$0xf0]  ;;  %v1817_v8 = vadd.f32 %v4352_v20, %v4437_v28 }
  0xcc   : > { %2102 = vmatmul.bf16.gmra.mxu3 %v3176_v25  ;;  %v3884_v22 = vld [vmem:[%s4148_s21 + $0x24c] sm:$0xf]  ;;  %v3251_v25 = vld [vmem:[%s4148_s21 + $0x250] sm:$0xf]  ;;  %v3244_v42 = vor.u32 %v3888_v21, %v3243_v19  ;;  %v3893_v19 = vld [vmem:[%s4148_s21 + $0x294] sm:$0xf] }
  0xcd   : > { %2191 = vmatmul.bf16.gmra.mxu0 %v3180_v26  ;;  %v3889_v26 = vld [vmem:[%s4148_s21 + $0x270] sm:$0xf0]  ;;  %v3248_v47 = vor.u32 %v3884_v22, %v3245_v24  ;;  %v3281_v21 = vld [vmem:[%s4148_s21 + $0x2b4] sm:$0xf0]  ;;  %v3898_v24 = vld [vmem:[%s4148_s21 + $0x2b8] sm:$0xf0] }
  0xce   : > { %v1856_v31 = vpop.f32.mrf.mxu2  ;;  %v3252_v48 = vor.u32 %v3889_v26, %v3251_v25  ;;  %v3287_v22 = vld [vmem:[%s4148_s21 + $0x298] sm:$0xf]  ;;  %v1812_v26 = vadd.f32 %v4352_v20, %v4407_v1  ;;  %v4004_v28 = vld [vmem:[%s5060_s1 + $0x188] sm:$0xff] }
  0xcf   : > { %v4446_v32 = vadd.f32 %v4352_v20, %v1856_v31  ;;  %v1876_v33 = vpop.f32.mrf.mxu3  ;;  %2337 = vmatpush.bf16.msra.mxu2 %v4004_v28 }
  0xd0   : > { %v4449_v36 = vadd.f32 %v4352_v20, %v1876_v33  ;;  %v1838_v37 = vpop.f32.mrf.mxu1 }
  0xd1   : > { %v4452_v38 = vadd.f32 %v4352_v20, %v1838_v37  ;;  %v3240_v37 = vor.u32 %v3883_v16, %v3237_v17  ;;  %v3279_v16 = vld [vmem:[%s4148_s21 + $0x290] sm:$0xf]  ;;  %v3897_v17 = vld [vmem:[%s4148_s21 + $0x2b0] sm:$0xf0] }
  0xd2   : > { %v4454_v40 = vpop.f32.mrf.mxu0 }
  0xd6   : > { %v1858_v54 = vpop.f32.mrf.mxu2 }
  0xd7   : > { %v4471_v55 = vadd.f32 %v4352_v20, %v1858_v54  ;;  %v1878_v57 = vpop.f32.mrf.mxu3 }
  0xd8   : > { %v4474_v61 = vadd.f32 %v4352_v20, %v1878_v57  ;;  %v1841_v62 = vpop.f32.mrf.mxu1 }
  0xd9   : > { %v4477_v4 = vadd.f32 %v4352_v20, %v1841_v62 }
  0xda   : > { %v4479_v6 = vpop.f32.mrf.mxu0 }
  0xdb   : > { %1929 = vmatmul.bf16.gmra.mxu1 %v3204_v58  ;;  %2018 = vmatmul.bf16.gmra.mxu2 %v3208_v59 }
  0xdc   : > { %2107 = vmatmul.bf16.gmra.mxu3 %v3212_v63 }
  0xdd   : > { %2196 = vmatmul.bf16.gmra.mxu0 %v3216_v2  ;;  %v3997_v2 = vld [vmem:[%s5060_s1 + $0x150] sm:$0xff] }
  0xde   : > { %v1861_v9 = vpop.f32.mrf.mxu2  ;;  %2247 = vmatpush.bf16.msra.mxu1 %v3997_v2  ;;  %v3309_v2 = vld [vmem:[%s4148_s21 + $0x2f4] sm:$0xf0] }
  0xdf   : > { %v4482_v10 = vadd.f32 %v4352_v20, %v1861_v9  ;;  %v1881_v11 = vpop.f32.mrf.mxu3  ;;  %v4021_v9 = vld [vmem:[%s5060_s1 + $0x210] sm:$0xff] }
  0xe0   : > { %v4485_v12 = vadd.f32 %v4352_v20, %v1881_v11  ;;  %v1843_v13 = vpop.f32.mrf.mxu1  ;;  %v3892_v11 = vld [vmem:[%s4148_s21 + $0x28c] sm:$0xf]  ;;  %2514 = vmatpush.bf16.msra.mxu0 %v4021_v9  ;;  %v3315_v9 = vld [vmem:[%s4148_s21 + $0x2d8] sm:$0xf] }
  0xe1   : > { %v4488_v14 = vadd.f32 %v4352_v20, %v1843_v13 }
  0xe2   : > { %v4490_v15 = vpop.f32.mrf.mxu0 }
  0xe6   : > { %v1863_v29 = vpop.f32.mrf.mxu2 }
  0xe7   : > { %v4503_v31 = vadd.f32 %v4352_v20, %v1863_v29  ;;  %v1883_v33 = vpop.f32.mrf.mxu3 }
  0xe8   : > { %v4506_v43 = vadd.f32 %v4352_v20, %v1883_v33  ;;  %v1895_v46 = vpop.f32.mrf.mxu1  ;;  %v3276_v33 = vor.u32 %v3892_v11, %v3273_v45  ;;  %v3906_v11 = vld [vmem:[%s4148_s21 + $0x2f8] sm:$0xf0] }
  0xe9   : > { %v1896_v49 = vadd.f32 %v1895_v46, %v1807_v30  ;;  %v3284_v46 = vor.u32 %v3893_v19, %v3281_v21  ;;  %v3902_v45 = vld [vmem:[%s4148_s21 + $0x2dc] sm:$0xf]  ;;  %v3907_v19 = vld [vmem:[%s4148_s21 + $0x300] sm:$0xf0] }
  0xea   : > { %v2162_v50 = vpop.f32.mrf.mxu0 }
  0xeb   : > { %1934 = vmatmul.bf16.gmra.mxu1 %v3240_v37  ;;  %2023 = vmatmul.bf16.gmra.mxu2 %v3244_v42  ;;  %v3280_v37 = vor.u32 %v3897_v17, %v3279_v16  ;;  %v3317_v16 = vld [vmem:[%s4148_s21 + $0x2fc] sm:$0xf0] }
  0xec   : > { %2112 = vmatmul.bf16.gmra.mxu3 %v3248_v47  ;;  %v3288_v47 = vor.u32 %v3898_v24, %v3287_v22  ;;  %v3323_v17 = vld [vmem:[%s4148_s21 + $0x2e0] sm:$0xf] }
  0xed   : > { %2201 = vmatmul.bf16.gmra.mxu0 %v3252_v48 }
  0xee   : > { %v1984_v52 = vpop.f32.mrf.mxu2 }
  0xef   : > { %v1985_v54 = vadd.f32 %v1984_v52, %v1896_v49  ;;  %v2073_v57 = vpop.f32.mrf.mxu3 }
  0xf0   : > { %v1897_v58 = vpop.f32.mrf.mxu1 }
  0xf1   : > { %v2074_v59 = vadd.f32 %v2073_v57, %v1985_v54  ;;  %v1898_v62 = vadd.f32 %v1897_v58, %v1809_v53 }
  0xf2   : > { %v2164_v63 = vpop.f32.mrf.mxu0 }
  0xf3   : > { %v4524_v13 = vadd.f32 %v2162_v50, %v2074_v59 }
  0xf6   : > { %v1986_v25 = vpop.f32.mrf.mxu2 }
  0xf7   : > { %v1987_v29 = vadd.f32 %v1986_v25, %v1898_v62  ;;  %v2075_v30 = vpop.f32.mrf.mxu3  ;;  %v3901_v62 = vld [vmem:[%s4148_s21 + $0x2d4] sm:$0xf] }
  0xf8   : > { %v1900_v42 = vpop.f32.mrf.mxu1  ;;  %v3312_v25 = vor.u32 %v3901_v62, %v3309_v2  ;;  %v3910_v62 = vld [vmem:[%s4148_s21 + $0x31c] sm:$0xf] }
  0xf9   : > { %v2076_v48 = vadd.f32 %v2075_v30, %v1987_v29  ;;  %v1901_v49 = vadd.f32 %v1900_v42, %v1812_v26  ;;  %v3316_v26 = vor.u32 %v3906_v11, %v3315_v9  ;;  %v3320_v30 = vor.u32 %v3902_v45, %v3317_v16  ;;  %v3351_v9 = vld [vmem:[%s4148_s21 + $0x320] sm:$0xf]  ;;  %v3915_v11 = vld [vmem:[%s4148_s21 + $0x340] sm:$0xf0]  ;;  %v3353_v16 = vld [vmem:[%s4148_s21 + $0x344] sm:$0xf0] }
  0xfa   : > { %v2167_v50 = vpop.f32.mrf.mxu0  ;;  %v3911_v45 = vld [vmem:[%s4148_s21 + $0x324] sm:$0xf] }
  0xfb   : > { %1939 = vmatmul.bf16.gmra.mxu1 %v3276_v33  ;;  %2028 = vmatmul.bf16.gmra.mxu2 %v3280_v37  ;;  %v4534_v35 = vadd.f32 %v2164_v63, %v2076_v48  ;;  %v3324_v33 = vor.u32 %v3907_v19, %v3323_v17  ;;  %v4012_v48 = vld [vmem:[%s5060_s1 + $0x1c8] sm:$0xff] }
  0xfc   : > { %2117 = vmatmul.bf16.gmra.mxu3 %v3284_v46  ;;  %v3359_v17 = vld [vmem:[%s4148_s21 + $0x328] sm:$0xf]  ;;  %v3916_v19 = vld [vmem:[%s4148_s21 + $0x348] sm:$0xf0] }
  0xfd   : > { %2206 = vmatmul.bf16.gmra.mxu0 %v3288_v47  ;;  %2426 = vmatpush.bf16.msra.mxu3 %v4012_v48  ;;  %v1824_v48 = vadd.f32 %v4352_v20, %v4490_v15 }
  0xfe   : > { %v1989_v1 = vpop.f32.mrf.mxu2 }
  0xff   : > { %v1990_v52 = vadd.f32 %v1989_v1, %v1901_v49  ;;  %v2078_v53 = vpop.f32.mrf.mxu3 }
 0x100   : > { %v1902_v54 = vpop.f32.mrf.mxu1 }
 0x101   : > { %v2079_v57 = vadd.f32 %v2078_v53, %v1990_v52  ;;  %v1903_v58 = vadd.f32 %v1902_v54, %v1814_v51 }
 0x102   : > { %v2169_v59 = vpop.f32.mrf.mxu0 }
 0x103   : > { %v4540_v63 = vadd.f32 %v2167_v50, %v2079_v57  ;;  %v1819_v50 = vadd.f32 %v4352_v20, %v4454_v40  ;;  %v3345_v40 = vld [vmem:[%s4148_s21 + $0x33c] sm:$0xf0] }
 0x106   : > { %v1991_v21 = vpop.f32.mrf.mxu2 }
 0x107   : > { %v1992_v22 = vadd.f32 %v1991_v21, %v1903_v58  ;;  %v2080_v24 = vpop.f32.mrf.mxu3  ;;  %v3996_v58 = vld [vmem:[%s5060_s1 + $0x148] sm:$0xff] }
 0x108   : > { %v1905_v29 = vpop.f32.mrf.mxu1  ;;  %2248 = vmatpush.bf16.msra.mxu1 %v3996_v58  ;;  %v3381_v58 = vld [vmem:[%s4148_s21 + $0x384] sm:$0xf0] }
 0x109   : > { %v2081_v37 = vadd.f32 %v2080_v24, %v1992_v22  ;;  %v1906_v42 = vadd.f32 %v1905_v29, %v1817_v8  ;;  %v1822_v8 = vadd.f32 %v4352_v20, %v4479_v6 }
 0x10a   : > { %v2172_v46 = vpop.f32.mrf.mxu0 }
 0x10b   : > { %1944 = vmatmul.bf16.gmra.mxu1 %v3312_v25  ;;  %2033 = vmatmul.bf16.gmra.mxu2 %v3316_v26  ;;  %v4550_v47 = vadd.f32 %v2169_v59, %v2081_v37  ;;  %v4020_v59 = vld [vmem:[%s5060_s1 + $0x208] sm:$0xff]  ;;  %v3348_v25 = vor.u32 %v3910_v62, %v3345_v40  ;;  %v3352_v26 = vor.u32 %v3915_v11, %v3351_v9  ;;  %v3389_v9 = vld [vmem:[%s4148_s21 + $0x38c] sm:$0xf0] }
 0x10c   : > { %2122 = vmatmul.bf16.gmra.mxu3 %v3320_v30  ;;  %2515 = vmatpush.bf16.msra.mxu0 %v4020_v59  ;;  %v3356_v30 = vor.u32 %v3911_v45, %v3353_v16  ;;  %v3387_v59 = vld [vmem:[%s4148_s21 + $0x368] sm:$0xf]  ;;  %v3924_v62 = vld [vmem:[%s4148_s21 + $0x388] sm:$0xf0]  ;;  %v3395_v11 = vld [vmem:[%s4148_s21 + $0x370] sm:$0xf] }
 0x10d   : > { %2211 = vmatmul.bf16.gmra.mxu0 %v3324_v33  ;;  %v3360_v33 = vor.u32 %v3916_v19, %v3359_v17  ;;  %v3920_v40 = vld [vmem:[%s4148_s21 + $0x36c] sm:$0xf]  ;;  %v3925_v45 = vld [vmem:[%s4148_s21 + $0x390] sm:$0xf0]  ;;  %v3388_v15 = vor.u32 %v3924_v62, %v3387_v59  ;;  %v3425_v62 = vld [vmem:[%s4148_s21 + $0x3d4] sm:$0xf0] }
 0x10e   : > { %v1994_v49 = vpop.f32.mrf.mxu2  ;;  %v3929_v59 = vld [vmem:[%s4148_s21 + $0x3b4] sm:$0xf] }
 0x10f   : > { %v1995_v1 = vadd.f32 %v1994_v49, %v1906_v42  ;;  %v2083_v51 = vpop.f32.mrf.mxu3 }
 0x110   : > { %v1907_v52 = vpop.f32.mrf.mxu1 }
 0x111   : > { %v2084_v53 = vadd.f32 %v2083_v51, %v1995_v1  ;;  %v1908_v54 = vadd.f32 %v1907_v52, %v1819_v50 }
 0x112   : > { %v2174_v57 = vpop.f32.mrf.mxu0 }
 0x113   : > { %v4568_v2 = vadd.f32 %v2172_v46, %v2084_v53 }
 0x116   : > { %v1996_v21 = vpop.f32.mrf.mxu2 }
 0x117   : > { %v1997_v22 = vadd.f32 %v1996_v21, %v1908_v54  ;;  %v2085_v24 = vpop.f32.mrf.mxu3  ;;  %v3919_v54 = vld [vmem:[%s4148_s21 + $0x364] sm:$0xf] }
 0x118   : > { %v1910_v29 = vpop.f32.mrf.mxu1  ;;  %v3384_v20 = vor.u32 %v3919_v54, %v3381_v58  ;;  %v3423_v54 = vld [vmem:[%s4148_s21 + $0x3b0] sm:$0xf]  ;;  %v3933_v58 = vld [vmem:[%s4148_s21 + $0x3d0] sm:$0xf0] }
 0x119   : > { %v2086_v37 = vadd.f32 %v2085_v24, %v1997_v22  ;;  %v1911_v42 = vadd.f32 %v1910_v29, %v1822_v8  ;;  %v3392_v8 = vor.u32 %v3920_v40, %v3389_v9  ;;  %v3396_v22 = vor.u32 %v3925_v45, %v3395_v11  ;;  %v3934_v40 = vld [vmem:[%s4148_s21 + $0x3d8] sm:$0xf0] }
 0x11a   : > { %v2177_v46 = vpop.f32.mrf.mxu0 }
 0x11b   : > { %1949 = vmatmul.bf16.gmra.mxu1 %v3348_v25  ;;  %2038 = vmatmul.bf16.gmra.mxu2 %v3352_v26  ;;  %v4578_v28 = vadd.f32 %v2174_v57, %v2086_v37 }
 0x11c   : > { %2127 = vmatmul.bf16.gmra.mxu3 %v3356_v30  ;;  %v4003_v30 = vld [vmem:[%s5060_s1 + $0x180] sm:$0xff] }
 0x11d   : > { %2216 = vmatmul.bf16.gmra.mxu0 %v3360_v33  ;;  %v4011_v33 = vld [vmem:[%s5060_s1 + $0x1c0] sm:$0xff]  ;;  %2338 = vmatpush.bf16.msra.mxu2 %v4003_v30 }
 0x11e   : > { %v1999_v6 = vpop.f32.mrf.mxu2  ;;  %2427 = vmatpush.bf16.msra.mxu3 %v4011_v33 }
 0x11f   : > { %v2000_v49 = vadd.f32 %v1999_v6, %v1911_v42  ;;  %v2088_v50 = vpop.f32.mrf.mxu3 }
 0x120   : > { %v1912_v1 = vpop.f32.mrf.mxu1 }
 0x121   : > { %v2089_v51 = vadd.f32 %v2088_v50, %v2000_v49  ;;  %v1913_v52 = vadd.f32 %v1912_v1, %v1824_v48  ;;  %v3995_v50 = vld [vmem:[%s5060_s1 + $0x140] sm:$0xff] }
 0x122   : > { %v2179_v53 = vpop.f32.mrf.mxu0  ;;  %v4019_v1 = vld [vmem:[%s5060_s1 + $0x200] sm:$0xff]  ;;  %2249 = vmatpush.bf16.msra.mxu1 %v3995_v50  ;;  %v3938_v50 = vld [vmem:[%s4148_s21 + $0x3fc] sm:$0xf] }
 0x123   : > { %v4584_v57 = vadd.f32 %v2177_v46, %v2089_v51  ;;  %v3928_v51 = vld [vmem:[%s4148_s21 + $0x3ac] sm:$0xf]  ;;  %2516 = vmatpush.bf16.msra.mxu0 %v4019_v1  ;;  %v3461_v1 = vld [vmem:[%s4148_s21 + $0x41c] sm:$0xf0] }
 0x126   : > { %v2001_v16 = vpop.f32.mrf.mxu2 }
 0x127   : > { %v2002_v17 = vadd.f32 %v2001_v16, %v1913_v52  ;;  %v2090_v19 = vpop.f32.mrf.mxu3  ;;  %v3417_v52 = vld [vmem:[%s4148_s21 + $0x3cc] sm:$0xf0] }
 0x128   : > { %v1915_v21 = vpop.f32.mrf.mxu1  ;;  %v3420_v16 = vor.u32 %v3928_v51, %v3417_v52  ;;  %v3467_v51 = vld [vmem:[%s4148_s21 + $0x400] sm:$0xf]  ;;  %v3943_v52 = vld [vmem:[%s4148_s21 + $0x420] sm:$0xf0] }
 0x129   : > { %v2091_v24 = vadd.f32 %v2090_v19, %v2002_v17  ;;  %v1916_v25 = vadd.f32 %v1915_v21, %v4363_v34  ;;  %v3424_v17 = vor.u32 %v3933_v58, %v3423_v54 }
 0x12a   : > { %v2182_v26 = vpop.f32.mrf.mxu0 }
 0x12b   : > { %1954 = vmatmul.bf16.gmra.mxu1 %v3384_v20  ;;  %2043 = vmatmul.bf16.gmra.mxu2 %v3388_v15  ;;  %v4593_v29 = vadd.f32 %v2179_v53, %v2091_v24  ;;  %v3428_v20 = vor.u32 %v3929_v59, %v3425_v62 }
 0x12c   : > { %2132 = vmatmul.bf16.gmra.mxu3 %v3392_v8 }
 0x12d   : > { %2221 = vmatmul.bf16.gmra.mxu0 %v3396_v22 }
 0x12e   : > { %v2004_v37 = vpop.f32.mrf.mxu2 }
 0x12f   : > { %v2005_v34 = vadd.f32 %v2004_v37, %v1916_v25  ;;  %v2093_v42 = vpop.f32.mrf.mxu3 }
 0x130   : > { %v1917_v46 = vpop.f32.mrf.mxu1 }
 0x131   : > { %v2094_v6 = vadd.f32 %v2093_v42, %v2005_v34  ;;  %v1918_v48 = vadd.f32 %v1917_v46, %v4383_v44  ;;  %v3431_v44 = vld [vmem:[%s4148_s21 + $0x3b8] sm:$0xf]  ;;  %v3937_v42 = vld [vmem:[%s4148_s21 + $0x3f4] sm:$0xf] }
 0x132   : > { %v2184_v49 = vpop.f32.mrf.mxu0  ;;  %v3432_v15 = vor.u32 %v3934_v40, %v3431_v44  ;;  %v3453_v46 = vld [vmem:[%s4148_s21 + $0x414] sm:$0xf0] }
 0x133   : > { %v4610_v53 = vadd.f32 %v2182_v26, %v2094_v6  ;;  %v3456_v62 = vor.u32 %v3937_v42, %v3453_v46  ;;  %v3503_v42 = vld [vmem:[%s4148_s21 + $0x448] sm:$0xf]  ;;  %v3952_v46 = vld [vmem:[%s4148_s21 + $0x468] sm:$0xf0] }
 0x136   : > { %v2006_v9 = vpop.f32.mrf.mxu2 }
 0x137   : > { %v2007_v11 = vadd.f32 %v2006_v9, %v1918_v48  ;;  %v2095_v45 = vpop.f32.mrf.mxu3  ;;  %v3459_v48 = vld [vmem:[%s4148_s21 + $0x3f8] sm:$0xf]  ;;  %v3464_v9 = vor.u32 %v3938_v50, %v3461_v1 }
 0x138   : > { %v1920_v19 = vpop.f32.mrf.mxu1 }
 0x139   : > { %v2096_v21 = vadd.f32 %v2095_v45, %v2007_v11  ;;  %v1921_v8 = vadd.f32 %v1920_v19, %v4405_v0  ;;  %v3468_v11 = vor.u32 %v3943_v52, %v3467_v51 }
 0x13a   : > { %v2187_v22 = vpop.f32.mrf.mxu0 }
 0x13b   : > { %1959 = vmatmul.bf16.gmra.mxu1 %v3420_v16  ;;  %2048 = vmatmul.bf16.gmra.mxu2 %v3424_v17  ;;  %v4619_v24 = vadd.f32 %v2184_v49, %v2096_v21  ;;  %v3942_v49 = vld [vmem:[%s4148_s21 + $0x418] sm:$0xf0] }
 0x13c   : > { %2137 = vmatmul.bf16.gmra.mxu3 %v3428_v20  ;;  %v3460_v44 = vor.u32 %v3942_v49, %v3459_v48 }
 0x13d   : > { %2226 = vmatmul.bf16.gmra.mxu0 %v3432_v15 }
 0x13e   : > { %v2009_v25 = vpop.f32.mrf.mxu2 }
 0x13f   : > { %v2010_v26 = vadd.f32 %v2009_v25, %v1921_v8  ;;  %v2098_v30 = vpop.f32.mrf.mxu3  ;;  %v3946_v25 = vld [vmem:[%s4148_s21 + $0x43c] sm:$0xf] }
 0x140   : > { %v1922_v33 = vpop.f32.mrf.mxu1 }
 0x141   : > { %v2099_v37 = vadd.f32 %v2098_v30, %v2010_v26  ;;  %v1923_v0 = vadd.f32 %v1922_v33, %v4416_v7  ;;  %v3489_v26 = vld [vmem:[%s4148_s21 + $0x45c] sm:$0xf0] }
 0x142   : > { %v2189_v34 = vpop.f32.mrf.mxu0  ;;  %v3495_v33 = vld [vmem:[%s4148_s21 + $0x440] sm:$0xf]  ;;  %v3492_v1 = vor.u32 %v3946_v25, %v3489_v26  ;;  %v3819_v26 = vld [vmem:[%s4148_s21 + $0x40] sm:$0xf0] }
 0x143   : > { %v4624_v6 = vadd.f32 %v2187_v22, %v2099_v37  ;;  %v3951_v37 = vld [vmem:[%s4148_s21 + $0x460] sm:$0xf0]  ;;  %v2979_v25 = vld [vmem:[%s4148_s21 + $0x20] sm:$0xf] }
 0x144   : > { %v3496_v51 = vor.u32 %v3951_v37, %v3495_v33 }
 0x146   : > { %v2011_v54 = vpop.f32.mrf.mxu2 }
 0x147   : > { %v2012_v58 = vadd.f32 %v2011_v54, %v1923_v0  ;;  %v2100_v59 = vpop.f32.mrf.mxu3  ;;  %v3947_v0 = vld [vmem:[%s4148_s21 + $0x444] sm:$0xf] }
 0x148   : > { %v1925_v40 = vpop.f32.mrf.mxu1 }
 0x149   : > { %v2101_v7 = vadd.f32 %v2100_v59, %v2012_v58  ;;  %v1926_v45 = vadd.f32 %v1925_v40, %v4435_v27  ;;  %v3504_v58 = vor.u32 %v3952_v46, %v3503_v42 }
 0x14a   : > { %v2192_v16 = vpop.f32.mrf.mxu0 }
 0x14b   : > { %1964 = vmatmul.bf16.gmra.mxu1 %v3456_v62  ;;  %2053 = vmatmul.bf16.gmra.mxu2 %v3460_v44  ;;  %v4633_v17 = vadd.f32 %v2189_v34, %v2101_v7  ;;  %v3497_v34 = vld [vmem:[%s4148_s21 + $0x464] sm:$0xf0] }
 0x14c   : > { %2142 = vmatmul.bf16.gmra.mxu3 %v3464_v9  ;;  %v3500_v54 = vor.u32 %v3947_v0, %v3497_v34 }
 0x14d   : > { %2231 = vmatmul.bf16.gmra.mxu0 %v3468_v11 }
 0x14e   : > { %v2014_v19 = vpop.f32.mrf.mxu2 }
 0x14f   : > { %v2015_v20 = vadd.f32 %v2014_v19, %v1926_v45  ;;  %v2103_v15 = vpop.f32.mrf.mxu3  ;;  %v3813_v19 = vld [vmem:[%s4148_s21 + $0x14] sm:$0xf] }
 0x150   : > { %v1927_v21 = vpop.f32.mrf.mxu1 }
 0x151   : > { %v2104_v8 = vadd.f32 %v2103_v15, %v2015_v20  ;;  %v1928_v27 = vadd.f32 %v1927_v21, %v4452_v38  ;;  %v2965_v20 = vld [vmem:[%s4148_s21 + $0x34] sm:$0xf0] }
 0x152   : > { %v2194_v22 = vpop.f32.mrf.mxu0  ;;  %v2971_v21 = vld [vmem:[%s4148_s21 + $0x18] sm:$0xf]  ;;  %v2968_v34 = vor.u32 %v3813_v19, %v2965_v20  ;;  %v3015_v19 = vld [vmem:[%s4148_s21 + $0x68] sm:$0xf]  ;;  %v3828_v20 = vld [vmem:[%s4148_s21 + $0x88] sm:$0xf0] }
 0x153   : > { %v4638_v30 = vadd.f32 %v2192_v16, %v2104_v8  ;;  %v3818_v8 = vld [vmem:[%s4148_s21 + $0x38] sm:$0xf0] }
 0x154   : > { %v2972_v42 = vor.u32 %v3818_v8, %v2971_v21 }
 0x156   : > { %v2016_v48 = vpop.f32.mrf.mxu2 }
 0x157   : > { %v2017_v49 = vadd.f32 %v2016_v48, %v1928_v27  ;;  %v2105_v50 = vpop.f32.mrf.mxu3  ;;  %v3814_v27 = vld [vmem:[%s4148_s21 + $0x1c] sm:$0xf] }
 0x158   : > { %v1930_v52 = vpop.f32.mrf.mxu1 }
 0x159   : > { %v2106_v38 = vadd.f32 %v2105_v50, %v2017_v49  ;;  %v1931_v59 = vadd.f32 %v1930_v52, %v4477_v4  ;;  %v2980_v49 = vor.u32 %v3819_v26, %v2979_v25 }
 0x15a   : > { %v2197_v62 = vpop.f32.mrf.mxu0 }
 0x15b   : > { %1969 = vmatmul.bf16.gmra.mxu1 %v3492_v1  ;;  %2058 = vmatmul.bf16.gmra.mxu2 %v3496_v51  ;;  %v4647_v44 = vadd.f32 %v2194_v22, %v2106_v38  ;;  %v2973_v22 = vld [vmem:[%s4148_s21 + $0x3c] sm:$0xf0] }
 0x15c   : > { %2147 = vmatmul.bf16.gmra.mxu3 %v3500_v54  ;;  %v2976_v48 = vor.u32 %v3814_v27, %v2973_v22 }
 0x15d   : > { %2236 = vmatmul.bf16.gmra.mxu0 %v3504_v58 }
 0x15e   : > { %v2019_v40 = vpop.f32.mrf.mxu2 }
 0x15f   : > { %v2020_v9 = vadd.f32 %v2019_v40, %v1931_v59  ;;  %v2108_v11 = vpop.f32.mrf.mxu3  ;;  %v3822_v40 = vld [vmem:[%s4148_s21 + $0x5c] sm:$0xf] }
 0x160   : > { %v1932_v7 = vpop.f32.mrf.mxu1 }
 0x161   : > { %v2109_v45 = vadd.f32 %v2108_v11, %v2020_v9  ;;  %v1933_v4 = vadd.f32 %v1932_v7, %v4488_v14  ;;  %v3001_v9 = vld [vmem:[%s4148_s21 + $0x7c] sm:$0xf0] }
 0x162   : > { %v2199_v16 = vpop.f32.mrf.mxu0  ;;  %v3007_v7 = vld [vmem:[%s4148_s21 + $0x60] sm:$0xf]  ;;  %v3004_v22 = vor.u32 %v3822_v40, %v3001_v9  ;;  %v3051_v40 = vld [vmem:[%s4148_s21 + $0xb0] sm:$0xf]  ;;  %v3837_v9 = vld [vmem:[%s4148_s21 + $0xd0] sm:$0xf0] }
 0x163   : > { %v4652_v15 = vadd.f32 %v2197_v62, %v2109_v45  ;;  %v3827_v45 = vld [vmem:[%s4148_s21 + $0x80] sm:$0xf0] }
 0x164   : > { %v3008_v25 = vor.u32 %v3827_v45, %v3007_v7 }
 0x166   : > { %v2021_v33 = vpop.f32.mrf.mxu2 }
 0x167   : > { %v2022_v37 = vadd.f32 %v2021_v33, %v1933_v4  ;;  %v2110_v0 = vpop.f32.mrf.mxu3  ;;  %v3823_v4 = vld [vmem:[%s4148_s21 + $0x64] sm:$0xf] }
 0x168   : > { %v1935_v46 = vpop.f32.mrf.mxu1 }
 0x169   : > { %v2111_v14 = vadd.f32 %v2110_v0, %v2022_v37  ;;  %v1936_v50 = vadd.f32 %v1935_v46, %v4374_v39  ;;  %v3016_v37 = vor.u32 %v3828_v20, %v3015_v19 }
 0x16a   : > { %v2202_v1 = vpop.f32.mrf.mxu0 }
 0x16b   : > { %2250 = vmatmul.bf16.vlgmr.msra.gmra.mxu1 %v2968_v34  ;;  %2339 = vmatmul.bf16.vlgmr.msra.gmra.mxu2 %v2972_v42  ;;  %v4661_v51 = vadd.f32 %v2199_v16, %v2111_v14  ;;  %v3009_v16 = vld [vmem:[%s4148_s21 + $0x84] sm:$0xf0] }
 0x16c   : > { %2428 = vmatmul.bf16.vlgmr.msra.gmra.mxu3 %v2976_v48  ;;  %v3012_v33 = vor.u32 %v3823_v4, %v3009_v16 }
 0x16d   : > { %2517 = vmatmul.bf16.vlgmr.msra.gmra.mxu0 %v2980_v49 }
 0x16e   : > { %v2024_v52 = vpop.f32.mrf.mxu2 }
 0x16f   : > { %v2025_v54 = vadd.f32 %v2024_v52, %v1936_v50  ;;  %v2113_v58 = vpop.f32.mrf.mxu3  ;;  %v3831_v52 = vld [vmem:[%s4148_s21 + $0xa4] sm:$0xf] }
 0x170   : > { %v1937_v38 = vpop.f32.mrf.mxu1 }
 0x171   : > { %v2114_v59 = vadd.f32 %v2113_v58, %v2025_v54  ;;  %v1938_v39 = vadd.f32 %v1937_v38, %v4399_v56  ;;  %v3037_v54 = vld [vmem:[%s4148_s21 + $0xc4] sm:$0xf0] }
 0x172   : > { %v2204_v62 = vpop.f32.mrf.mxu0  ;;  %v3043_v38 = vld [vmem:[%s4148_s21 + $0xa8] sm:$0xf]  ;;  %v3040_v16 = vor.u32 %v3831_v52, %v3037_v54  ;;  %v3087_v52 = vld [vmem:[%s4148_s21 + $0xf8] sm:$0xf]  ;;  %v3846_v54 = vld [vmem:[%s4148_s21 + $0x118] sm:$0xf0] }
 0x173   : > { %v4666_v11 = vadd.f32 %v2202_v1, %v2114_v59  ;;  %v3836_v59 = vld [vmem:[%s4148_s21 + $0xc8] sm:$0xf0] }
 0x174   : > { %v3044_v19 = vor.u32 %v3836_v59, %v3043_v38 }
 0x176   : > { %v2026_v21 = vpop.f32.mrf.mxu2 }
 0x177   : > { %v2027_v8 = vadd.f32 %v2026_v21, %v1938_v39  ;;  %v2115_v27 = vpop.f32.mrf.mxu3  ;;  %v3832_v39 = vld [vmem:[%s4148_s21 + $0xac] sm:$0xf] }
 0x178   : > { %v1940_v26 = vpop.f32.mrf.mxu1 }
 0x179   : > { %v2116_v56 = vadd.f32 %v2115_v27, %v2027_v8  ;;  %v1941_v0 = vadd.f32 %v1940_v26, %v4410_v3  ;;  %v3052_v8 = vor.u32 %v3837_v9, %v3051_v40 }
 0x17a   : > { %v2207_v34 = vpop.f32.mrf.mxu0 }
 0x17b   : > { %2255 = vmatmul.bf16.gmra.mxu1 %v3004_v22  ;;  %2344 = vmatmul.bf16.gmra.mxu2 %v3008_v25  ;;  %v4675_v42 = vadd.f32 %v2204_v62, %v2116_v56  ;;  %v3045_v62 = vld [vmem:[%s4148_s21 + $0xcc] sm:$0xf0] }
 0x17c   : > { %2433 = vmatmul.bf16.gmra.mxu3 %v3012_v33  ;;  %v3048_v21 = vor.u32 %v3832_v39, %v3045_v62 }
 0x17d   : > { %2522 = vmatmul.bf16.gmra.mxu0 %v3016_v37 }
 0x17e   : > { %v2029_v46 = vpop.f32.mrf.mxu2 }
 0x17f   : > { %v2030_v48 = vadd.f32 %v2029_v46, %v1941_v0  ;;  %v2118_v49 = vpop.f32.mrf.mxu3  ;;  %v3840_v46 = vld [vmem:[%s4148_s21 + $0xec] sm:$0xf] }
 0x180   : > { %v1942_v14 = vpop.f32.mrf.mxu1 }
 0x181   : > { %v2119_v50 = vadd.f32 %v2118_v49, %v2030_v48  ;;  %v1943_v3 = vadd.f32 %v1942_v14, %v4429_v18  ;;  %v3073_v48 = vld [vmem:[%s4148_s21 + $0x10c] sm:$0xf0] }
 0x182   : > { %v2209_v1 = vpop.f32.mrf.mxu0  ;;  %v3079_v14 = vld [vmem:[%s4148_s21 + $0xf0] sm:$0xf]  ;;  %v3076_v62 = vor.u32 %v3840_v46, %v3073_v48  ;;  %v3123_v46 = vld [vmem:[%s4148_s21 + $0x140] sm:$0xf]  ;;  %v3855_v48 = vld [vmem:[%s4148_s21 + $0x160] sm:$0xf0] }
 0x183   : > { %v4680_v58 = vadd.f32 %v2207_v34, %v2119_v50  ;;  %v3845_v50 = vld [vmem:[%s4148_s21 + $0x110] sm:$0xf0] }
 0x184   : > { %v3080_v40 = vor.u32 %v3845_v50, %v3079_v14 }
 0x186   : > { %v2031_v7 = vpop.f32.mrf.mxu2 }
 0x187   : > { %v2032_v45 = vadd.f32 %v2031_v7, %v1943_v3  ;;  %v2120_v4 = vpop.f32.mrf.mxu3  ;;  %v3841_v3 = vld [vmem:[%s4148_s21 + $0xf4] sm:$0xf] }
 0x188   : > { %v1945_v20 = vpop.f32.mrf.mxu1 }
 0x189   : > { %v2121_v18 = vadd.f32 %v2120_v4, %v2032_v45  ;;  %v1946_v27 = vadd.f32 %v1945_v20, %v4446_v32  ;;  %v3088_v45 = vor.u32 %v3846_v54, %v3087_v52 }
 0x18a   : > { %v2212_v22 = vpop.f32.mrf.mxu0 }
 0x18b   : > { %2260 = vmatmul.bf16.gmra.mxu1 %v3040_v16  ;;  %2349 = vmatmul.bf16.gmra.mxu2 %v3044_v19  ;;  %v4689_v25 = vadd.f32 %v2209_v1, %v2121_v18  ;;  %v3081_v1 = vld [vmem:[%s4148_s21 + $0x114] sm:$0xf0] }
 0x18c   : > { %2438 = vmatmul.bf16.gmra.mxu3 %v3048_v21  ;;  %v3084_v7 = vor.u32 %v3841_v3, %v3081_v1 }
 0x18d   : > { %2527 = vmatmul.bf16.gmra.mxu0 %v3052_v8 }
 0x18e   : > { %v2034_v26 = vpop.f32.mrf.mxu2 }
 0x18f   : > { %v2035_v33 = vadd.f32 %v2034_v26, %v1946_v27  ;;  %v2123_v37 = vpop.f32.mrf.mxu3  ;;  %v3849_v26 = vld [vmem:[%s4148_s21 + $0x134] sm:$0xf] }
 0x190   : > { %v1947_v56 = vpop.f32.mrf.mxu1 }
 0x191   : > { %v2124_v0 = vadd.f32 %v2123_v37, %v2035_v33  ;;  %v1948_v32 = vadd.f32 %v1947_v56, %v4471_v55  ;;  %v3109_v33 = vld [vmem:[%s4148_s21 + $0x154] sm:$0xf0] }
 0x192   : > { %v2214_v34 = vpop.f32.mrf.mxu0  ;;  %v3115_v56 = vld [vmem:[%s4148_s21 + $0x138] sm:$0xf]  ;;  %v3112_v1 = vor.u32 %v3849_v26, %v3109_v33  ;;  %v3159_v26 = vld [vmem:[%s4148_s21 + $0x188] sm:$0xf]  ;;  %v3864_v33 = vld [vmem:[%s4148_s21 + $0x1a8] sm:$0xf0] }
 0x193   : > { %v4694_v49 = vadd.f32 %v2212_v22, %v2124_v0  ;;  %v3854_v0 = vld [vmem:[%s4148_s21 + $0x158] sm:$0xf0] }
 0x194   : > { %v3116_v52 = vor.u32 %v3854_v0, %v3115_v56 }
 0x196   : > { %v2036_v38 = vpop.f32.mrf.mxu2 }
 0x197   : > { %v2037_v59 = vadd.f32 %v2036_v38, %v1948_v32  ;;  %v2125_v39 = vpop.f32.mrf.mxu3  ;;  %v3850_v32 = vld [vmem:[%s4148_s21 + $0x13c] sm:$0xf] }
 0x198   : > { %v1950_v9 = vpop.f32.mrf.mxu1 }
 0x199   : > { %v2126_v55 = vadd.f32 %v2125_v39, %v2037_v59  ;;  %v1951_v4 = vadd.f32 %v1950_v9, %v4482_v10  ;;  %v3124_v59 = vor.u32 %v3855_v48, %v3123_v46 }
 0x19a   : > { %v2217_v16 = vpop.f32.mrf.mxu0 }
 0x19b   : > { %2265 = vmatmul.bf16.gmra.mxu1 %v3076_v62  ;;  %2354 = vmatmul.bf16.gmra.mxu2 %v3080_v40  ;;  %v4703_v19 = vadd.f32 %v2214_v34, %v2126_v55  ;;  %v3117_v34 = vld [vmem:[%s4148_s21 + $0x15c] sm:$0xf0] }
 0x19c   : > { %2443 = vmatmul.bf16.gmra.mxu3 %v3084_v7  ;;  %v3120_v38 = vor.u32 %v3850_v32, %v3117_v34 }
 0x19d   : > { %2532 = vmatmul.bf16.gmra.mxu0 %v3088_v45 }
 0x19e   : > { %v2039_v20 = vpop.f32.mrf.mxu2 }
 0x19f   : > { %v2040_v21 = vadd.f32 %v2039_v20, %v1951_v4  ;;  %v2128_v8 = vpop.f32.mrf.mxu3  ;;  %v3858_v20 = vld [vmem:[%s4148_s21 + $0x17c] sm:$0xf] }
 0x1a0   : > { %v1952_v18 = vpop.f32.mrf.mxu1 }
 0x1a1   : > { %v2129_v27 = vadd.f32 %v2128_v8, %v2040_v21  ;;  %v1953_v10 = vadd.f32 %v1952_v18, %v4503_v31  ;;  %v3145_v21 = vld [vmem:[%s4148_s21 + $0x19c] sm:$0xf0] }
 0x1a2   : > { %v2219_v22 = vpop.f32.mrf.mxu0  ;;  %v3151_v18 = vld [vmem:[%s4148_s21 + $0x180] sm:$0xf]  ;;  %v3148_v34 = vor.u32 %v3858_v20, %v3145_v21  ;;  %v3195_v20 = vld [vmem:[%s4148_s21 + $0x1d0] sm:$0xf]  ;;  %v3873_v21 = vld [vmem:[%s4148_s21 + $0x1f0] sm:$0xf0] }
 0x1a3   : > { %v4708_v37 = vadd.f32 %v2217_v16, %v2129_v27  ;;  %v3863_v27 = vld [vmem:[%s4148_s21 + $0x1a0] sm:$0xf0] }
 0x1a4   : > { %v3152_v46 = vor.u32 %v3863_v27, %v3151_v18 }
 0x1a6   : > { %v2041_v14 = vpop.f32.mrf.mxu2 }
 0x1a7   : > { %v2042_v50 = vadd.f32 %v2041_v14, %v1953_v10  ;;  %v2130_v3 = vpop.f32.mrf.mxu3  ;;  %v3859_v10 = vld [vmem:[%s4148_s21 + $0x184] sm:$0xf] }
 0x1a8   : > { %v1955_v54 = vpop.f32.mrf.mxu1 }
 0x1a9   : > { %v2131_v31 = vadd.f32 %v2130_v3, %v2042_v50  ;;  %v1956_v39 = vadd.f32 %v1955_v54, %v4377_v41  ;;  %v3160_v50 = vor.u32 %v3864_v33, %v3159_v26 }
 0x1aa   : > { %v2222_v62 = vpop.f32.mrf.mxu0 }
 0x1ab   : > { %2270 = vmatmul.bf16.gmra.mxu1 %v3112_v1  ;;  %2359 = vmatmul.bf16.gmra.mxu2 %v3116_v52  ;;  %v4717_v40 = vadd.f32 %v2219_v22, %v2131_v31  ;;  %v3153_v22 = vld [vmem:[%s4148_s21 + $0x1a4] sm:$0xf0] }
 0x1ac   : > { %2448 = vmatmul.bf16.gmra.mxu3 %v3120_v38  ;;  %v3156_v14 = vor.u32 %v3859_v10, %v3153_v22 }
 0x1ad   : > { %2537 = vmatmul.bf16.gmra.mxu0 %v3124_v59 }
 0x1ae   : > { %v2044_v9 = vpop.f32.mrf.mxu2 }
 0x1af   : > { %v2045_v7 = vadd.f32 %v2044_v9, %v1956_v39  ;;  %v2133_v45 = vpop.f32.mrf.mxu3  ;;  %v3867_v9 = vld [vmem:[%s4148_s21 + $0x1c4] sm:$0xf] }
 0x1b0   : > { %v1957_v55 = vpop.f32.mrf.mxu1 }
 0x1b1   : > { %v2134_v4 = vadd.f32 %v2133_v45, %v2045_v7  ;;  %v1958_v41 = vadd.f32 %v1957_v55, %v4402_v60  ;;  %v3181_v7 = vld [vmem:[%s4148_s21 + $0x1e4] sm:$0xf0] }
 0x1b2   : > { %v2224_v16 = vpop.f32.mrf.mxu0  ;;  %v3187_v55 = vld [vmem:[%s4148_s21 + $0x1c8] sm:$0xf]  ;;  %v3184_v22 = vor.u32 %v3867_v9, %v3181_v7  ;;  %v3231_v9 = vld [vmem:[%s4148_s21 + $0x218] sm:$0xf]  ;;  %v3882_v7 = vld [vmem:[%s4148_s21 + $0x238] sm:$0xf0] }
 0x1b3   : > { %v4722_v8 = vadd.f32 %v2222_v62, %v2134_v4  ;;  %v3872_v4 = vld [vmem:[%s4148_s21 + $0x1e8] sm:$0xf0] }
 0x1b4   : > { %v3188_v26 = vor.u32 %v3872_v4, %v3187_v55 }
 0x1b6   : > { %v2046_v56 = vpop.f32.mrf.mxu2 }
 0x1b7   : > { %v2047_v0 = vadd.f32 %v2046_v56, %v1958_v41  ;;  %v2135_v32 = vpop.f32.mrf.mxu3  ;;  %v3868_v41 = vld [vmem:[%s4148_s21 + $0x1cc] sm:$0xf] }
 0x1b8   : > { %v1960_v48 = vpop.f32.mrf.mxu1 }
 0x1b9   : > { %v2136_v60 = vadd.f32 %v2135_v32, %v2047_v0  ;;  %v1961_v3 = vadd.f32 %v1960_v48, %v4413_v5  ;;  %v3196_v0 = vor.u32 %v3873_v21, %v3195_v20 }
 0x1ba   : > { %v2227_v1 = vpop.f32.mrf.mxu0 }
 0x1bb   : > { %2275 = vmatmul.bf16.gmra.mxu1 %v3148_v34  ;;  %2364 = vmatmul.bf16.gmra.mxu2 %v3152_v46  ;;  %v4731_v52 = vadd.f32 %v2224_v16, %v2136_v60  ;;  %v3189_v16 = vld [vmem:[%s4148_s21 + $0x1ec] sm:$0xf0] }
 0x1bc   : > { %2453 = vmatmul.bf16.gmra.mxu3 %v3156_v14  ;;  %v3192_v56 = vor.u32 %v3868_v41, %v3189_v16 }
 0x1bd   : > { %2542 = vmatmul.bf16.gmra.mxu0 %v3160_v50 }
 0x1be   : > { %v2049_v54 = vpop.f32.mrf.mxu2 }
 0x1bf   : > { %v2050_v38 = vadd.f32 %v2049_v54, %v1961_v3  ;;  %v2138_v59 = vpop.f32.mrf.mxu3  ;;  %v3876_v54 = vld [vmem:[%s4148_s21 + $0x20c] sm:$0xf] }
 0x1c0   : > { %v1962_v31 = vpop.f32.mrf.mxu1 }
 0x1c1   : > { %v2139_v39 = vadd.f32 %v2138_v59, %v2050_v38  ;;  %v1963_v5 = vadd.f32 %v1962_v31, %v4432_v23  ;;  %v3217_v38 = vld [vmem:[%s4148_s21 + $0x22c] sm:$0xf0] }
 0x1c2   : > { %v2229_v62 = vpop.f32.mrf.mxu0  ;;  %v3223_v31 = vld [vmem:[%s4148_s21 + $0x210] sm:$0xf]  ;;  %v3220_v16 = vor.u32 %v3876_v54, %v3217_v38  ;;  %v3267_v54 = vld [vmem:[%s4148_s21 + $0x260] sm:$0xf]  ;;  %v3891_v38 = vld [vmem:[%s4148_s21 + $0x280] sm:$0xf0] }
 0x1c3   : > { %v4736_v45 = vadd.f32 %v2227_v1, %v2139_v39  ;;  %v3881_v39 = vld [vmem:[%s4148_s21 + $0x230] sm:$0xf0] }
 0x1c4   : > { %v3224_v20 = vor.u32 %v3881_v39, %v3223_v31 }
 0x1c6   : > { %v2051_v18 = vpop.f32.mrf.mxu2 }
 0x1c7   : > { %v2052_v27 = vadd.f32 %v2051_v18, %v1963_v5  ;;  %v2140_v10 = vpop.f32.mrf.mxu3  ;;  %v3877_v5 = vld [vmem:[%s4148_s21 + $0x214] sm:$0xf] }
 0x1c8   : > { %v1965_v33 = vpop.f32.mrf.mxu1 }
 0x1c9   : > { %v2141_v23 = vadd.f32 %v2140_v10, %v2052_v27  ;;  %v1966_v32 = vadd.f32 %v1965_v33, %v4449_v36  ;;  %v3232_v27 = vor.u32 %v3882_v7, %v3231_v9 }
 0x1ca   : > { %v2232_v34 = vpop.f32.mrf.mxu0 }
 0x1cb   : > { %2280 = vmatmul.bf16.gmra.mxu1 %v3184_v22  ;;  %2369 = vmatmul.bf16.gmra.mxu2 %v3188_v26  ;;  %v4745_v46 = vadd.f32 %v2229_v62, %v2141_v23  ;;  %v3225_v62 = vld [vmem:[%s4148_s21 + $0x234] sm:$0xf0] }
 0x1cc   : > { %2458 = vmatmul.bf16.gmra.mxu3 %v3192_v56  ;;  %v3228_v18 = vor.u32 %v3877_v5, %v3225_v62 }
 0x1cd   : > { %2547 = vmatmul.bf16.gmra.mxu0 %v3196_v0 }
 0x1ce   : > { %v2054_v48 = vpop.f32.mrf.mxu2 }
 0x1cf   : > { %v2055_v14 = vadd.f32 %v2054_v48, %v1966_v32  ;;  %v2143_v50 = vpop.f32.mrf.mxu3  ;;  %v3885_v48 = vld [vmem:[%s4148_s21 + $0x254] sm:$0xf] }
 0x1d0   : > { %v1967_v60 = vpop.f32.mrf.mxu1 }
 0x1d1   : > { %v2144_v3 = vadd.f32 %v2143_v50, %v2055_v14  ;;  %v1968_v36 = vadd.f32 %v1967_v60, %v4474_v61  ;;  %v3253_v14 = vld [vmem:[%s4148_s21 + $0x274] sm:$0xf0] }
 0x1d2   : > { %v2234_v1 = vpop.f32.mrf.mxu0  ;;  %v3259_v60 = vld [vmem:[%s4148_s21 + $0x258] sm:$0xf]  ;;  %v3256_v62 = vor.u32 %v3885_v48, %v3253_v14  ;;  %v3895_v48 = vld [vmem:[%s4148_s21 + $0x2a4] sm:$0xf] }
 0x1d3   : > { %v4750_v59 = vadd.f32 %v2232_v34, %v2144_v3  ;;  %v3890_v3 = vld [vmem:[%s4148_s21 + $0x278] sm:$0xf0] }
 0x1d4   : > { %v3260_v9 = vor.u32 %v3890_v3, %v3259_v60  ;;  %v3297_v3 = vld [vmem:[%s4148_s21 + $0x2c4] sm:$0xf0] }
 0x1d6   : > { %v2056_v55 = vpop.f32.mrf.mxu2 }
 0x1d7   : > { %v2057_v4 = vadd.f32 %v2056_v55, %v1968_v36  ;;  %v2145_v41 = vpop.f32.mrf.mxu3  ;;  %v3886_v36 = vld [vmem:[%s4148_s21 + $0x25c] sm:$0xf] }
 0x1d8   : > { %v1970_v21 = vpop.f32.mrf.mxu1 }
 0x1d9   : > { %v2146_v61 = vadd.f32 %v2145_v41, %v2057_v4  ;;  %v1971_v10 = vadd.f32 %v1970_v21, %v4485_v12 }
 0x1da   : > { %v2237_v22 = vpop.f32.mrf.mxu0 }
 0x1db   : > { %2285 = vmatmul.bf16.gmra.mxu1 %v3220_v16  ;;  %2374 = vmatmul.bf16.gmra.mxu2 %v3224_v20  ;;  %v4759_v26 = vadd.f32 %v2234_v1, %v2146_v61  ;;  %v3261_v1 = vld [vmem:[%s4148_s21 + $0x27c] sm:$0xf0] }
 0x1dc   : > { %2463 = vmatmul.bf16.gmra.mxu3 %v3228_v18  ;;  %v3264_v55 = vor.u32 %v3886_v36, %v3261_v1  ;;  %v3303_v36 = vld [vmem:[%s4148_s21 + $0x2a8] sm:$0xf]  ;;  %v3900_v1 = vld [vmem:[%s4148_s21 + $0x2c8] sm:$0xf0] }
 0x1dd   : > { %2552 = vmatmul.bf16.gmra.mxu0 %v3232_v27 }
 0x1de   : > { %v2059_v33 = vpop.f32.mrf.mxu2 }
 0x1df   : > { %v2060_v56 = vadd.f32 %v2059_v33, %v1971_v10  ;;  %v2148_v0 = vpop.f32.mrf.mxu3  ;;  %v2598_v33 = vld [vmem:[%s4782_s16] sm:$0xff] }
 0x1e0   : > { %v1972_v23 = vpop.f32.mrf.mxu1 }
 0x1e1   : > { %v2149_v32 = vadd.f32 %v2148_v0, %v2060_v56  ;;  %v1973_v12 = vadd.f32 %v1972_v23, %v4506_v43  ;;  %v3268_v43 = vor.u32 %v3891_v38, %v3267_v54  ;;  %v4793_v0 = vld [vmem:[%s5064_s5] ss:$0 sm:$0xff]  ;;  %v3894_v23 = vld [vmem:[%s4148_s21 + $0x29c] sm:$0xf] }
 0x1e2   : > { %v2239_v34 = vpop.f32.mrf.mxu0 }
 0x1e3   : > { %v4764_v50 = vadd.f32 %v2237_v22, %v2149_v32  ;;  %v3289_v32 = vld [vmem:[%s4148_s21 + $0x2bc] sm:$0xf0] }
 0x1e6   : > { %v2061_v31 = vpop.f32.mrf.mxu2 }
 0x1e7   : > { %v2062_v39 = vadd.f32 %v2061_v31, %v1973_v12  ;;  %v2150_v5 = vpop.f32.mrf.mxu3  ;;  %v3295_v12 = vld [vmem:[%s4148_s21 + $0x2a0] sm:$0xf] }
 0x1e8   : > { %v2251_v7 = vpop.f32.mrf.mxu1 }
 0x1e9   : > { %v2151_v4 = vadd.f32 %v2150_v5, %v2062_v39  ;;  %v2252_v20 = vadd.f32 %v2251_v7, %v4524_v13  ;;  %v4788_v13 = vld [vmem:[%s5063_s4] ss:$0 sm:$0xff]  ;;  %v3292_v5 = vor.u32 %v3894_v23, %v3289_v32  ;;  %v3300_v7 = vor.u32 %v3895_v48, %v3297_v3  ;;  %v3331_v3 = vld [vmem:[%s4148_s21 + $0x2e8] sm:$0xf] }
 0x1ea   : > { %v2518_v41 = vpop.f32.mrf.mxu0 }
 0x1eb   : > { %2290 = vmatmul.bf16.gmra.mxu1 %v3256_v62  ;;  %2379 = vmatmul.bf16.gmra.mxu2 %v3260_v9  ;;  %v4772_v16 = vadd.f32 %v2239_v34, %v2151_v4  ;;  %v3899_v34 = vld [vmem:[%s4148_s21 + $0x2c0] sm:$0xf0] }
 0x1ec   : > { %2468 = vmatmul.bf16.gmra.mxu3 %v3264_v55  ;;  %v3296_v62 = vor.u32 %v3899_v34, %v3295_v12  ;;  %v3304_v55 = vor.u32 %v3900_v1, %v3303_v36  ;;  %v2600_v34 = vld [vmem:[%s4782_s16 + $0x10] sm:$0xff]  ;;  %v3908_v36 = vld [vmem:[%s4148_s21 + $0x308] sm:$0xf0] }
 0x1ed   : > { %2557 = vmatmul.bf16.gmra.mxu0 %v3268_v43  ;;  %v3904_v1 = vld [vmem:[%s4148_s21 + $0x2ec] sm:$0xf] }
 0x1ee   : > { %v2340_v21 = vpop.f32.mrf.mxu2 }
 0x1ef   : > { %v2341_v18 = vadd.f32 %v2340_v21, %v2252_v20  ;;  %v2429_v27 = vpop.f32.mrf.mxu3 }
 0x1f0   : > { %v2253_v61 = vpop.f32.mrf.mxu1 }
 0x1f1   : > { %v2430_v10 = vadd.f32 %v2429_v27, %v2341_v18  ;;  %v2254_v60 = vadd.f32 %v2253_v61, %v4534_v35 }
 0x1f2   : > { %v2520_v22 = vpop.f32.mrf.mxu0 }
 0x1f3   : > { %v2519_v56 = vadd.f32 %v2518_v41, %v2430_v10  ;;  %v2599_v41 = vld [vmem:[%s4782_s16 + $0x8] sm:$0xff] }
 0x1f5   : > { %v2630_v14 = vadd.f32 %v2598_v33, %v2519_v56 }
 0x1f6   : > { %v2342_v54 = vpop.f32.mrf.mxu2 }
 0x1f7   : > { %2662 = vst [vmem:[%s4801_s23] sm:$0xff] %v2630_v14  ;;  %v2698_v38 = vmul.f32 %v4788_v13, %v2630_v14  ;;  %v2343_v31 = vadd.f32 %v2342_v54, %v2254_v60  ;;  %v2431_v39 = vpop.f32.mrf.mxu3  ;;  %v3325_v60 = vld [vmem:[%s4148_s21 + $0x304] sm:$0xf0]  ;;  %v3333_v54 = vld [vmem:[%s4148_s21 + $0x30c] sm:$0xf0] }
 0x1f8   : > { %v2256_v9 = vpop.f32.mrf.mxu1 }
 0x1f9   : > { %v2734_v43 = vadd.f32 %v4793_v0, %v2698_v38  ;;  %v2432_v35 = vadd.f32 %v2431_v39, %v2343_v31  ;;  %v2257_v27 = vadd.f32 %v2256_v9, %v4540_v63  ;;  %v3903_v63 = vld [vmem:[%s4148_s21 + $0x2e4] sm:$0xf]  ;;  %v3339_v39 = vld [vmem:[%s4148_s21 + $0x2f0] sm:$0xf] }
 0x1fa   : > { %v2523_v4 = vpop.f32.mrf.mxu0 }
 0x1fb   : > { %v2766_v20 = vmax.f32 %v2734_v43, 0.0  ;;  %v2521_v21 = vadd.f32 %v2520_v22, %v2432_v35  ;;  %2295 = vmatmul.bf16.gmra.mxu1 %v3292_v5  ;;  %2384 = vmatmul.bf16.gmra.mxu2 %v3296_v62  ;;  %v3909_v5 = vld [vmem:[%s4148_s21 + $0x310] sm:$0xf0]  ;;  %v3328_v43 = vor.u32 %v3903_v63, %v3325_v60  ;;  %v3332_v35 = vor.u32 %v3908_v36, %v3331_v3  ;;  %v2602_v60 = vld [vmem:[%s4782_s16 + $0x20] sm:$0xff] }
 0x1fc   : > { %2473 = vmatmul.bf16.gmra.mxu3 %v3300_v7 }
 0x1fd   : > { %2562 = vmatmul.bf16.gmra.mxu0 %v3304_v55  ;;  %2798 = vst [vmem:[%s4817_s27] sm:$0xff] %v2766_v20  ;;  %v2631_v18 = vadd.f32 %v2599_v41, %v2521_v21  ;;  %v3336_v41 = vor.u32 %v3904_v1, %v3333_v54  ;;  %v3340_v20 = vor.u32 %v3909_v5, %v3339_v39  ;;  %v3361_v1 = vld [vmem:[%s4148_s21 + $0x34c] sm:$0xf0]  ;;  %v3369_v39 = vld [vmem:[%s4148_s21 + $0x354] sm:$0xf0] }
 0x1fe   : > { %v2345_v61 = vpop.f32.mrf.mxu2  ;;  %v3367_v54 = vld [vmem:[%s4148_s21 + $0x330] sm:$0xf] }
 0x1ff   : > { %2663 = vst [vmem:[%s4801_s23 + $0x8] sm:$0xff] %v2631_v18  ;;  %v2699_v10 = vmul.f32 %v4788_v13, %v2631_v18  ;;  %v2346_v22 = vadd.f32 %v2345_v61, %v2257_v27  ;;  %v2434_v33 = vpop.f32.mrf.mxu3  ;;  %v2601_v27 = vld [vmem:[%s4782_s16 + $0x18] sm:$0xff] }
 0x200   : > { %v2258_v56 = vpop.f32.mrf.mxu1 }
 0x201   : > { %v2735_v23 = vadd.f32 %v4793_v0, %v2699_v10  ;;  %v2435_v32 = vadd.f32 %v2434_v33, %v2346_v22  ;;  %v2259_v31 = vadd.f32 %v2258_v56, %v4550_v47 }
 0x202   : > { %v2525_v12 = vpop.f32.mrf.mxu0 }
 0x203   : > { %v2767_v48 = vmax.f32 %v2735_v23, 0.0  ;;  %v2524_v14 = vadd.f32 %v2523_v4, %v2435_v32 }
 0x205   : > { %2799 = vst [vmem:[%s4817_s27 + $0x8] sm:$0xff] %v2767_v48  ;;  %v2632_v38 = vadd.f32 %v2600_v34, %v2524_v14 }
 0x206   : > { %v2347_v62 = vpop.f32.mrf.mxu2 }
 0x207   : > { %2664 = vst [vmem:[%s4801_s23 + $0x10] sm:$0xff] %v2632_v38  ;;  %v2700_v9 = vmul.f32 %v4788_v13, %v2632_v38  ;;  %v2348_v7 = vadd.f32 %v2347_v62, %v2259_v31  ;;  %v2436_v55 = vpop.f32.mrf.mxu3  ;;  %v3917_v38 = vld [vmem:[%s4148_s21 + $0x350] sm:$0xf0] }
 0x208   : > { %v2261_v4 = vpop.f32.mrf.mxu1  ;;  %v3913_v31 = vld [vmem:[%s4148_s21 + $0x334] sm:$0xf] }
 0x209   : > { %v2736_v21 = vadd.f32 %v4793_v0, %v2700_v9  ;;  %v2437_v18 = vadd.f32 %v2436_v55, %v2348_v7  ;;  %v2262_v33 = vadd.f32 %v2261_v4, %v4568_v2  ;;  %v3912_v2 = vld [vmem:[%s4148_s21 + $0x32c] sm:$0xf]  ;;  %v3375_v9 = vld [vmem:[%s4148_s21 + $0x338] sm:$0xf]  ;;  %v3918_v7 = vld [vmem:[%s4148_s21 + $0x358] sm:$0xf0] }
 0x20a   : > { %v2528_v47 = vpop.f32.mrf.mxu0 }
 0x20b   : > { %v2768_v61 = vmax.f32 %v2736_v21, 0.0  ;;  %v2526_v10 = vadd.f32 %v2525_v12, %v2437_v18  ;;  %2300 = vmatmul.bf16.gmra.mxu1 %v3328_v43  ;;  %2389 = vmatmul.bf16.gmra.mxu2 %v3332_v35  ;;  %v3372_v18 = vor.u32 %v3913_v31, %v3369_v39  ;;  %v3926_v31 = vld [vmem:[%s4148_s21 + $0x398] sm:$0xf0] }
 0x20c   : > { %2478 = vmatmul.bf16.gmra.mxu3 %v3336_v41  ;;  %v3364_v41 = vor.u32 %v3912_v2, %v3361_v1  ;;  %v3922_v39 = vld [vmem:[%s4148_s21 + $0x37c] sm:$0xf] }
 0x20d   : > { %2567 = vmatmul.bf16.gmra.mxu0 %v3340_v20  ;;  %2800 = vst [vmem:[%s4817_s27 + $0x10] sm:$0xff] %v2768_v61  ;;  %v2633_v22 = vadd.f32 %v2601_v27, %v2526_v10  ;;  %v3368_v20 = vor.u32 %v3917_v38, %v3367_v54  ;;  %v2603_v10 = vld [vmem:[%s4782_s16 + $0x28] sm:$0xff]  ;;  %v3397_v54 = vld [vmem:[%s4148_s21 + $0x394] sm:$0xf0] }
 0x20e   : > { %v2350_v56 = vpop.f32.mrf.mxu2  ;;  %v3403_v38 = vld [vmem:[%s4148_s21 + $0x378] sm:$0xf] }
 0x20f   : > { %2665 = vst [vmem:[%s4801_s23 + $0x18] sm:$0xff] %v2633_v22  ;;  %v2701_v23 = vmul.f32 %v4788_v13, %v2633_v22  ;;  %v2351_v32 = vadd.f32 %v2350_v56, %v2262_v33  ;;  %v2439_v12 = vpop.f32.mrf.mxu3 }
 0x210   : > { %v2263_v34 = vpop.f32.mrf.mxu1 }
 0x211   : > { %v2737_v63 = vadd.f32 %v4793_v0, %v2701_v23  ;;  %v2440_v48 = vadd.f32 %v2439_v12, %v2351_v32  ;;  %v2264_v62 = vadd.f32 %v2263_v34, %v4578_v28 }
 0x212   : > { %v2530_v14 = vpop.f32.mrf.mxu0 }
 0x213   : > { %v2769_v3 = vmax.f32 %v2737_v63, 0.0  ;;  %v2529_v36 = vadd.f32 %v2528_v47, %v2440_v48  ;;  %v3376_v47 = vor.u32 %v3918_v7, %v3375_v9  ;;  %v3411_v7 = vld [vmem:[%s4148_s21 + $0x380] sm:$0xf] }
 0x215   : > { %2801 = vst [vmem:[%s4817_s27 + $0x18] sm:$0xff] %v2769_v3  ;;  %v2634_v5 = vadd.f32 %v2602_v60, %v2529_v36  ;;  %v2604_v3 = vld [vmem:[%s4782_s16 + $0x30] sm:$0xff] }
 0x216   : > { %v2352_v55 = vpop.f32.mrf.mxu2 }
 0x217   : > { %2666 = vst [vmem:[%s4801_s23 + $0x20] sm:$0xff] %v2634_v5  ;;  %v2702_v43 = vmul.f32 %v4788_v13, %v2634_v5  ;;  %v2353_v35 = vadd.f32 %v2352_v55, %v2264_v62  ;;  %v2441_v4 = vpop.f32.mrf.mxu3  ;;  %v3405_v5 = vld [vmem:[%s4148_s21 + $0x39c] sm:$0xf0]  ;;  %v3927_v55 = vld [vmem:[%s4148_s21 + $0x3a0] sm:$0xf0] }
 0x218   : > { %v2266_v21 = vpop.f32.mrf.mxu1 }
 0x219   : > { %v2738_v27 = vadd.f32 %v4793_v0, %v2702_v43  ;;  %v2442_v61 = vadd.f32 %v2441_v4, %v2353_v35  ;;  %v2267_v23 = vadd.f32 %v2266_v21, %v4584_v57  ;;  %v3921_v57 = vld [vmem:[%s4148_s21 + $0x374] sm:$0xf]  ;;  %v3404_v21 = vor.u32 %v3926_v31, %v3403_v38  ;;  %v3935_v38 = vld [vmem:[%s4148_s21 + $0x3e0] sm:$0xf0] }
 0x21a   : > { %v2533_v28 = vpop.f32.mrf.mxu0  ;;  %v3931_v31 = vld [vmem:[%s4148_s21 + $0x3c4] sm:$0xf] }
 0x21b   : > { %v2770_v22 = vmax.f32 %v2738_v27, 0.0  ;;  %v2531_v33 = vadd.f32 %v2530_v14, %v2442_v61  ;;  %2305 = vmatmul.bf16.gmra.mxu1 %v3364_v41  ;;  %2394 = vmatmul.bf16.gmra.mxu2 %v3368_v20  ;;  %v3400_v20 = vor.u32 %v3921_v57, %v3397_v54  ;;  %v3412_v27 = vor.u32 %v3927_v55, %v3411_v7  ;;  %v3439_v54 = vld [vmem:[%s4148_s21 + $0x3c0] sm:$0xf]  ;;  %v3936_v7 = vld [vmem:[%s4148_s21 + $0x3e8] sm:$0xf0] }
 0x21c   : > { %2483 = vmatmul.bf16.gmra.mxu3 %v3372_v18 }
 0x21d   : > { %2572 = vmatmul.bf16.gmra.mxu0 %v3376_v47  ;;  %2802 = vst [vmem:[%s4817_s27 + $0x20] sm:$0xff] %v2770_v22  ;;  %v2635_v56 = vadd.f32 %v2603_v10, %v2531_v33  ;;  %v3408_v47 = vor.u32 %v3922_v39, %v3405_v5  ;;  %v2605_v10 = vld [vmem:[%s4782_s16 + $0x38] sm:$0xff]  ;;  %v3441_v39 = vld [vmem:[%s4148_s21 + $0x3e4] sm:$0xf0] }
 0x21e   : > { %v2355_v32 = vpop.f32.mrf.mxu2 }
 0x21f   : > { %2667 = vst [vmem:[%s4801_s23 + $0x28] sm:$0xff] %v2635_v56  ;;  %v2703_v12 = vmul.f32 %v4788_v13, %v2635_v56  ;;  %v2356_v34 = vadd.f32 %v2355_v32, %v2267_v23  ;;  %v2444_v63 = vpop.f32.mrf.mxu3 }
 0x220   : > { %v2268_v48 = vpop.f32.mrf.mxu1 }
 0x221   : > { %v2739_v14 = vadd.f32 %v4793_v0, %v2703_v12  ;;  %v2445_v60 = vadd.f32 %v2444_v63, %v2356_v34  ;;  %v2269_v9 = vadd.f32 %v2268_v48, %v4593_v29 }
 0x222   : > { %v2535_v2 = vpop.f32.mrf.mxu0 }
 0x223   : > { %v2771_v36 = vmax.f32 %v2739_v14, 0.0  ;;  %v2534_v1 = vadd.f32 %v2533_v28, %v2445_v60 }
 0x225   : > { %2803 = vst [vmem:[%s4817_s27 + $0x28] sm:$0xff] %v2771_v36  ;;  %v2636_v62 = vadd.f32 %v2604_v3, %v2534_v1  ;;  %v2606_v3 = vld [vmem:[%s4782_s16 + $0x40] sm:$0xff] }
 0x226   : > { %v2357_v43 = vpop.f32.mrf.mxu2  ;;  %v3433_v1 = vld [vmem:[%s4148_s21 + $0x3dc] sm:$0xf0] }
 0x227   : > { %2668 = vst [vmem:[%s4801_s23 + $0x30] sm:$0xff] %v2636_v62  ;;  %v2704_v35 = vmul.f32 %v4788_v13, %v2636_v62  ;;  %v2358_v4 = vadd.f32 %v2357_v43, %v2269_v9  ;;  %v2446_v41 = vpop.f32.mrf.mxu3  ;;  %v3447_v9 = vld [vmem:[%s4148_s21 + $0x3c8] sm:$0xf] }
 0x228   : > { %v2271_v18 = vpop.f32.mrf.mxu1 }
 0x229   : > { %v2740_v61 = vadd.f32 %v4793_v0, %v2704_v35  ;;  %v2447_v28 = vadd.f32 %v2446_v41, %v2358_v4  ;;  %v2272_v23 = vadd.f32 %v2271_v18, %v4610_v53  ;;  %v3930_v53 = vld [vmem:[%s4148_s21 + $0x3bc] sm:$0xf]  ;;  %v3444_v18 = vor.u32 %v3931_v31, %v3441_v39  ;;  %v3483_v39 = vld [vmem:[%s4148_s21 + $0x410] sm:$0xf] }
 0x22a   : > { %v2538_v29 = vpop.f32.mrf.mxu0  ;;  %v3436_v41 = vor.u32 %v3930_v53, %v3433_v1  ;;  %v3469_v53 = vld [vmem:[%s4148_s21 + $0x424] sm:$0xf0]  ;;  %v3940_v1 = vld [vmem:[%s4148_s21 + $0x40c] sm:$0xf] }
 0x22b   : > { %v2772_v22 = vmax.f32 %v2740_v61, 0.0  ;;  %v2536_v33 = vadd.f32 %v2535_v2, %v2447_v28  ;;  %2310 = vmatmul.bf16.gmra.mxu1 %v3400_v20  ;;  %2399 = vmatmul.bf16.gmra.mxu2 %v3404_v21  ;;  %v3440_v20 = vor.u32 %v3935_v38, %v3439_v54  ;;  %v2607_v28 = vld [vmem:[%s4782_s16 + $0x48] sm:$0xff]  ;;  %v3477_v54 = vld [vmem:[%s4148_s21 + $0x42c] sm:$0xf0] }
 0x22c   : > { %2488 = vmatmul.bf16.gmra.mxu3 %v3408_v47  ;;  %v3448_v47 = vor.u32 %v3936_v7, %v3447_v9 }
 0x22d   : > { %2577 = vmatmul.bf16.gmra.mxu0 %v3412_v27  ;;  %2804 = vst [vmem:[%s4817_s27 + $0x30] sm:$0xff] %v2772_v22  ;;  %v2637_v56 = vadd.f32 %v2605_v10, %v2536_v33 }
 0x22e   : > { %v2360_v32 = vpop.f32.mrf.mxu2 }
 0x22f   : > { %2669 = vst [vmem:[%s4801_s23 + $0x38] sm:$0xff] %v2637_v56  ;;  %v2705_v12 = vmul.f32 %v4788_v13, %v2637_v56  ;;  %v2361_v34 = vadd.f32 %v2360_v32, %v2272_v23  ;;  %v2449_v63 = vpop.f32.mrf.mxu3 }
 0x230   : > { %v2273_v48 = vpop.f32.mrf.mxu1 }
 0x231   : > { %v2741_v14 = vadd.f32 %v4793_v0, %v2705_v12  ;;  %v2450_v60 = vadd.f32 %v2449_v63, %v2361_v34  ;;  %v2274_v62 = vadd.f32 %v2273_v48, %v4619_v24 }
 0x232   : > { %v2540_v2 = vpop.f32.mrf.mxu0 }
 0x233   : > { %v2773_v57 = vmax.f32 %v2741_v14, 0.0  ;;  %v2539_v36 = vadd.f32 %v2538_v29, %v2450_v60  ;;  %v2608_v60 = vld [vmem:[%s4782_s16 + $0x50] sm:$0xff] }
 0x235   : > { %2805 = vst [vmem:[%s4817_s27 + $0x38] sm:$0xff] %v2773_v57  ;;  %v2638_v5 = vadd.f32 %v2606_v3, %v2539_v36  ;;  %v3475_v57 = vld [vmem:[%s4148_s21 + $0x408] sm:$0xf]  ;;  %v3944_v36 = vld [vmem:[%s4148_s21 + $0x428] sm:$0xf0] }
 0x236   : > { %v2362_v55 = vpop.f32.mrf.mxu2 }
 0x237   : > { %2670 = vst [vmem:[%s4801_s23 + $0x40] sm:$0xff] %v2638_v5  ;;  %v2706_v43 = vmul.f32 %v4788_v13, %v2638_v5  ;;  %v2363_v35 = vadd.f32 %v2362_v55, %v2274_v62  ;;  %v2451_v4 = vpop.f32.mrf.mxu3  ;;  %v3945_v5 = vld [vmem:[%s4148_s21 + $0x430] sm:$0xf0] }
 0x238   : > { %v2276_v21 = vpop.f32.mrf.mxu1 }
 0x239   : > { %v2742_v27 = vadd.f32 %v4793_v0, %v2706_v43  ;;  %v2452_v61 = vadd.f32 %v2451_v4, %v2363_v35  ;;  %v2277_v33 = vadd.f32 %v2276_v21, %v4624_v6  ;;  %v3939_v6 = vld [vmem:[%s4148_s21 + $0x404] sm:$0xf]  ;;  %v3476_v35 = vor.u32 %v3944_v36, %v3475_v57  ;;  %v3519_v36 = vld [vmem:[%s4148_s21 + $0x458] sm:$0xf] }
 0x23a   : > { %v2543_v24 = vpop.f32.mrf.mxu0  ;;  %v3472_v43 = vor.u32 %v3939_v6, %v3469_v53  ;;  %v3953_v6 = vld [vmem:[%s4148_s21 + $0x470] sm:$0xf0] }
 0x23b   : > { %v2774_v29 = vmax.f32 %v2742_v27, 0.0  ;;  %v2541_v10 = vadd.f32 %v2540_v2, %v2452_v61  ;;  %2315 = vmatmul.bf16.gmra.mxu1 %v3436_v41  ;;  %2404 = vmatmul.bf16.gmra.mxu2 %v3440_v20  ;;  %v3480_v41 = vor.u32 %v3940_v1, %v3477_v54  ;;  %v3484_v20 = vor.u32 %v3945_v5, %v3483_v39  ;;  %v3954_v1 = vld [vmem:[%s4148_s21 + $0x478] sm:$0xf0] }
 0x23c   : > { %2493 = vmatmul.bf16.gmra.mxu3 %v3444_v18 }
 0x23d   : > { %2582 = vmatmul.bf16.gmra.mxu0 %v3448_v47  ;;  %2806 = vst [vmem:[%s4817_s27 + $0x40] sm:$0xff] %v2774_v29  ;;  %v2639_v22 = vadd.f32 %v2607_v28, %v2541_v10  ;;  %v2609_v47 = vld [vmem:[%s4782_s16 + $0x58] sm:$0xff] }
 0x23e   : > { %v2365_v56 = vpop.f32.mrf.mxu2 }
 0x23f   : > { %2671 = vst [vmem:[%s4801_s23 + $0x48] sm:$0xff] %v2639_v22  ;;  %v2707_v23 = vmul.f32 %v4788_v13, %v2639_v22  ;;  %v2366_v32 = vadd.f32 %v2365_v56, %v2277_v33  ;;  %v2454_v12 = vpop.f32.mrf.mxu3 }
 0x240   : > { %v2278_v34 = vpop.f32.mrf.mxu1 }
 0x241   : > { %v2743_v63 = vadd.f32 %v4793_v0, %v2707_v23  ;;  %v2455_v48 = vadd.f32 %v2454_v12, %v2366_v32  ;;  %v2279_v31 = vadd.f32 %v2278_v34, %v4633_v17  ;;  %v2610_v34 = vld [vmem:[%s4782_s16 + $0x60] sm:$0xff] }
 0x242   : > { %v2545_v14 = vpop.f32.mrf.mxu0 }
 0x243   : > { %v2775_v2 = vmax.f32 %v2743_v63, 0.0  ;;  %v2544_v3 = vadd.f32 %v2543_v24, %v2455_v48 }
 0x245   : > { %2807 = vst [vmem:[%s4817_s27 + $0x48] sm:$0xff] %v2775_v2  ;;  %v2640_v38 = vadd.f32 %v2608_v60, %v2544_v3  ;;  %v3511_v60 = vld [vmem:[%s4148_s21 + $0x450] sm:$0xf]  ;;  %v3949_v2 = vld [vmem:[%s4148_s21 + $0x454] sm:$0xf] }
 0x246   : > { %v2367_v62 = vpop.f32.mrf.mxu2  ;;  %v3513_v3 = vld [vmem:[%s4148_s21 + $0x474] sm:$0xf0] }
 0x247   : > { %2672 = vst [vmem:[%s4801_s23 + $0x50] sm:$0xff] %v2640_v38  ;;  %v2708_v9 = vmul.f32 %v4788_v13, %v2640_v38  ;;  %v2368_v7 = vadd.f32 %v2367_v62, %v2279_v31  ;;  %v2456_v55 = vpop.f32.mrf.mxu3  ;;  %v3512_v62 = vor.u32 %v3953_v6, %v3511_v60  ;;  %v2613_v6 = vld [vmem:[%s4782_s16 + $0x78] sm:$0xff] }
 0x248   : > { %v2281_v4 = vpop.f32.mrf.mxu1 }
 0x249   : > { %v2744_v21 = vadd.f32 %v4793_v0, %v2708_v9  ;;  %v2457_v18 = vadd.f32 %v2456_v55, %v2368_v7  ;;  %v2282_v28 = vadd.f32 %v2281_v4, %v4638_v30  ;;  %v3948_v30 = vld [vmem:[%s4148_s21 + $0x44c] sm:$0xf]  ;;  %v3516_v7 = vor.u32 %v3949_v2, %v3513_v3 }
 0x24a   : > { %v2548_v17 = vpop.f32.mrf.mxu0  ;;  %v3520_v55 = vor.u32 %v3954_v1, %v3519_v36  ;;  %v2611_v4 = vld [vmem:[%s4782_s16 + $0x68] sm:$0xff] }
 0x24b   : > { %v2776_v27 = vmax.f32 %v2744_v21, 0.0  ;;  %v2546_v61 = vadd.f32 %v2545_v14, %v2457_v18  ;;  %2320 = vmatmul.bf16.gmra.mxu1 %v3472_v43  ;;  %2409 = vmatmul.bf16.gmra.mxu2 %v3476_v35  ;;  %v3505_v14 = vld [vmem:[%s4148_s21 + $0x46c] sm:$0xf0] }
 0x24c   : > { %2498 = vmatmul.bf16.gmra.mxu3 %v3480_v41  ;;  %v3508_v5 = vor.u32 %v3948_v30, %v3505_v14 }
 0x24d   : > { %2587 = vmatmul.bf16.gmra.mxu0 %v3484_v20  ;;  %2808 = vst [vmem:[%s4817_s27 + $0x50] sm:$0xff] %v2776_v27  ;;  %v2641_v24 = vadd.f32 %v2609_v47, %v2546_v61 }
 0x24e   : > { %v2370_v29 = vpop.f32.mrf.mxu2 }
 0x24f   : > { %2673 = vst [vmem:[%s4801_s23 + $0x58] sm:$0xff] %v2641_v24  ;;  %v2709_v10 = vmul.f32 %v4788_v13, %v2641_v24  ;;  %v2371_v22 = vadd.f32 %v2370_v29, %v2282_v28  ;;  %v2459_v33 = vpop.f32.mrf.mxu3 }
 0x250   : > { %v2283_v56 = vpop.f32.mrf.mxu1 }
 0x251   : > { %v2745_v23 = vadd.f32 %v4793_v0, %v2709_v10  ;;  %v2460_v32 = vadd.f32 %v2459_v33, %v2371_v22  ;;  %v2284_v57 = vadd.f32 %v2283_v56, %v4647_v44  ;;  %v2612_v22 = vld [vmem:[%s4782_s16 + $0x70] sm:$0xff] }
 0x252   : > { %v2550_v12 = vpop.f32.mrf.mxu0 }
 0x253   : > { %v2777_v63 = vmax.f32 %v2745_v23, 0.0  ;;  %v2549_v48 = vadd.f32 %v2548_v17, %v2460_v32 }
 0x255   : > { %2809 = vst [vmem:[%s4817_s27 + $0x58] sm:$0xff] %v2777_v63  ;;  %v2642_v53 = vadd.f32 %v2610_v34, %v2549_v48 }
 0x256   : > { %v2372_v54 = vpop.f32.mrf.mxu2 }
 0x257   : > { %2674 = vst [vmem:[%s4801_s23 + $0x60] sm:$0xff] %v2642_v53  ;;  %v2710_v38 = vmul.f32 %v4788_v13, %v2642_v53  ;;  %v2373_v31 = vadd.f32 %v2372_v54, %v2284_v57  ;;  %v2461_v39 = vpop.f32.mrf.mxu3 }
 0x258   : > { %v2286_v9 = vpop.f32.mrf.mxu1 }
 0x259   : > { %v2746_v43 = vadd.f32 %v4793_v0, %v2710_v38  ;;  %v2462_v35 = vadd.f32 %v2461_v39, %v2373_v31  ;;  %v2287_v18 = vadd.f32 %v2286_v9, %v4652_v15 }
 0x25a   : > { %v2553_v44 = vpop.f32.mrf.mxu0 }
 0x25b   : > { %v2778_v41 = vmax.f32 %v2746_v43, 0.0  ;;  %v2551_v20 = vadd.f32 %v2550_v12, %v2462_v35  ;;  %2325 = vmatmul.bf16.gmra.mxu1 %v3508_v5  ;;  %2414 = vmatmul.bf16.gmra.mxu2 %v3512_v62  ;;  %v2614_v62 = vld [vmem:[%s4782_s16 + $0x80] sm:$0xff] }
 0x25c   : > { %2503 = vmatmul.bf16.gmra.mxu3 %v3516_v7 }
 0x25d   : > { %2592 = vmatmul.bf16.gmra.mxu0 %v3520_v55  ;;  %2810 = vst [vmem:[%s4817_s27 + $0x60] sm:$0xff] %v2778_v41  ;;  %v2643_v21 = vadd.f32 %v2611_v4, %v2551_v20 }
 0x25e   : > { %v2375_v17 = vpop.f32.mrf.mxu2 }
 0x25f   : > { %2675 = vst [vmem:[%s4801_s23 + $0x68] sm:$0xff] %v2643_v21  ;;  %v2711_v47 = vmul.f32 %v4788_v13, %v2643_v21  ;;  %v2376_v27 = vadd.f32 %v2375_v17, %v2287_v18  ;;  %v2464_v61 = vpop.f32.mrf.mxu3  ;;  %v2615_v17 = vld [vmem:[%s4782_s16 + $0x88] sm:$0xff] }
 0x260   : > { %v2288_v24 = vpop.f32.mrf.mxu1 }
 0x261   : > { %v2747_v28 = vadd.f32 %v4793_v0, %v2711_v47  ;;  %v2465_v29 = vadd.f32 %v2464_v61, %v2376_v27  ;;  %v2289_v15 = vadd.f32 %v2288_v24, %v4661_v51 }
 0x262   : > { %v2555_v10 = vpop.f32.mrf.mxu0 }
 0x263   : > { %v2779_v33 = vmax.f32 %v2747_v28, 0.0  ;;  %v2554_v56 = vadd.f32 %v2553_v44, %v2465_v29 }
 0x265   : > { %2811 = vst [vmem:[%s4817_s27 + $0x68] sm:$0xff] %v2779_v33  ;;  %v2644_v23 = vadd.f32 %v2612_v22, %v2554_v56 }
 0x266   : > { %v2377_v32 = vpop.f32.mrf.mxu2 }
 0x267   : > { %2676 = vst [vmem:[%s4801_s23 + $0x70] sm:$0xff] %v2644_v23  ;;  %v2712_v12 = vmul.f32 %v4788_v13, %v2644_v23  ;;  %v2378_v34 = vadd.f32 %v2377_v32, %v2289_v15  ;;  %v2466_v30 = vpop.f32.mrf.mxu3  ;;  %v2616_v15 = vld [vmem:[%s4782_s16 + $0x90] sm:$0xff] }
 0x268   : > { %v2291_v63 = vpop.f32.mrf.mxu1 }
 0x269   : > { %v2748_v48 = vadd.f32 %v4793_v0, %v2712_v12  ;;  %v2467_v14 = vadd.f32 %v2466_v30, %v2378_v34  ;;  %v2292_v51 = vadd.f32 %v2291_v63, %v4666_v11 }
 0x26a   : > { %v2558_v60 = vpop.f32.mrf.mxu0 }
 0x26b   : > { %v2780_v2 = vmax.f32 %v2748_v48, 0.0  ;;  %v2556_v3 = vadd.f32 %v2555_v10, %v2467_v14 }
 0x26d   : > { %2812 = vst [vmem:[%s4817_s27 + $0x70] sm:$0xff] %v2780_v2  ;;  %v2645_v53 = vadd.f32 %v2613_v6, %v2556_v3 }
 0x26e   : > { %v2380_v57 = vpop.f32.mrf.mxu2 }
 0x26f   : > { %2677 = vst [vmem:[%s4801_s23 + $0x78] sm:$0xff] %v2645_v53  ;;  %v2713_v36 = vmul.f32 %v4788_v13, %v2645_v53  ;;  %v2381_v1 = vadd.f32 %v2380_v57, %v2292_v51  ;;  %v2469_v54 = vpop.f32.mrf.mxu3  ;;  %v2617_v53 = vld [vmem:[%s4782_s16 + $0x98] sm:$0xff] }
 0x270   : > { %v2293_v38 = vpop.f32.mrf.mxu1 }
 0x271   : > { %v2749_v31 = vadd.f32 %v4793_v0, %v2713_v36  ;;  %v2470_v39 = vadd.f32 %v2469_v54, %v2381_v1  ;;  %v2294_v11 = vadd.f32 %v2293_v38, %v4675_v42 }
 0x272   : > { %v2560_v5 = vpop.f32.mrf.mxu0 }
 0x273   : > { %v2781_v9 = vmax.f32 %v2749_v31, 0.0  ;;  %v2559_v7 = vadd.f32 %v2558_v60, %v2470_v39 }
 0x275   : > { %2813 = vst [vmem:[%s4817_s27 + $0x78] sm:$0xff] %v2781_v9  ;;  %v2646_v55 = vadd.f32 %v2614_v62, %v2559_v7  ;;  %v2618_v7 = vld [vmem:[%s4782_s16 + $0xa0] sm:$0xff] }
 0x276   : > { %v2382_v43 = vpop.f32.mrf.mxu2 }
 0x277   : > { %2678 = vst [vmem:[%s4801_s23 + $0x80] sm:$0xff] %v2646_v55  ;;  %v2714_v35 = vmul.f32 %v4788_v13, %v2646_v55  ;;  %v2383_v44 = vadd.f32 %v2382_v43, %v2294_v11  ;;  %v2471_v4 = vpop.f32.mrf.mxu3 }
 0x278   : > { %v2296_v41 = vpop.f32.mrf.mxu1 }
 0x279   : > { %v2750_v20 = vadd.f32 %v4793_v0, %v2714_v35  ;;  %v2472_v21 = vadd.f32 %v2471_v4, %v2383_v44  ;;  %v2297_v42 = vadd.f32 %v2296_v41, %v4680_v58 }
 0x27a   : > { %v2563_v18 = vpop.f32.mrf.mxu0 }
 0x27b   : > { %v2782_v47 = vmax.f32 %v2750_v20, 0.0  ;;  %v2561_v27 = vadd.f32 %v2560_v5, %v2472_v21 }
 0x27d   : > { %2814 = vst [vmem:[%s4817_s27 + $0x80] sm:$0xff] %v2782_v47  ;;  %v2647_v61 = vadd.f32 %v2615_v17, %v2561_v27  ;;  %v2619_v47 = vld [vmem:[%s4782_s16 + $0xa8] sm:$0xff] }
 0x27e   : > { %v2385_v24 = vpop.f32.mrf.mxu2 }
 0x27f   : > { %2679 = vst [vmem:[%s4801_s23 + $0x88] sm:$0xff] %v2647_v61  ;;  %v2715_v28 = vmul.f32 %v4788_v13, %v2647_v61  ;;  %v2386_v29 = vadd.f32 %v2385_v24, %v2297_v42  ;;  %v2474_v10 = vpop.f32.mrf.mxu3 }
 0x280   : > { %v2298_v22 = vpop.f32.mrf.mxu1 }
 0x281   : > { %v2751_v33 = vadd.f32 %v4793_v0, %v2715_v28  ;;  %v2475_v56 = vadd.f32 %v2474_v10, %v2386_v29  ;;  %v2299_v58 = vadd.f32 %v2298_v22, %v4689_v25 }
 0x282   : > { %v2565_v23 = vpop.f32.mrf.mxu0 }
 0x283   : > { %v2783_v32 = vmax.f32 %v2751_v33, 0.0  ;;  %v2564_v12 = vadd.f32 %v2563_v18, %v2475_v56 }
 0x285   : > { %2815 = vst [vmem:[%s4817_s27 + $0x88] sm:$0xff] %v2783_v32  ;;  %v2648_v34 = vadd.f32 %v2616_v15, %v2564_v12  ;;  %v2620_v15 = vld [vmem:[%s4782_s16 + $0xb0] sm:$0xff] }
 0x286   : > { %v2387_v30 = vpop.f32.mrf.mxu2 }
 0x287   : > { %2680 = vst [vmem:[%s4801_s23 + $0x90] sm:$0xff] %v2648_v34  ;;  %v2716_v63 = vmul.f32 %v4788_v13, %v2648_v34  ;;  %v2388_v48 = vadd.f32 %v2387_v30, %v2299_v58  ;;  %v2476_v14 = vpop.f32.mrf.mxu3 }
 0x288   : > { %v2301_v60 = vpop.f32.mrf.mxu1 }
 0x289   : > { %v2752_v6 = vadd.f32 %v4793_v0, %v2716_v63  ;;  %v2477_v2 = vadd.f32 %v2476_v14, %v2388_v48  ;;  %v2302_v25 = vadd.f32 %v2301_v60, %v4694_v49 }
 0x28a   : > { %v2568_v3 = vpop.f32.mrf.mxu0 }
 0x28b   : > { %v2784_v51 = vmax.f32 %v2752_v6, 0.0  ;;  %v2566_v57 = vadd.f32 %v2565_v23, %v2477_v2 }
 0x28d   : > { %2816 = vst [vmem:[%s4817_s27 + $0x90] sm:$0xff] %v2784_v51  ;;  %v2649_v36 = vadd.f32 %v2617_v53, %v2566_v57 }
 0x28e   : > { %v2390_v1 = vpop.f32.mrf.mxu2 }
 0x28f   : > { %2681 = vst [vmem:[%s4801_s23 + $0x98] sm:$0xff] %v2649_v36  ;;  %v2717_v54 = vmul.f32 %v4788_v13, %v2649_v36  ;;  %v2391_v38 = vadd.f32 %v2390_v1, %v2302_v25  ;;  %v2479_v31 = vpop.f32.mrf.mxu3 }
 0x290   : > { %v2303_v39 = vpop.f32.mrf.mxu1 }
 0x291   : > { %v2753_v5 = vadd.f32 %v4793_v0, %v2717_v54  ;;  %v2480_v62 = vadd.f32 %v2479_v31, %v2391_v38  ;;  %v2304_v49 = vadd.f32 %v2303_v39, %v4703_v19 }
 0x292   : > { %v2570_v9 = vpop.f32.mrf.mxu0 }
 0x293   : > { %v2785_v55 = vmax.f32 %v2753_v5, 0.0  ;;  %v2569_v11 = vadd.f32 %v2568_v3, %v2480_v62  ;;  %v2621_v3 = vld [vmem:[%s4782_s16 + $0xb8] sm:$0xff]  ;;  %v2622_v62 = vld [vmem:[%s4782_s16 + $0xc0] sm:$0xff] }
 0x295   : > { %2817 = vst [vmem:[%s4817_s27 + $0x98] sm:$0xff] %v2785_v55  ;;  %v2650_v43 = vadd.f32 %v2618_v7, %v2569_v11 }
 0x296   : > { %v2392_v35 = vpop.f32.mrf.mxu2 }
 0x297   : > { %2682 = vst [vmem:[%s4801_s23 + $0xa0] sm:$0xff] %v2650_v43  ;;  %v2718_v44 = vmul.f32 %v4788_v13, %v2650_v43  ;;  %v2393_v4 = vadd.f32 %v2392_v35, %v2304_v49  ;;  %v2481_v41 = vpop.f32.mrf.mxu3 }
 0x298   : > { %v2306_v20 = vpop.f32.mrf.mxu1 }
 0x299   : > { %v2754_v21 = vadd.f32 %v4793_v0, %v2718_v44  ;;  %v2482_v18 = vadd.f32 %v2481_v41, %v2393_v4  ;;  %v2307_v19 = vadd.f32 %v2306_v20, %v4708_v37 }
 0x29a   : > { %v2573_v17 = vpop.f32.mrf.mxu0 }
 0x29b   : > { %v2786_v27 = vmax.f32 %v2754_v21, 0.0  ;;  %v2571_v61 = vadd.f32 %v2570_v9, %v2482_v18  ;;  %v2623_v21 = vld [vmem:[%s4782_s16 + $0xc8] sm:$0xff] }
 0x29d   : > { %2818 = vst [vmem:[%s4817_s27 + $0xa0] sm:$0xff] %v2786_v27  ;;  %v2651_v42 = vadd.f32 %v2619_v47, %v2571_v61 }
 0x29e   : > { %v2395_v24 = vpop.f32.mrf.mxu2 }
 0x29f   : > { %2683 = vst [vmem:[%s4801_s23 + $0xa8] sm:$0xff] %v2651_v42  ;;  %v2719_v28 = vmul.f32 %v4788_v13, %v2651_v42  ;;  %v2396_v29 = vadd.f32 %v2395_v24, %v2307_v19  ;;  %v2484_v10 = vpop.f32.mrf.mxu3 }
 0x2a0   : > { %v2308_v22 = vpop.f32.mrf.mxu1 }
 0x2a1   : > { %v2755_v33 = vadd.f32 %v4793_v0, %v2719_v28  ;;  %v2485_v56 = vadd.f32 %v2484_v10, %v2396_v29  ;;  %v2309_v37 = vadd.f32 %v2308_v22, %v4717_v40  ;;  %v2624_v10 = vld [vmem:[%s4782_s16 + $0xd0] sm:$0xff] }
 0x2a2   : > { %v2575_v23 = vpop.f32.mrf.mxu0 }
 0x2a3   : > { %v2787_v32 = vmax.f32 %v2755_v33, 0.0  ;;  %v2574_v12 = vadd.f32 %v2573_v17, %v2485_v56 }
 0x2a5   : > { %2819 = vst [vmem:[%s4817_s27 + $0xa8] sm:$0xff] %v2787_v32  ;;  %v2652_v34 = vadd.f32 %v2620_v15, %v2574_v12 }
 0x2a6   : > { %v2397_v58 = vpop.f32.mrf.mxu2 }
 0x2a7   : > { %2684 = vst [vmem:[%s4801_s23 + $0xb0] sm:$0xff] %v2652_v34  ;;  %v2720_v30 = vmul.f32 %v4788_v13, %v2652_v34  ;;  %v2398_v63 = vadd.f32 %v2397_v58, %v2309_v37  ;;  %v2486_v48 = vpop.f32.mrf.mxu3 }
 0x2a8   : > { %v2311_v14 = vpop.f32.mrf.mxu1 }
 0x2a9   : > { %v2756_v60 = vadd.f32 %v4793_v0, %v2720_v30  ;;  %v2487_v6 = vadd.f32 %v2486_v48, %v2398_v63  ;;  %v2312_v40 = vadd.f32 %v2311_v14, %v4722_v8  ;;  %v2625_v63 = vld [vmem:[%s4782_s16 + $0xd8] sm:$0xff] }
 0x2aa   : > { %v2578_v2 = vpop.f32.mrf.mxu0 }
 0x2ab   : > { %v2788_v53 = vmax.f32 %v2756_v60, 0.0  ;;  %v2576_v51 = vadd.f32 %v2575_v23, %v2487_v6 }
 0x2ad   : > { %2820 = vst [vmem:[%s4817_s27 + $0xb0] sm:$0xff] %v2788_v53  ;;  %v2653_v57 = vadd.f32 %v2621_v3, %v2576_v51 }
 0x2ae   : > { %v2400_v36 = vpop.f32.mrf.mxu2 }
 0x2af   : > { %2685 = vst [vmem:[%s4801_s23 + $0xb8] sm:$0xff] %v2653_v57  ;;  %v2721_v25 = vmul.f32 %v4788_v13, %v2653_v57  ;;  %v2401_v1 = vadd.f32 %v2400_v36, %v2312_v40  ;;  %v2489_v54 = vpop.f32.mrf.mxu3 }
 0x2b0   : > { %v2313_v38 = vpop.f32.mrf.mxu1 }
 0x2b1   : > { %v2757_v31 = vadd.f32 %v4793_v0, %v2721_v25  ;;  %v2490_v39 = vadd.f32 %v2489_v54, %v2401_v1  ;;  %v2314_v8 = vadd.f32 %v2313_v38, %v4731_v52  ;;  %v2626_v25 = vld [vmem:[%s4782_s16 + $0xe0] sm:$0xff] }
 0x2b2   : > { %v2580_v5 = vpop.f32.mrf.mxu0 }
 0x2b3   : > { %v2789_v9 = vmax.f32 %v2757_v31, 0.0  ;;  %v2579_v7 = vadd.f32 %v2578_v2, %v2490_v39  ;;  %v4064_v2 = vld [vmem:[%s5063_s4] ss:$0 sm:$0xff] }
 0x2b5   : > { %2821 = vst [vmem:[%s4817_s27 + $0xb8] sm:$0xff] %v2789_v9  ;;  %v2654_v55 = vadd.f32 %v2622_v62, %v2579_v7 }
 0x2b6   : > { %v2402_v11 = vpop.f32.mrf.mxu2 }
 0x2b7   : > { %2686 = vst [vmem:[%s4801_s23 + $0xc0] sm:$0xff] %v2654_v55  ;;  %v2722_v43 = vmul.f32 %v4788_v13, %v2654_v55  ;;  %v2403_v49 = vadd.f32 %v2402_v11, %v2314_v8  ;;  %v2491_v35 = vpop.f32.mrf.mxu3  ;;  %v2627_v11 = vld [vmem:[%s4782_s16 + $0xe8] sm:$0xff] }
 0x2b8   : > { %v2316_v44 = vpop.f32.mrf.mxu1 }
 0x2b9   : > { %v2758_v4 = vadd.f32 %v4793_v0, %v2722_v43  ;;  %v2492_v41 = vadd.f32 %v2491_v35, %v2403_v49  ;;  %v2317_v52 = vadd.f32 %v2316_v44, %v4736_v45 }
 0x2ba   : > { %v2583_v20 = vpop.f32.mrf.mxu0 }
 0x2bb   : > { %v2790_v18 = vmax.f32 %v2758_v4, 0.0  ;;  %v2581_v17 = vadd.f32 %v2580_v5, %v2492_v41 }
 0x2bd   : > { %2822 = vst [vmem:[%s4817_s27 + $0xc0] sm:$0xff] %v2790_v18  ;;  %v2655_v47 = vadd.f32 %v2623_v21, %v2581_v17 }
 0x2be   : > { %v2405_v27 = vpop.f32.mrf.mxu2 }
 0x2bf   : > { %2687 = vst [vmem:[%s4801_s23 + $0xc8] sm:$0xff] %v2655_v47  ;;  %v2723_v61 = vmul.f32 %v4788_v13, %v2655_v47  ;;  %v2406_v42 = vadd.f32 %v2405_v27, %v2317_v52  ;;  %v2494_v19 = vpop.f32.mrf.mxu3  ;;  %v2628_v47 = vld [vmem:[%s4782_s16 + $0xf0] sm:$0xff] }
 0x2c0   : > { %v2318_v24 = vpop.f32.mrf.mxu1 }
 0x2c1   : > { %v2759_v28 = vadd.f32 %v4793_v0, %v2723_v61  ;;  %v2495_v29 = vadd.f32 %v2494_v19, %v2406_v42  ;;  %v2319_v45 = vadd.f32 %v2318_v24, %v4745_v46  ;;  %v5025_v0 = vld [vmem:[%s5064_s5] ss:$0 sm:$0xff] }
 0x2c2   : > { %v2585_v22 = vpop.f32.mrf.mxu0 }
 0x2c3   : > { %v2791_v33 = vmax.f32 %v2759_v28, 0.0  ;;  %v2584_v56 = vadd.f32 %v2583_v20, %v2495_v29 }
 0x2c5   : > { %2823 = vst [vmem:[%s4817_s27 + $0xc8] sm:$0xff] %v2791_v33  ;;  %v2656_v23 = vadd.f32 %v2624_v10, %v2584_v56  ;;  %v2629_v56 = vld [vmem:[%s4782_s16 + $0xf8] sm:$0xff] }
 0x2c6   : > { %v2407_v15 = vpop.f32.mrf.mxu2 }
 0x2c7   : > { %2688 = vst [vmem:[%s4801_s23 + $0xd0] sm:$0xff] %v2656_v23  ;;  %v2724_v32 = vmul.f32 %v4788_v13, %v2656_v23  ;;  %v2408_v12 = vadd.f32 %v2407_v15, %v2319_v45  ;;  %v2496_v34 = vpop.f32.mrf.mxu3 }
 0x2c8   : > { %v2321_v37 = vpop.f32.mrf.mxu1 }
 0x2c9   : > { %v2760_v58 = vadd.f32 %v5025_v0, %v2724_v32  ;;  %v2497_v30 = vadd.f32 %v2496_v34, %v2408_v12  ;;  %v2322_v13 = vadd.f32 %v2321_v37, %v4750_v59 }
 0x2ca   : > { %v2588_v14 = vpop.f32.mrf.mxu0 }
 0x2cb   : > { %v2792_v48 = vmax.f32 %v2760_v58, 0.0  ;;  %v2586_v46 = vadd.f32 %v2585_v22, %v2497_v30 }
 0x2cd   : > { %2824 = vst [vmem:[%s4817_s27 + $0xd0] sm:$0xff] %v2792_v48  ;;  %v2657_v60 = vadd.f32 %v2625_v63, %v2586_v46 }
 0x2ce   : > { %v2410_v6 = vpop.f32.mrf.mxu2 }
 0x2cf   : > { %2689 = vst [vmem:[%s4801_s23 + $0xd8] sm:$0xff] %v2657_v60  ;;  %v2725_v3 = vmul.f32 %v4064_v2, %v2657_v60  ;;  %v2411_v53 = vadd.f32 %v2410_v6, %v2322_v13  ;;  %v2499_v51 = vpop.f32.mrf.mxu3 }
 0x2d0   : > { %v2323_v57 = vpop.f32.mrf.mxu1 }
 0x2d1   : > { %v2761_v40 = vadd.f32 %v5025_v0, %v2725_v3  ;;  %v2500_v36 = vadd.f32 %v2499_v51, %v2411_v53  ;;  %v2324_v38 = vadd.f32 %v2323_v57, %v4759_v26 }
 0x2d2   : > { %v2590_v31 = vpop.f32.mrf.mxu0 }
 0x2d3   : > { %v2793_v1 = vmax.f32 %v2761_v40, 0.0  ;;  %v2589_v54 = vadd.f32 %v2588_v14, %v2500_v36 }
 0x2d5   : > { %2825 = vst [vmem:[%s4817_s27 + $0xd8] sm:$0xff] %v2793_v1  ;;  %v2658_v59 = vadd.f32 %v2626_v25, %v2589_v54 }
 0x2d6   : > { %v2412_v39 = vpop.f32.mrf.mxu2 }
 0x2d7   : > { %2690 = vst [vmem:[%s4801_s23 + $0xe0] sm:$0xff] %v2658_v59  ;;  %v2726_v5 = vmul.f32 %v4064_v2, %v2658_v59  ;;  %v2413_v62 = vadd.f32 %v2412_v39, %v2324_v38  ;;  %v2501_v9 = vpop.f32.mrf.mxu3 }
 0x2d8   : > { %v2326_v7 = vpop.f32.mrf.mxu1 }
 0x2d9   : > { %v2762_v55 = vadd.f32 %v5025_v0, %v2726_v5  ;;  %v2502_v8 = vadd.f32 %v2501_v9, %v2413_v62  ;;  %v2327_v26 = vadd.f32 %v2326_v7, %v4764_v50 }
 0x2da   : > { %v2593_v21 = vpop.f32.mrf.mxu0 }
 0x2db   : > { %v2794_v43 = vmax.f32 %v2762_v55, 0.0  ;;  %v2591_v49 = vadd.f32 %v2590_v31, %v2502_v8 }
 0x2dd   : > { %2826 = vst [vmem:[%s4817_s27 + $0xe0] sm:$0xff] %v2794_v43  ;;  %v2659_v35 = vadd.f32 %v2627_v11, %v2591_v49 }
 0x2de   : > { %v2415_v44 = vpop.f32.mrf.mxu2 }
 0x2df   : > { %2691 = vst [vmem:[%s4801_s23 + $0xe8] sm:$0xff] %v2659_v35  ;;  %v2727_v4 = vmul.f32 %v4064_v2, %v2659_v35  ;;  %v2416_v41 = vadd.f32 %v2415_v44, %v2327_v26  ;;  %v2504_v20 = vpop.f32.mrf.mxu3 }
 0x2e0   : > { %v2328_v52 = vpop.f32.mrf.mxu1 }
 0x2e1   : > { %v2763_v18 = vadd.f32 %v5025_v0, %v2727_v4  ;;  %v2505_v17 = vadd.f32 %v2504_v20, %v2416_v41  ;;  %v2329_v50 = vadd.f32 %v2328_v52, %v4772_v16 }
 0x2e2   : > { %v2595_v33 = vpop.f32.mrf.mxu0 }
 0x2e3   : > { %v2795_v27 = vmax.f32 %v2763_v18, 0.0  ;;  %v2594_v61 = vadd.f32 %v2593_v21, %v2505_v17 }
 0x2e5   : > { %2827 = vst [vmem:[%s4817_s27 + $0xe8] sm:$0xff] %v2795_v27  ;;  %v2660_v42 = vadd.f32 %v2628_v47, %v2594_v61 }
 0x2e6   : > { %v2417_v19 = vpop.f32.mrf.mxu2 }
 0x2e7   : > { %2692 = vst [vmem:[%s4801_s23 + $0xf0] sm:$0xff] %v2660_v42  ;;  %v2728_v24 = vmul.f32 %v4064_v2, %v2660_v42  ;;  %v2418_v28 = vadd.f32 %v2417_v19, %v2329_v50  ;;  %v2506_v29 = vpop.f32.mrf.mxu3 }
 0x2e9   : > { %v2764_v10 = vadd.f32 %v5025_v0, %v2728_v24  ;;  %v2507_v22 = vadd.f32 %v2506_v29, %v2418_v28 }
 0x2eb   : > { %v2796_v23 = vmax.f32 %v2764_v10, 0.0  ;;  %v2596_v45 = vadd.f32 %v2595_v33, %v2507_v22 }
 0x2ed   : > { %2828 = vst [vmem:[%s4817_s27 + $0xf0] sm:$0xff] %v2796_v23  ;;  %v2661_v15 = vadd.f32 %v2629_v56, %v2596_v45 }
 0x2ef   : > { %2693 = vst [vmem:[%s4801_s23 + $0xf8] sm:$0xff] %v2661_v15  ;;  %v2729_v32 = vmul.f32 %v4064_v2, %v2661_v15 }
 0x2f1   : > { %v2765_v12 = vadd.f32 %v5025_v0, %v2729_v32 }
 0x2f3   : > { %v2797_v16 = vmax.f32 %v2765_v12, 0.0 }
 0x2f5   : > { %2829 = vst [vmem:[%s4817_s27 + $0xf8] sm:$0xff] %v2797_v16 }
 0x2f6 PF: > { %s18_s24 = sadd.s32 1, %s4071_s24  }
 0x2f7   : > { %p15_p4 = scmp.ge.s32.totalorder %s18_s24, 4  }
 0x2f9   :  { %17 = sbr.rel (!%p15_p4) target bundleno = 1 (0x1), region = 89 }

// kernel: wideresnet_forward.14
= control target key start
LH: loop header
LB: loop body
LE: loop exit
PB: predicated region body
PF: predicated region fallthrough
CT: control target
= control target key end

     0   :  { %s439_s1 = inlined_call_operand.vmem [shape: bf16[128,128], index: 1, kind: input, shape index: {}]   ;;  %s440_s2 = inlined_call_operand.vmem [shape: f32[1,128], index: 2, kind: input, shape index: {}]   ;;  %s441_s0 = inlined_call_operand.vmem [shape: bf16[128,128], index: 0, kind: input, shape index: {}]   ;;  %s442_s3 = inlined_call_operand.vmem [shape: f32[128,128], index: 3, kind: output, shape index: {}]  }
   0x1   :  { %v294_v0 = vld [vmem:[%s439_s1 + $0x38] sm:$0xff]  ;;  %v293_v1 = vld [vmem:[%s439_s1 + $0x30] sm:$0xff]  ;;  %v292_v2 = vld [vmem:[%s439_s1 + $0x28] sm:$0xff] }
   0x2   :  { %146 = vmatpush.bf16.msra.mxu0 %v294_v0  ;;  %295 = vmatpush.bf16.msra.mxu1 %v294_v0  ;;  %v291_v3 = vld [vmem:[%s439_s1 + $0x20] sm:$0xff]  ;;  %v290_v4 = vld [vmem:[%s439_s1 + $0x18] sm:$0xff]  ;;  %v289_v5 = vld [vmem:[%s439_s1 + $0x10] sm:$0xff] }
   0x3   :  { %296 = vmatpush.bf16.msra.mxu2 %v294_v0  ;;  %297 = vmatpush.bf16.msra.mxu3 %v294_v0  ;;  %v288_v6 = vld [vmem:[%s439_s1 + $0x8] sm:$0xff]  ;;  %v287_v7 = vld [vmem:[%s439_s1] sm:$0xff]  ;;  %v281_v9 = vld [vmem:[%s441_s0 + $0x10] sm:$0xff] }
   0x4   :  { %v279_v8 = vld [vmem:[%s441_s0] sm:$0xff]  ;;  %v285_v11 = vld [vmem:[%s441_s0 + $0x30] sm:$0xff]  ;;  %v280_v12 = vld [vmem:[%s441_s0 + $0x8] sm:$0xff] }
   0x5   :  { %v283_v10 = vld [vmem:[%s441_s0 + $0x20] sm:$0xff]  ;;  %v282_v13 = vld [vmem:[%s441_s0 + $0x18] sm:$0xff]  ;;  %v284_v14 = vld [vmem:[%s441_s0 + $0x28] sm:$0xff] }
   0x6   :  { %147 = vmatpush.bf16.msra.mxu0 %v293_v1  ;;  %298 = vmatpush.bf16.msra.mxu1 %v293_v1  ;;  %v286_v15 = vld [vmem:[%s441_s0 + $0x38] sm:$0xff]  ;;  %v319_v16 = vld [vmem:[%s440_s2] ss:$0 sm:$0xff] }
   0x7   :  { %299 = vmatpush.bf16.msra.mxu2 %v293_v1  ;;  %300 = vmatpush.bf16.msra.mxu3 %v293_v1 }
   0xa   :  { %148 = vmatpush.bf16.msra.mxu0 %v292_v2  ;;  %301 = vmatpush.bf16.msra.mxu1 %v292_v2 }
   0xb   :  { %302 = vmatpush.bf16.msra.mxu2 %v292_v2  ;;  %303 = vmatpush.bf16.msra.mxu3 %v292_v2 }
   0xe   :  { %149 = vmatpush.bf16.msra.mxu0 %v291_v3  ;;  %304 = vmatpush.bf16.msra.mxu1 %v291_v3 }
   0xf   :  { %305 = vmatpush.bf16.msra.mxu2 %v291_v3  ;;  %306 = vmatpush.bf16.msra.mxu3 %v291_v3 }
  0x12   :  { %150 = vmatpush.bf16.msra.mxu0 %v290_v4  ;;  %307 = vmatpush.bf16.msra.mxu1 %v290_v4 }
  0x13   :  { %308 = vmatpush.bf16.msra.mxu2 %v290_v4  ;;  %309 = vmatpush.bf16.msra.mxu3 %v290_v4 }
  0x16   :  { %151 = vmatpush.bf16.msra.mxu0 %v289_v5  ;;  %310 = vmatpush.bf16.msra.mxu1 %v289_v5 }
  0x17   :  { %311 = vmatpush.bf16.msra.mxu2 %v289_v5  ;;  %312 = vmatpush.bf16.msra.mxu3 %v289_v5 }
  0x1a   :  { %152 = vmatpush.bf16.msra.mxu0 %v288_v6  ;;  %313 = vmatpush.bf16.msra.mxu1 %v288_v6 }
  0x1b   :  { %314 = vmatpush.bf16.msra.mxu2 %v288_v6  ;;  %315 = vmatpush.bf16.msra.mxu3 %v288_v6 }
  0x1e   :  { %153 = vmatpush.bf16.msra.mxu0 %v287_v7  ;;  %316 = vmatpush.bf16.msra.mxu1 %v287_v7 }
  0x1f   :  { %317 = vmatpush.bf16.msra.mxu2 %v287_v7  ;;  %318 = vmatpush.bf16.msra.mxu3 %v287_v7 }
  0x21   :  { %154 = vmatmul.bf16.vlgmr.msra.gmra.mxu0 %v279_v8  ;;  %164 = vmatmul.bf16.vlgmr.msra.gmra.mxu1 %v281_v9 }
  0x22   :  { %174 = vmatmul.bf16.vlgmr.msra.gmra.mxu2 %v283_v10  ;;  %184 = vmatmul.bf16.vlgmr.msra.gmra.mxu3 %v285_v11 }
  0x31   :  { %159 = vmatmul.bf16.gmra.mxu0 %v280_v12  ;;  %169 = vmatmul.bf16.gmra.mxu1 %v282_v13 }
  0x32   :  { %179 = vmatmul.bf16.gmra.mxu2 %v284_v14  ;;  %189 = vmatmul.bf16.gmra.mxu3 %v286_v15 }
  0x9e   :  { %v155_v17 = vpop.f32.mrf.mxu0  ;;  %v165_v18 = vpop.f32.mrf.mxu1 }
  0x9f   :  { %v156_v19 = vadd.f32 %v319_v16, %v155_v17  ;;  %v166_v20 = vadd.f32 %v319_v16, %v165_v18 }
  0xa1   :  { %195 = vst [vmem:[%s442_s3] sm:$0xff] %v156_v19 }
  0xa2   :  { %199 = vst [vmem:[%s442_s3 + $0x20] sm:$0xff] %v166_v20 }
  0xa5   :  { %v175_v21 = vpop.f32.mrf.mxu2  ;;  %v185_v22 = vpop.f32.mrf.mxu3 }
  0xa6   :  { %v176_v23 = vadd.f32 %v319_v16, %v175_v21  ;;  %v186_v24 = vadd.f32 %v319_v16, %v185_v22  ;;  %v157_v25 = vpop.f32.mrf.mxu0  ;;  %v167_v26 = vpop.f32.mrf.mxu1 }
  0xa7   :  { %v158_v27 = vadd.f32 %v319_v16, %v157_v25  ;;  %v168_v28 = vadd.f32 %v319_v16, %v167_v26 }
  0xa8   :  { %203 = vst [vmem:[%s442_s3 + $0x40] sm:$0xff] %v176_v23 }
  0xa9   :  { %207 = vst [vmem:[%s442_s3 + $0x60] sm:$0xff] %v186_v24 }
  0xaa   :  { %196 = vst [vmem:[%s442_s3 + $0x8] sm:$0xff] %v158_v27 }
  0xab   :  { %200 = vst [vmem:[%s442_s3 + $0x28] sm:$0xff] %v168_v28 }
  0xad   :  { %v177_v29 = vpop.f32.mrf.mxu2  ;;  %v187_v30 = vpop.f32.mrf.mxu3 }
  0xae   :  { %v178_v31 = vadd.f32 %v319_v16, %v177_v29  ;;  %v188_v32 = vadd.f32 %v319_v16, %v187_v30  ;;  %v160_v33 = vpop.f32.mrf.mxu0  ;;  %v170_v34 = vpop.f32.mrf.mxu1 }
  0xaf   :  { %v161_v35 = vadd.f32 %v319_v16, %v160_v33  ;;  %v171_v36 = vadd.f32 %v319_v16, %v170_v34 }
  0xb0   :  { %204 = vst [vmem:[%s442_s3 + $0x48] sm:$0xff] %v178_v31 }
  0xb1   :  { %208 = vst [vmem:[%s442_s3 + $0x68] sm:$0xff] %v188_v32 }
  0xb2   :  { %197 = vst [vmem:[%s442_s3 + $0x10] sm:$0xff] %v161_v35 }
  0xb3   :  { %201 = vst [vmem:[%s442_s3 + $0x30] sm:$0xff] %v171_v36 }
  0xb5   :  { %v180_v37 = vpop.f32.mrf.mxu2  ;;  %v190_v38 = vpop.f32.mrf.mxu3 }
  0xb6   :  { %v181_v39 = vadd.f32 %v319_v16, %v180_v37  ;;  %v191_v40 = vadd.f32 %v319_v16, %v190_v38  ;;  %v162_v41 = vpop.f32.mrf.mxu0  ;;  %v172_v42 = vpop.f32.mrf.mxu1 }
  0xb7   :  { %v163_v43 = vadd.f32 %v319_v16, %v162_v41  ;;  %v173_v44 = vadd.f32 %v319_v16, %v172_v42 }
  0xb8   :  { %205 = vst [vmem:[%s442_s3 + $0x50] sm:$0xff] %v181_v39 }
  0xb9   :  { %209 = vst [vmem:[%s442_s3 + $0x70] sm:$0xff] %v191_v40 }
  0xba   :  { %198 = vst [vmem:[%s442_s3 + $0x18] sm:$0xff] %v163_v43 }
  0xbb   :  { %202 = vst [vmem:[%s442_s3 + $0x38] sm:$0xff] %v173_v44 }
  0xbd   :  { %v182_v45 = vpop.f32.mrf.mxu2  ;;  %v192_v46 = vpop.f32.mrf.mxu3 }
  0xbe   :  { %v183_v47 = vadd.f32 %v319_v16, %v182_v45  ;;  %v193_v48 = vadd.f32 %v319_v16, %v192_v46 }
  0xc0   :  { %206 = vst [vmem:[%s442_s3 + $0x58] sm:$0xff] %v183_v47 }
  0xc1   :  { %210 = vst [vmem:[%s442_s3 + $0x78] sm:$0xff] %v193_v48 }

// kernel: wideresnet_forward.13
= control target key start
LH: loop header
LB: loop body
LE: loop exit
PB: predicated region body
PF: predicated region fallthrough
CT: control target
= control target key end

     0   :  { %s3185_s1 = inlined_call_operand.vmem [shape: bf16[1152,128], index: 1, kind: input, shape index: {}]   ;;  %s3186_s2 = inlined_call_operand.vmem [shape: f32[1,128], index: 2, kind: input, shape index: {}]   ;;  %s3187_s0 = inlined_call_operand.vmem [shape: bf16[128,1152], index: 0, kind: input, shape index: {}]   ;;  %s3188_s3 = inlined_call_operand.vmem [shape: f32[1,128], index: 3, kind: input, shape index: {}]   ;;  %s3189_s4 = inlined_call_operand.vmem [shape: f32[1,128], index: 4, kind: input, shape index: {}]   ;;  %s3190_s5 = inlined_call_operand.vmem [shape: f32[128,128], index: 5, kind: output, shape index: {}]  }
   0x1   :  { %v2220_v0 = vld [vmem:[%s3185_s1 + $0x38] sm:$0xff]  ;;  %v2219_v1 = vld [vmem:[%s3185_s1 + $0x30] sm:$0xff]  ;;  %v2218_v2 = vld [vmem:[%s3185_s1 + $0x28] sm:$0xff] }
   0x2   :  { %2285 = vmatpush.bf16.msra.mxu1 %v2220_v0  ;;  %2286 = vmatpush.bf16.msra.mxu2 %v2220_v0  ;;  %v2217_v3 = vld [vmem:[%s3185_s1 + $0x20] sm:$0xff]  ;;  %v2216_v4 = vld [vmem:[%s3185_s1 + $0x18] sm:$0xff]  ;;  %v2215_v5 = vld [vmem:[%s3185_s1 + $0x10] sm:$0xff] }
   0x3   :  { %2287 = vmatpush.bf16.msra.mxu3 %v2220_v0  ;;  %1048 = vmatpush.bf16.msra.mxu0 %v2220_v0  ;;  %v2214_v6 = vld [vmem:[%s3185_s1 + $0x8] sm:$0xff]  ;;  %v2213_v7 = vld [vmem:[%s3185_s1] sm:$0xff]  ;;  %v1639_v8 = vld [vmem:[%s3187_s0 + $0x90] sm:$0xf] }
   0x4   :  { %v2163_v9 = vld [vmem:[%s3187_s0 + $0xb0] sm:$0xf0]  ;;  %v1711_v10 = vld [vmem:[%s3187_s0 + $0x120] sm:$0xf]  ;;  %v2181_v11 = vld [vmem:[%s3187_s0 + $0x140] sm:$0xf0] }
   0x5   :  { %v1783_v12 = vld [vmem:[%s3187_s0 + $0x1b0] sm:$0xf]  ;;  %v2199_v13 = vld [vmem:[%s3187_s0 + $0x1d0] sm:$0xf0]  ;;  %v1567_v14 = vld [vmem:[%s3187_s0] sm:$0xf]  ;;  %v1640_v18 = vor.u32 %v2163_v9, %v1639_v8  ;;  %v1712_v19 = vor.u32 %v2181_v11, %v1711_v10 }
   0x6   :  { %2288 = vmatpush.bf16.msra.mxu1 %v2219_v1  ;;  %2289 = vmatpush.bf16.msra.mxu2 %v2219_v1  ;;  %v2145_v15 = vld [vmem:[%s3187_s0 + $0x20] sm:$0xf0]  ;;  %v2236_v16 = vld [vmem:[%s3185_s1 + $0xb8] sm:$0xff]  ;;  %v1784_v20 = vor.u32 %v2199_v13, %v1783_v12  ;;  %v2235_v24 = vld [vmem:[%s3185_s1 + $0xb0] sm:$0xff] }
   0x7   :  { %2290 = vmatpush.bf16.msra.mxu3 %v2219_v1  ;;  %1049 = vmatpush.bf16.msra.mxu0 %v2219_v1  ;;  %v2228_v17 = vld [vmem:[%s3185_s1 + $0x78] sm:$0xff]  ;;  %v1568_v21 = vor.u32 %v2145_v15, %v1567_v14  ;;  %v2227_v25 = vld [vmem:[%s3185_s1 + $0x70] sm:$0xff]  ;;  %v2234_v28 = vld [vmem:[%s3185_s1 + $0xa8] sm:$0xff] }
   0x8   :  { %v2244_v22 = vld [vmem:[%s3185_s1 + $0xf8] sm:$0xff]  ;;  %v2243_v26 = vld [vmem:[%s3185_s1 + $0xf0] sm:$0xff]  ;;  %v2226_v29 = vld [vmem:[%s3185_s1 + $0x68] sm:$0xff] }
   0x9   :  { %v2252_v23 = vld [vmem:[%s3185_s1 + $0x138] sm:$0xff]  ;;  %v2251_v27 = vld [vmem:[%s3185_s1 + $0x130] sm:$0xff]  ;;  %v2242_v30 = vld [vmem:[%s3185_s1 + $0xe8] sm:$0xff] }
   0xa   :  { %2291 = vmatpush.bf16.msra.mxu1 %v2218_v2  ;;  %2292 = vmatpush.bf16.msra.mxu2 %v2218_v2  ;;  %v2250_v31 = vld [vmem:[%s3185_s1 + $0x128] sm:$0xff]  ;;  %v2233_v32 = vld [vmem:[%s3185_s1 + $0xa0] sm:$0xff]  ;;  %v1675_v36 = vld [vmem:[%s3187_s0 + $0xd8] sm:$0xf] }
   0xb   :  { %2293 = vmatpush.bf16.msra.mxu3 %v2218_v2  ;;  %1050 = vmatpush.bf16.msra.mxu0 %v2218_v2  ;;  %v2225_v33 = vld [vmem:[%s3185_s1 + $0x60] sm:$0xff]  ;;  %v2172_v37 = vld [vmem:[%s3187_s0 + $0xf8] sm:$0xf0]  ;;  %v1747_v38 = vld [vmem:[%s3187_s0 + $0x168] sm:$0xf] }
   0xc   :  { %v2241_v34 = vld [vmem:[%s3185_s1 + $0xe0] sm:$0xff]  ;;  %v2190_v39 = vld [vmem:[%s3187_s0 + $0x188] sm:$0xf0]  ;;  %v1819_v40 = vld [vmem:[%s3187_s0 + $0x1f8] sm:$0xf]  ;;  %v1676_v46 = vor.u32 %v2172_v37, %v1675_v36 }
   0xd   :  { %v2249_v35 = vld [vmem:[%s3185_s1 + $0x120] sm:$0xff]  ;;  %v2208_v41 = vld [vmem:[%s3187_s0 + $0x218] sm:$0xf0]  ;;  %v1603_v42 = vld [vmem:[%s3187_s0 + $0x48] sm:$0xf]  ;;  %v1748_v47 = vor.u32 %v2190_v39, %v1747_v38 }
   0xe   :  { %2294 = vmatpush.bf16.msra.mxu1 %v2217_v3  ;;  %2295 = vmatpush.bf16.msra.mxu2 %v2217_v3  ;;  %v2154_v43 = vld [vmem:[%s3187_s0 + $0x68] sm:$0xf0]  ;;  %v2232_v44 = vld [vmem:[%s3185_s1 + $0x98] sm:$0xff]  ;;  %v1820_v48 = vor.u32 %v2208_v41, %v1819_v40  ;;  %v2231_v52 = vld [vmem:[%s3185_s1 + $0x90] sm:$0xff] }
   0xf   :  { %2296 = vmatpush.bf16.msra.mxu3 %v2217_v3  ;;  %1051 = vmatpush.bf16.msra.mxu0 %v2217_v3  ;;  %v2224_v45 = vld [vmem:[%s3185_s1 + $0x58] sm:$0xff]  ;;  %v1604_v49 = vor.u32 %v2154_v43, %v1603_v42  ;;  %v2223_v53 = vld [vmem:[%s3185_s1 + $0x50] sm:$0xff]  ;;  %v2230_v56 = vld [vmem:[%s3185_s1 + $0x88] sm:$0xff] }
  0x10   :  { %v2240_v50 = vld [vmem:[%s3185_s1 + $0xd8] sm:$0xff]  ;;  %v2239_v54 = vld [vmem:[%s3185_s1 + $0xd0] sm:$0xff]  ;;  %v2222_v57 = vld [vmem:[%s3185_s1 + $0x48] sm:$0xff] }
  0x11   :  { %v2248_v51 = vld [vmem:[%s3185_s1 + $0x118] sm:$0xff]  ;;  %v2247_v55 = vld [vmem:[%s3185_s1 + $0x110] sm:$0xff]  ;;  %v2238_v58 = vld [vmem:[%s3185_s1 + $0xc8] sm:$0xff] }
  0x12   :  { %2297 = vmatpush.bf16.msra.mxu1 %v2216_v4  ;;  %2298 = vmatpush.bf16.msra.mxu2 %v2216_v4  ;;  %v2246_v59 = vld [vmem:[%s3185_s1 + $0x108] sm:$0xff]  ;;  %v2229_v60 = vld [vmem:[%s3185_s1 + $0x80] sm:$0xff]  ;;  %v2268_v2 = vld [vmem:[%s3185_s1 + $0x1b8] sm:$0xff] }
  0x13   :  { %2299 = vmatpush.bf16.msra.mxu3 %v2216_v4  ;;  %1052 = vmatpush.bf16.msra.mxu0 %v2216_v4  ;;  %v2221_v61 = vld [vmem:[%s3185_s1 + $0x40] sm:$0xff]  ;;  %v1569_v1 = vld [vmem:[%s3187_s0 + $0x24] sm:$0xf0]  ;;  %v2260_v3 = vld [vmem:[%s3185_s1 + $0x178] sm:$0xff] }
  0x14   :  { %v2141_v62 = vld [vmem:[%s3187_s0 + $0x4] sm:$0xf]  ;;  %v1575_v4 = vld [vmem:[%s3187_s0 + $0x8] sm:$0xf]  ;;  %v1583_v8 = vld [vmem:[%s3187_s0 + $0x10] sm:$0xf] }
  0x15   :  { %v2237_v63 = vld [vmem:[%s3185_s1 + $0xc0] sm:$0xff]  ;;  %v2147_v9 = vld [vmem:[%s3187_s0 + $0x30] sm:$0xf0]  ;;  %v2276_v10 = vld [vmem:[%s3185_s1 + $0x1f8] sm:$0xff]  ;;  %v1572_v12 = vor.u32 %v2141_v62, %v1569_v1 }
  0x16   :  { %2300 = vmatpush.bf16.msra.mxu1 %v2215_v5  ;;  %2301 = vmatpush.bf16.msra.mxu2 %v2215_v5  ;;  %v2245_v0 = vld [vmem:[%s3185_s1 + $0x100] sm:$0xff]  ;;  %v2284_v11 = vld [vmem:[%s3185_s1 + $0x238] sm:$0xff]  ;;  %v1584_v15 = vor.u32 %v2147_v9, %v1583_v8  ;;  %v2159_v40 = vld [vmem:[%s3187_s0 + $0x94] sm:$0xf] }
  0x17   :  { %2302 = vmatpush.bf16.msra.mxu3 %v2215_v5  ;;  %1053 = vmatpush.bf16.msra.mxu0 %v2215_v5  ;;  %v2146_v5 = vld [vmem:[%s3187_s0 + $0x28] sm:$0xf0]  ;;  %v2265_v36 = vld [vmem:[%s3185_s1 + $0x1a0] sm:$0xff]  ;;  %v1641_v41 = vld [vmem:[%s3187_s0 + $0xb4] sm:$0xf0] }
  0x18   :  { %v1576_v13 = vor.u32 %v2146_v5, %v1575_v4  ;;  %v2273_v37 = vld [vmem:[%s3185_s1 + $0x1e0] sm:$0xff]  ;;  %v1647_v42 = vld [vmem:[%s3187_s0 + $0x98] sm:$0xf]  ;;  %v2164_v43 = vld [vmem:[%s3187_s0 + $0xb8] sm:$0xf0] }
  0x19   :  { %v2257_v38 = vld [vmem:[%s3185_s1 + $0x160] sm:$0xff]  ;;  %v1691_v62 = vld [vmem:[%s3187_s0 + $0xe8] sm:$0xf]  ;;  %v2263_v4 = vld [vmem:[%s3185_s1 + $0x190] sm:$0xff] }
  0x1a   :  { %2303 = vmatpush.bf16.msra.mxu1 %v2214_v6  ;;  %2304 = vmatpush.bf16.msra.mxu2 %v2214_v6  ;;  %v2281_v39 = vld [vmem:[%s3185_s1 + $0x220] sm:$0xff]  ;;  %v2271_v5 = vld [vmem:[%s3185_s1 + $0x1d0] sm:$0xff]  ;;  %v1713_v9 = vld [vmem:[%s3187_s0 + $0x144] sm:$0xf0] }
  0x1b   :  { %2305 = vmatpush.bf16.msra.mxu3 %v2214_v6  ;;  %1054 = vmatpush.bf16.msra.mxu0 %v2214_v6  ;;  %v2142_v6 = vld [vmem:[%s3187_s0 + $0xc] sm:$0xf]  ;;  %v2177_v8 = vld [vmem:[%s3187_s0 + $0x124] sm:$0xf] }
  0x1e   :  { %2306 = vmatpush.bf16.msra.mxu1 %v2213_v7  ;;  %2307 = vmatpush.bf16.msra.mxu2 %v2213_v7 }
  0x1f   :  { %2308 = vmatpush.bf16.msra.mxu3 %v2213_v7  ;;  %1055 = vmatpush.bf16.msra.mxu0 %v2213_v7  ;;  %v1577_v7 = vld [vmem:[%s3187_s0 + $0x2c] sm:$0xf0] }
  0x20   :  { %v1580_v14 = vor.u32 %v2142_v6, %v1577_v7  ;;  %v2255_v6 = vld [vmem:[%s3185_s1 + $0x150] sm:$0xff] }
  0x21   :  { %1066 = vmatmul.bf16.vlgmr.msra.gmra.mxu1 %v1640_v18  ;;  %1076 = vmatmul.bf16.vlgmr.msra.gmra.mxu2 %v1712_v19  ;;  %v2275_v18 = vld [vmem:[%s3185_s1 + $0x1f0] sm:$0xff] }
  0x22   :  { %1146 = vmatpush.bf16.msrb.mxu2 %v2236_v16  ;;  %1097 = vmatpush.bf16.msrb.mxu1 %v2228_v17  ;;  %v2267_v16 = vld [vmem:[%s3185_s1 + $0x1b0] sm:$0xff] }
  0x23   :  { %1086 = vmatmul.bf16.vlgmr.msra.gmra.mxu3 %v1784_v20  ;;  %1056 = vmatmul.bf16.vlgmr.msra.gmra.mxu0 %v1568_v21  ;;  %v2259_v17 = vld [vmem:[%s3185_s1 + $0x170] sm:$0xff]  ;;  %v2266_v20 = vld [vmem:[%s3185_s1 + $0x1a8] sm:$0xff] }
  0x24   :  { %1195 = vmatpush.bf16.msrb.mxu3 %v2244_v22  ;;  %1244 = vmatpush.bf16.msrb.mxu0 %v2252_v23  ;;  %v2283_v19 = vld [vmem:[%s3185_s1 + $0x230] sm:$0xff]  ;;  %v2258_v21 = vld [vmem:[%s3185_s1 + $0x168] sm:$0xff] }
  0x25   :  { %v2274_v22 = vld [vmem:[%s3185_s1 + $0x1e8] sm:$0xff]  ;;  %v2279_v7 = vld [vmem:[%s3185_s1 + $0x210] sm:$0xff] }
  0x26   :  { %1147 = vmatpush.bf16.msrb.mxu2 %v2235_v24  ;;  %1098 = vmatpush.bf16.msrb.mxu1 %v2227_v25  ;;  %v2282_v23 = vld [vmem:[%s3185_s1 + $0x228] sm:$0xff]  ;;  %v1605_v25 = vld [vmem:[%s3187_s0 + $0x6c] sm:$0xf0] }
  0x27   :  { %v2150_v24 = vld [vmem:[%s3187_s0 + $0x4c] sm:$0xf] }
  0x28   :  { %1196 = vmatpush.bf16.msrb.mxu3 %v2243_v26  ;;  %1245 = vmatpush.bf16.msrb.mxu0 %v2251_v27  ;;  %v1611_v26 = vld [vmem:[%s3187_s0 + $0x50] sm:$0xf]  ;;  %v2155_v27 = vld [vmem:[%s3187_s0 + $0x70] sm:$0xf0] }
  0x2a   :  { %1148 = vmatpush.bf16.msrb.mxu2 %v2234_v28  ;;  %1099 = vmatpush.bf16.msrb.mxu1 %v2226_v29  ;;  %v2151_v28 = vld [vmem:[%s3187_s0 + $0x54] sm:$0xf]  ;;  %v1613_v29 = vld [vmem:[%s3187_s0 + $0x74] sm:$0xf0] }
  0x2c   :  { %1197 = vmatpush.bf16.msrb.mxu3 %v2242_v30  ;;  %1246 = vmatpush.bf16.msrb.mxu0 %v2250_v31  ;;  %v1619_v30 = vld [vmem:[%s3187_s0 + $0x58] sm:$0xf]  ;;  %v2156_v31 = vld [vmem:[%s3187_s0 + $0x78] sm:$0xf0] }
  0x2e   :  { %1149 = vmatpush.bf16.msrb.mxu2 %v2233_v32  ;;  %1100 = vmatpush.bf16.msrb.mxu1 %v2225_v33  ;;  %v1608_v32 = vor.u32 %v2150_v24, %v1605_v25  ;;  %v1612_v33 = vor.u32 %v2155_v27, %v1611_v26  ;;  %v2186_v24 = vld [vmem:[%s3187_s0 + $0x16c] sm:$0xf]  ;;  %v1749_v25 = vld [vmem:[%s3187_s0 + $0x18c] sm:$0xf0]  ;;  %v2191_v27 = vld [vmem:[%s3187_s0 + $0x190] sm:$0xf0] }
  0x2f   :  { %v1755_v26 = vld [vmem:[%s3187_s0 + $0x170] sm:$0xf] }
  0x30   :  { %1198 = vmatpush.bf16.msrb.mxu3 %v2241_v34  ;;  %1247 = vmatpush.bf16.msrb.mxu0 %v2249_v35  ;;  %v1616_v34 = vor.u32 %v2151_v28, %v1613_v29  ;;  %v1620_v35 = vor.u32 %v2156_v31, %v1619_v30  ;;  %v2187_v28 = vld [vmem:[%s3187_s0 + $0x174] sm:$0xf]  ;;  %v1757_v29 = vld [vmem:[%s3187_s0 + $0x194] sm:$0xf0]  ;;  %v2192_v31 = vld [vmem:[%s3187_s0 + $0x198] sm:$0xf0] }
  0x31   :  { %1071 = vmatmul.bf16.gmra.mxu1 %v1676_v46  ;;  %1081 = vmatmul.bf16.gmra.mxu2 %v1748_v47  ;;  %v1655_v46 = vld [vmem:[%s3187_s0 + $0xa0] sm:$0xf]  ;;  %v2165_v47 = vld [vmem:[%s3187_s0 + $0xc0] sm:$0xf0]  ;;  %v1763_v30 = vld [vmem:[%s3187_s0 + $0x178] sm:$0xf] }
  0x32   :  { %1150 = vmatpush.bf16.msrb.mxu2 %v2232_v44  ;;  %1101 = vmatpush.bf16.msrb.mxu1 %v2224_v45  ;;  %v2160_v44 = vld [vmem:[%s3187_s0 + $0x9c] sm:$0xf]  ;;  %v1649_v45 = vld [vmem:[%s3187_s0 + $0xbc] sm:$0xf0] }
  0x33   :  { %1091 = vmatmul.bf16.gmra.mxu3 %v1820_v48  ;;  %1061 = vmatmul.bf16.gmra.mxu0 %v1604_v49  ;;  %v1644_v48 = vor.u32 %v2159_v40, %v1641_v41  ;;  %v1648_v49 = vor.u32 %v2164_v43, %v1647_v42  ;;  %v2195_v40 = vld [vmem:[%s3187_s0 + $0x1b4] sm:$0xf]  ;;  %v1785_v41 = vld [vmem:[%s3187_s0 + $0x1d4] sm:$0xf0]  ;;  %v2200_v43 = vld [vmem:[%s3187_s0 + $0x1d8] sm:$0xf0] }
  0x34   :  { %1199 = vmatpush.bf16.msrb.mxu3 %v2240_v50  ;;  %1248 = vmatpush.bf16.msrb.mxu0 %v2248_v51  ;;  %v1652_v50 = vor.u32 %v2160_v44, %v1649_v45  ;;  %v1656_v51 = vor.u32 %v2165_v47, %v1655_v46  ;;  %v1791_v42 = vld [vmem:[%s3187_s0 + $0x1b8] sm:$0xf]  ;;  %v2196_v44 = vld [vmem:[%s3187_s0 + $0x1bc] sm:$0xf]  ;;  %v1793_v45 = vld [vmem:[%s3187_s0 + $0x1dc] sm:$0xf0] }
  0x35   :  { %v1799_v46 = vld [vmem:[%s3187_s0 + $0x1c0] sm:$0xf]  ;;  %v2201_v47 = vld [vmem:[%s3187_s0 + $0x1e0] sm:$0xf0] }
  0x36   :  { %1151 = vmatpush.bf16.msrb.mxu2 %v2231_v52  ;;  %1102 = vmatpush.bf16.msrb.mxu1 %v2223_v53  ;;  %v2264_v52 = vld [vmem:[%s3185_s1 + $0x198] sm:$0xff] }
  0x37   :  { %v2272_v53 = vld [vmem:[%s3185_s1 + $0x1d8] sm:$0xff] }
  0x38   :  { %1200 = vmatpush.bf16.msrb.mxu3 %v2239_v54  ;;  %1249 = vmatpush.bf16.msrb.mxu0 %v2247_v55  ;;  %v2256_v54 = vld [vmem:[%s3185_s1 + $0x158] sm:$0xff] }
  0x39   :  { %v2280_v55 = vld [vmem:[%s3185_s1 + $0x218] sm:$0xff] }
  0x3a   :  { %1152 = vmatpush.bf16.msrb.mxu2 %v2230_v56  ;;  %1103 = vmatpush.bf16.msrb.mxu1 %v2222_v57  ;;  %v2168_v56 = vld [vmem:[%s3187_s0 + $0xdc] sm:$0xf]  ;;  %v1677_v57 = vld [vmem:[%s3187_s0 + $0xfc] sm:$0xf0] }
  0x3c   :  { %1201 = vmatpush.bf16.msrb.mxu3 %v2238_v58  ;;  %1250 = vmatpush.bf16.msrb.mxu0 %v2246_v59  ;;  %v1683_v58 = vld [vmem:[%s3187_s0 + $0xe0] sm:$0xf]  ;;  %v2173_v59 = vld [vmem:[%s3187_s0 + $0x100] sm:$0xf0] }
  0x3d   :  { %v1684_v1 = vor.u32 %v2173_v59, %v1683_v58 }
  0x3e   :  { %1153 = vmatpush.bf16.msrb.mxu2 %v2229_v60  ;;  %1104 = vmatpush.bf16.msrb.mxu1 %v2221_v61  ;;  %v2169_v60 = vld [vmem:[%s3187_s0 + $0xe4] sm:$0xf]  ;;  %v1685_v61 = vld [vmem:[%s3187_s0 + $0x104] sm:$0xf0] }
  0x40   :  { %1202 = vmatpush.bf16.msrb.mxu3 %v2237_v63  ;;  %1251 = vmatpush.bf16.msrb.mxu0 %v2245_v0  ;;  %v2174_v63 = vld [vmem:[%s3187_s0 + $0x108] sm:$0xf0]  ;;  %v1680_v0 = vor.u32 %v2168_v56, %v1677_v57 }
  0x41   :  { %1105 = vmatmul.bf16.vlgmr.msrb.gmra.mxu1 %v1572_v12  ;;  %1154 = vmatmul.bf16.vlgmr.msrb.gmra.mxu2 %v1576_v13  ;;  %v2178_v12 = vld [vmem:[%s3187_s0 + $0x12c] sm:$0xf]  ;;  %v1721_v13 = vld [vmem:[%s3187_s0 + $0x14c] sm:$0xf0] }
  0x42   :  { %1342 = vmatpush.bf16.msra.mxu2 %v2268_v2  ;;  %1293 = vmatpush.bf16.msra.mxu1 %v2260_v3  ;;  %v1688_v2 = vor.u32 %v2169_v60, %v1685_v61  ;;  %v1692_v3 = vor.u32 %v2174_v63, %v1691_v62  ;;  %v2204_v61 = vld [vmem:[%s3187_s0 + $0x1fc] sm:$0xf]  ;;  %v1821_v62 = vld [vmem:[%s3187_s0 + $0x21c] sm:$0xf0] }
  0x43   :  { %1203 = vmatmul.bf16.vlgmr.msrb.gmra.mxu3 %v1580_v14  ;;  %1252 = vmatmul.bf16.vlgmr.msrb.gmra.mxu0 %v1584_v15  ;;  %v1727_v14 = vld [vmem:[%s3187_s0 + $0x130] sm:$0xf]  ;;  %v2183_v15 = vld [vmem:[%s3187_s0 + $0x150] sm:$0xf0]  ;;  %v1827_v63 = vld [vmem:[%s3187_s0 + $0x200] sm:$0xf] }
  0x44   :  { %1391 = vmatpush.bf16.msra.mxu3 %v2276_v10  ;;  %1440 = vmatpush.bf16.msra.mxu0 %v2284_v11  ;;  %v1719_v10 = vld [vmem:[%s3187_s0 + $0x128] sm:$0xf]  ;;  %v2182_v11 = vld [vmem:[%s3187_s0 + $0x148] sm:$0xf0] }
  0x46   :  { %1343 = vmatpush.bf16.msra.mxu2 %v2267_v16  ;;  %1294 = vmatpush.bf16.msra.mxu1 %v2259_v17  ;;  %v1716_v16 = vor.u32 %v2177_v8, %v1713_v9  ;;  %v1720_v17 = vor.u32 %v2182_v11, %v1719_v10  ;;  %v1824_v8 = vor.u32 %v2204_v61, %v1821_v62  ;;  %v1635_v61 = vld [vmem:[%s3187_s0 + $0x68] sm:$0xf]  ;;  %v2158_v62 = vld [vmem:[%s3187_s0 + $0x88] sm:$0xf0] }
  0x48   :  { %1392 = vmatpush.bf16.msra.mxu3 %v2275_v18  ;;  %1441 = vmatpush.bf16.msra.mxu0 %v2283_v19  ;;  %v1724_v18 = vor.u32 %v2178_v12, %v1721_v13  ;;  %v1728_v19 = vor.u32 %v2183_v15, %v1727_v14 }
  0x4a   :  { %1344 = vmatpush.bf16.msra.mxu2 %v2266_v20  ;;  %1295 = vmatpush.bf16.msra.mxu1 %v2258_v21  ;;  %v2262_v20 = vld [vmem:[%s3185_s1 + $0x188] sm:$0xff] }
  0x4b   :  { %v2270_v21 = vld [vmem:[%s3185_s1 + $0x1c8] sm:$0xff] }
  0x4c   :  { %1393 = vmatpush.bf16.msra.mxu3 %v2274_v22  ;;  %1442 = vmatpush.bf16.msra.mxu0 %v2282_v23  ;;  %v2254_v22 = vld [vmem:[%s3185_s1 + $0x148] sm:$0xff] }
  0x4d   :  { %v2278_v23 = vld [vmem:[%s3185_s1 + $0x208] sm:$0xff] }
  0x4e   :  { %1345 = vmatpush.bf16.msra.mxu2 %v2265_v36  ;;  %1296 = vmatpush.bf16.msra.mxu1 %v2257_v38  ;;  %v2261_v36 = vld [vmem:[%s3185_s1 + $0x180] sm:$0xff] }
  0x4f   :  { %v2253_v38 = vld [vmem:[%s3185_s1 + $0x140] sm:$0xff] }
  0x50   :  { %1394 = vmatpush.bf16.msra.mxu3 %v2273_v37  ;;  %1443 = vmatpush.bf16.msra.mxu0 %v2281_v39  ;;  %v2269_v37 = vld [vmem:[%s3185_s1 + $0x1c0] sm:$0xff] }
  0x51   :  { %1110 = vmatmul.bf16.gmra.mxu1 %v1608_v32  ;;  %1159 = vmatmul.bf16.gmra.mxu2 %v1612_v33  ;;  %v1752_v32 = vor.u32 %v2186_v24, %v1749_v25  ;;  %v1756_v33 = vor.u32 %v2191_v27, %v1755_v26  ;;  %v2277_v39 = vld [vmem:[%s3185_s1 + $0x200] sm:$0xff]  ;;  %v2148_v24 = vld [vmem:[%s3187_s0 + $0x38] sm:$0xf0] }
  0x52   :  { %1346 = vmatpush.bf16.msra.mxu2 %v2264_v52  ;;  %1297 = vmatpush.bf16.msra.mxu1 %v2256_v54  ;;  %v1800_v52 = vor.u32 %v2201_v47, %v1799_v46  ;;  %v2779_v54 = vld [vmem:[%s3186_s2] ss:$0 sm:$0xff]  ;;  %v2144_v25 = vld [vmem:[%s3187_s0 + $0x1c] sm:$0xf] }
  0x53   :  { %1208 = vmatmul.bf16.gmra.mxu3 %v1616_v34  ;;  %1257 = vmatmul.bf16.gmra.mxu0 %v1620_v35  ;;  %v1760_v34 = vor.u32 %v2187_v28, %v1757_v29  ;;  %v1764_v35 = vor.u32 %v2192_v31, %v1763_v30  ;;  %v1593_v26 = vld [vmem:[%s3187_s0 + $0x3c] sm:$0xf0]  ;;  %v2149_v28 = vld [vmem:[%s3187_s0 + $0x40] sm:$0xf0] }
  0x54   :  { %1395 = vmatpush.bf16.msra.mxu3 %v2272_v53  ;;  %1444 = vmatpush.bf16.msra.mxu0 %v2280_v55  ;;  %v1599_v27 = vld [vmem:[%s3187_s0 + $0x20] sm:$0xf] }
  0x56   :  { %1347 = vmatpush.bf16.msra.mxu2 %v2263_v4  ;;  %1298 = vmatpush.bf16.msra.mxu1 %v2255_v6  ;;  %v2210_v4 = vld [vmem:[%s3187_s0 + $0x228] sm:$0xf0] }
  0x58   :  { %1396 = vmatpush.bf16.msra.mxu3 %v2271_v5  ;;  %1445 = vmatpush.bf16.msra.mxu0 %v2279_v7 }
  0x5a   :  { %1348 = vmatpush.bf16.msra.mxu2 %v2262_v20  ;;  %1299 = vmatpush.bf16.msra.mxu1 %v2254_v22  ;;  %v1585_v22 = vld [vmem:[%s3187_s0 + $0x34] sm:$0xf0] }
  0x5c   :  { %1397 = vmatpush.bf16.msra.mxu3 %v2270_v21  ;;  %1446 = vmatpush.bf16.msra.mxu0 %v2278_v23  ;;  %v2143_v21 = vld [vmem:[%s3187_s0 + $0x14] sm:$0xf]  ;;  %v1591_v23 = vld [vmem:[%s3187_s0 + $0x18] sm:$0xf] }
  0x5e   :  { %1349 = vmatpush.bf16.msra.mxu2 %v2261_v36  ;;  %1300 = vmatpush.bf16.msra.mxu1 %v2253_v38  ;;  %v1600_v38 = vor.u32 %v2149_v28, %v1599_v27  ;;  %v2161_v27 = vld [vmem:[%s3187_s0 + $0xa4] sm:$0xf]  ;;  %v1657_v28 = vld [vmem:[%s3187_s0 + $0xc4] sm:$0xf0] }
  0x60   :  { %1398 = vmatpush.bf16.msra.mxu3 %v2269_v37  ;;  %1447 = vmatpush.bf16.msra.mxu0 %v2277_v39  ;;  %v1596_v37 = vor.u32 %v2144_v25, %v1593_v26 }
  0x61   :  { %1115 = vmatmul.bf16.gmra.mxu1 %v1644_v48  ;;  %1164 = vmatmul.bf16.gmra.mxu2 %v1648_v49  ;;  %v1788_v48 = vor.u32 %v2195_v40, %v1785_v41  ;;  %v1792_v49 = vor.u32 %v2200_v43, %v1791_v42 }
  0x63   :  { %1213 = vmatmul.bf16.gmra.mxu3 %v1652_v50  ;;  %1262 = vmatmul.bf16.gmra.mxu0 %v1656_v51  ;;  %v1796_v51 = vor.u32 %v2196_v44, %v1793_v45 }
  0x71   :  { %1120 = vmatmul.bf16.gmra.mxu1 %v1680_v0  ;;  %1169 = vmatmul.bf16.gmra.mxu2 %v1684_v1  ;;  %v2209_v0 = vld [vmem:[%s3187_s0 + $0x220] sm:$0xf0] }
  0x72   :  { %v2205_v1 = vld [vmem:[%s3187_s0 + $0x204] sm:$0xf]  ;;  %v1828_v9 = vor.u32 %v2209_v0, %v1827_v63 }
  0x73   :  { %1218 = vmatmul.bf16.gmra.mxu3 %v1688_v2  ;;  %1267 = vmatmul.bf16.gmra.mxu0 %v1692_v3  ;;  %v1829_v2 = vld [vmem:[%s3187_s0 + $0x224] sm:$0xf0] }
  0x74   :  { %v1835_v3 = vld [vmem:[%s3187_s0 + $0x208] sm:$0xf]  ;;  %v1832_v12 = vor.u32 %v2205_v1, %v1829_v2 }
  0x75   :  { %v1836_v13 = vor.u32 %v2210_v4, %v1835_v3 }
  0x81   :  { %1125 = vmatmul.bf16.gmra.mxu1 %v1716_v16  ;;  %1174 = vmatmul.bf16.gmra.mxu2 %v1720_v17 }
  0x83   :  { %1223 = vmatmul.bf16.gmra.mxu3 %v1724_v18  ;;  %1272 = vmatmul.bf16.gmra.mxu0 %v1728_v19 }
  0x91   :  { %1130 = vmatmul.bf16.gmra.mxu1 %v1752_v32  ;;  %1179 = vmatmul.bf16.gmra.mxu2 %v1756_v33  ;;  %v1588_v33 = vor.u32 %v2143_v21, %v1585_v22 }
  0x93   :  { %1228 = vmatmul.bf16.gmra.mxu3 %v1760_v34  ;;  %1277 = vmatmul.bf16.gmra.mxu0 %v1764_v35  ;;  %v1592_v34 = vor.u32 %v2148_v24, %v1591_v23 }
  0x9e   :  { %v2774_v50 = vpop.f32.mrf.mxu1 }
  0xa0   :  { %v1057_v53 = vpop.f32.mrf.mxu0 }
  0xa1   :  { %1135 = vmatmul.bf16.gmra.mxu1 %v1788_v48  ;;  %1184 = vmatmul.bf16.gmra.mxu2 %v1792_v49  ;;  %v1058_v30 = vadd.f32 %v2779_v54, %v1057_v53  ;;  %v2152_v49 = vld [vmem:[%s3187_s0 + $0x5c] sm:$0xf]  ;;  %v1627_v53 = vld [vmem:[%s3187_s0 + $0x60] sm:$0xf] }
  0xa3   :  { %1233 = vmatmul.bf16.gmra.mxu3 %v1796_v51  ;;  %1282 = vmatmul.bf16.gmra.mxu0 %v1800_v52  ;;  %v1621_v51 = vld [vmem:[%s3187_s0 + $0x7c] sm:$0xf0] }
  0xa4   :  { %v1077_v55 = vpop.f32.mrf.mxu2  ;;  %v1624_v3 = vor.u32 %v2152_v49, %v1621_v51 }
  0xa5   :  { %v2782_v56 = vadd.f32 %v2779_v54, %v1077_v55  ;;  %v2157_v55 = vld [vmem:[%s3187_s0 + $0x80] sm:$0xf0] }
  0xa6   :  { %v1087_v57 = vpop.f32.mrf.mxu3  ;;  %v2787_v59 = vpop.f32.mrf.mxu1  ;;  %v1628_v4 = vor.u32 %v2157_v55, %v1627_v53 }
  0xa7   :  { %v2785_v58 = vadd.f32 %v2779_v54, %v1087_v57  ;;  %v2153_v57 = vld [vmem:[%s3187_s0 + $0x64] sm:$0xf] }
  0xa8   :  { %v1059_v60 = vpop.f32.mrf.mxu0 }
  0xa9   :  { %v1060_v42 = vadd.f32 %v2779_v54, %v1059_v60  ;;  %v1629_v60 = vld [vmem:[%s3187_s0 + $0x84] sm:$0xf0] }
  0xac   :  { %v1079_v5 = vpop.f32.mrf.mxu2 }
  0xad   :  { %v2814_v6 = vadd.f32 %v2779_v54, %v1079_v5 }
  0xae   :  { %v1089_v7 = vpop.f32.mrf.mxu3  ;;  %v2819_v11 = vpop.f32.mrf.mxu1 }
  0xaf   :  { %v2817_v10 = vadd.f32 %v2779_v54, %v1089_v7  ;;  %v1632_v7 = vor.u32 %v2153_v57, %v1629_v60 }
  0xb0   :  { %v1062_v14 = vpop.f32.mrf.mxu0 }
  0xb1   :  { %1140 = vmatmul.bf16.gmra.mxu1 %v1824_v8  ;;  %1189 = vmatmul.bf16.gmra.mxu2 %v1828_v9  ;;  %v1063_v0 = vadd.f32 %v2779_v54, %v1062_v14  ;;  %v1636_v8 = vor.u32 %v2158_v62, %v1635_v61 }
  0xb3   :  { %1238 = vmatmul.bf16.gmra.mxu3 %v1832_v12  ;;  %1287 = vmatmul.bf16.gmra.mxu0 %v1836_v13 }
  0xb4   :  { %v1082_v15 = vpop.f32.mrf.mxu2 }
  0xb5   :  { %v2822_v16 = vadd.f32 %v2779_v54, %v1082_v15 }
  0xb6   :  { %v1092_v17 = vpop.f32.mrf.mxu3  ;;  %v2827_v19 = vpop.f32.mrf.mxu1 }
  0xb7   :  { %v2825_v18 = vadd.f32 %v2779_v54, %v1092_v17 }
  0xb8   :  { %v1064_v20 = vpop.f32.mrf.mxu0 }
  0xb9   :  { %v1065_v21 = vadd.f32 %v2779_v54, %v1064_v20  ;;  %v1663_v20 = vld [vmem:[%s3187_s0 + $0xa8] sm:$0xf] }
  0xbc   :  { %v1084_v29 = vpop.f32.mrf.mxu2 }
  0xbd   :  { %v2855_v31 = vadd.f32 %v2779_v54, %v1084_v29 }
  0xbe   :  { %v1094_v32 = vpop.f32.mrf.mxu3  ;;  %v1106_v36 = vpop.f32.mrf.mxu1 }
  0xbf   :  { %v2858_v35 = vadd.f32 %v2779_v54, %v1094_v32  ;;  %v1107_v39 = vadd.f32 %v1106_v36, %v1058_v30  ;;  %v2166_v30 = vld [vmem:[%s3187_s0 + $0xc8] sm:$0xf0]  ;;  %v2167_v36 = vld [vmem:[%s3187_s0 + $0xd0] sm:$0xf0] }
  0xc0   :  { %v1253_v40 = vpop.f32.mrf.mxu0  ;;  %v2162_v32 = vld [vmem:[%s3187_s0 + $0xac] sm:$0xf] }
  0xc1   :  { %1301 = vmatmul.bf16.vlgmr.msra.gmra.mxu1 %v1588_v33  ;;  %1350 = vmatmul.bf16.vlgmr.msra.gmra.mxu2 %v1592_v34  ;;  %v1665_v33 = vld [vmem:[%s3187_s0 + $0xcc] sm:$0xf0] }
  0xc2   :  { %v1671_v34 = vld [vmem:[%s3187_s0 + $0xb0] sm:$0xf] }
  0xc3   :  { %1399 = vmatmul.bf16.vlgmr.msra.gmra.mxu3 %v1596_v37  ;;  %1448 = vmatmul.bf16.vlgmr.msra.gmra.mxu0 %v1600_v38  ;;  %v1068_v38 = vadd.f32 %v2779_v54, %v2774_v50  ;;  %v1070_v50 = vadd.f32 %v2779_v54, %v2787_v59  ;;  %v1699_v59 = vld [vmem:[%s3187_s0 + $0xf0] sm:$0xf] }
  0xc4   :  { %v1155_v41 = vpop.f32.mrf.mxu2 }
  0xc5   :  { %v1156_v43 = vadd.f32 %v1155_v41, %v1107_v39  ;;  %v1660_v41 = vor.u32 %v2161_v27, %v1657_v28 }
  0xc6   :  { %v1204_v44 = vpop.f32.mrf.mxu3  ;;  %v1108_v45 = vpop.f32.mrf.mxu1 }
  0xc7   :  { %v1205_v46 = vadd.f32 %v1204_v44, %v1156_v43  ;;  %v1109_v47 = vadd.f32 %v1108_v45, %v1060_v42  ;;  %v1664_v42 = vor.u32 %v2166_v30, %v1663_v20  ;;  %v1668_v44 = vor.u32 %v2162_v32, %v1665_v33 }
  0xc8   :  { %v1255_v48 = vpop.f32.mrf.mxu0  ;;  %v1672_v45 = vor.u32 %v2167_v36, %v1671_v34 }
  0xc9   :  { %v2867_v52 = vadd.f32 %v1253_v40, %v1205_v46 }
  0xcc   :  { %v1157_v63 = vpop.f32.mrf.mxu2 }
  0xcd   :  { %v1158_v1 = vadd.f32 %v1157_v63, %v1109_v47  ;;  %v2170_v63 = vld [vmem:[%s3187_s0 + $0xec] sm:$0xf] }
  0xce   :  { %v1206_v2 = vpop.f32.mrf.mxu3  ;;  %v1111_v5 = vpop.f32.mrf.mxu1 }
  0xcf   :  { %v1207_v9 = vadd.f32 %v1206_v2, %v1158_v1  ;;  %v1112_v12 = vadd.f32 %v1111_v5, %v1063_v0  ;;  %v1693_v0 = vld [vmem:[%s3187_s0 + $0x10c] sm:$0xf0]  ;;  %v2175_v2 = vld [vmem:[%s3187_s0 + $0x110] sm:$0xf0]  ;;  %v1707_v5 = vld [vmem:[%s3187_s0 + $0xf8] sm:$0xf] }
  0xd0   :  { %v1258_v13 = vpop.f32.mrf.mxu0 }
  0xd1   :  { %1306 = vmatmul.bf16.gmra.mxu1 %v1624_v3  ;;  %1355 = vmatmul.bf16.gmra.mxu2 %v1628_v4  ;;  %v2888_v15 = vadd.f32 %v1255_v48, %v1207_v9  ;;  %v2171_v3 = vld [vmem:[%s3187_s0 + $0xf4] sm:$0xf]  ;;  %v1701_v4 = vld [vmem:[%s3187_s0 + $0x114] sm:$0xf0]  ;;  %v1073_v9 = vadd.f32 %v2779_v54, %v2819_v11  ;;  %v1075_v11 = vadd.f32 %v2779_v54, %v2827_v19  ;;  %v2184_v19 = vld [vmem:[%s3187_s0 + $0x158] sm:$0xf0] }
  0xd2   :  { %v1735_v54 = vld [vmem:[%s3187_s0 + $0x138] sm:$0xf] }
  0xd3   :  { %1404 = vmatmul.bf16.gmra.mxu3 %v1632_v7  ;;  %1453 = vmatmul.bf16.gmra.mxu0 %v1636_v8  ;;  %v2176_v7 = vld [vmem:[%s3187_s0 + $0x118] sm:$0xf0] }
  0xd4   :  { %v1160_v17 = vpop.f32.mrf.mxu2 }
  0xd5   :  { %v1161_v14 = vadd.f32 %v1160_v17, %v1112_v12  ;;  %v1696_v17 = vor.u32 %v2170_v63, %v1693_v0 }
  0xd6   :  { %v1209_v22 = vpop.f32.mrf.mxu3  ;;  %v1113_v23 = vpop.f32.mrf.mxu1 }
  0xd7   :  { %v1210_v24 = vadd.f32 %v1209_v22, %v1161_v14  ;;  %v1114_v25 = vadd.f32 %v1113_v23, %v1065_v21  ;;  %v1700_v21 = vor.u32 %v2175_v2, %v1699_v59  ;;  %v1704_v22 = vor.u32 %v2171_v3, %v1701_v4 }
  0xd8   :  { %v1260_v26 = vpop.f32.mrf.mxu0  ;;  %v1708_v23 = vor.u32 %v2176_v7, %v1707_v5  ;;  %v2188_v5 = vld [vmem:[%s3187_s0 + $0x17c] sm:$0xf] }
  0xd9   :  { %v2897_v29 = vadd.f32 %v1258_v13, %v1210_v24 }
  0xdc   :  { %v1162_v37 = vpop.f32.mrf.mxu2 }
  0xdd   :  { %v1163_v39 = vadd.f32 %v1162_v37, %v1114_v25  ;;  %v2179_v37 = vld [vmem:[%s3187_s0 + $0x134] sm:$0xf] }
  0xde   :  { %v1211_v40 = vpop.f32.mrf.mxu3  ;;  %v1116_v43 = vpop.f32.mrf.mxu1 }
  0xdf   :  { %v1212_v46 = vadd.f32 %v1211_v40, %v1163_v39  ;;  %v1117_v47 = vadd.f32 %v1116_v43, %v1068_v38  ;;  %v1729_v38 = vld [vmem:[%s3187_s0 + $0x154] sm:$0xf0]  ;;  %v2180_v40 = vld [vmem:[%s3187_s0 + $0x13c] sm:$0xf]  ;;  %v2185_v43 = vld [vmem:[%s3187_s0 + $0x160] sm:$0xf0] }
  0xe0   :  { %v1263_v48 = vpop.f32.mrf.mxu0 }
  0xe1   :  { %1311 = vmatmul.bf16.gmra.mxu1 %v1660_v41  ;;  %1360 = vmatmul.bf16.gmra.mxu2 %v1664_v42  ;;  %v2919_v49 = vadd.f32 %v1260_v26, %v1212_v46  ;;  %v1737_v41 = vld [vmem:[%s3187_s0 + $0x15c] sm:$0xf0] }
  0xe2   :  { %v1743_v42 = vld [vmem:[%s3187_s0 + $0x140] sm:$0xf] }
  0xe3   :  { %1409 = vmatmul.bf16.gmra.mxu3 %v1668_v44  ;;  %1458 = vmatmul.bf16.gmra.mxu0 %v1672_v45 }
  0xe4   :  { %v1165_v51 = vpop.f32.mrf.mxu2 }
  0xe5   :  { %v1166_v53 = vadd.f32 %v1165_v51, %v1117_v47  ;;  %v1732_v47 = vor.u32 %v2179_v37, %v1729_v38 }
  0xe6   :  { %v1214_v55 = vpop.f32.mrf.mxu3  ;;  %v1118_v57 = vpop.f32.mrf.mxu1 }
  0xe7   :  { %v1215_v60 = vadd.f32 %v1214_v55, %v1166_v53  ;;  %v1119_v61 = vadd.f32 %v1118_v57, %v1070_v50  ;;  %v1740_v50 = vor.u32 %v2180_v40, %v1737_v41  ;;  %v1744_v53 = vor.u32 %v2185_v43, %v1743_v42  ;;  %v2197_v40 = vld [vmem:[%s3187_s0 + $0x1c4] sm:$0xf]  ;;  %v1807_v42 = vld [vmem:[%s3187_s0 + $0x1c8] sm:$0xf]  ;;  %v2202_v43 = vld [vmem:[%s3187_s0 + $0x1e8] sm:$0xf0] }
  0xe8   :  { %v1265_v62 = vpop.f32.mrf.mxu0 }
  0xe9   :  { %v2929_v1 = vadd.f32 %v1263_v48, %v1215_v60  ;;  %v1736_v48 = vor.u32 %v2184_v19, %v1735_v54 }
  0xec   :  { %v1167_v8 = vpop.f32.mrf.mxu2 }
  0xed   :  { %v1168_v12 = vadd.f32 %v1167_v8, %v1119_v61  ;;  %v1771_v8 = vld [vmem:[%s3187_s0 + $0x180] sm:$0xf] }
  0xee   :  { %v1216_v13 = vpop.f32.mrf.mxu3  ;;  %v1121_v14 = vpop.f32.mrf.mxu1 }
  0xef   :  { %v1217_v24 = vadd.f32 %v1216_v13, %v1168_v12  ;;  %v1122_v25 = vadd.f32 %v1121_v14, %v1073_v9  ;;  %v2193_v9 = vld [vmem:[%s3187_s0 + $0x1a0] sm:$0xf0]  ;;  %v1773_v12 = vld [vmem:[%s3187_s0 + $0x1a4] sm:$0xf0] }
  0xf0   :  { %v1268_v26 = vpop.f32.mrf.mxu0  ;;  %v1779_v13 = vld [vmem:[%s3187_s0 + $0x188] sm:$0xf] }
  0xf1   :  { %1316 = vmatmul.bf16.gmra.mxu1 %v1696_v17  ;;  %1365 = vmatmul.bf16.gmra.mxu2 %v1700_v21  ;;  %v2951_v27 = vadd.f32 %v1265_v62, %v1217_v24  ;;  %v2194_v17 = vld [vmem:[%s3187_s0 + $0x1a8] sm:$0xf0]  ;;  %v1772_v24 = vor.u32 %v2193_v9, %v1771_v8 }
  0xf3   :  { %1414 = vmatmul.bf16.gmra.mxu3 %v1704_v22  ;;  %1463 = vmatmul.bf16.gmra.mxu0 %v1708_v23 }
  0xf4   :  { %v1170_v28 = vpop.f32.mrf.mxu2 }
  0xf5   :  { %v1171_v20 = vadd.f32 %v1170_v28, %v1122_v25  ;;  %v1780_v28 = vor.u32 %v2194_v17, %v1779_v13  ;;  %v1843_v13 = vld [vmem:[%s3187_s0 + $0x210] sm:$0xf]  ;;  %v2211_v17 = vld [vmem:[%s3187_s0 + $0x230] sm:$0xf0] }
  0xf6   :  { %v1219_v30 = vpop.f32.mrf.mxu3  ;;  %v1123_v32 = vpop.f32.mrf.mxu1 }
  0xf7   :  { %v1220_v33 = vadd.f32 %v1219_v30, %v1171_v20  ;;  %v1124_v34 = vadd.f32 %v1123_v32, %v1075_v11 }
  0xf8   :  { %v1270_v36 = vpop.f32.mrf.mxu0 }
  0xf9   :  { %v2961_v39 = vadd.f32 %v1268_v26, %v1220_v33 }
  0xfc   :  { %v1172_v44 = vpop.f32.mrf.mxu2 }
  0xfd   :  { %v1173_v45 = vadd.f32 %v1172_v44, %v1124_v34  ;;  %v1809_v44 = vld [vmem:[%s3187_s0 + $0x1ec] sm:$0xf0] }
  0xfe   :  { %v1221_v46 = vpop.f32.mrf.mxu3  ;;  %v1126_v51 = vpop.f32.mrf.mxu1 }
  0xff   :  { %v1222_v55 = vadd.f32 %v1221_v46, %v1173_v45  ;;  %v1127_v57 = vadd.f32 %v1126_v51, %v2782_v56  ;;  %v1765_v56 = vld [vmem:[%s3187_s0 + $0x19c] sm:$0xf0]  ;;  %v1815_v45 = vld [vmem:[%s3187_s0 + $0x1d0] sm:$0xf]  ;;  %v2203_v46 = vld [vmem:[%s3187_s0 + $0x1f0] sm:$0xf0] }
 0x100   :  { %v1273_v60 = vpop.f32.mrf.mxu0  ;;  %v1768_v23 = vor.u32 %v2188_v5, %v1765_v56 }
 0x101   :  { %1321 = vmatmul.bf16.gmra.mxu1 %v1732_v47  ;;  %1370 = vmatmul.bf16.gmra.mxu2 %v1736_v48  ;;  %v2982_v61 = vadd.f32 %v1270_v36, %v1222_v55 }
 0x103   :  { %1419 = vmatmul.bf16.gmra.mxu3 %v1740_v50  ;;  %1468 = vmatmul.bf16.gmra.mxu0 %v1744_v53  ;;  %v1808_v53 = vor.u32 %v2202_v43, %v1807_v42 }
 0x104   :  { %v1175_v62 = vpop.f32.mrf.mxu2 }
 0x105   :  { %v1176_v63 = vadd.f32 %v1175_v62, %v1127_v57 }
 0x106   :  { %v1224_v0 = vpop.f32.mrf.mxu3  ;;  %v1128_v59 = vpop.f32.mrf.mxu1 }
 0x107   :  { %v1225_v2 = vadd.f32 %v1224_v0, %v1176_v63  ;;  %v1129_v3 = vadd.f32 %v1128_v59, %v2814_v6  ;;  %v2189_v6 = vld [vmem:[%s3187_s0 + $0x184] sm:$0xf] }
 0x108   :  { %v1275_v4 = vpop.f32.mrf.mxu0  ;;  %v1776_v26 = vor.u32 %v2189_v6, %v1773_v12  ;;  %v2206_v6 = vld [vmem:[%s3187_s0 + $0x20c] sm:$0xf] }
 0x109   :  { %v2991_v7 = vadd.f32 %v1273_v60, %v1225_v2  ;;  %v1816_v60 = vor.u32 %v2203_v46, %v1815_v45 }
 0x10c   :  { %v1177_v21 = vpop.f32.mrf.mxu2 }
 0x10d   :  { %v1178_v14 = vadd.f32 %v1177_v21, %v1129_v3  ;;  %v1845_v21 = vld [vmem:[%s3187_s0 + $0x234] sm:$0xf0] }
 0x10e   :  { %v1226_v22 = vpop.f32.mrf.mxu3  ;;  %v1131_v25 = vpop.f32.mrf.mxu1 }
 0x10f   :  { %v1227_v11 = vadd.f32 %v1226_v22, %v1178_v14  ;;  %v1132_v20 = vadd.f32 %v1131_v25, %v2822_v16  ;;  %v1801_v16 = vld [vmem:[%s3187_s0 + $0x1e4] sm:$0xf0]  ;;  %v1851_v14 = vld [vmem:[%s3187_s0 + $0x218] sm:$0xf]  ;;  %v2212_v22 = vld [vmem:[%s3187_s0 + $0x238] sm:$0xf0] }
 0x110   :  { %v1278_v30 = vpop.f32.mrf.mxu0  ;;  %v1804_v50 = vor.u32 %v2197_v40, %v1801_v16 }
 0x111   :  { %1326 = vmatmul.bf16.gmra.mxu1 %v1768_v23  ;;  %1375 = vmatmul.bf16.gmra.mxu2 %v1772_v24  ;;  %v3012_v32 = vadd.f32 %v1275_v4, %v1227_v11 }
 0x113   :  { %1424 = vmatmul.bf16.gmra.mxu3 %v1776_v26  ;;  %1473 = vmatmul.bf16.gmra.mxu0 %v1780_v28  ;;  %v1844_v28 = vor.u32 %v2211_v17, %v1843_v13 }
 0x114   :  { %v1180_v33 = vpop.f32.mrf.mxu2 }
 0x115   :  { %v1181_v34 = vadd.f32 %v1180_v33, %v1132_v20 }
 0x116   :  { %v1229_v36 = vpop.f32.mrf.mxu3  ;;  %v1133_v37 = vpop.f32.mrf.mxu1 }
 0x117   :  { %v1230_v38 = vadd.f32 %v1229_v36, %v1181_v34  ;;  %v1134_v54 = vadd.f32 %v1133_v37, %v2855_v31  ;;  %v2198_v31 = vld [vmem:[%s3187_s0 + $0x1cc] sm:$0xf] }
 0x118   :  { %v1280_v19 = vpop.f32.mrf.mxu0  ;;  %v1812_v57 = vor.u32 %v2198_v31, %v1809_v44 }
 0x119   :  { %v3021_v41 = vadd.f32 %v1278_v30, %v1230_v38  ;;  %v1852_v30 = vor.u32 %v2212_v22, %v1851_v14 }
 0x11c   :  { %v1182_v47 = vpop.f32.mrf.mxu2 }
 0x11d   :  { %v1183_v48 = vadd.f32 %v1182_v47, %v1134_v54 }
 0x11e   :  { %v1231_v51 = vpop.f32.mrf.mxu3  ;;  %v1136_v55 = vpop.f32.mrf.mxu1 }
 0x11f   :  { %v1232_v62 = vadd.f32 %v1231_v51, %v1183_v48  ;;  %v1137_v63 = vadd.f32 %v1136_v55, %v2785_v58  ;;  %v1837_v58 = vld [vmem:[%s3187_s0 + $0x22c] sm:$0xf0] }
 0x120   :  { %v1283_v0 = vpop.f32.mrf.mxu0  ;;  %v1840_v26 = vor.u32 %v2206_v6, %v1837_v58 }
 0x121   :  { %1331 = vmatmul.bf16.gmra.mxu1 %v1804_v50  ;;  %1380 = vmatmul.bf16.gmra.mxu2 %v1808_v53  ;;  %v3042_v59 = vadd.f32 %v1280_v19, %v1232_v62 }
 0x123   :  { %1429 = vmatmul.bf16.gmra.mxu3 %v1812_v57  ;;  %1478 = vmatmul.bf16.gmra.mxu0 %v1816_v60 }
 0x124   :  { %v1185_v2 = vpop.f32.mrf.mxu2 }
 0x125   :  { %v1186_v3 = vadd.f32 %v1185_v2, %v1137_v63  ;;  %v3088_v2 = vld [vmem:[%s3189_s4] ss:$0 sm:$0xff] }
 0x126   :  { %v1234_v4 = vpop.f32.mrf.mxu3  ;;  %v1138_v5 = vpop.f32.mrf.mxu1 }
 0x127   :  { %v1235_v56 = vadd.f32 %v1234_v4, %v1186_v3  ;;  %v1139_v8 = vadd.f32 %v1138_v5, %v2817_v10  ;;  %v2207_v10 = vld [vmem:[%s3187_s0 + $0x214] sm:$0xf] }
 0x128   :  { %v1285_v9 = vpop.f32.mrf.mxu0  ;;  %v1848_v20 = vor.u32 %v2207_v10, %v1845_v21 }
 0x129   :  { %v3051_v12 = vadd.f32 %v1283_v0, %v1235_v56 }
 0x12c   :  { %v1187_v23 = vpop.f32.mrf.mxu2 }
 0x12d   :  { %v1188_v24 = vadd.f32 %v1187_v23, %v1139_v8 }
 0x12e   :  { %v1236_v25 = vpop.f32.mrf.mxu3  ;;  %v1141_v11 = vpop.f32.mrf.mxu1 }
 0x12f   :  { %v1237_v33 = vadd.f32 %v1236_v25, %v1188_v24  ;;  %v1142_v34 = vadd.f32 %v1141_v11, %v2825_v18 }
 0x130   :  { %v1288_v36 = vpop.f32.mrf.mxu0 }
 0x131   :  { %1336 = vmatmul.bf16.gmra.mxu1 %v1840_v26  ;;  %1385 = vmatmul.bf16.gmra.mxu2 %v1844_v28  ;;  %v3072_v37 = vadd.f32 %v1285_v9, %v1237_v33 }
 0x133   :  { %1434 = vmatmul.bf16.gmra.mxu3 %v1848_v20  ;;  %1483 = vmatmul.bf16.gmra.mxu0 %v1852_v30 }
 0x134   :  { %v1190_v38 = vpop.f32.mrf.mxu2 }
 0x135   :  { %v1191_v54 = vadd.f32 %v1190_v38, %v1142_v34 }
 0x136   :  { %v1239_v19 = vpop.f32.mrf.mxu3  ;;  %v1143_v40 = vpop.f32.mrf.mxu1 }
 0x137   :  { %v1240_v16 = vadd.f32 %v1239_v19, %v1191_v54  ;;  %v1144_v42 = vadd.f32 %v1143_v40, %v2858_v35  ;;  %v3083_v35 = vld [vmem:[%s3188_s3] ss:$0 sm:$0xff] }
 0x138   :  { %v1290_v43 = vpop.f32.mrf.mxu0 }
 0x139   :  { %v3075_v31 = vadd.f32 %v1288_v36, %v1240_v16 }
 0x13c   :  { %v1192_v44 = vpop.f32.mrf.mxu2 }
 0x13d   :  { %v1193_v45 = vadd.f32 %v1192_v44, %v1144_v42 }
 0x13e   :  { %v1241_v18 = vpop.f32.mrf.mxu3  ;;  %v1302_v46 = vpop.f32.mrf.mxu1 }
 0x13f   :  { %v1242_v47 = vadd.f32 %v1241_v18, %v1193_v45  ;;  %v1303_v50 = vadd.f32 %v1302_v46, %v2867_v52 }
 0x140   :  { %v1449_v48 = vpop.f32.mrf.mxu0 }
 0x141   :  { %v3077_v51 = vadd.f32 %v1290_v43, %v1242_v47 }
 0x144   :  { %v1351_v53 = vpop.f32.mrf.mxu2 }
 0x145   :  { %v1352_v55 = vadd.f32 %v1351_v53, %v1303_v50 }
 0x146   :  { %v1400_v57 = vpop.f32.mrf.mxu3  ;;  %v1304_v60 = vpop.f32.mrf.mxu1 }
 0x147   :  { %v1401_v62 = vadd.f32 %v1400_v57, %v1352_v55  ;;  %v1305_v52 = vadd.f32 %v1304_v60, %v2888_v15 }
 0x148   :  { %v1451_v63 = vpop.f32.mrf.mxu0 }
 0x149   :  { %v1450_v0 = vadd.f32 %v1449_v48, %v1401_v62 }
 0x14b   :  { %v1493_v3 = vmul.f32 %v3083_v35, %v1450_v0 }
 0x14c   :  { %v1353_v4 = vpop.f32.mrf.mxu2 }
 0x14d   :  { %v1513_v5 = vadd.f32 %v3088_v2, %v1493_v3  ;;  %v1354_v56 = vadd.f32 %v1353_v4, %v1305_v52 }
 0x14e   :  { %v1402_v8 = vpop.f32.mrf.mxu3  ;;  %v1307_v9 = vpop.f32.mrf.mxu1 }
 0x14f   :  { %v1529_v6 = vmax.f32 %v1513_v5, 0.0  ;;  %v1403_v58 = vadd.f32 %v1402_v8, %v1354_v56  ;;  %v1308_v21 = vadd.f32 %v1307_v9, %v2897_v29 }
 0x150   :  { %v1454_v13 = vpop.f32.mrf.mxu0 }
 0x151   :  { %1545 = vst [vmem:[%s3190_s5] sm:$0xff] %v1529_v6  ;;  %v1452_v17 = vadd.f32 %v1451_v63, %v1403_v58 }
 0x153   :  { %v1494_v10 = vmul.f32 %v3083_v35, %v1452_v17 }
 0x154   :  { %v1356_v14 = vpop.f32.mrf.mxu2 }
 0x155   :  { %v1514_v15 = vadd.f32 %v3088_v2, %v1494_v10  ;;  %v1357_v22 = vadd.f32 %v1356_v14, %v1308_v21 }
 0x156   :  { %v1405_v23 = vpop.f32.mrf.mxu3  ;;  %v1309_v24 = vpop.f32.mrf.mxu1 }
 0x157   :  { %v1530_v25 = vmax.f32 %v1514_v15, 0.0  ;;  %v1406_v26 = vadd.f32 %v1405_v23, %v1357_v22  ;;  %v1310_v30 = vadd.f32 %v1309_v24, %v2919_v49 }
 0x158   :  { %v1456_v28 = vpop.f32.mrf.mxu0 }
 0x159   :  { %1546 = vst [vmem:[%s3190_s5 + $0x8] sm:$0xff] %v1530_v25  ;;  %v1455_v11 = vadd.f32 %v1454_v13, %v1406_v26 }
 0x15b   :  { %v1495_v20 = vmul.f32 %v3083_v35, %v1455_v11 }
 0x15c   :  { %v1358_v33 = vpop.f32.mrf.mxu2 }
 0x15d   :  { %v1515_v29 = vadd.f32 %v3088_v2, %v1495_v20  ;;  %v1359_v34 = vadd.f32 %v1358_v33, %v1310_v30 }
 0x15e   :  { %v1407_v36 = vpop.f32.mrf.mxu3  ;;  %v1312_v38 = vpop.f32.mrf.mxu1 }
 0x15f   :  { %v1531_v54 = vmax.f32 %v1515_v29, 0.0  ;;  %v1408_v19 = vadd.f32 %v1407_v36, %v1359_v34  ;;  %v1313_v43 = vadd.f32 %v1312_v38, %v2929_v1 }
 0x160   :  { %v1459_v40 = vpop.f32.mrf.mxu0 }
 0x161   :  { %1547 = vst [vmem:[%s3190_s5 + $0x10] sm:$0xff] %v1531_v54  ;;  %v1457_v16 = vadd.f32 %v1456_v28, %v1408_v19 }
 0x163   :  { %v1496_v42 = vmul.f32 %v3083_v35, %v1457_v16 }
 0x164   :  { %v1361_v44 = vpop.f32.mrf.mxu2 }
 0x165   :  { %v1516_v49 = vadd.f32 %v3088_v2, %v1496_v42  ;;  %v1362_v45 = vadd.f32 %v1361_v44, %v1313_v43 }
 0x166   :  { %v1410_v18 = vpop.f32.mrf.mxu3  ;;  %v1314_v46 = vpop.f32.mrf.mxu1 }
 0x167   :  { %v1532_v47 = vmax.f32 %v1516_v49, 0.0  ;;  %v1411_v48 = vadd.f32 %v1410_v18, %v1362_v45  ;;  %v1315_v57 = vadd.f32 %v1314_v46, %v2951_v27 }
 0x168   :  { %v1461_v50 = vpop.f32.mrf.mxu0 }
 0x169   :  { %1548 = vst [vmem:[%s3190_s5 + $0x18] sm:$0xff] %v1532_v47  ;;  %v1460_v53 = vadd.f32 %v1459_v40, %v1411_v48 }
 0x16b   :  { %v1497_v55 = vmul.f32 %v3083_v35, %v1460_v53 }
 0x16c   :  { %v1363_v60 = vpop.f32.mrf.mxu2 }
 0x16d   :  { %v1517_v1 = vadd.f32 %v3088_v2, %v1497_v55  ;;  %v1364_v62 = vadd.f32 %v1363_v60, %v1315_v57 }
 0x16e   :  { %v1412_v63 = vpop.f32.mrf.mxu3  ;;  %v1317_v0 = vpop.f32.mrf.mxu1 }
 0x16f   :  { %v1533_v3 = vmax.f32 %v1517_v1, 0.0  ;;  %v1413_v52 = vadd.f32 %v1412_v63, %v1364_v62  ;;  %v1318_v8 = vadd.f32 %v1317_v0, %v2961_v39 }
 0x170   :  { %v1464_v4 = vpop.f32.mrf.mxu0 }
 0x171   :  { %1549 = vst [vmem:[%s3190_s5 + $0x20] sm:$0xff] %v1533_v3  ;;  %v1462_v5 = vadd.f32 %v1461_v50, %v1413_v52 }
 0x173   :  { %v1498_v56 = vmul.f32 %v3083_v35, %v1462_v5 }
 0x174   :  { %v1366_v9 = vpop.f32.mrf.mxu2 }
 0x175   :  { %v1518_v27 = vadd.f32 %v3088_v2, %v1498_v56  ;;  %v1367_v6 = vadd.f32 %v1366_v9, %v1318_v8 }
 0x176   :  { %v1415_v58 = vpop.f32.mrf.mxu3  ;;  %v1319_v13 = vpop.f32.mrf.mxu1 }
 0x177   :  { %v1534_v17 = vmax.f32 %v1518_v27, 0.0  ;;  %v1416_v10 = vadd.f32 %v1415_v58, %v1367_v6  ;;  %v1320_v22 = vadd.f32 %v1319_v13, %v2982_v61 }
 0x178   :  { %v1466_v21 = vpop.f32.mrf.mxu0 }
 0x179   :  { %1550 = vst [vmem:[%s3190_s5 + $0x28] sm:$0xff] %v1534_v17  ;;  %v1465_v14 = vadd.f32 %v1464_v4, %v1416_v10 }
 0x17b   :  { %v1499_v15 = vmul.f32 %v3083_v35, %v1465_v14 }
 0x17c   :  { %v1368_v23 = vpop.f32.mrf.mxu2 }
 0x17d   :  { %v1519_v39 = vadd.f32 %v3088_v2, %v1499_v15  ;;  %v1369_v24 = vadd.f32 %v1368_v23, %v1320_v22 }
 0x17e   :  { %v1417_v25 = vpop.f32.mrf.mxu3  ;;  %v1322_v26 = vpop.f32.mrf.mxu1 }
 0x17f   :  { %v1535_v28 = vmax.f32 %v1519_v39, 0.0  ;;  %v1418_v11 = vadd.f32 %v1417_v25, %v1369_v24  ;;  %v1323_v29 = vadd.f32 %v1322_v26, %v2991_v7 }
 0x180   :  { %v1469_v20 = vpop.f32.mrf.mxu0 }
 0x181   :  { %1551 = vst [vmem:[%s3190_s5 + $0x30] sm:$0xff] %v1535_v28  ;;  %v1467_v30 = vadd.f32 %v1466_v21, %v1418_v11 }
 0x183   :  { %v1500_v33 = vmul.f32 %v3083_v35, %v1467_v30 }
 0x184   :  { %v1371_v34 = vpop.f32.mrf.mxu2 }
 0x185   :  { %v1520_v61 = vadd.f32 %v3088_v2, %v1500_v33  ;;  %v1372_v36 = vadd.f32 %v1371_v34, %v1323_v29 }
 0x186   :  { %v1420_v38 = vpop.f32.mrf.mxu3  ;;  %v1324_v54 = vpop.f32.mrf.mxu1 }
 0x187   :  { %v1536_v19 = vmax.f32 %v1520_v61, 0.0  ;;  %v1421_v40 = vadd.f32 %v1420_v38, %v1372_v36  ;;  %v1325_v44 = vadd.f32 %v1324_v54, %v3012_v32 }
 0x188   :  { %v1471_v16 = vpop.f32.mrf.mxu0 }
 0x189   :  { %1552 = vst [vmem:[%s3190_s5 + $0x38] sm:$0xff] %v1536_v19  ;;  %v1470_v42 = vadd.f32 %v1469_v20, %v1421_v40 }
 0x18b   :  { %v1501_v43 = vmul.f32 %v3083_v35, %v1470_v42 }
 0x18c   :  { %v1373_v49 = vpop.f32.mrf.mxu2 }
 0x18d   :  { %v1521_v7 = vadd.f32 %v3088_v2, %v1501_v43  ;;  %v1374_v45 = vadd.f32 %v1373_v49, %v1325_v44 }
 0x18e   :  { %v1422_v18 = vpop.f32.mrf.mxu3  ;;  %v1327_v46 = vpop.f32.mrf.mxu1 }
 0x18f   :  { %v1537_v47 = vmax.f32 %v1521_v7, 0.0  ;;  %v1423_v48 = vadd.f32 %v1422_v18, %v1374_v45  ;;  %v1328_v57 = vadd.f32 %v1327_v46, %v3021_v41 }
 0x190   :  { %v1474_v50 = vpop.f32.mrf.mxu0 }
 0x191   :  { %1553 = vst [vmem:[%s3190_s5 + $0x40] sm:$0xff] %v1537_v47  ;;  %v1472_v53 = vadd.f32 %v1471_v16, %v1423_v48 }
 0x193   :  { %v1502_v55 = vmul.f32 %v3083_v35, %v1472_v53 }
 0x194   :  { %v1376_v60 = vpop.f32.mrf.mxu2 }
 0x195   :  { %v1522_v32 = vadd.f32 %v3088_v2, %v1502_v55  ;;  %v1377_v1 = vadd.f32 %v1376_v60, %v1328_v57 }
 0x196   :  { %v1425_v62 = vpop.f32.mrf.mxu3  ;;  %v1329_v63 = vpop.f32.mrf.mxu1 }
 0x197   :  { %v1538_v0 = vmax.f32 %v1522_v32, 0.0  ;;  %v1426_v3 = vadd.f32 %v1425_v62, %v1377_v1  ;;  %v1330_v56 = vadd.f32 %v1329_v63, %v3042_v59 }
 0x198   :  { %v1476_v52 = vpop.f32.mrf.mxu0 }
 0x199   :  { %1554 = vst [vmem:[%s3190_s5 + $0x48] sm:$0xff] %v1538_v0  ;;  %v1475_v4 = vadd.f32 %v1474_v50, %v1426_v3 }
 0x19b   :  { %v1503_v5 = vmul.f32 %v3083_v35, %v1475_v4 }
 0x19c   :  { %v1378_v8 = vpop.f32.mrf.mxu2 }
 0x19d   :  { %v1523_v41 = vadd.f32 %v3088_v2, %v1503_v5  ;;  %v1379_v9 = vadd.f32 %v1378_v8, %v1330_v56 }
 0x19e   :  { %v1427_v27 = vpop.f32.mrf.mxu3  ;;  %v1332_v6 = vpop.f32.mrf.mxu1 }
 0x19f   :  { %v1539_v58 = vmax.f32 %v1523_v41, 0.0  ;;  %v1428_v13 = vadd.f32 %v1427_v27, %v1379_v9  ;;  %v1333_v14 = vadd.f32 %v1332_v6, %v3051_v12 }
 0x1a0   :  { %v1479_v10 = vpop.f32.mrf.mxu0 }
 0x1a1   :  { %1555 = vst [vmem:[%s3190_s5 + $0x50] sm:$0xff] %v1539_v58  ;;  %v1477_v17 = vadd.f32 %v1476_v52, %v1428_v13 }
 0x1a3   :  { %v1504_v21 = vmul.f32 %v3083_v35, %v1477_v17 }
 0x1a4   :  { %v1381_v15 = vpop.f32.mrf.mxu2 }
 0x1a5   :  { %v1524_v59 = vadd.f32 %v3088_v2, %v1504_v21  ;;  %v1382_v22 = vadd.f32 %v1381_v15, %v1333_v14 }
 0x1a6   :  { %v1430_v23 = vpop.f32.mrf.mxu3  ;;  %v1334_v39 = vpop.f32.mrf.mxu1 }
 0x1a7   :  { %v1540_v24 = vmax.f32 %v1524_v59, 0.0  ;;  %v1431_v25 = vadd.f32 %v1430_v23, %v1382_v22  ;;  %v1335_v11 = vadd.f32 %v1334_v39, %v3072_v37 }
 0x1a8   :  { %v1481_v20 = vpop.f32.mrf.mxu0 }
 0x1a9   :  { %1556 = vst [vmem:[%s3190_s5 + $0x58] sm:$0xff] %v1540_v24  ;;  %v1480_v26 = vadd.f32 %v1479_v10, %v1431_v25 }
 0x1ab   :  { %v1505_v28 = vmul.f32 %v3083_v35, %v1480_v26 }
 0x1ac   :  { %v1383_v30 = vpop.f32.mrf.mxu2 }
 0x1ad   :  { %v1525_v12 = vadd.f32 %v3088_v2, %v1505_v28  ;;  %v1384_v33 = vadd.f32 %v1383_v30, %v1335_v11 }
 0x1ae   :  { %v1432_v29 = vpop.f32.mrf.mxu3  ;;  %v1337_v34 = vpop.f32.mrf.mxu1 }
 0x1af   :  { %v1541_v61 = vmax.f32 %v1525_v12, 0.0  ;;  %v1433_v36 = vadd.f32 %v1432_v29, %v1384_v33  ;;  %v1338_v19 = vadd.f32 %v1337_v34, %v3075_v31 }
 0x1b0   :  { %v1484_v43 = vpop.f32.mrf.mxu0 }
 0x1b1   :  { %1557 = vst [vmem:[%s3190_s5 + $0x60] sm:$0xff] %v1541_v61  ;;  %v1482_v38 = vadd.f32 %v1481_v20, %v1433_v36 }
 0x1b3   :  { %v1506_v54 = vmul.f32 %v3083_v35, %v1482_v38 }
 0x1b4   :  { %v1386_v40 = vpop.f32.mrf.mxu2 }
 0x1b5   :  { %v1526_v37 = vadd.f32 %v3088_v2, %v1506_v54  ;;  %v1387_v16 = vadd.f32 %v1386_v40, %v1338_v19 }
 0x1b6   :  { %v1435_v42 = vpop.f32.mrf.mxu3  ;;  %v1339_v7 = vpop.f32.mrf.mxu1 }
 0x1b7   :  { %v1542_v44 = vmax.f32 %v1526_v37, 0.0  ;;  %v1436_v49 = vadd.f32 %v1435_v42, %v1387_v16  ;;  %v1340_v46 = vadd.f32 %v1339_v7, %v3077_v51 }
 0x1b8   :  { %v1486_v57 = vpop.f32.mrf.mxu0 }
 0x1b9   :  { %1558 = vst [vmem:[%s3190_s5 + $0x68] sm:$0xff] %v1542_v44  ;;  %v1485_v45 = vadd.f32 %v1484_v43, %v1436_v49 }
 0x1bb   :  { %v1507_v18 = vmul.f32 %v3083_v35, %v1485_v45 }
 0x1bc   :  { %v1388_v47 = vpop.f32.mrf.mxu2 }
 0x1bd   :  { %v1527_v31 = vadd.f32 %v3088_v2, %v1507_v18  ;;  %v1389_v48 = vadd.f32 %v1388_v47, %v1340_v46 }
 0x1be   :  { %v1437_v50 = vpop.f32.mrf.mxu3 }
 0x1bf   :  { %v1543_v53 = vmax.f32 %v1527_v31, 0.0  ;;  %v1438_v55 = vadd.f32 %v1437_v50, %v1389_v48 }
 0x1c1   :  { %1559 = vst [vmem:[%s3190_s5 + $0x70] sm:$0xff] %v1543_v53  ;;  %v1487_v60 = vadd.f32 %v1486_v57, %v1438_v55 }
 0x1c3   :  { %v1508_v32 = vmul.f32 %v3083_v35, %v1487_v60 }
 0x1c5   :  { %v1528_v1 = vadd.f32 %v3088_v2, %v1508_v32 }
 0x1c7   :  { %v1544_v62 = vmax.f32 %v1528_v1, 0.0 }
 0x1c9   :  { %1560 = vst [vmem:[%s3190_s5 + $0x78] sm:$0xff] %v1544_v62 }

// kernel: wideresnet_forward.17
= control target key start
LH: loop header
LB: loop body
LE: loop exit
PB: predicated region body
PF: predicated region fallthrough
CT: control target
= control target key end

     0   :  { %s249_s1 = inlined_call_operand.vmem [shape: bf16[128,128], index: 1, kind: input, shape index: {}]   ;;  %s250_s2 = inlined_call_operand.vmem [shape: f32[1,128], index: 2, kind: input, shape index: {}]   ;;  %s251_s0 = inlined_call_operand.vmem [shape: bf16[32,128], index: 0, kind: input, shape index: {}]   ;;  %s252_s3 = inlined_call_operand.vmem [shape: f32[32,128], index: 3, kind: output, shape index: {}]  }
   0x1   :  { %v174_v0 = vld [vmem:[%s249_s1 + $0x38] sm:$0xff]  ;;  %v173_v1 = vld [vmem:[%s249_s1 + $0x30] sm:$0xff]  ;;  %v172_v2 = vld [vmem:[%s249_s1 + $0x28] sm:$0xff] }
   0x2   :  { %98 = vmatpush.bf16.msra.mxu0 %v174_v0  ;;  %175 = vmatpush.bf16.msra.mxu1 %v174_v0  ;;  %v171_v3 = vld [vmem:[%s249_s1 + $0x20] sm:$0xff]  ;;  %v170_v4 = vld [vmem:[%s249_s1 + $0x18] sm:$0xff]  ;;  %v169_v5 = vld [vmem:[%s249_s1 + $0x10] sm:$0xff] }
   0x3   :  { %v168_v6 = vld [vmem:[%s249_s1 + $0x8] sm:$0xff]  ;;  %v167_v7 = vld [vmem:[%s249_s1] sm:$0xff] }
   0x4   :  { %v165_v8 = vld [vmem:[%s251_s0] sm:$0xff]  ;;  %v166_v9 = vld [vmem:[%s251_s0 + $0x8] sm:$0xff] }
   0x5   :  { %v183_v10 = vld [vmem:[%s250_s2] ss:$0 sm:$0xff] }
   0x6   :  { %99 = vmatpush.bf16.msra.mxu0 %v173_v1  ;;  %176 = vmatpush.bf16.msra.mxu1 %v173_v1 }
   0xa   :  { %100 = vmatpush.bf16.msra.mxu0 %v172_v2  ;;  %177 = vmatpush.bf16.msra.mxu1 %v172_v2 }
   0xe   :  { %101 = vmatpush.bf16.msra.mxu0 %v171_v3  ;;  %178 = vmatpush.bf16.msra.mxu1 %v171_v3 }
  0x12   :  { %102 = vmatpush.bf16.msra.mxu0 %v170_v4  ;;  %179 = vmatpush.bf16.msra.mxu1 %v170_v4 }
  0x16   :  { %103 = vmatpush.bf16.msra.mxu0 %v169_v5  ;;  %180 = vmatpush.bf16.msra.mxu1 %v169_v5 }
  0x1a   :  { %104 = vmatpush.bf16.msra.mxu0 %v168_v6  ;;  %181 = vmatpush.bf16.msra.mxu1 %v168_v6 }
  0x1e   :  { %105 = vmatpush.bf16.msra.mxu0 %v167_v7  ;;  %182 = vmatpush.bf16.msra.mxu1 %v167_v7 }
  0x21   :  { %106 = vmatmul.bf16.vlgmr.msra.gmra.mxu0 %v165_v8  ;;  %111 = vmatmul.bf16.vlgmr.msra.gmra.mxu1 %v166_v9 }
  0x9e   :  { %v107_v11 = vpop.f32.mrf.mxu0  ;;  %v112_v12 = vpop.f32.mrf.mxu1 }
  0x9f   :  { %v108_v13 = vadd.f32 %v183_v10, %v107_v11  ;;  %v113_v14 = vadd.f32 %v183_v10, %v112_v12 }
  0xa1   :  { %117 = vst [vmem:[%s252_s3] sm:$0xff] %v108_v13 }
  0xa2   :  { %119 = vst [vmem:[%s252_s3 + $0x10] sm:$0xff] %v113_v14 }
  0xa6   :  { %v109_v15 = vpop.f32.mrf.mxu0  ;;  %v114_v16 = vpop.f32.mrf.mxu1 }
  0xa7   :  { %v110_v17 = vadd.f32 %v183_v10, %v109_v15  ;;  %v115_v18 = vadd.f32 %v183_v10, %v114_v16 }
  0xa9   :  { %118 = vst [vmem:[%s252_s3 + $0x8] sm:$0xff] %v110_v17 }
  0xaa   :  { %120 = vst [vmem:[%s252_s3 + $0x18] sm:$0xff] %v115_v18 }

// kernel: wideresnet_forward.15
= control target key start
LH: loop header
LB: loop body
LE: loop exit
PB: predicated region body
PF: predicated region fallthrough
CT: control target
= control target key end

     0   :  { %s3348_s1 = inlined_call_operand.vmem [shape: bf16[1152,128], index: 1, kind: input, shape index: {}]   ;;  %s3349_s2 = inlined_call_operand.vmem [shape: f32[1,128], index: 2, kind: input, shape index: {}]   ;;  %s3350_s0 = inlined_call_operand.vmem [shape: bf16[128,1152], index: 0, kind: input, shape index: {}]   ;;  %s3351_s4 = inlined_call_operand.vmem [shape: f32[1,128], index: 4, kind: input, shape index: {}]   ;;  %s3352_s5 = inlined_call_operand.vmem [shape: f32[1,128], index: 5, kind: input, shape index: {}]   ;;  %s3353_s3 = inlined_call_operand.vmem [shape: f32[128,128], index: 3, kind: input, shape index: {}]   ;;  %s3354_s6 = inlined_call_operand.vmem [shape: f32[128,128], index: 6, kind: output, shape index: {0}]   ;;  %s3355_s7 = inlined_call_operand.vmem [shape: f32[128,128], index: 7, kind: output, shape index: {1}]  }
   0x1   :  { %v2277_v0 = vld [vmem:[%s3348_s1 + $0x38] sm:$0xff]  ;;  %v2276_v1 = vld [vmem:[%s3348_s1 + $0x30] sm:$0xff]  ;;  %v2275_v2 = vld [vmem:[%s3348_s1 + $0x28] sm:$0xff] }
   0x2   :  { %2342 = vmatpush.bf16.msra.mxu1 %v2277_v0  ;;  %2343 = vmatpush.bf16.msra.mxu2 %v2277_v0  ;;  %v2274_v3 = vld [vmem:[%s3348_s1 + $0x20] sm:$0xff]  ;;  %v2273_v4 = vld [vmem:[%s3348_s1 + $0x18] sm:$0xff]  ;;  %v2272_v5 = vld [vmem:[%s3348_s1 + $0x10] sm:$0xff] }
   0x3   :  { %2344 = vmatpush.bf16.msra.mxu3 %v2277_v0  ;;  %1053 = vmatpush.bf16.msra.mxu0 %v2277_v0  ;;  %v2271_v6 = vld [vmem:[%s3348_s1 + $0x8] sm:$0xff]  ;;  %v2270_v7 = vld [vmem:[%s3348_s1] sm:$0xff]  ;;  %v1696_v8 = vld [vmem:[%s3350_s0 + $0x90] sm:$0xf] }
   0x4   :  { %v2220_v9 = vld [vmem:[%s3350_s0 + $0xb0] sm:$0xf0]  ;;  %v1768_v10 = vld [vmem:[%s3350_s0 + $0x120] sm:$0xf]  ;;  %v2238_v11 = vld [vmem:[%s3350_s0 + $0x140] sm:$0xf0] }
   0x5   :  { %v1840_v12 = vld [vmem:[%s3350_s0 + $0x1b0] sm:$0xf]  ;;  %v2256_v13 = vld [vmem:[%s3350_s0 + $0x1d0] sm:$0xf0]  ;;  %v1624_v14 = vld [vmem:[%s3350_s0] sm:$0xf]  ;;  %v1697_v18 = vor.u32 %v2220_v9, %v1696_v8  ;;  %v1769_v19 = vor.u32 %v2238_v11, %v1768_v10 }
   0x6   :  { %2345 = vmatpush.bf16.msra.mxu1 %v2276_v1  ;;  %2346 = vmatpush.bf16.msra.mxu2 %v2276_v1  ;;  %v2202_v15 = vld [vmem:[%s3350_s0 + $0x20] sm:$0xf0]  ;;  %v2293_v16 = vld [vmem:[%s3348_s1 + $0xb8] sm:$0xff]  ;;  %v1841_v20 = vor.u32 %v2256_v13, %v1840_v12  ;;  %v2292_v24 = vld [vmem:[%s3348_s1 + $0xb0] sm:$0xff] }
   0x7   :  { %2347 = vmatpush.bf16.msra.mxu3 %v2276_v1  ;;  %1054 = vmatpush.bf16.msra.mxu0 %v2276_v1  ;;  %v2285_v17 = vld [vmem:[%s3348_s1 + $0x78] sm:$0xff]  ;;  %v1625_v21 = vor.u32 %v2202_v15, %v1624_v14  ;;  %v2284_v25 = vld [vmem:[%s3348_s1 + $0x70] sm:$0xff]  ;;  %v2291_v28 = vld [vmem:[%s3348_s1 + $0xa8] sm:$0xff] }
   0x8   :  { %v2301_v22 = vld [vmem:[%s3348_s1 + $0xf8] sm:$0xff]  ;;  %v2300_v26 = vld [vmem:[%s3348_s1 + $0xf0] sm:$0xff]  ;;  %v2283_v29 = vld [vmem:[%s3348_s1 + $0x68] sm:$0xff] }
   0x9   :  { %v2309_v23 = vld [vmem:[%s3348_s1 + $0x138] sm:$0xff]  ;;  %v2308_v27 = vld [vmem:[%s3348_s1 + $0x130] sm:$0xff]  ;;  %v2299_v30 = vld [vmem:[%s3348_s1 + $0xe8] sm:$0xff] }
   0xa   :  { %2348 = vmatpush.bf16.msra.mxu1 %v2275_v2  ;;  %2349 = vmatpush.bf16.msra.mxu2 %v2275_v2  ;;  %v2307_v31 = vld [vmem:[%s3348_s1 + $0x128] sm:$0xff]  ;;  %v2290_v32 = vld [vmem:[%s3348_s1 + $0xa0] sm:$0xff]  ;;  %v1732_v36 = vld [vmem:[%s3350_s0 + $0xd8] sm:$0xf] }
   0xb   :  { %2350 = vmatpush.bf16.msra.mxu3 %v2275_v2  ;;  %1055 = vmatpush.bf16.msra.mxu0 %v2275_v2  ;;  %v2282_v33 = vld [vmem:[%s3348_s1 + $0x60] sm:$0xff]  ;;  %v2229_v37 = vld [vmem:[%s3350_s0 + $0xf8] sm:$0xf0]  ;;  %v1804_v38 = vld [vmem:[%s3350_s0 + $0x168] sm:$0xf] }
   0xc   :  { %v2298_v34 = vld [vmem:[%s3348_s1 + $0xe0] sm:$0xff]  ;;  %v2247_v39 = vld [vmem:[%s3350_s0 + $0x188] sm:$0xf0]  ;;  %v1876_v40 = vld [vmem:[%s3350_s0 + $0x1f8] sm:$0xf]  ;;  %v1733_v46 = vor.u32 %v2229_v37, %v1732_v36 }
   0xd   :  { %v2306_v35 = vld [vmem:[%s3348_s1 + $0x120] sm:$0xff]  ;;  %v2265_v41 = vld [vmem:[%s3350_s0 + $0x218] sm:$0xf0]  ;;  %v1660_v42 = vld [vmem:[%s3350_s0 + $0x48] sm:$0xf]  ;;  %v1805_v47 = vor.u32 %v2247_v39, %v1804_v38 }
   0xe   :  { %2351 = vmatpush.bf16.msra.mxu1 %v2274_v3  ;;  %2352 = vmatpush.bf16.msra.mxu2 %v2274_v3  ;;  %v2211_v43 = vld [vmem:[%s3350_s0 + $0x68] sm:$0xf0]  ;;  %v2289_v44 = vld [vmem:[%s3348_s1 + $0x98] sm:$0xff]  ;;  %v1877_v48 = vor.u32 %v2265_v41, %v1876_v40  ;;  %v2288_v52 = vld [vmem:[%s3348_s1 + $0x90] sm:$0xff] }
   0xf   :  { %2353 = vmatpush.bf16.msra.mxu3 %v2274_v3  ;;  %1056 = vmatpush.bf16.msra.mxu0 %v2274_v3  ;;  %v2281_v45 = vld [vmem:[%s3348_s1 + $0x58] sm:$0xff]  ;;  %v1661_v49 = vor.u32 %v2211_v43, %v1660_v42  ;;  %v2280_v53 = vld [vmem:[%s3348_s1 + $0x50] sm:$0xff]  ;;  %v2287_v56 = vld [vmem:[%s3348_s1 + $0x88] sm:$0xff] }
  0x10   :  { %v2297_v50 = vld [vmem:[%s3348_s1 + $0xd8] sm:$0xff]  ;;  %v2296_v54 = vld [vmem:[%s3348_s1 + $0xd0] sm:$0xff]  ;;  %v2279_v57 = vld [vmem:[%s3348_s1 + $0x48] sm:$0xff] }
  0x11   :  { %v2305_v51 = vld [vmem:[%s3348_s1 + $0x118] sm:$0xff]  ;;  %v2304_v55 = vld [vmem:[%s3348_s1 + $0x110] sm:$0xff]  ;;  %v2295_v58 = vld [vmem:[%s3348_s1 + $0xc8] sm:$0xff] }
  0x12   :  { %2354 = vmatpush.bf16.msra.mxu1 %v2273_v4  ;;  %2355 = vmatpush.bf16.msra.mxu2 %v2273_v4  ;;  %v2303_v59 = vld [vmem:[%s3348_s1 + $0x108] sm:$0xff]  ;;  %v2286_v60 = vld [vmem:[%s3348_s1 + $0x80] sm:$0xff]  ;;  %v2325_v2 = vld [vmem:[%s3348_s1 + $0x1b8] sm:$0xff] }
  0x13   :  { %2356 = vmatpush.bf16.msra.mxu3 %v2273_v4  ;;  %1057 = vmatpush.bf16.msra.mxu0 %v2273_v4  ;;  %v2278_v61 = vld [vmem:[%s3348_s1 + $0x40] sm:$0xff]  ;;  %v1626_v1 = vld [vmem:[%s3350_s0 + $0x24] sm:$0xf0]  ;;  %v2317_v3 = vld [vmem:[%s3348_s1 + $0x178] sm:$0xff] }
  0x14   :  { %v2198_v62 = vld [vmem:[%s3350_s0 + $0x4] sm:$0xf]  ;;  %v1632_v4 = vld [vmem:[%s3350_s0 + $0x8] sm:$0xf]  ;;  %v1640_v8 = vld [vmem:[%s3350_s0 + $0x10] sm:$0xf] }
  0x15   :  { %v2294_v63 = vld [vmem:[%s3348_s1 + $0xc0] sm:$0xff]  ;;  %v2204_v9 = vld [vmem:[%s3350_s0 + $0x30] sm:$0xf0]  ;;  %v2333_v10 = vld [vmem:[%s3348_s1 + $0x1f8] sm:$0xff]  ;;  %v1629_v12 = vor.u32 %v2198_v62, %v1626_v1 }
  0x16   :  { %2357 = vmatpush.bf16.msra.mxu1 %v2272_v5  ;;  %2358 = vmatpush.bf16.msra.mxu2 %v2272_v5  ;;  %v2302_v0 = vld [vmem:[%s3348_s1 + $0x100] sm:$0xff]  ;;  %v2341_v11 = vld [vmem:[%s3348_s1 + $0x238] sm:$0xff]  ;;  %v1641_v15 = vor.u32 %v2204_v9, %v1640_v8  ;;  %v2216_v40 = vld [vmem:[%s3350_s0 + $0x94] sm:$0xf] }
  0x17   :  { %2359 = vmatpush.bf16.msra.mxu3 %v2272_v5  ;;  %1058 = vmatpush.bf16.msra.mxu0 %v2272_v5  ;;  %v2203_v5 = vld [vmem:[%s3350_s0 + $0x28] sm:$0xf0]  ;;  %v2322_v36 = vld [vmem:[%s3348_s1 + $0x1a0] sm:$0xff]  ;;  %v1698_v41 = vld [vmem:[%s3350_s0 + $0xb4] sm:$0xf0] }
  0x18   :  { %v1633_v13 = vor.u32 %v2203_v5, %v1632_v4  ;;  %v2330_v37 = vld [vmem:[%s3348_s1 + $0x1e0] sm:$0xff]  ;;  %v1704_v42 = vld [vmem:[%s3350_s0 + $0x98] sm:$0xf]  ;;  %v2221_v43 = vld [vmem:[%s3350_s0 + $0xb8] sm:$0xf0] }
  0x19   :  { %v2314_v38 = vld [vmem:[%s3348_s1 + $0x160] sm:$0xff]  ;;  %v1748_v62 = vld [vmem:[%s3350_s0 + $0xe8] sm:$0xf]  ;;  %v2320_v4 = vld [vmem:[%s3348_s1 + $0x190] sm:$0xff] }
  0x1a   :  { %2360 = vmatpush.bf16.msra.mxu1 %v2271_v6  ;;  %2361 = vmatpush.bf16.msra.mxu2 %v2271_v6  ;;  %v2338_v39 = vld [vmem:[%s3348_s1 + $0x220] sm:$0xff]  ;;  %v2328_v5 = vld [vmem:[%s3348_s1 + $0x1d0] sm:$0xff]  ;;  %v1770_v9 = vld [vmem:[%s3350_s0 + $0x144] sm:$0xf0] }
  0x1b   :  { %2362 = vmatpush.bf16.msra.mxu3 %v2271_v6  ;;  %1059 = vmatpush.bf16.msra.mxu0 %v2271_v6  ;;  %v2199_v6 = vld [vmem:[%s3350_s0 + $0xc] sm:$0xf]  ;;  %v2234_v8 = vld [vmem:[%s3350_s0 + $0x124] sm:$0xf] }
  0x1e   :  { %2363 = vmatpush.bf16.msra.mxu1 %v2270_v7  ;;  %2364 = vmatpush.bf16.msra.mxu2 %v2270_v7 }
  0x1f   :  { %2365 = vmatpush.bf16.msra.mxu3 %v2270_v7  ;;  %1060 = vmatpush.bf16.msra.mxu0 %v2270_v7  ;;  %v1634_v7 = vld [vmem:[%s3350_s0 + $0x2c] sm:$0xf0] }
  0x20   :  { %v1637_v14 = vor.u32 %v2199_v6, %v1634_v7  ;;  %v2312_v6 = vld [vmem:[%s3348_s1 + $0x150] sm:$0xff] }
  0x21   :  { %1071 = vmatmul.bf16.vlgmr.msra.gmra.mxu1 %v1697_v18  ;;  %1081 = vmatmul.bf16.vlgmr.msra.gmra.mxu2 %v1769_v19  ;;  %v2332_v18 = vld [vmem:[%s3348_s1 + $0x1f0] sm:$0xff] }
  0x22   :  { %1151 = vmatpush.bf16.msrb.mxu2 %v2293_v16  ;;  %1102 = vmatpush.bf16.msrb.mxu1 %v2285_v17  ;;  %v2324_v16 = vld [vmem:[%s3348_s1 + $0x1b0] sm:$0xff] }
  0x23   :  { %1091 = vmatmul.bf16.vlgmr.msra.gmra.mxu3 %v1841_v20  ;;  %1061 = vmatmul.bf16.vlgmr.msra.gmra.mxu0 %v1625_v21  ;;  %v2316_v17 = vld [vmem:[%s3348_s1 + $0x170] sm:$0xff]  ;;  %v2323_v20 = vld [vmem:[%s3348_s1 + $0x1a8] sm:$0xff] }
  0x24   :  { %1200 = vmatpush.bf16.msrb.mxu3 %v2301_v22  ;;  %1249 = vmatpush.bf16.msrb.mxu0 %v2309_v23  ;;  %v2340_v19 = vld [vmem:[%s3348_s1 + $0x230] sm:$0xff]  ;;  %v2315_v21 = vld [vmem:[%s3348_s1 + $0x168] sm:$0xff] }
  0x25   :  { %v2331_v22 = vld [vmem:[%s3348_s1 + $0x1e8] sm:$0xff]  ;;  %v2336_v7 = vld [vmem:[%s3348_s1 + $0x210] sm:$0xff] }
  0x26   :  { %1152 = vmatpush.bf16.msrb.mxu2 %v2292_v24  ;;  %1103 = vmatpush.bf16.msrb.mxu1 %v2284_v25  ;;  %v2339_v23 = vld [vmem:[%s3348_s1 + $0x228] sm:$0xff]  ;;  %v1662_v25 = vld [vmem:[%s3350_s0 + $0x6c] sm:$0xf0] }
  0x27   :  { %v2207_v24 = vld [vmem:[%s3350_s0 + $0x4c] sm:$0xf] }
  0x28   :  { %1201 = vmatpush.bf16.msrb.mxu3 %v2300_v26  ;;  %1250 = vmatpush.bf16.msrb.mxu0 %v2308_v27  ;;  %v1668_v26 = vld [vmem:[%s3350_s0 + $0x50] sm:$0xf]  ;;  %v2212_v27 = vld [vmem:[%s3350_s0 + $0x70] sm:$0xf0] }
  0x2a   :  { %1153 = vmatpush.bf16.msrb.mxu2 %v2291_v28  ;;  %1104 = vmatpush.bf16.msrb.mxu1 %v2283_v29  ;;  %v2208_v28 = vld [vmem:[%s3350_s0 + $0x54] sm:$0xf]  ;;  %v1670_v29 = vld [vmem:[%s3350_s0 + $0x74] sm:$0xf0] }
  0x2c   :  { %1202 = vmatpush.bf16.msrb.mxu3 %v2299_v30  ;;  %1251 = vmatpush.bf16.msrb.mxu0 %v2307_v31  ;;  %v1676_v30 = vld [vmem:[%s3350_s0 + $0x58] sm:$0xf]  ;;  %v2213_v31 = vld [vmem:[%s3350_s0 + $0x78] sm:$0xf0] }
  0x2e   :  { %1154 = vmatpush.bf16.msrb.mxu2 %v2290_v32  ;;  %1105 = vmatpush.bf16.msrb.mxu1 %v2282_v33  ;;  %v1665_v32 = vor.u32 %v2207_v24, %v1662_v25  ;;  %v1669_v33 = vor.u32 %v2212_v27, %v1668_v26  ;;  %v2243_v24 = vld [vmem:[%s3350_s0 + $0x16c] sm:$0xf]  ;;  %v1806_v25 = vld [vmem:[%s3350_s0 + $0x18c] sm:$0xf0]  ;;  %v2248_v27 = vld [vmem:[%s3350_s0 + $0x190] sm:$0xf0] }
  0x2f   :  { %v1812_v26 = vld [vmem:[%s3350_s0 + $0x170] sm:$0xf] }
  0x30   :  { %1203 = vmatpush.bf16.msrb.mxu3 %v2298_v34  ;;  %1252 = vmatpush.bf16.msrb.mxu0 %v2306_v35  ;;  %v1673_v34 = vor.u32 %v2208_v28, %v1670_v29  ;;  %v1677_v35 = vor.u32 %v2213_v31, %v1676_v30  ;;  %v2244_v28 = vld [vmem:[%s3350_s0 + $0x174] sm:$0xf]  ;;  %v1814_v29 = vld [vmem:[%s3350_s0 + $0x194] sm:$0xf0]  ;;  %v2249_v31 = vld [vmem:[%s3350_s0 + $0x198] sm:$0xf0] }
  0x31   :  { %1076 = vmatmul.bf16.gmra.mxu1 %v1733_v46  ;;  %1086 = vmatmul.bf16.gmra.mxu2 %v1805_v47  ;;  %v1712_v46 = vld [vmem:[%s3350_s0 + $0xa0] sm:$0xf]  ;;  %v2222_v47 = vld [vmem:[%s3350_s0 + $0xc0] sm:$0xf0]  ;;  %v1820_v30 = vld [vmem:[%s3350_s0 + $0x178] sm:$0xf] }
  0x32   :  { %1155 = vmatpush.bf16.msrb.mxu2 %v2289_v44  ;;  %1106 = vmatpush.bf16.msrb.mxu1 %v2281_v45  ;;  %v2217_v44 = vld [vmem:[%s3350_s0 + $0x9c] sm:$0xf]  ;;  %v1706_v45 = vld [vmem:[%s3350_s0 + $0xbc] sm:$0xf0] }
  0x33   :  { %1096 = vmatmul.bf16.gmra.mxu3 %v1877_v48  ;;  %1066 = vmatmul.bf16.gmra.mxu0 %v1661_v49  ;;  %v1701_v48 = vor.u32 %v2216_v40, %v1698_v41  ;;  %v1705_v49 = vor.u32 %v2221_v43, %v1704_v42  ;;  %v2252_v40 = vld [vmem:[%s3350_s0 + $0x1b4] sm:$0xf]  ;;  %v1842_v41 = vld [vmem:[%s3350_s0 + $0x1d4] sm:$0xf0]  ;;  %v2257_v43 = vld [vmem:[%s3350_s0 + $0x1d8] sm:$0xf0] }
  0x34   :  { %1204 = vmatpush.bf16.msrb.mxu3 %v2297_v50  ;;  %1253 = vmatpush.bf16.msrb.mxu0 %v2305_v51  ;;  %v1709_v50 = vor.u32 %v2217_v44, %v1706_v45  ;;  %v1713_v51 = vor.u32 %v2222_v47, %v1712_v46  ;;  %v1848_v42 = vld [vmem:[%s3350_s0 + $0x1b8] sm:$0xf]  ;;  %v2253_v44 = vld [vmem:[%s3350_s0 + $0x1bc] sm:$0xf]  ;;  %v1850_v45 = vld [vmem:[%s3350_s0 + $0x1dc] sm:$0xf0] }
  0x35   :  { %v1856_v46 = vld [vmem:[%s3350_s0 + $0x1c0] sm:$0xf]  ;;  %v2258_v47 = vld [vmem:[%s3350_s0 + $0x1e0] sm:$0xf0] }
  0x36   :  { %1156 = vmatpush.bf16.msrb.mxu2 %v2288_v52  ;;  %1107 = vmatpush.bf16.msrb.mxu1 %v2280_v53  ;;  %v2321_v52 = vld [vmem:[%s3348_s1 + $0x198] sm:$0xff] }
  0x37   :  { %v2329_v53 = vld [vmem:[%s3348_s1 + $0x1d8] sm:$0xff] }
  0x38   :  { %1205 = vmatpush.bf16.msrb.mxu3 %v2296_v54  ;;  %1254 = vmatpush.bf16.msrb.mxu0 %v2304_v55  ;;  %v2313_v54 = vld [vmem:[%s3348_s1 + $0x158] sm:$0xff] }
  0x39   :  { %v2337_v55 = vld [vmem:[%s3348_s1 + $0x218] sm:$0xff] }
  0x3a   :  { %1157 = vmatpush.bf16.msrb.mxu2 %v2287_v56  ;;  %1108 = vmatpush.bf16.msrb.mxu1 %v2279_v57  ;;  %v2225_v56 = vld [vmem:[%s3350_s0 + $0xdc] sm:$0xf]  ;;  %v1734_v57 = vld [vmem:[%s3350_s0 + $0xfc] sm:$0xf0] }
  0x3c   :  { %1206 = vmatpush.bf16.msrb.mxu3 %v2295_v58  ;;  %1255 = vmatpush.bf16.msrb.mxu0 %v2303_v59  ;;  %v1740_v58 = vld [vmem:[%s3350_s0 + $0xe0] sm:$0xf]  ;;  %v2230_v59 = vld [vmem:[%s3350_s0 + $0x100] sm:$0xf0] }
  0x3d   :  { %v1741_v1 = vor.u32 %v2230_v59, %v1740_v58 }
  0x3e   :  { %1158 = vmatpush.bf16.msrb.mxu2 %v2286_v60  ;;  %1109 = vmatpush.bf16.msrb.mxu1 %v2278_v61  ;;  %v2226_v60 = vld [vmem:[%s3350_s0 + $0xe4] sm:$0xf]  ;;  %v1742_v61 = vld [vmem:[%s3350_s0 + $0x104] sm:$0xf0] }
  0x40   :  { %1207 = vmatpush.bf16.msrb.mxu3 %v2294_v63  ;;  %1256 = vmatpush.bf16.msrb.mxu0 %v2302_v0  ;;  %v2231_v63 = vld [vmem:[%s3350_s0 + $0x108] sm:$0xf0]  ;;  %v1737_v0 = vor.u32 %v2225_v56, %v1734_v57 }
  0x41   :  { %1110 = vmatmul.bf16.vlgmr.msrb.gmra.mxu1 %v1629_v12  ;;  %1159 = vmatmul.bf16.vlgmr.msrb.gmra.mxu2 %v1633_v13  ;;  %v2235_v12 = vld [vmem:[%s3350_s0 + $0x12c] sm:$0xf]  ;;  %v1778_v13 = vld [vmem:[%s3350_s0 + $0x14c] sm:$0xf0] }
  0x42   :  { %1347 = vmatpush.bf16.msra.mxu2 %v2325_v2  ;;  %1298 = vmatpush.bf16.msra.mxu1 %v2317_v3  ;;  %v1745_v2 = vor.u32 %v2226_v60, %v1742_v61  ;;  %v1749_v3 = vor.u32 %v2231_v63, %v1748_v62  ;;  %v2261_v61 = vld [vmem:[%s3350_s0 + $0x1fc] sm:$0xf]  ;;  %v1878_v62 = vld [vmem:[%s3350_s0 + $0x21c] sm:$0xf0] }
  0x43   :  { %1208 = vmatmul.bf16.vlgmr.msrb.gmra.mxu3 %v1637_v14  ;;  %1257 = vmatmul.bf16.vlgmr.msrb.gmra.mxu0 %v1641_v15  ;;  %v1784_v14 = vld [vmem:[%s3350_s0 + $0x130] sm:$0xf]  ;;  %v2240_v15 = vld [vmem:[%s3350_s0 + $0x150] sm:$0xf0]  ;;  %v1884_v63 = vld [vmem:[%s3350_s0 + $0x200] sm:$0xf] }
  0x44   :  { %1396 = vmatpush.bf16.msra.mxu3 %v2333_v10  ;;  %1445 = vmatpush.bf16.msra.mxu0 %v2341_v11  ;;  %v1776_v10 = vld [vmem:[%s3350_s0 + $0x128] sm:$0xf]  ;;  %v2239_v11 = vld [vmem:[%s3350_s0 + $0x148] sm:$0xf0] }
  0x46   :  { %1348 = vmatpush.bf16.msra.mxu2 %v2324_v16  ;;  %1299 = vmatpush.bf16.msra.mxu1 %v2316_v17  ;;  %v1773_v16 = vor.u32 %v2234_v8, %v1770_v9  ;;  %v1777_v17 = vor.u32 %v2239_v11, %v1776_v10  ;;  %v1881_v8 = vor.u32 %v2261_v61, %v1878_v62  ;;  %v1692_v61 = vld [vmem:[%s3350_s0 + $0x68] sm:$0xf]  ;;  %v2215_v62 = vld [vmem:[%s3350_s0 + $0x88] sm:$0xf0] }
  0x48   :  { %1397 = vmatpush.bf16.msra.mxu3 %v2332_v18  ;;  %1446 = vmatpush.bf16.msra.mxu0 %v2340_v19  ;;  %v1781_v18 = vor.u32 %v2235_v12, %v1778_v13  ;;  %v1785_v19 = vor.u32 %v2240_v15, %v1784_v14 }
  0x4a   :  { %1349 = vmatpush.bf16.msra.mxu2 %v2323_v20  ;;  %1300 = vmatpush.bf16.msra.mxu1 %v2315_v21  ;;  %v2319_v20 = vld [vmem:[%s3348_s1 + $0x188] sm:$0xff] }
  0x4b   :  { %v2327_v21 = vld [vmem:[%s3348_s1 + $0x1c8] sm:$0xff] }
  0x4c   :  { %1398 = vmatpush.bf16.msra.mxu3 %v2331_v22  ;;  %1447 = vmatpush.bf16.msra.mxu0 %v2339_v23  ;;  %v2311_v22 = vld [vmem:[%s3348_s1 + $0x148] sm:$0xff] }
  0x4d   :  { %v2335_v23 = vld [vmem:[%s3348_s1 + $0x208] sm:$0xff] }
  0x4e   :  { %1350 = vmatpush.bf16.msra.mxu2 %v2322_v36  ;;  %1301 = vmatpush.bf16.msra.mxu1 %v2314_v38  ;;  %v2318_v36 = vld [vmem:[%s3348_s1 + $0x180] sm:$0xff] }
  0x4f   :  { %v2310_v38 = vld [vmem:[%s3348_s1 + $0x140] sm:$0xff] }
  0x50   :  { %1399 = vmatpush.bf16.msra.mxu3 %v2330_v37  ;;  %1448 = vmatpush.bf16.msra.mxu0 %v2338_v39  ;;  %v2326_v37 = vld [vmem:[%s3348_s1 + $0x1c0] sm:$0xff] }
  0x51   :  { %1115 = vmatmul.bf16.gmra.mxu1 %v1665_v32  ;;  %1164 = vmatmul.bf16.gmra.mxu2 %v1669_v33  ;;  %v1809_v32 = vor.u32 %v2243_v24, %v1806_v25  ;;  %v1813_v33 = vor.u32 %v2248_v27, %v1812_v26  ;;  %v2334_v39 = vld [vmem:[%s3348_s1 + $0x200] sm:$0xff]  ;;  %v2205_v24 = vld [vmem:[%s3350_s0 + $0x38] sm:$0xf0] }
  0x52   :  { %1351 = vmatpush.bf16.msra.mxu2 %v2321_v52  ;;  %1302 = vmatpush.bf16.msra.mxu1 %v2313_v54  ;;  %v1857_v52 = vor.u32 %v2258_v47, %v1856_v46  ;;  %v2846_v54 = vld [vmem:[%s3349_s2] ss:$0 sm:$0xff]  ;;  %v2201_v25 = vld [vmem:[%s3350_s0 + $0x1c] sm:$0xf] }
  0x53   :  { %1213 = vmatmul.bf16.gmra.mxu3 %v1673_v34  ;;  %1262 = vmatmul.bf16.gmra.mxu0 %v1677_v35  ;;  %v1817_v34 = vor.u32 %v2244_v28, %v1814_v29  ;;  %v1821_v35 = vor.u32 %v2249_v31, %v1820_v30  ;;  %v1650_v26 = vld [vmem:[%s3350_s0 + $0x3c] sm:$0xf0]  ;;  %v2206_v28 = vld [vmem:[%s3350_s0 + $0x40] sm:$0xf0] }
  0x54   :  { %1400 = vmatpush.bf16.msra.mxu3 %v2329_v53  ;;  %1449 = vmatpush.bf16.msra.mxu0 %v2337_v55  ;;  %v1656_v27 = vld [vmem:[%s3350_s0 + $0x20] sm:$0xf] }
  0x56   :  { %1352 = vmatpush.bf16.msra.mxu2 %v2320_v4  ;;  %1303 = vmatpush.bf16.msra.mxu1 %v2312_v6  ;;  %v2267_v4 = vld [vmem:[%s3350_s0 + $0x228] sm:$0xf0] }
  0x58   :  { %1401 = vmatpush.bf16.msra.mxu3 %v2328_v5  ;;  %1450 = vmatpush.bf16.msra.mxu0 %v2336_v7 }
  0x5a   :  { %1353 = vmatpush.bf16.msra.mxu2 %v2319_v20  ;;  %1304 = vmatpush.bf16.msra.mxu1 %v2311_v22  ;;  %v1642_v22 = vld [vmem:[%s3350_s0 + $0x34] sm:$0xf0] }
  0x5c   :  { %1402 = vmatpush.bf16.msra.mxu3 %v2327_v21  ;;  %1451 = vmatpush.bf16.msra.mxu0 %v2335_v23  ;;  %v2200_v21 = vld [vmem:[%s3350_s0 + $0x14] sm:$0xf]  ;;  %v1648_v23 = vld [vmem:[%s3350_s0 + $0x18] sm:$0xf] }
  0x5e   :  { %1354 = vmatpush.bf16.msra.mxu2 %v2318_v36  ;;  %1305 = vmatpush.bf16.msra.mxu1 %v2310_v38  ;;  %v1657_v38 = vor.u32 %v2206_v28, %v1656_v27  ;;  %v2218_v27 = vld [vmem:[%s3350_s0 + $0xa4] sm:$0xf]  ;;  %v1714_v28 = vld [vmem:[%s3350_s0 + $0xc4] sm:$0xf0] }
  0x60   :  { %1403 = vmatpush.bf16.msra.mxu3 %v2326_v37  ;;  %1452 = vmatpush.bf16.msra.mxu0 %v2334_v39  ;;  %v1653_v37 = vor.u32 %v2201_v25, %v1650_v26 }
  0x61   :  { %1120 = vmatmul.bf16.gmra.mxu1 %v1701_v48  ;;  %1169 = vmatmul.bf16.gmra.mxu2 %v1705_v49  ;;  %v1845_v48 = vor.u32 %v2252_v40, %v1842_v41  ;;  %v1849_v49 = vor.u32 %v2257_v43, %v1848_v42 }
  0x63   :  { %1218 = vmatmul.bf16.gmra.mxu3 %v1709_v50  ;;  %1267 = vmatmul.bf16.gmra.mxu0 %v1713_v51  ;;  %v1853_v51 = vor.u32 %v2253_v44, %v1850_v45 }
  0x71   :  { %1125 = vmatmul.bf16.gmra.mxu1 %v1737_v0  ;;  %1174 = vmatmul.bf16.gmra.mxu2 %v1741_v1  ;;  %v2266_v0 = vld [vmem:[%s3350_s0 + $0x220] sm:$0xf0] }
  0x72   :  { %v2262_v1 = vld [vmem:[%s3350_s0 + $0x204] sm:$0xf]  ;;  %v1885_v9 = vor.u32 %v2266_v0, %v1884_v63 }
  0x73   :  { %1223 = vmatmul.bf16.gmra.mxu3 %v1745_v2  ;;  %1272 = vmatmul.bf16.gmra.mxu0 %v1749_v3  ;;  %v1886_v2 = vld [vmem:[%s3350_s0 + $0x224] sm:$0xf0] }
  0x74   :  { %v1892_v3 = vld [vmem:[%s3350_s0 + $0x208] sm:$0xf]  ;;  %v1889_v12 = vor.u32 %v2262_v1, %v1886_v2 }
  0x75   :  { %v1893_v13 = vor.u32 %v2267_v4, %v1892_v3 }
  0x81   :  { %1130 = vmatmul.bf16.gmra.mxu1 %v1773_v16  ;;  %1179 = vmatmul.bf16.gmra.mxu2 %v1777_v17 }
  0x83   :  { %1228 = vmatmul.bf16.gmra.mxu3 %v1781_v18  ;;  %1277 = vmatmul.bf16.gmra.mxu0 %v1785_v19 }
  0x91   :  { %1135 = vmatmul.bf16.gmra.mxu1 %v1809_v32  ;;  %1184 = vmatmul.bf16.gmra.mxu2 %v1813_v33  ;;  %v1645_v33 = vor.u32 %v2200_v21, %v1642_v22 }
  0x93   :  { %1233 = vmatmul.bf16.gmra.mxu3 %v1817_v34  ;;  %1282 = vmatmul.bf16.gmra.mxu0 %v1821_v35  ;;  %v1649_v34 = vor.u32 %v2205_v24, %v1648_v23 }
  0x9e   :  { %v2841_v50 = vpop.f32.mrf.mxu1 }
  0xa0   :  { %v1062_v53 = vpop.f32.mrf.mxu0 }
  0xa1   :  { %1140 = vmatmul.bf16.gmra.mxu1 %v1845_v48  ;;  %1189 = vmatmul.bf16.gmra.mxu2 %v1849_v49  ;;  %v1063_v30 = vadd.f32 %v2846_v54, %v1062_v53  ;;  %v2209_v49 = vld [vmem:[%s3350_s0 + $0x5c] sm:$0xf]  ;;  %v1684_v53 = vld [vmem:[%s3350_s0 + $0x60] sm:$0xf] }
  0xa3   :  { %1238 = vmatmul.bf16.gmra.mxu3 %v1853_v51  ;;  %1287 = vmatmul.bf16.gmra.mxu0 %v1857_v52  ;;  %v1678_v51 = vld [vmem:[%s3350_s0 + $0x7c] sm:$0xf0] }
  0xa4   :  { %v1082_v55 = vpop.f32.mrf.mxu2  ;;  %v1681_v3 = vor.u32 %v2209_v49, %v1678_v51 }
  0xa5   :  { %v2849_v56 = vadd.f32 %v2846_v54, %v1082_v55  ;;  %v2214_v55 = vld [vmem:[%s3350_s0 + $0x80] sm:$0xf0] }
  0xa6   :  { %v1092_v57 = vpop.f32.mrf.mxu3  ;;  %v2854_v59 = vpop.f32.mrf.mxu1  ;;  %v1685_v4 = vor.u32 %v2214_v55, %v1684_v53 }
  0xa7   :  { %v2852_v58 = vadd.f32 %v2846_v54, %v1092_v57  ;;  %v2210_v57 = vld [vmem:[%s3350_s0 + $0x64] sm:$0xf] }
  0xa8   :  { %v1064_v60 = vpop.f32.mrf.mxu0 }
  0xa9   :  { %v1065_v42 = vadd.f32 %v2846_v54, %v1064_v60  ;;  %v1686_v60 = vld [vmem:[%s3350_s0 + $0x84] sm:$0xf0] }
  0xac   :  { %v1084_v5 = vpop.f32.mrf.mxu2 }
  0xad   :  { %v2881_v6 = vadd.f32 %v2846_v54, %v1084_v5 }
  0xae   :  { %v1094_v7 = vpop.f32.mrf.mxu3  ;;  %v2886_v11 = vpop.f32.mrf.mxu1 }
  0xaf   :  { %v2884_v10 = vadd.f32 %v2846_v54, %v1094_v7  ;;  %v1689_v7 = vor.u32 %v2210_v57, %v1686_v60 }
  0xb0   :  { %v1067_v14 = vpop.f32.mrf.mxu0 }
  0xb1   :  { %1145 = vmatmul.bf16.gmra.mxu1 %v1881_v8  ;;  %1194 = vmatmul.bf16.gmra.mxu2 %v1885_v9  ;;  %v1068_v0 = vadd.f32 %v2846_v54, %v1067_v14  ;;  %v1693_v8 = vor.u32 %v2215_v62, %v1692_v61 }
  0xb3   :  { %1243 = vmatmul.bf16.gmra.mxu3 %v1889_v12  ;;  %1292 = vmatmul.bf16.gmra.mxu0 %v1893_v13 }
  0xb4   :  { %v1087_v15 = vpop.f32.mrf.mxu2 }
  0xb5   :  { %v2889_v16 = vadd.f32 %v2846_v54, %v1087_v15 }
  0xb6   :  { %v1097_v17 = vpop.f32.mrf.mxu3  ;;  %v2894_v19 = vpop.f32.mrf.mxu1 }
  0xb7   :  { %v2892_v18 = vadd.f32 %v2846_v54, %v1097_v17 }
  0xb8   :  { %v1069_v20 = vpop.f32.mrf.mxu0 }
  0xb9   :  { %v1070_v21 = vadd.f32 %v2846_v54, %v1069_v20  ;;  %v1720_v20 = vld [vmem:[%s3350_s0 + $0xa8] sm:$0xf] }
  0xbc   :  { %v1089_v29 = vpop.f32.mrf.mxu2 }
  0xbd   :  { %v2922_v31 = vadd.f32 %v2846_v54, %v1089_v29 }
  0xbe   :  { %v1099_v32 = vpop.f32.mrf.mxu3  ;;  %v1111_v36 = vpop.f32.mrf.mxu1 }
  0xbf   :  { %v2925_v35 = vadd.f32 %v2846_v54, %v1099_v32  ;;  %v1112_v39 = vadd.f32 %v1111_v36, %v1063_v30  ;;  %v2223_v30 = vld [vmem:[%s3350_s0 + $0xc8] sm:$0xf0]  ;;  %v2224_v36 = vld [vmem:[%s3350_s0 + $0xd0] sm:$0xf0] }
  0xc0   :  { %v1258_v40 = vpop.f32.mrf.mxu0  ;;  %v2219_v32 = vld [vmem:[%s3350_s0 + $0xac] sm:$0xf] }
  0xc1   :  { %1306 = vmatmul.bf16.vlgmr.msra.gmra.mxu1 %v1645_v33  ;;  %1355 = vmatmul.bf16.vlgmr.msra.gmra.mxu2 %v1649_v34  ;;  %v1722_v33 = vld [vmem:[%s3350_s0 + $0xcc] sm:$0xf0] }
  0xc2   :  { %v1728_v34 = vld [vmem:[%s3350_s0 + $0xb0] sm:$0xf] }
  0xc3   :  { %1404 = vmatmul.bf16.vlgmr.msra.gmra.mxu3 %v1653_v37  ;;  %1453 = vmatmul.bf16.vlgmr.msra.gmra.mxu0 %v1657_v38  ;;  %v1073_v38 = vadd.f32 %v2846_v54, %v2841_v50  ;;  %v1075_v50 = vadd.f32 %v2846_v54, %v2854_v59  ;;  %v1756_v59 = vld [vmem:[%s3350_s0 + $0xf0] sm:$0xf] }
  0xc4   :  { %v1160_v41 = vpop.f32.mrf.mxu2 }
  0xc5   :  { %v1161_v43 = vadd.f32 %v1160_v41, %v1112_v39  ;;  %v1717_v41 = vor.u32 %v2218_v27, %v1714_v28 }
  0xc6   :  { %v1209_v44 = vpop.f32.mrf.mxu3  ;;  %v1113_v45 = vpop.f32.mrf.mxu1 }
  0xc7   :  { %v1210_v46 = vadd.f32 %v1209_v44, %v1161_v43  ;;  %v1114_v47 = vadd.f32 %v1113_v45, %v1065_v42  ;;  %v1721_v42 = vor.u32 %v2223_v30, %v1720_v20  ;;  %v1725_v44 = vor.u32 %v2219_v32, %v1722_v33 }
  0xc8   :  { %v1260_v48 = vpop.f32.mrf.mxu0  ;;  %v1729_v45 = vor.u32 %v2224_v36, %v1728_v34 }
  0xc9   :  { %v2934_v52 = vadd.f32 %v1258_v40, %v1210_v46 }
  0xcc   :  { %v1162_v63 = vpop.f32.mrf.mxu2 }
  0xcd   :  { %v1163_v1 = vadd.f32 %v1162_v63, %v1114_v47  ;;  %v2227_v63 = vld [vmem:[%s3350_s0 + $0xec] sm:$0xf] }
  0xce   :  { %v1211_v2 = vpop.f32.mrf.mxu3  ;;  %v1116_v5 = vpop.f32.mrf.mxu1 }
  0xcf   :  { %v1212_v9 = vadd.f32 %v1211_v2, %v1163_v1  ;;  %v1117_v12 = vadd.f32 %v1116_v5, %v1068_v0  ;;  %v1750_v0 = vld [vmem:[%s3350_s0 + $0x10c] sm:$0xf0]  ;;  %v2232_v2 = vld [vmem:[%s3350_s0 + $0x110] sm:$0xf0]  ;;  %v1764_v5 = vld [vmem:[%s3350_s0 + $0xf8] sm:$0xf] }
  0xd0   :  { %v1263_v13 = vpop.f32.mrf.mxu0 }
  0xd1   :  { %1311 = vmatmul.bf16.gmra.mxu1 %v1681_v3  ;;  %1360 = vmatmul.bf16.gmra.mxu2 %v1685_v4  ;;  %v2955_v15 = vadd.f32 %v1260_v48, %v1212_v9  ;;  %v2228_v3 = vld [vmem:[%s3350_s0 + $0xf4] sm:$0xf]  ;;  %v1758_v4 = vld [vmem:[%s3350_s0 + $0x114] sm:$0xf0]  ;;  %v1078_v9 = vadd.f32 %v2846_v54, %v2886_v11  ;;  %v1080_v11 = vadd.f32 %v2846_v54, %v2894_v19  ;;  %v2241_v19 = vld [vmem:[%s3350_s0 + $0x158] sm:$0xf0] }
  0xd2   :  { %v1792_v54 = vld [vmem:[%s3350_s0 + $0x138] sm:$0xf] }
  0xd3   :  { %1409 = vmatmul.bf16.gmra.mxu3 %v1689_v7  ;;  %1458 = vmatmul.bf16.gmra.mxu0 %v1693_v8  ;;  %v2233_v7 = vld [vmem:[%s3350_s0 + $0x118] sm:$0xf0] }
  0xd4   :  { %v1165_v17 = vpop.f32.mrf.mxu2 }
  0xd5   :  { %v1166_v14 = vadd.f32 %v1165_v17, %v1117_v12  ;;  %v1753_v17 = vor.u32 %v2227_v63, %v1750_v0 }
  0xd6   :  { %v1214_v22 = vpop.f32.mrf.mxu3  ;;  %v1118_v23 = vpop.f32.mrf.mxu1 }
  0xd7   :  { %v1215_v24 = vadd.f32 %v1214_v22, %v1166_v14  ;;  %v1119_v25 = vadd.f32 %v1118_v23, %v1070_v21  ;;  %v1757_v21 = vor.u32 %v2232_v2, %v1756_v59  ;;  %v1761_v22 = vor.u32 %v2228_v3, %v1758_v4 }
  0xd8   :  { %v1265_v26 = vpop.f32.mrf.mxu0  ;;  %v1765_v23 = vor.u32 %v2233_v7, %v1764_v5  ;;  %v2245_v5 = vld [vmem:[%s3350_s0 + $0x17c] sm:$0xf] }
  0xd9   :  { %v2964_v29 = vadd.f32 %v1263_v13, %v1215_v24 }
  0xdc   :  { %v1167_v37 = vpop.f32.mrf.mxu2 }
  0xdd   :  { %v1168_v39 = vadd.f32 %v1167_v37, %v1119_v25  ;;  %v2236_v37 = vld [vmem:[%s3350_s0 + $0x134] sm:$0xf] }
  0xde   :  { %v1216_v40 = vpop.f32.mrf.mxu3  ;;  %v1121_v43 = vpop.f32.mrf.mxu1 }
  0xdf   :  { %v1217_v46 = vadd.f32 %v1216_v40, %v1168_v39  ;;  %v1122_v47 = vadd.f32 %v1121_v43, %v1073_v38  ;;  %v1786_v38 = vld [vmem:[%s3350_s0 + $0x154] sm:$0xf0]  ;;  %v2237_v40 = vld [vmem:[%s3350_s0 + $0x13c] sm:$0xf]  ;;  %v2242_v43 = vld [vmem:[%s3350_s0 + $0x160] sm:$0xf0] }
  0xe0   :  { %v1268_v48 = vpop.f32.mrf.mxu0 }
  0xe1   :  { %1316 = vmatmul.bf16.gmra.mxu1 %v1717_v41  ;;  %1365 = vmatmul.bf16.gmra.mxu2 %v1721_v42  ;;  %v2986_v49 = vadd.f32 %v1265_v26, %v1217_v46  ;;  %v1794_v41 = vld [vmem:[%s3350_s0 + $0x15c] sm:$0xf0] }
  0xe2   :  { %v1800_v42 = vld [vmem:[%s3350_s0 + $0x140] sm:$0xf] }
  0xe3   :  { %1414 = vmatmul.bf16.gmra.mxu3 %v1725_v44  ;;  %1463 = vmatmul.bf16.gmra.mxu0 %v1729_v45 }
  0xe4   :  { %v1170_v51 = vpop.f32.mrf.mxu2 }
  0xe5   :  { %v1171_v53 = vadd.f32 %v1170_v51, %v1122_v47  ;;  %v1789_v47 = vor.u32 %v2236_v37, %v1786_v38 }
  0xe6   :  { %v1219_v55 = vpop.f32.mrf.mxu3  ;;  %v1123_v57 = vpop.f32.mrf.mxu1 }
  0xe7   :  { %v1220_v60 = vadd.f32 %v1219_v55, %v1171_v53  ;;  %v1124_v61 = vadd.f32 %v1123_v57, %v1075_v50  ;;  %v1797_v50 = vor.u32 %v2237_v40, %v1794_v41  ;;  %v1801_v53 = vor.u32 %v2242_v43, %v1800_v42  ;;  %v2254_v40 = vld [vmem:[%s3350_s0 + $0x1c4] sm:$0xf]  ;;  %v1864_v42 = vld [vmem:[%s3350_s0 + $0x1c8] sm:$0xf]  ;;  %v2259_v43 = vld [vmem:[%s3350_s0 + $0x1e8] sm:$0xf0] }
  0xe8   :  { %v1270_v62 = vpop.f32.mrf.mxu0 }
  0xe9   :  { %v2996_v1 = vadd.f32 %v1268_v48, %v1220_v60  ;;  %v1793_v48 = vor.u32 %v2241_v19, %v1792_v54 }
  0xec   :  { %v1172_v8 = vpop.f32.mrf.mxu2 }
  0xed   :  { %v1173_v12 = vadd.f32 %v1172_v8, %v1124_v61  ;;  %v1828_v8 = vld [vmem:[%s3350_s0 + $0x180] sm:$0xf] }
  0xee   :  { %v1221_v13 = vpop.f32.mrf.mxu3  ;;  %v1126_v14 = vpop.f32.mrf.mxu1 }
  0xef   :  { %v1222_v24 = vadd.f32 %v1221_v13, %v1173_v12  ;;  %v1127_v25 = vadd.f32 %v1126_v14, %v1078_v9  ;;  %v2250_v9 = vld [vmem:[%s3350_s0 + $0x1a0] sm:$0xf0]  ;;  %v1830_v12 = vld [vmem:[%s3350_s0 + $0x1a4] sm:$0xf0] }
  0xf0   :  { %v1273_v26 = vpop.f32.mrf.mxu0  ;;  %v1836_v13 = vld [vmem:[%s3350_s0 + $0x188] sm:$0xf] }
  0xf1   :  { %1321 = vmatmul.bf16.gmra.mxu1 %v1753_v17  ;;  %1370 = vmatmul.bf16.gmra.mxu2 %v1757_v21  ;;  %v3018_v27 = vadd.f32 %v1270_v62, %v1222_v24  ;;  %v2251_v17 = vld [vmem:[%s3350_s0 + $0x1a8] sm:$0xf0]  ;;  %v1829_v24 = vor.u32 %v2250_v9, %v1828_v8 }
  0xf3   :  { %1419 = vmatmul.bf16.gmra.mxu3 %v1761_v22  ;;  %1468 = vmatmul.bf16.gmra.mxu0 %v1765_v23 }
  0xf4   :  { %v1175_v28 = vpop.f32.mrf.mxu2 }
  0xf5   :  { %v1176_v20 = vadd.f32 %v1175_v28, %v1127_v25  ;;  %v1837_v28 = vor.u32 %v2251_v17, %v1836_v13  ;;  %v1900_v13 = vld [vmem:[%s3350_s0 + $0x210] sm:$0xf]  ;;  %v2268_v17 = vld [vmem:[%s3350_s0 + $0x230] sm:$0xf0] }
  0xf6   :  { %v1224_v30 = vpop.f32.mrf.mxu3  ;;  %v1128_v32 = vpop.f32.mrf.mxu1 }
  0xf7   :  { %v1225_v33 = vadd.f32 %v1224_v30, %v1176_v20  ;;  %v1129_v34 = vadd.f32 %v1128_v32, %v1080_v11 }
  0xf8   :  { %v1275_v36 = vpop.f32.mrf.mxu0 }
  0xf9   :  { %v3028_v39 = vadd.f32 %v1273_v26, %v1225_v33 }
  0xfc   :  { %v1177_v44 = vpop.f32.mrf.mxu2 }
  0xfd   :  { %v1178_v45 = vadd.f32 %v1177_v44, %v1129_v34  ;;  %v1866_v44 = vld [vmem:[%s3350_s0 + $0x1ec] sm:$0xf0] }
  0xfe   :  { %v1226_v46 = vpop.f32.mrf.mxu3  ;;  %v1131_v51 = vpop.f32.mrf.mxu1 }
  0xff   :  { %v1227_v55 = vadd.f32 %v1226_v46, %v1178_v45  ;;  %v1132_v57 = vadd.f32 %v1131_v51, %v2849_v56  ;;  %v1822_v56 = vld [vmem:[%s3350_s0 + $0x19c] sm:$0xf0]  ;;  %v1872_v45 = vld [vmem:[%s3350_s0 + $0x1d0] sm:$0xf]  ;;  %v2260_v46 = vld [vmem:[%s3350_s0 + $0x1f0] sm:$0xf0] }
 0x100   :  { %v1278_v60 = vpop.f32.mrf.mxu0  ;;  %v1825_v23 = vor.u32 %v2245_v5, %v1822_v56 }
 0x101   :  { %1326 = vmatmul.bf16.gmra.mxu1 %v1789_v47  ;;  %1375 = vmatmul.bf16.gmra.mxu2 %v1793_v48  ;;  %v3049_v61 = vadd.f32 %v1275_v36, %v1227_v55 }
 0x103   :  { %1424 = vmatmul.bf16.gmra.mxu3 %v1797_v50  ;;  %1473 = vmatmul.bf16.gmra.mxu0 %v1801_v53  ;;  %v1865_v53 = vor.u32 %v2259_v43, %v1864_v42 }
 0x104   :  { %v1180_v62 = vpop.f32.mrf.mxu2 }
 0x105   :  { %v1181_v63 = vadd.f32 %v1180_v62, %v1132_v57 }
 0x106   :  { %v1229_v0 = vpop.f32.mrf.mxu3  ;;  %v1133_v59 = vpop.f32.mrf.mxu1 }
 0x107   :  { %v1230_v2 = vadd.f32 %v1229_v0, %v1181_v63  ;;  %v1134_v3 = vadd.f32 %v1133_v59, %v2881_v6  ;;  %v2246_v6 = vld [vmem:[%s3350_s0 + $0x184] sm:$0xf] }
 0x108   :  { %v1280_v4 = vpop.f32.mrf.mxu0  ;;  %v1833_v26 = vor.u32 %v2246_v6, %v1830_v12  ;;  %v2263_v6 = vld [vmem:[%s3350_s0 + $0x20c] sm:$0xf] }
 0x109   :  { %v3058_v7 = vadd.f32 %v1278_v60, %v1230_v2  ;;  %v1873_v60 = vor.u32 %v2260_v46, %v1872_v45 }
 0x10c   :  { %v1182_v21 = vpop.f32.mrf.mxu2 }
 0x10d   :  { %v1183_v14 = vadd.f32 %v1182_v21, %v1134_v3  ;;  %v1902_v21 = vld [vmem:[%s3350_s0 + $0x234] sm:$0xf0] }
 0x10e   :  { %v1231_v22 = vpop.f32.mrf.mxu3  ;;  %v1136_v25 = vpop.f32.mrf.mxu1 }
 0x10f   :  { %v1232_v11 = vadd.f32 %v1231_v22, %v1183_v14  ;;  %v1137_v20 = vadd.f32 %v1136_v25, %v2889_v16  ;;  %v1858_v16 = vld [vmem:[%s3350_s0 + $0x1e4] sm:$0xf0]  ;;  %v1908_v14 = vld [vmem:[%s3350_s0 + $0x218] sm:$0xf]  ;;  %v2269_v22 = vld [vmem:[%s3350_s0 + $0x238] sm:$0xf0] }
 0x110   :  { %v1283_v30 = vpop.f32.mrf.mxu0  ;;  %v1861_v50 = vor.u32 %v2254_v40, %v1858_v16 }
 0x111   :  { %1331 = vmatmul.bf16.gmra.mxu1 %v1825_v23  ;;  %1380 = vmatmul.bf16.gmra.mxu2 %v1829_v24  ;;  %v3079_v32 = vadd.f32 %v1280_v4, %v1232_v11 }
 0x113   :  { %1429 = vmatmul.bf16.gmra.mxu3 %v1833_v26  ;;  %1478 = vmatmul.bf16.gmra.mxu0 %v1837_v28  ;;  %v1901_v28 = vor.u32 %v2268_v17, %v1900_v13 }
 0x114   :  { %v1185_v33 = vpop.f32.mrf.mxu2 }
 0x115   :  { %v1186_v34 = vadd.f32 %v1185_v33, %v1137_v20 }
 0x116   :  { %v1234_v36 = vpop.f32.mrf.mxu3  ;;  %v1138_v37 = vpop.f32.mrf.mxu1 }
 0x117   :  { %v1235_v38 = vadd.f32 %v1234_v36, %v1186_v34  ;;  %v1139_v54 = vadd.f32 %v1138_v37, %v2922_v31  ;;  %v2255_v31 = vld [vmem:[%s3350_s0 + $0x1cc] sm:$0xf] }
 0x118   :  { %v1285_v19 = vpop.f32.mrf.mxu0  ;;  %v1869_v57 = vor.u32 %v2255_v31, %v1866_v44 }
 0x119   :  { %v3088_v41 = vadd.f32 %v1283_v30, %v1235_v38  ;;  %v1909_v30 = vor.u32 %v2269_v22, %v1908_v14 }
 0x11c   :  { %v1187_v47 = vpop.f32.mrf.mxu2 }
 0x11d   :  { %v1188_v48 = vadd.f32 %v1187_v47, %v1139_v54 }
 0x11e   :  { %v1236_v51 = vpop.f32.mrf.mxu3  ;;  %v1141_v55 = vpop.f32.mrf.mxu1 }
 0x11f   :  { %v1237_v62 = vadd.f32 %v1236_v51, %v1188_v48  ;;  %v1142_v63 = vadd.f32 %v1141_v55, %v2852_v58  ;;  %v1894_v58 = vld [vmem:[%s3350_s0 + $0x22c] sm:$0xf0] }
 0x120   :  { %v1288_v0 = vpop.f32.mrf.mxu0  ;;  %v1897_v26 = vor.u32 %v2263_v6, %v1894_v58 }
 0x121   :  { %1336 = vmatmul.bf16.gmra.mxu1 %v1861_v50  ;;  %1385 = vmatmul.bf16.gmra.mxu2 %v1865_v53  ;;  %v3109_v59 = vadd.f32 %v1285_v19, %v1237_v62 }
 0x123   :  { %1434 = vmatmul.bf16.gmra.mxu3 %v1869_v57  ;;  %1483 = vmatmul.bf16.gmra.mxu0 %v1873_v60 }
 0x124   :  { %v1190_v2 = vpop.f32.mrf.mxu2 }
 0x125   :  { %v1191_v3 = vadd.f32 %v1190_v2, %v1142_v63  ;;  %v3153_v2 = vld [vmem:[%s3351_s4] ss:$0 sm:$0xff] }
 0x126   :  { %v1239_v4 = vpop.f32.mrf.mxu3  ;;  %v1143_v5 = vpop.f32.mrf.mxu1 }
 0x127   :  { %v1240_v56 = vadd.f32 %v1239_v4, %v1191_v3  ;;  %v1144_v8 = vadd.f32 %v1143_v5, %v2884_v10  ;;  %v2264_v10 = vld [vmem:[%s3350_s0 + $0x214] sm:$0xf] }
 0x128   :  { %v1290_v9 = vpop.f32.mrf.mxu0  ;;  %v1905_v20 = vor.u32 %v2264_v10, %v1902_v21  ;;  %v1495_v10 = vld [vmem:[%s3353_s3 + $0x8] sm:$0xff] }
 0x129   :  { %v3118_v12 = vadd.f32 %v1288_v0, %v1240_v56 }
 0x12c   :  { %v1192_v23 = vpop.f32.mrf.mxu2 }
 0x12d   :  { %v1193_v24 = vadd.f32 %v1192_v23, %v1144_v8 }
 0x12e   :  { %v1241_v25 = vpop.f32.mrf.mxu3  ;;  %v1146_v11 = vpop.f32.mrf.mxu1 }
 0x12f   :  { %v1242_v33 = vadd.f32 %v1241_v25, %v1193_v24  ;;  %v1147_v34 = vadd.f32 %v1146_v11, %v2892_v18 }
 0x130   :  { %v1293_v36 = vpop.f32.mrf.mxu0 }
 0x131   :  { %1341 = vmatmul.bf16.gmra.mxu1 %v1897_v26  ;;  %1390 = vmatmul.bf16.gmra.mxu2 %v1901_v28  ;;  %v3139_v37 = vadd.f32 %v1290_v9, %v1242_v33  ;;  %v1496_v33 = vld [vmem:[%s3353_s3 + $0x10] sm:$0xff] }
 0x133   :  { %1439 = vmatmul.bf16.gmra.mxu3 %v1905_v20  ;;  %1488 = vmatmul.bf16.gmra.mxu0 %v1909_v30 }
 0x134   :  { %v1195_v38 = vpop.f32.mrf.mxu2 }
 0x135   :  { %v1196_v54 = vadd.f32 %v1195_v38, %v1147_v34 }
 0x136   :  { %v1244_v19 = vpop.f32.mrf.mxu3  ;;  %v1148_v40 = vpop.f32.mrf.mxu1 }
 0x137   :  { %v1245_v16 = vadd.f32 %v1244_v19, %v1196_v54  ;;  %v1149_v42 = vadd.f32 %v1148_v40, %v2925_v35  ;;  %v1494_v35 = vld [vmem:[%s3353_s3] sm:$0xff] }
 0x138   :  { %v1295_v43 = vpop.f32.mrf.mxu0 }
 0x139   :  { %v3142_v31 = vadd.f32 %v1293_v36, %v1245_v16 }
 0x13c   :  { %v1197_v44 = vpop.f32.mrf.mxu2 }
 0x13d   :  { %v1198_v45 = vadd.f32 %v1197_v44, %v1149_v42 }
 0x13e   :  { %v1246_v18 = vpop.f32.mrf.mxu3  ;;  %v1307_v46 = vpop.f32.mrf.mxu1 }
 0x13f   :  { %v1247_v47 = vadd.f32 %v1246_v18, %v1198_v45  ;;  %v1308_v50 = vadd.f32 %v1307_v46, %v2934_v52  ;;  %v3158_v52 = vld [vmem:[%s3352_s5] ss:$0 sm:$0xff]  ;;  %v1497_v18 = vld [vmem:[%s3353_s3 + $0x18] sm:$0xff] }
 0x140   :  { %v1454_v48 = vpop.f32.mrf.mxu0 }
 0x141   :  { %v3144_v51 = vadd.f32 %v1295_v43, %v1247_v47 }
 0x144   :  { %v1356_v53 = vpop.f32.mrf.mxu2 }
 0x145   :  { %v1357_v55 = vadd.f32 %v1356_v53, %v1308_v50 }
 0x146   :  { %v1405_v57 = vpop.f32.mrf.mxu3  ;;  %v1309_v60 = vpop.f32.mrf.mxu1 }
 0x147   :  { %v1406_v62 = vadd.f32 %v1405_v57, %v1357_v55  ;;  %v1310_v4 = vadd.f32 %v1309_v60, %v2955_v15 }
 0x148   :  { %v1456_v63 = vpop.f32.mrf.mxu0 }
 0x149   :  { %v1455_v0 = vadd.f32 %v1454_v48, %v1406_v62 }
 0x14b   :  { %v1510_v3 = vadd.f32 %v1494_v35, %v1455_v0  ;;  %v1498_v0 = vld [vmem:[%s3353_s3 + $0x20] sm:$0xff] }
 0x14c   :  { %v1358_v5 = vpop.f32.mrf.mxu2 }
 0x14d   :  { %1526 = vst [vmem:[%s3354_s6] sm:$0xff] %v1510_v3  ;;  %v1546_v56 = vmul.f32 %v3153_v2, %v1510_v3  ;;  %v1359_v8 = vadd.f32 %v1358_v5, %v1310_v4 }
 0x14e   :  { %v1407_v9 = vpop.f32.mrf.mxu3  ;;  %v1312_v6 = vpop.f32.mrf.mxu1 }
 0x14f   :  { %v1566_v58 = vadd.f32 %v3158_v52, %v1546_v56  ;;  %v1408_v13 = vadd.f32 %v1407_v9, %v1359_v8  ;;  %v1313_v22 = vadd.f32 %v1312_v6, %v2964_v29 }
 0x150   :  { %v1459_v17 = vpop.f32.mrf.mxu0 }
 0x151   :  { %v1582_v21 = vmax.f32 %v1566_v58, 0.0  ;;  %v1457_v15 = vadd.f32 %v1456_v63, %v1408_v13 }
 0x153   :  { %1598 = vst [vmem:[%s3355_s7] sm:$0xff] %v1582_v21  ;;  %v1511_v14 = vadd.f32 %v1495_v10, %v1457_v15  ;;  %v1499_v21 = vld [vmem:[%s3353_s3 + $0x28] sm:$0xff] }
 0x154   :  { %v1361_v23 = vpop.f32.mrf.mxu2 }
 0x155   :  { %1527 = vst [vmem:[%s3354_s6 + $0x8] sm:$0xff] %v1511_v14  ;;  %v1547_v24 = vmul.f32 %v3153_v2, %v1511_v14  ;;  %v1362_v25 = vadd.f32 %v1361_v23, %v1313_v22 }
 0x156   :  { %v1410_v26 = vpop.f32.mrf.mxu3  ;;  %v1314_v28 = vpop.f32.mrf.mxu1 }
 0x157   :  { %v1567_v11 = vadd.f32 %v3158_v52, %v1547_v24  ;;  %v1411_v20 = vadd.f32 %v1410_v26, %v1362_v25  ;;  %v1315_v38 = vadd.f32 %v1314_v28, %v2986_v49 }
 0x158   :  { %v1461_v30 = vpop.f32.mrf.mxu0 }
 0x159   :  { %v1583_v34 = vmax.f32 %v1567_v11, 0.0  ;;  %v1460_v29 = vadd.f32 %v1459_v17, %v1411_v20 }
 0x15b   :  { %1599 = vst [vmem:[%s3355_s7 + $0x8] sm:$0xff] %v1583_v34  ;;  %v1512_v36 = vadd.f32 %v1496_v33, %v1460_v29  ;;  %v1500_v33 = vld [vmem:[%s3353_s3 + $0x30] sm:$0xff] }
 0x15c   :  { %v1363_v54 = vpop.f32.mrf.mxu2 }
 0x15d   :  { %1528 = vst [vmem:[%s3354_s6 + $0x10] sm:$0xff] %v1512_v36  ;;  %v1548_v19 = vmul.f32 %v3153_v2, %v1512_v36  ;;  %v1364_v40 = vadd.f32 %v1363_v54, %v1315_v38 }
 0x15e   :  { %v1412_v16 = vpop.f32.mrf.mxu3  ;;  %v1317_v42 = vpop.f32.mrf.mxu1 }
 0x15f   :  { %v1568_v43 = vadd.f32 %v3158_v52, %v1548_v19  ;;  %v1413_v44 = vadd.f32 %v1412_v16, %v1364_v40  ;;  %v1318_v48 = vadd.f32 %v1317_v42, %v2996_v1 }
 0x160   :  { %v1464_v45 = vpop.f32.mrf.mxu0 }
 0x161   :  { %v1584_v46 = vmax.f32 %v1568_v43, 0.0  ;;  %v1462_v49 = vadd.f32 %v1461_v30, %v1413_v44 }
 0x163   :  { %1600 = vst [vmem:[%s3355_s7 + $0x10] sm:$0xff] %v1584_v46  ;;  %v1513_v47 = vadd.f32 %v1497_v18, %v1462_v49 }
 0x164   :  { %v1366_v50 = vpop.f32.mrf.mxu2 }
 0x165   :  { %1529 = vst [vmem:[%s3354_s6 + $0x18] sm:$0xff] %v1513_v47  ;;  %v1549_v53 = vmul.f32 %v3153_v2, %v1513_v47  ;;  %v1367_v55 = vadd.f32 %v1366_v50, %v1318_v48 }
 0x166   :  { %v1415_v57 = vpop.f32.mrf.mxu3  ;;  %v1319_v60 = vpop.f32.mrf.mxu1 }
 0x167   :  { %v1569_v62 = vadd.f32 %v3158_v52, %v1549_v53  ;;  %v1416_v63 = vadd.f32 %v1415_v57, %v1367_v55  ;;  %v1320_v5 = vadd.f32 %v1319_v60, %v3018_v27 }
 0x168   :  { %v1466_v35 = vpop.f32.mrf.mxu0 }
 0x169   :  { %v1585_v3 = vmax.f32 %v1569_v62, 0.0  ;;  %v1465_v1 = vadd.f32 %v1464_v45, %v1416_v63  ;;  %v1501_v45 = vld [vmem:[%s3353_s3 + $0x38] sm:$0xff]  ;;  %v1502_v63 = vld [vmem:[%s3353_s3 + $0x40] sm:$0xff] }
 0x16b   :  { %1601 = vst [vmem:[%s3355_s7 + $0x18] sm:$0xff] %v1585_v3  ;;  %v1514_v4 = vadd.f32 %v1498_v0, %v1465_v1 }
 0x16c   :  { %v1368_v56 = vpop.f32.mrf.mxu2 }
 0x16d   :  { %1530 = vst [vmem:[%s3354_s6 + $0x20] sm:$0xff] %v1514_v4  ;;  %v1550_v8 = vmul.f32 %v3153_v2, %v1514_v4  ;;  %v1369_v9 = vadd.f32 %v1368_v56, %v1320_v5 }
 0x16e   :  { %v1417_v6 = vpop.f32.mrf.mxu3  ;;  %v1322_v58 = vpop.f32.mrf.mxu1 }
 0x16f   :  { %v1570_v13 = vadd.f32 %v3158_v52, %v1550_v8  ;;  %v1418_v17 = vadd.f32 %v1417_v6, %v1369_v9  ;;  %v1323_v22 = vadd.f32 %v1322_v58, %v3028_v39 }
 0x170   :  { %v1469_v10 = vpop.f32.mrf.mxu0 }
 0x171   :  { %v1586_v15 = vmax.f32 %v1570_v13, 0.0  ;;  %v1467_v27 = vadd.f32 %v1466_v35, %v1418_v17  ;;  %v1503_v13 = vld [vmem:[%s3353_s3 + $0x48] sm:$0xff] }
 0x173   :  { %1602 = vst [vmem:[%s3355_s7 + $0x20] sm:$0xff] %v1586_v15  ;;  %v1515_v14 = vadd.f32 %v1499_v21, %v1467_v27 }
 0x174   :  { %v1371_v23 = vpop.f32.mrf.mxu2 }
 0x175   :  { %1531 = vst [vmem:[%s3354_s6 + $0x28] sm:$0xff] %v1515_v14  ;;  %v1551_v24 = vmul.f32 %v3153_v2, %v1515_v14  ;;  %v1372_v25 = vadd.f32 %v1371_v23, %v1323_v22 }
 0x176   :  { %v1420_v26 = vpop.f32.mrf.mxu3  ;;  %v1324_v28 = vpop.f32.mrf.mxu1 }
 0x177   :  { %v1571_v11 = vadd.f32 %v3158_v52, %v1551_v24  ;;  %v1421_v20 = vadd.f32 %v1420_v26, %v1372_v25  ;;  %v1325_v36 = vadd.f32 %v1324_v28, %v3049_v61  ;;  %v1504_v26 = vld [vmem:[%s3353_s3 + $0x50] sm:$0xff] }
 0x178   :  { %v1471_v30 = vpop.f32.mrf.mxu0 }
 0x179   :  { %v1587_v34 = vmax.f32 %v1571_v11, 0.0  ;;  %v1470_v39 = vadd.f32 %v1469_v10, %v1421_v20 }
 0x17b   :  { %1603 = vst [vmem:[%s3355_s7 + $0x28] sm:$0xff] %v1587_v34  ;;  %v1516_v29 = vadd.f32 %v1500_v33, %v1470_v39 }
 0x17c   :  { %v1373_v38 = vpop.f32.mrf.mxu2 }
 0x17d   :  { %1532 = vst [vmem:[%s3354_s6 + $0x30] sm:$0xff] %v1516_v29  ;;  %v1552_v54 = vmul.f32 %v3153_v2, %v1516_v29  ;;  %v1374_v19 = vadd.f32 %v1373_v38, %v1325_v36 }
 0x17e   :  { %v1422_v40 = vpop.f32.mrf.mxu3  ;;  %v1327_v16 = vpop.f32.mrf.mxu1 }
 0x17f   :  { %v1572_v42 = vadd.f32 %v3158_v52, %v1552_v54  ;;  %v1423_v43 = vadd.f32 %v1422_v40, %v1374_v19  ;;  %v1328_v49 = vadd.f32 %v1327_v16, %v3058_v7  ;;  %v1505_v19 = vld [vmem:[%s3353_s3 + $0x58] sm:$0xff] }
 0x180   :  { %v1474_v44 = vpop.f32.mrf.mxu0 }
 0x181   :  { %v1588_v18 = vmax.f32 %v1572_v42, 0.0  ;;  %v1472_v61 = vadd.f32 %v1471_v30, %v1423_v43 }
 0x183   :  { %1604 = vst [vmem:[%s3355_s7 + $0x30] sm:$0xff] %v1588_v18  ;;  %v1517_v46 = vadd.f32 %v1501_v45, %v1472_v61 }
 0x184   :  { %v1376_v47 = vpop.f32.mrf.mxu2 }
 0x185   :  { %1533 = vst [vmem:[%s3354_s6 + $0x38] sm:$0xff] %v1517_v46  ;;  %v1553_v48 = vmul.f32 %v3153_v2, %v1517_v46  ;;  %v1377_v50 = vadd.f32 %v1376_v47, %v1328_v49 }
 0x186   :  { %v1425_v53 = vpop.f32.mrf.mxu3  ;;  %v1329_v55 = vpop.f32.mrf.mxu1 }
 0x187   :  { %v1573_v57 = vadd.f32 %v3158_v52, %v1553_v48  ;;  %v1426_v60 = vadd.f32 %v1425_v53, %v1377_v50  ;;  %v1330_v3 = vadd.f32 %v1329_v55, %v3079_v32  ;;  %v1506_v48 = vld [vmem:[%s3353_s3 + $0x60] sm:$0xff] }
 0x188   :  { %v1476_v62 = vpop.f32.mrf.mxu0 }
 0x189   :  { %v1589_v35 = vmax.f32 %v1573_v57, 0.0  ;;  %v1475_v7 = vadd.f32 %v1474_v44, %v1426_v60 }
 0x18b   :  { %1605 = vst [vmem:[%s3355_s7 + $0x38] sm:$0xff] %v1589_v35  ;;  %v1518_v0 = vadd.f32 %v1502_v63, %v1475_v7 }
 0x18c   :  { %v1378_v1 = vpop.f32.mrf.mxu2 }
 0x18d   :  { %1534 = vst [vmem:[%s3354_s6 + $0x40] sm:$0xff] %v1518_v0  ;;  %v1554_v4 = vmul.f32 %v3153_v2, %v1518_v0  ;;  %v1379_v5 = vadd.f32 %v1378_v1, %v1330_v3  ;;  %v1507_v1 = vld [vmem:[%s3353_s3 + $0x68] sm:$0xff] }
 0x18e   :  { %v1427_v56 = vpop.f32.mrf.mxu3  ;;  %v1332_v8 = vpop.f32.mrf.mxu1 }
 0x18f   :  { %v1574_v9 = vadd.f32 %v3158_v52, %v1554_v4  ;;  %v1428_v6 = vadd.f32 %v1427_v56, %v1379_v5  ;;  %v1333_v21 = vadd.f32 %v1332_v8, %v3088_v41 }
 0x190   :  { %v1479_v58 = vpop.f32.mrf.mxu0 }
 0x191   :  { %v1590_v17 = vmax.f32 %v1574_v9, 0.0  ;;  %v1477_v32 = vadd.f32 %v1476_v62, %v1428_v6 }
 0x193   :  { %1606 = vst [vmem:[%s3355_s7 + $0x40] sm:$0xff] %v1590_v17  ;;  %v1519_v10 = vadd.f32 %v1503_v13, %v1477_v32 }
 0x194   :  { %v1381_v15 = vpop.f32.mrf.mxu2 }
 0x195   :  { %1535 = vst [vmem:[%s3354_s6 + $0x48] sm:$0xff] %v1519_v10  ;;  %v1555_v27 = vmul.f32 %v3153_v2, %v1519_v10  ;;  %v1382_v14 = vadd.f32 %v1381_v15, %v1333_v21  ;;  %v1508_v10 = vld [vmem:[%s3353_s3 + $0x70] sm:$0xff] }
 0x196   :  { %v1430_v22 = vpop.f32.mrf.mxu3  ;;  %v1334_v23 = vpop.f32.mrf.mxu1 }
 0x197   :  { %v1575_v24 = vadd.f32 %v3158_v52, %v1555_v27  ;;  %v1431_v25 = vadd.f32 %v1430_v22, %v1382_v14  ;;  %v1335_v30 = vadd.f32 %v1334_v23, %v3109_v59 }
 0x198   :  { %v1481_v28 = vpop.f32.mrf.mxu0 }
 0x199   :  { %v1591_v11 = vmax.f32 %v1575_v24, 0.0  ;;  %v1480_v41 = vadd.f32 %v1479_v58, %v1431_v25 }
 0x19b   :  { %1607 = vst [vmem:[%s3355_s7 + $0x48] sm:$0xff] %v1591_v11  ;;  %v1520_v20 = vadd.f32 %v1504_v26, %v1480_v41  ;;  %v1509_v41 = vld [vmem:[%s3353_s3 + $0x78] sm:$0xff] }
 0x19c   :  { %v1383_v33 = vpop.f32.mrf.mxu2 }
 0x19d   :  { %1536 = vst [vmem:[%s3354_s6 + $0x50] sm:$0xff] %v1520_v20  ;;  %v1556_v34 = vmul.f32 %v3153_v2, %v1520_v20  ;;  %v1384_v39 = vadd.f32 %v1383_v33, %v1335_v30 }
 0x19e   :  { %v1432_v29 = vpop.f32.mrf.mxu3  ;;  %v1337_v36 = vpop.f32.mrf.mxu1 }
 0x19f   :  { %v1576_v38 = vadd.f32 %v3158_v52, %v1556_v34  ;;  %v1433_v54 = vadd.f32 %v1432_v29, %v1384_v39  ;;  %v1338_v43 = vadd.f32 %v1337_v36, %v3118_v12 }
 0x1a0   :  { %v1484_v59 = vpop.f32.mrf.mxu0 }
 0x1a1   :  { %v1592_v40 = vmax.f32 %v1576_v38, 0.0  ;;  %v1482_v16 = vadd.f32 %v1481_v28, %v1433_v54 }
 0x1a3   :  { %1608 = vst [vmem:[%s3355_s7 + $0x50] sm:$0xff] %v1592_v40  ;;  %v1521_v42 = vadd.f32 %v1505_v19, %v1482_v16 }
 0x1a4   :  { %v1386_v44 = vpop.f32.mrf.mxu2 }
 0x1a5   :  { %1537 = vst [vmem:[%s3354_s6 + $0x58] sm:$0xff] %v1521_v42  ;;  %v1557_v45 = vmul.f32 %v3153_v2, %v1521_v42  ;;  %v1387_v18 = vadd.f32 %v1386_v44, %v1338_v43 }
 0x1a6   :  { %v1435_v61 = vpop.f32.mrf.mxu3  ;;  %v1339_v46 = vpop.f32.mrf.mxu1 }
 0x1a7   :  { %v1577_v49 = vadd.f32 %v3158_v52, %v1557_v45  ;;  %v1436_v47 = vadd.f32 %v1435_v61, %v1387_v18  ;;  %v1340_v55 = vadd.f32 %v1339_v46, %v3139_v37 }
 0x1a8   :  { %v1486_v57 = vpop.f32.mrf.mxu0 }
 0x1a9   :  { %v1593_v50 = vmax.f32 %v1577_v49, 0.0  ;;  %v1485_v53 = vadd.f32 %v1484_v59, %v1436_v47 }
 0x1ab   :  { %1609 = vst [vmem:[%s3355_s7 + $0x58] sm:$0xff] %v1593_v50  ;;  %v1522_v12 = vadd.f32 %v1506_v48, %v1485_v53 }
 0x1ac   :  { %v1388_v60 = vpop.f32.mrf.mxu2 }
 0x1ad   :  { %1538 = vst [vmem:[%s3354_s6 + $0x60] sm:$0xff] %v1522_v12  ;;  %v1558_v62 = vmul.f32 %v3153_v2, %v1522_v12  ;;  %v1389_v63 = vadd.f32 %v1388_v60, %v1340_v55 }
 0x1ae   :  { %v1437_v35 = vpop.f32.mrf.mxu3  ;;  %v1342_v7 = vpop.f32.mrf.mxu1 }
 0x1af   :  { %v1578_v0 = vadd.f32 %v3158_v52, %v1558_v62  ;;  %v1438_v3 = vadd.f32 %v1437_v35, %v1389_v63  ;;  %v1343_v56 = vadd.f32 %v1342_v7, %v3142_v31 }
 0x1b0   :  { %v1489_v13 = vpop.f32.mrf.mxu0 }
 0x1b1   :  { %v1594_v4 = vmax.f32 %v1578_v0, 0.0  ;;  %v1487_v37 = vadd.f32 %v1486_v57, %v1438_v3 }
 0x1b3   :  { %1610 = vst [vmem:[%s3355_s7 + $0x60] sm:$0xff] %v1594_v4  ;;  %v1523_v5 = vadd.f32 %v1507_v1, %v1487_v37 }
 0x1b4   :  { %v1391_v8 = vpop.f32.mrf.mxu2 }
 0x1b5   :  { %1539 = vst [vmem:[%s3354_s6 + $0x68] sm:$0xff] %v1523_v5  ;;  %v1559_v9 = vmul.f32 %v3153_v2, %v1523_v5  ;;  %v1392_v6 = vadd.f32 %v1391_v8, %v1343_v56 }
 0x1b6   :  { %v1440_v58 = vpop.f32.mrf.mxu3  ;;  %v1344_v21 = vpop.f32.mrf.mxu1 }
 0x1b7   :  { %v1579_v17 = vadd.f32 %v3158_v52, %v1559_v9  ;;  %v1441_v32 = vadd.f32 %v1440_v58, %v1392_v6  ;;  %v1345_v14 = vadd.f32 %v1344_v21, %v3144_v51 }
 0x1b8   :  { %v1491_v11 = vpop.f32.mrf.mxu0 }
 0x1b9   :  { %v1595_v15 = vmax.f32 %v1579_v17, 0.0  ;;  %v1490_v31 = vadd.f32 %v1489_v13, %v1441_v32 }
 0x1bb   :  { %1611 = vst [vmem:[%s3355_s7 + $0x68] sm:$0xff] %v1595_v15  ;;  %v1524_v27 = vadd.f32 %v1508_v10, %v1490_v31 }
 0x1bc   :  { %v1393_v22 = vpop.f32.mrf.mxu2 }
 0x1bd   :  { %1540 = vst [vmem:[%s3354_s6 + $0x70] sm:$0xff] %v1524_v27  ;;  %v1560_v23 = vmul.f32 %v3153_v2, %v1524_v27  ;;  %v1394_v24 = vadd.f32 %v1393_v22, %v1345_v14 }
 0x1be   :  { %v1442_v25 = vpop.f32.mrf.mxu3 }
 0x1bf   :  { %v1580_v26 = vadd.f32 %v3158_v52, %v1560_v23  ;;  %v1443_v28 = vadd.f32 %v1442_v25, %v1394_v24 }
 0x1c1   :  { %v1596_v20 = vmax.f32 %v1580_v26, 0.0  ;;  %v1492_v30 = vadd.f32 %v1491_v11, %v1443_v28 }
 0x1c3   :  { %1612 = vst [vmem:[%s3355_s7 + $0x70] sm:$0xff] %v1596_v20  ;;  %v1525_v51 = vadd.f32 %v1509_v41, %v1492_v30 }
 0x1c5   :  { %1541 = vst [vmem:[%s3354_s6 + $0x78] sm:$0xff] %v1525_v51  ;;  %v1561_v33 = vmul.f32 %v3153_v2, %v1525_v51 }
 0x1c7   :  { %v1581_v34 = vadd.f32 %v3158_v52, %v1561_v33 }
 0x1c9   :  { %v1597_v39 = vmax.f32 %v1581_v34, 0.0 }
 0x1cb   :  { %1613 = vst [vmem:[%s3355_s7 + $0x78] sm:$0xff] %v1597_v39 }

// kernel: wideresnet_forward.16
= control target key start
LH: loop header
LB: loop body
LE: loop exit
PB: predicated region body
PF: predicated region fallthrough
CT: control target
= control target key end

     0   :  { %s1747_s1 = inlined_call_operand.vmem [shape: bf16[1152,128], index: 1, kind: input, shape index: {}]   ;;  %s1748_s0 = inlined_call_operand.vmem [shape: bf16[32,1152], index: 0, kind: input, shape index: {}]   ;;  %s1749_s2 = inlined_call_operand.vmem [shape: f32[1,128], index: 2, kind: input, shape index: {}]   ;;  %s1750_s3 = inlined_call_operand.vmem [shape: f32[1,128], index: 3, kind: input, shape index: {}]   ;;  %s1751_s4 = inlined_call_operand.vmem [shape: f32[1,128], index: 4, kind: input, shape index: {}]   ;;  %s1752_s5 = inlined_call_operand.vmem [shape: f32[32,128], index: 5, kind: output, shape index: {}]  }
   0x1   :  { %v1296_v0 = vld [vmem:[%s1747_s1 + $0x38] sm:$0xff]  ;;  %v1295_v4 = vld [vmem:[%s1747_s1 + $0x30] sm:$0xff]  ;;  %v1294_v8 = vld [vmem:[%s1747_s1 + $0x28] sm:$0xff] }
   0x2   :  { %v1304_v1 = vld [vmem:[%s1747_s1 + $0x78] sm:$0xff]  ;;  %712 = vmatpush.bf16.msra.mxu0 %v1296_v0  ;;  %v1303_v5 = vld [vmem:[%s1747_s1 + $0x70] sm:$0xff]  ;;  %v1302_v9 = vld [vmem:[%s1747_s1 + $0x68] sm:$0xff] }
   0x3   :  { %v1312_v2 = vld [vmem:[%s1747_s1 + $0xb8] sm:$0xff]  ;;  %731 = vmatpush.bf16.msra.mxu1 %v1304_v1  ;;  %v1311_v6 = vld [vmem:[%s1747_s1 + $0xb0] sm:$0xff]  ;;  %v1310_v10 = vld [vmem:[%s1747_s1 + $0xa8] sm:$0xff] }
   0x4   :  { %v1320_v3 = vld [vmem:[%s1747_s1 + $0xf8] sm:$0xff]  ;;  %750 = vmatpush.bf16.msra.mxu2 %v1312_v2  ;;  %v1319_v7 = vld [vmem:[%s1747_s1 + $0xf0] sm:$0xff]  ;;  %v1318_v11 = vld [vmem:[%s1747_s1 + $0xe8] sm:$0xff] }
   0x5   :  { %769 = vmatpush.bf16.msra.mxu3 %v1320_v3  ;;  %v1293_v12 = vld [vmem:[%s1747_s1 + $0x20] sm:$0xff]  ;;  %v1292_v16 = vld [vmem:[%s1747_s1 + $0x18] sm:$0xff]  ;;  %v1291_v20 = vld [vmem:[%s1747_s1 + $0x10] sm:$0xff] }
   0x6   :  { %713 = vmatpush.bf16.msra.mxu0 %v1295_v4  ;;  %v1301_v13 = vld [vmem:[%s1747_s1 + $0x60] sm:$0xff]  ;;  %v1300_v17 = vld [vmem:[%s1747_s1 + $0x58] sm:$0xff]  ;;  %v1299_v21 = vld [vmem:[%s1747_s1 + $0x50] sm:$0xff] }
   0x7   :  { %732 = vmatpush.bf16.msra.mxu1 %v1303_v5  ;;  %v1309_v14 = vld [vmem:[%s1747_s1 + $0xa0] sm:$0xff]  ;;  %v1308_v18 = vld [vmem:[%s1747_s1 + $0x98] sm:$0xff]  ;;  %v1307_v22 = vld [vmem:[%s1747_s1 + $0x90] sm:$0xff] }
   0x8   :  { %751 = vmatpush.bf16.msra.mxu2 %v1311_v6  ;;  %v1317_v15 = vld [vmem:[%s1747_s1 + $0xe0] sm:$0xff]  ;;  %v1316_v19 = vld [vmem:[%s1747_s1 + $0xd8] sm:$0xff]  ;;  %v1315_v23 = vld [vmem:[%s1747_s1 + $0xd0] sm:$0xff] }
   0x9   :  { %770 = vmatpush.bf16.msra.mxu3 %v1319_v7  ;;  %v1290_v24 = vld [vmem:[%s1747_s1 + $0x8] sm:$0xff]  ;;  %v1289_v28 = vld [vmem:[%s1747_s1] sm:$0xff]  ;;  %v923_v39 = vld [vmem:[%s1748_s0 + $0x2c] sm:$0xf0] }
   0xa   :  { %714 = vmatpush.bf16.msra.mxu0 %v1294_v8  ;;  %v1298_v25 = vld [vmem:[%s1747_s1 + $0x48] sm:$0xff]  ;;  %v1297_v29 = vld [vmem:[%s1747_s1 + $0x40] sm:$0xff]  ;;  %v1328_v40 = vld [vmem:[%s1747_s1 + $0x138] sm:$0xff] }
   0xb   :  { %733 = vmatpush.bf16.msra.mxu1 %v1302_v9  ;;  %v1306_v26 = vld [vmem:[%s1747_s1 + $0x88] sm:$0xff]  ;;  %v1305_v30 = vld [vmem:[%s1747_s1 + $0x80] sm:$0xff]  ;;  %v1336_v41 = vld [vmem:[%s1747_s1 + $0x178] sm:$0xff] }
   0xc   :  { %752 = vmatpush.bf16.msra.mxu2 %v1310_v10  ;;  %v1314_v27 = vld [vmem:[%s1747_s1 + $0xc8] sm:$0xff]  ;;  %v1313_v31 = vld [vmem:[%s1747_s1 + $0xc0] sm:$0xff]  ;;  %v1344_v46 = vld [vmem:[%s1747_s1 + $0x1b8] sm:$0xff] }
   0xd   :  { %771 = vmatpush.bf16.msra.mxu3 %v1318_v11  ;;  %v913_v32 = vld [vmem:[%s1748_s0] sm:$0xf]  ;;  %v1275_v33 = vld [vmem:[%s1748_s0 + $0x20] sm:$0xf0]  ;;  %v915_v35 = vld [vmem:[%s1748_s0 + $0x24] sm:$0xf0] }
   0xe   :  { %715 = vmatpush.bf16.msra.mxu0 %v1293_v12  ;;  %v1271_v34 = vld [vmem:[%s1748_s0 + $0x4] sm:$0xf]  ;;  %v921_v36 = vld [vmem:[%s1748_s0 + $0x8] sm:$0xf]  ;;  %v1276_v37 = vld [vmem:[%s1748_s0 + $0x28] sm:$0xf0]  ;;  %v914_v42 = vor.u32 %v1275_v33, %v913_v32 }
   0xf   :  { %734 = vmatpush.bf16.msra.mxu1 %v1301_v13  ;;  %v1272_v38 = vld [vmem:[%s1748_s0 + $0xc] sm:$0xf]  ;;  %v918_v43 = vor.u32 %v1271_v34, %v915_v35  ;;  %v922_v44 = vor.u32 %v1276_v37, %v921_v36  ;;  %v1352_v47 = vld [vmem:[%s1747_s1 + $0x1f8] sm:$0xff]  ;;  %v1327_v48 = vld [vmem:[%s1747_s1 + $0x130] sm:$0xff] }
  0x10   :  { %753 = vmatpush.bf16.msra.mxu2 %v1309_v14  ;;  %v926_v45 = vor.u32 %v1272_v38, %v923_v39  ;;  %v1335_v49 = vld [vmem:[%s1747_s1 + $0x170] sm:$0xff]  ;;  %v1326_v52 = vld [vmem:[%s1747_s1 + $0x128] sm:$0xff]  ;;  %v1325_v56 = vld [vmem:[%s1747_s1 + $0x120] sm:$0xff] }
  0x11   :  { %772 = vmatpush.bf16.msra.mxu3 %v1317_v15  ;;  %v1343_v50 = vld [vmem:[%s1747_s1 + $0x1b0] sm:$0xff]  ;;  %v1334_v53 = vld [vmem:[%s1747_s1 + $0x168] sm:$0xff]  ;;  %v1333_v57 = vld [vmem:[%s1747_s1 + $0x160] sm:$0xff] }
  0x12   :  { %716 = vmatpush.bf16.msra.mxu0 %v1292_v16  ;;  %v1351_v51 = vld [vmem:[%s1747_s1 + $0x1f0] sm:$0xff]  ;;  %v1342_v54 = vld [vmem:[%s1747_s1 + $0x1a8] sm:$0xff]  ;;  %v1341_v58 = vld [vmem:[%s1747_s1 + $0x1a0] sm:$0xff] }
  0x13   :  { %735 = vmatpush.bf16.msra.mxu1 %v1300_v17  ;;  %v1350_v55 = vld [vmem:[%s1747_s1 + $0x1e8] sm:$0xff]  ;;  %v1349_v59 = vld [vmem:[%s1747_s1 + $0x1e0] sm:$0xff]  ;;  %v951_v63 = vld [vmem:[%s1748_s0 + $0x6c] sm:$0xf0] }
  0x14   :  { %754 = vmatpush.bf16.msra.mxu2 %v1308_v18  ;;  %v949_v60 = vld [vmem:[%s1748_s0 + $0x48] sm:$0xf]  ;;  %v1284_v61 = vld [vmem:[%s1748_s0 + $0x68] sm:$0xf0]  ;;  %v957_v0 = vld [vmem:[%s1748_s0 + $0x50] sm:$0xf] }
  0x15   :  { %773 = vmatpush.bf16.msra.mxu3 %v1316_v19  ;;  %v1280_v62 = vld [vmem:[%s1748_s0 + $0x4c] sm:$0xf]  ;;  %v1285_v1 = vld [vmem:[%s1748_s0 + $0x70] sm:$0xf0]  ;;  %v959_v3 = vld [vmem:[%s1748_s0 + $0x74] sm:$0xf0]  ;;  %v950_v6 = vor.u32 %v1284_v61, %v949_v60 }
  0x16   :  { %717 = vmatpush.bf16.msra.mxu0 %v1291_v20  ;;  %v1281_v2 = vld [vmem:[%s1748_s0 + $0x54] sm:$0xf]  ;;  %v1324_v4 = vld [vmem:[%s1747_s1 + $0x118] sm:$0xff]  ;;  %v954_v7 = vor.u32 %v1280_v62, %v951_v63  ;;  %v958_v8 = vor.u32 %v1285_v1, %v957_v0  ;;  %v1322_v16 = vld [vmem:[%s1747_s1 + $0x108] sm:$0xff] }
  0x17   :  { %736 = vmatpush.bf16.msra.mxu1 %v1299_v21  ;;  %v1332_v5 = vld [vmem:[%s1747_s1 + $0x158] sm:$0xff]  ;;  %v962_v9 = vor.u32 %v1281_v2, %v959_v3  ;;  %v1323_v12 = vld [vmem:[%s1747_s1 + $0x110] sm:$0xff]  ;;  %v1330_v17 = vld [vmem:[%s1747_s1 + $0x148] sm:$0xff] }
  0x18   :  { %755 = vmatpush.bf16.msra.mxu2 %v1307_v22  ;;  %v1340_v10 = vld [vmem:[%s1747_s1 + $0x198] sm:$0xff]  ;;  %v1331_v13 = vld [vmem:[%s1747_s1 + $0x150] sm:$0xff]  ;;  %v1338_v18 = vld [vmem:[%s1747_s1 + $0x188] sm:$0xff] }
  0x19   :  { %774 = vmatpush.bf16.msra.mxu3 %v1315_v23  ;;  %v1348_v11 = vld [vmem:[%s1747_s1 + $0x1d8] sm:$0xff]  ;;  %v1339_v14 = vld [vmem:[%s1747_s1 + $0x190] sm:$0xff]  ;;  %v1346_v19 = vld [vmem:[%s1747_s1 + $0x1c8] sm:$0xff] }
  0x1a   :  { %718 = vmatpush.bf16.msra.mxu0 %v1290_v24  ;;  %v1347_v15 = vld [vmem:[%s1747_s1 + $0x1d0] sm:$0xff]  ;;  %v1321_v20 = vld [vmem:[%s1747_s1 + $0x100] sm:$0xff]  ;;  %v1358_v38 = vld [vmem:[%s1747_s1 + $0x228] sm:$0xff] }
  0x1b   :  { %737 = vmatpush.bf16.msra.mxu1 %v1298_v25  ;;  %v1329_v21 = vld [vmem:[%s1747_s1 + $0x140] sm:$0xff]  ;;  %v929_v24 = vld [vmem:[%s1748_s0 + $0x10] sm:$0xf]  ;;  %v1277_v25 = vld [vmem:[%s1748_s0 + $0x30] sm:$0xf0] }
  0x1c   :  { %756 = vmatpush.bf16.msra.mxu2 %v1306_v26  ;;  %v1337_v22 = vld [vmem:[%s1747_s1 + $0x180] sm:$0xff]  ;;  %v1360_v26 = vld [vmem:[%s1747_s1 + $0x238] sm:$0xff]  ;;  %v930_v33 = vor.u32 %v1277_v25, %v929_v24  ;;  %v1359_v37 = vld [vmem:[%s1747_s1 + $0x230] sm:$0xff] }
  0x1d   :  { %775 = vmatpush.bf16.msra.mxu3 %v1314_v27  ;;  %v1345_v23 = vld [vmem:[%s1747_s1 + $0x1c0] sm:$0xff]  ;;  %v1273_v27 = vld [vmem:[%s1748_s0 + $0x14] sm:$0xf] }
  0x1e   :  { %719 = vmatpush.bf16.msra.mxu0 %v1289_v28  ;;  %v931_v28 = vld [vmem:[%s1748_s0 + $0x34] sm:$0xf0]  ;;  %v939_v32 = vld [vmem:[%s1748_s0 + $0x3c] sm:$0xf0] }
  0x1f   :  { %738 = vmatpush.bf16.msra.mxu1 %v1297_v29  ;;  %v937_v29 = vld [vmem:[%s1748_s0 + $0x18] sm:$0xf]  ;;  %v934_v34 = vor.u32 %v1273_v27, %v931_v28  ;;  %v1357_v39 = vld [vmem:[%s1747_s1 + $0x220] sm:$0xff] }
  0x20   :  { %757 = vmatpush.bf16.msra.mxu2 %v1305_v30  ;;  %v1278_v30 = vld [vmem:[%s1748_s0 + $0x38] sm:$0xf0] }
  0x21   :  { %776 = vmatpush.bf16.msra.mxu3 %v1313_v31  ;;  %720 = vmatmul.bf16.vlgmr.msra.gmra.mxu0 %v914_v42  ;;  %v1274_v31 = vld [vmem:[%s1748_s0 + $0x1c] sm:$0xf]  ;;  %v938_v35 = vor.u32 %v1278_v30, %v937_v29 }
  0x22   :  { %788 = vmatpush.bf16.msrb.mxu0 %v1328_v40  ;;  %739 = vmatmul.bf16.vlgmr.msra.gmra.mxu1 %v918_v43  ;;  %v942_v36 = vor.u32 %v1274_v31, %v939_v32  ;;  %v965_v40 = vld [vmem:[%s1748_s0 + $0x58] sm:$0xf]  ;;  %v1282_v42 = vld [vmem:[%s1748_s0 + $0x5c] sm:$0xf]  ;;  %v967_v43 = vld [vmem:[%s1748_s0 + $0x7c] sm:$0xf0] }
  0x23   :  { %807 = vmatpush.bf16.msrb.mxu1 %v1336_v41  ;;  %758 = vmatmul.bf16.vlgmr.msra.gmra.mxu2 %v922_v44  ;;  %v1286_v41 = vld [vmem:[%s1748_s0 + $0x78] sm:$0xf0]  ;;  %v973_v44 = vld [vmem:[%s1748_s0 + $0x60] sm:$0xf] }
  0x24   :  { %777 = vmatmul.bf16.vlgmr.msra.gmra.mxu3 %v926_v45  ;;  %826 = vmatpush.bf16.msrb.mxu2 %v1344_v46  ;;  %v1287_v45 = vld [vmem:[%s1748_s0 + $0x80] sm:$0xf0] }
  0x25   :  { %845 = vmatpush.bf16.msrb.mxu3 %v1352_v47  ;;  %v1283_v46 = vld [vmem:[%s1748_s0 + $0x64] sm:$0xf]  ;;  %v975_v47 = vld [vmem:[%s1748_s0 + $0x84] sm:$0xf0] }
  0x26   :  { %789 = vmatpush.bf16.msrb.mxu0 %v1327_v48  ;;  %v1356_v48 = vld [vmem:[%s1747_s1 + $0x218] sm:$0xff] }
  0x27   :  { %808 = vmatpush.bf16.msrb.mxu1 %v1335_v49  ;;  %v966_v49 = vor.u32 %v1286_v41, %v965_v40 }
  0x28   :  { %827 = vmatpush.bf16.msrb.mxu2 %v1343_v50  ;;  %v970_v50 = vor.u32 %v1282_v42, %v967_v43 }
  0x29   :  { %846 = vmatpush.bf16.msrb.mxu3 %v1351_v51  ;;  %v974_v51 = vor.u32 %v1287_v45, %v973_v44 }
  0x2a   :  { %790 = vmatpush.bf16.msrb.mxu0 %v1326_v52  ;;  %v978_v52 = vor.u32 %v1283_v46, %v975_v47 }
  0x2b   :  { %809 = vmatpush.bf16.msrb.mxu1 %v1334_v53  ;;  %v1355_v53 = vld [vmem:[%s1747_s1 + $0x210] sm:$0xff] }
  0x2c   :  { %828 = vmatpush.bf16.msrb.mxu2 %v1342_v54  ;;  %v1354_v54 = vld [vmem:[%s1747_s1 + $0x208] sm:$0xff] }
  0x2d   :  { %847 = vmatpush.bf16.msrb.mxu3 %v1350_v55  ;;  %v1353_v55 = vld [vmem:[%s1747_s1 + $0x200] sm:$0xff] }
  0x2e   :  { %791 = vmatpush.bf16.msrb.mxu0 %v1325_v56  ;;  %v945_v56 = vld [vmem:[%s1748_s0 + $0x20] sm:$0xf] }
  0x2f   :  { %810 = vmatpush.bf16.msrb.mxu1 %v1333_v57  ;;  %v1279_v57 = vld [vmem:[%s1748_s0 + $0x40] sm:$0xf0] }
  0x30   :  { %829 = vmatpush.bf16.msrb.mxu2 %v1341_v58  ;;  %v981_v58 = vld [vmem:[%s1748_s0 + $0x68] sm:$0xf]  ;;  %v946_v60 = vor.u32 %v1279_v57, %v945_v56  ;;  %v1370_v56 = vld [vmem:[%s1750_s3] ss:$0 sm:$0xff] }
  0x31   :  { %848 = vmatpush.bf16.msrb.mxu3 %v1349_v59  ;;  %725 = vmatmul.bf16.gmra.mxu0 %v950_v6  ;;  %v1288_v59 = vld [vmem:[%s1748_s0 + $0x88] sm:$0xf0] }
  0x32   :  { %792 = vmatpush.bf16.msrb.mxu0 %v1324_v4  ;;  %744 = vmatmul.bf16.gmra.mxu1 %v954_v7  ;;  %v982_v61 = vor.u32 %v1288_v59, %v981_v58 }
  0x33   :  { %811 = vmatpush.bf16.msrb.mxu1 %v1332_v5  ;;  %763 = vmatmul.bf16.gmra.mxu2 %v958_v8 }
  0x34   :  { %782 = vmatmul.bf16.gmra.mxu3 %v962_v9  ;;  %830 = vmatpush.bf16.msrb.mxu2 %v1340_v10 }
  0x35   :  { %849 = vmatpush.bf16.msrb.mxu3 %v1348_v11 }
  0x36   :  { %793 = vmatpush.bf16.msrb.mxu0 %v1323_v12 }
  0x37   :  { %812 = vmatpush.bf16.msrb.mxu1 %v1331_v13 }
  0x38   :  { %831 = vmatpush.bf16.msrb.mxu2 %v1339_v14 }
  0x39   :  { %850 = vmatpush.bf16.msrb.mxu3 %v1347_v15 }
  0x3a   :  { %794 = vmatpush.bf16.msrb.mxu0 %v1322_v16  ;;  %v1369_v16 = vld [vmem:[%s1749_s2] ss:$0 sm:$0xff] }
  0x3b   :  { %813 = vmatpush.bf16.msrb.mxu1 %v1330_v17 }
  0x3c   :  { %832 = vmatpush.bf16.msrb.mxu2 %v1338_v18 }
  0x3d   :  { %851 = vmatpush.bf16.msrb.mxu3 %v1346_v19 }
  0x3e   :  { %795 = vmatpush.bf16.msrb.mxu0 %v1321_v20 }
  0x3f   :  { %814 = vmatpush.bf16.msrb.mxu1 %v1329_v21 }
  0x40   :  { %833 = vmatpush.bf16.msrb.mxu2 %v1337_v22 }
  0x41   :  { %852 = vmatpush.bf16.msrb.mxu3 %v1345_v23  ;;  %796 = vmatmul.bf16.vlgmr.msrb.gmra.mxu0 %v930_v33 }
  0x42   :  { %864 = vmatpush.bf16.msra.mxu0 %v1360_v26  ;;  %815 = vmatmul.bf16.vlgmr.msrb.gmra.mxu1 %v934_v34 }
  0x43   :  { %1361 = vmatpush.bf16.msra.mxu1 %v1360_v26  ;;  %834 = vmatmul.bf16.vlgmr.msrb.gmra.mxu2 %v938_v35 }
  0x44   :  { %853 = vmatmul.bf16.vlgmr.msrb.gmra.mxu3 %v942_v36 }
  0x46   :  { %865 = vmatpush.bf16.msra.mxu0 %v1359_v37 }
  0x47   :  { %1362 = vmatpush.bf16.msra.mxu1 %v1359_v37 }
  0x4a   :  { %866 = vmatpush.bf16.msra.mxu0 %v1358_v38 }
  0x4b   :  { %1363 = vmatpush.bf16.msra.mxu1 %v1358_v38 }
  0x4e   :  { %867 = vmatpush.bf16.msra.mxu0 %v1357_v39 }
  0x4f   :  { %1364 = vmatpush.bf16.msra.mxu1 %v1357_v39 }
  0x51   :  { %801 = vmatmul.bf16.gmra.mxu0 %v966_v49 }
  0x52   :  { %868 = vmatpush.bf16.msra.mxu0 %v1356_v48  ;;  %820 = vmatmul.bf16.gmra.mxu1 %v970_v50 }
  0x53   :  { %1365 = vmatpush.bf16.msra.mxu1 %v1356_v48  ;;  %839 = vmatmul.bf16.gmra.mxu2 %v974_v51 }
  0x54   :  { %858 = vmatmul.bf16.gmra.mxu3 %v978_v52 }
  0x56   :  { %869 = vmatpush.bf16.msra.mxu0 %v1355_v53 }
  0x57   :  { %1366 = vmatpush.bf16.msra.mxu1 %v1355_v53 }
  0x5a   :  { %870 = vmatpush.bf16.msra.mxu0 %v1354_v54 }
  0x5b   :  { %1367 = vmatpush.bf16.msra.mxu1 %v1354_v54 }
  0x5e   :  { %871 = vmatpush.bf16.msra.mxu0 %v1353_v55 }
  0x5f   :  { %1368 = vmatpush.bf16.msra.mxu1 %v1353_v55 }
  0x61   :  { %872 = vmatmul.bf16.vlgmr.msra.gmra.mxu0 %v946_v60 }
  0x62   :  { %877 = vmatmul.bf16.vlgmr.msra.gmra.mxu1 %v982_v61 }
  0x9e   :  { %v721_v62 = vpop.f32.mrf.mxu0 }
  0x9f   :  { %v740_v63 = vpop.f32.mrf.mxu1  ;;  %v722_v21 = vadd.f32 %v1369_v16, %v721_v62  ;;  %v1371_v62 = vld [vmem:[%s1751_s4] ss:$0 sm:$0xff] }
  0xa1   :  { %v741_v23 = vadd.f32 %v740_v63, %v722_v21 }
  0xa6   :  { %v759_v0 = vpop.f32.mrf.mxu2  ;;  %v723_v2 = vpop.f32.mrf.mxu0 }
  0xa7   :  { %v778_v1 = vpop.f32.mrf.mxu3  ;;  %v742_v3 = vpop.f32.mrf.mxu1  ;;  %v760_v25 = vadd.f32 %v759_v0, %v741_v23  ;;  %v724_v30 = vadd.f32 %v1369_v16, %v723_v2 }
  0xa9   :  { %v779_v33 = vadd.f32 %v778_v1, %v760_v25  ;;  %v743_v35 = vadd.f32 %v742_v3, %v724_v30 }
  0xae   :  { %v761_v4 = vpop.f32.mrf.mxu2  ;;  %v726_v6 = vpop.f32.mrf.mxu0 }
  0xaf   :  { %v780_v5 = vpop.f32.mrf.mxu3  ;;  %v745_v7 = vpop.f32.mrf.mxu1  ;;  %v727_v22 = vadd.f32 %v1369_v16, %v726_v6  ;;  %v762_v39 = vadd.f32 %v761_v4, %v743_v35 }
  0xb1   :  { %v746_v24 = vadd.f32 %v745_v7, %v727_v22  ;;  %v781_v46 = vadd.f32 %v780_v5, %v762_v39 }
  0xb6   :  { %v764_v8 = vpop.f32.mrf.mxu2  ;;  %v728_v10 = vpop.f32.mrf.mxu0 }
  0xb7   :  { %v783_v9 = vpop.f32.mrf.mxu3  ;;  %v747_v11 = vpop.f32.mrf.mxu1  ;;  %v765_v26 = vadd.f32 %v764_v8, %v746_v24  ;;  %v729_v31 = vadd.f32 %v1369_v16, %v728_v10 }
  0xb9   :  { %v784_v34 = vadd.f32 %v783_v9, %v765_v26  ;;  %v748_v36 = vadd.f32 %v747_v11, %v729_v31 }
  0xbe   :  { %v766_v12 = vpop.f32.mrf.mxu2  ;;  %v797_v14 = vpop.f32.mrf.mxu0 }
  0xbf   :  { %v785_v13 = vpop.f32.mrf.mxu3  ;;  %v816_v15 = vpop.f32.mrf.mxu1  ;;  %v798_v37 = vadd.f32 %v797_v14, %v779_v33  ;;  %v767_v40 = vadd.f32 %v766_v12, %v748_v36 }
  0xc1   :  { %v817_v44 = vadd.f32 %v816_v15, %v798_v37  ;;  %v786_v47 = vadd.f32 %v785_v13, %v767_v40 }
  0xc6   :  { %v835_v17 = vpop.f32.mrf.mxu2  ;;  %v799_v19 = vpop.f32.mrf.mxu0 }
  0xc7   :  { %v854_v18 = vpop.f32.mrf.mxu3  ;;  %v818_v20 = vpop.f32.mrf.mxu1  ;;  %v836_v48 = vadd.f32 %v835_v17, %v817_v44  ;;  %v800_v51 = vadd.f32 %v799_v19, %v781_v46 }
  0xc9   :  { %v855_v53 = vadd.f32 %v854_v18, %v836_v48  ;;  %v819_v59 = vadd.f32 %v818_v20, %v800_v51 }
  0xce   :  { %v837_v27 = vpop.f32.mrf.mxu2  ;;  %v802_v28 = vpop.f32.mrf.mxu0 }
  0xcf   :  { %v821_v29 = vpop.f32.mrf.mxu1  ;;  %v856_v32 = vpop.f32.mrf.mxu3  ;;  %v803_v38 = vadd.f32 %v802_v28, %v784_v34  ;;  %v838_v0 = vadd.f32 %v837_v27, %v819_v59 }
  0xd1   :  { %v822_v45 = vadd.f32 %v821_v29, %v803_v38  ;;  %v857_v7 = vadd.f32 %v856_v32, %v838_v0 }
  0xd6   :  { %v840_v41 = vpop.f32.mrf.mxu2  ;;  %v804_v42 = vpop.f32.mrf.mxu0 }
  0xd7   :  { %v823_v43 = vpop.f32.mrf.mxu1  ;;  %v841_v49 = vadd.f32 %v840_v41, %v822_v45  ;;  %v859_v50 = vpop.f32.mrf.mxu3  ;;  %v805_v52 = vadd.f32 %v804_v42, %v786_v47 }
  0xd9   :  { %v860_v54 = vadd.f32 %v859_v50, %v841_v49  ;;  %v824_v60 = vadd.f32 %v823_v43, %v805_v52 }
  0xde   :  { %v842_v55 = vpop.f32.mrf.mxu2  ;;  %v873_v57 = vpop.f32.mrf.mxu0 }
  0xdf   :  { %v878_v58 = vpop.f32.mrf.mxu1  ;;  %v874_v61 = vadd.f32 %v873_v57, %v855_v53  ;;  %v843_v1 = vadd.f32 %v842_v55, %v824_v60  ;;  %v861_v6 = vpop.f32.mrf.mxu3 }
  0xe0   :  { %v879_v63 = vadd.f32 %v878_v58, %v860_v54 }
  0xe1   :  { %v887_v2 = vmul.f32 %v1370_v56, %v874_v61  ;;  %v862_v8 = vadd.f32 %v861_v6, %v843_v1 }
  0xe2   :  { %v889_v3 = vmul.f32 %v1370_v56, %v879_v63 }
  0xe3   :  { %v895_v4 = vadd.f32 %v1371_v62, %v887_v2 }
  0xe4   :  { %v897_v5 = vadd.f32 %v1371_v62, %v889_v3 }
  0xe5   :  { %v899_v9 = vmax.f32 %v895_v4, 0.0 }
  0xe6   :  { %v901_v10 = vmax.f32 %v897_v5, 0.0  ;;  %v875_v11 = vpop.f32.mrf.mxu0 }
  0xe7   :  { %v880_v12 = vpop.f32.mrf.mxu1  ;;  %903 = vst [vmem:[%s1752_s5] sm:$0xff] %v899_v9  ;;  %v876_v13 = vadd.f32 %v875_v11, %v857_v7 }
  0xe8   :  { %v881_v14 = vadd.f32 %v880_v12, %v862_v8  ;;  %905 = vst [vmem:[%s1752_s5 + $0x10] sm:$0xff] %v901_v10 }
  0xe9   :  { %v888_v15 = vmul.f32 %v1370_v56, %v876_v13 }
  0xea   :  { %v890_v16 = vmul.f32 %v1370_v56, %v881_v14 }
  0xeb   :  { %v896_v17 = vadd.f32 %v1371_v62, %v888_v15 }
  0xec   :  { %v898_v18 = vadd.f32 %v1371_v62, %v890_v16 }
  0xed   :  { %v900_v19 = vmax.f32 %v896_v17, 0.0 }
  0xee   :  { %v902_v20 = vmax.f32 %v898_v18, 0.0 }
  0xef   :  { %904 = vst [vmem:[%s1752_s5 + $0x8] sm:$0xff] %v900_v19 }
  0xf0   :  { %906 = vst [vmem:[%s1752_s5 + $0x18] sm:$0xff] %v902_v20 }

// kernel: wideresnet_forward.19
= control target key start
LH: loop header
LB: loop body
LE: loop exit
PB: predicated region body
PF: predicated region fallthrough
CT: control target
= control target key end

     0   :  { %v135_v2 = vmov 16.0   ;;  %s223_s0 = inlined_call_operand.vmem [shape: f32[2,16,128], index: 0, kind: input, shape index: {}]   ;;  %s224_s1 = inlined_call_operand.vmem [shape: f32[128,128], index: 1, kind: input, shape index: {}]   ;;  %s225_s2 = inlined_call_operand.vmem [shape: f32[1,128], index: 2, kind: input, shape index: {}]   ;;  %s226_s3 = inlined_call_operand.hbm [shape: f32[2,128], index: 3, kind: output, shape index: {}]  }
   0x1   :  { %v57_v0 = vld [vmem:[%s224_s1 + $0x78] sm:$0xff]  ;;  %v56_v1 = vld [vmem:[%s224_s1 + $0x70] sm:$0xff]  ;;  %107 = vrcp.f32 %v135_v2  ;;  %v55_v3 = vld [vmem:[%s224_s1 + $0x68] sm:$0xff] }
   0x2   :  { %67 = vmatpush.msra.mxu0 %v57_v0  ;;  %v54_v4 = vld [vmem:[%s224_s1 + $0x60] sm:$0xff]  ;;  %v53_v5 = vld [vmem:[%s224_s1 + $0x58] sm:$0xff]  ;;  %v16_v7 = vld [vmem:[%s223_s0 + $0x8] sm:$0xff] }
   0x3   :  { %v15_v6 = vld [vmem:[%s223_s0] sm:$0xff]  ;;  %v17_v8 = vld [vmem:[%s223_s0 + $0x10] sm:$0xff]  ;;  %v18_v9 = vld [vmem:[%s223_s0 + $0x18] sm:$0xff] }
   0x4   :  { %68 = vmatpush.msra.mxu0 %v56_v1  ;;  %v19_v10 = vadd.f32 %v16_v7, %v15_v6  ;;  %v26_v12 = vadd.f32 %v18_v9, %v17_v8 }
   0x6   :  { %69 = vmatpush.msra.mxu0 %v55_v3 }
   0x7   :  { %v108_v11 = vpop.eup %107 }
   0x8   :  { %70 = vmatpush.msra.mxu0 %v54_v4 }
   0x9   :  { %8 = vsyncpa [#allocation3], 0  ;;  %v52_v13 = vld [vmem:[%s224_s1 + $0x50] sm:$0xff]  ;;  %v20_v14 = vrot.slane %v19_v10, 4  ;;  %v34_v15 = vmul.f32 16.0, %v108_v11  ;;  %v27_v16 = vrot.slane %v26_v12, 4  ;;  %vm38_vm0 = vweird.f32 %v108_v11 }
   0xa   :  { %71 = vmatpush.msra.mxu0 %v53_v5  ;;  %v51_v17 = vld [vmem:[%s224_s1 + $0x48] sm:$0xff]  ;;  %v50_v21 = vld [vmem:[%s224_s1 + $0x40] sm:$0xff]  ;;  %v49_v24 = vld [vmem:[%s224_s1 + $0x38] sm:$0xff]  ;;  %vm64_vm1 = vcmask 1041409   ;;  %s136_s26 = smov [#allocation2]   ;;  %s95_s30 = sshll.u32 %s226_s3, 4  ;;  %s96_s30 = int_to_ptr.hbm [resolvable:$true] %s95_s30 }
   0xb   :  { %v21_v18 = vadd.f32 %v20_v14, %v19_v10  ;;  %v35_v19 = vsub.f32 1.0, %v34_v15  ;;  %v28_v20 = vadd.f32 %v27_v16, %v26_v12  ;;  %v48_v28 = vld [vmem:[%s224_s1 + $0x30] sm:$0xff]  ;;  %v47_v31 = vld [vmem:[%s224_s1 + $0x28] sm:$0xff]  ;;  %v46_v33 = vld [vmem:[%s224_s1 + $0x20] sm:$0xff]  ;;  %s93_s27 = sshll.u32 %s136_s26, 4  ;;  %s94_s27 = int_to_ptr.vmem [resolvable:$true] %s93_s27 }
   0xc   :  { %72 = vmatpush.msra.mxu0 %v52_v13  ;;  %v45_v36 = vld [vmem:[%s224_s1 + $0x18] sm:$0xff]  ;;  %v44_v38 = vld [vmem:[%s224_s1 + $0x10] sm:$0xff]  ;;  %v43_v41 = vld [vmem:[%s224_s1 + $0x8] sm:$0xff] }
   0xd   :  { %v22_v22 = vrot.slane %v21_v18, 2  ;;  %v29_v23 = vrot.slane %v28_v20, 2  ;;  %v36_v26 = vmul.f32 %v108_v11, %v35_v19  ;;  %v42_v42 = vld [vmem:[%s224_s1] sm:$0xff] }
   0xe   :  { %73 = vmatpush.msra.mxu0 %v51_v17  ;;  %v106_v44 = vld [vmem:[%s225_s2] ss:$0 sm:$0xff] }
   0xf   :  { %v23_v25 = vadd.f32 %v22_v22, %v21_v18  ;;  %v30_v27 = vadd.f32 %v29_v23, %v28_v20  ;;  %v37_v32 = vadd.f32 %v108_v11, %v36_v26 }
  0x10   :  { %74 = vmatpush.msra.mxu0 %v50_v21 }
  0x11   :  { %v24_v29 = vrot.slane %v23_v25, 1  ;;  %v31_v30 = vrot.slane %v30_v27, 1  ;;  %v39_v37 = vsel %vm38_vm0, %v108_v11, %v37_v32 }
  0x12   :  { %75 = vmatpush.msra.mxu0 %v49_v24 }
  0x13   :  { %v25_v34 = vadd.f32 %v24_v29, %v23_v25  ;;  %v32_v35 = vadd.f32 %v31_v30, %v30_v27 }
  0x14   :  { %76 = vmatpush.msra.mxu0 %v48_v28 }
  0x15   :  { %v40_v39 = vmul.f32 %v39_v37, %v25_v34  ;;  %v41_v40 = vmul.f32 %v39_v37, %v32_v35 }
  0x16   :  { %77 = vmatpush.msra.mxu0 %v47_v31 }
  0x17   :  { %v65_v43 = vsel %vm64_vm1, %v41_v40, %v40_v39 }
  0x18   :  { %78 = vmatpush.msra.mxu0 %v46_v33 }
  0x1a   :  { %79 = vmatpush.msra.mxu0 %v45_v36 }
  0x1c   :  { %80 = vmatpush.msra.mxu0 %v44_v38 }
  0x1e   :  { %81 = vmatpush.msra.mxu0 %v43_v41 }
  0x20   :  { %82 = vmatpush.msra.mxu0 %v42_v42 }
  0x21   :  { %83 = vmatmul.f32.vlgmr.msra.gmra.mxu0 %v65_v43 }
  0x9e   :  { %v84_v45 = vpop.f32.mrf.mxu0 }
  0x9f   :  { %v85_v46 = vadd.f32 %v106_v44, %v84_v45 }
  0xa1   :  { %87 = vst [vmem:[#allocation2] sm:$0x3] %v85_v46 }
  0xa2   :  { %98 = dma.vmem_to_hbm [thread:$0]  %s94_s27, 32, %s96_s30, [#allocation3]  }
  0xa3   :  { %133 = dma.done.wait [#allocation3], 32  }
  0xa4   :  { %134 = vsyncadd [#allocation3], 4294967264 }
  0xa5   :  { %103 = vsyncpa [#allocation3], 1 }

// kernel: wideresnet_forward.18
= control target key start
LH: loop header
LB: loop body
LE: loop exit
PB: predicated region body
PF: predicated region fallthrough
CT: control target
= control target key end

     0   :  { %s1840_s0 = inlined_call_operand.vmem [shape: bf16[32,1152], index: 0, kind: input, shape index: {}]   ;;  %s1841_s1 = inlined_call_operand.vmem [shape: bf16[1152,128], index: 1, kind: input, shape index: {}]   ;;  %s1842_s2 = inlined_call_operand.vmem [shape: f32[1,128], index: 2, kind: input, shape index: {}]   ;;  %s1843_s3 = inlined_call_operand.vmem [shape: f32[32,128], index: 3, kind: input, shape index: {}]   ;;  %s1844_s4 = inlined_call_operand.vmem [shape: f32[1,128], index: 4, kind: input, shape index: {}]   ;;  %s1845_s5 = inlined_call_operand.vmem [shape: f32[1,128], index: 5, kind: input, shape index: {}]   ;;  %s1846_s6 = inlined_call_operand.hbm [shape: f32[32,128], index: 6, kind: output, shape index: {0}]   ;;  %s1847_s7 = inlined_call_operand.vmem [shape: f32[32,128], index: 7, kind: output, shape index: {1}]  }
   0x1   :  { %v1332_v0 = vld [vmem:[%s1841_s1 + $0x38] sm:$0xff]  ;;  %v1331_v4 = vld [vmem:[%s1841_s1 + $0x30] sm:$0xff]  ;;  %v1330_v8 = vld [vmem:[%s1841_s1 + $0x28] sm:$0xff] }
   0x2   :  { %v1340_v1 = vld [vmem:[%s1841_s1 + $0x78] sm:$0xff]  ;;  %718 = vmatpush.bf16.msra.mxu0 %v1332_v0  ;;  %v1339_v5 = vld [vmem:[%s1841_s1 + $0x70] sm:$0xff]  ;;  %v1338_v9 = vld [vmem:[%s1841_s1 + $0x68] sm:$0xff] }
   0x3   :  { %v1348_v2 = vld [vmem:[%s1841_s1 + $0xb8] sm:$0xff]  ;;  %737 = vmatpush.bf16.msra.mxu1 %v1340_v1  ;;  %v1347_v6 = vld [vmem:[%s1841_s1 + $0xb0] sm:$0xff]  ;;  %v1346_v10 = vld [vmem:[%s1841_s1 + $0xa8] sm:$0xff] }
   0x4   :  { %v1356_v3 = vld [vmem:[%s1841_s1 + $0xf8] sm:$0xff]  ;;  %756 = vmatpush.bf16.msra.mxu2 %v1348_v2  ;;  %v1355_v7 = vld [vmem:[%s1841_s1 + $0xf0] sm:$0xff]  ;;  %v1354_v11 = vld [vmem:[%s1841_s1 + $0xe8] sm:$0xff] }
   0x5   :  { %775 = vmatpush.bf16.msra.mxu3 %v1356_v3  ;;  %v1329_v12 = vld [vmem:[%s1841_s1 + $0x20] sm:$0xff]  ;;  %v1328_v16 = vld [vmem:[%s1841_s1 + $0x18] sm:$0xff]  ;;  %v1327_v20 = vld [vmem:[%s1841_s1 + $0x10] sm:$0xff] }
   0x6   :  { %719 = vmatpush.bf16.msra.mxu0 %v1331_v4  ;;  %v1337_v13 = vld [vmem:[%s1841_s1 + $0x60] sm:$0xff]  ;;  %v1336_v17 = vld [vmem:[%s1841_s1 + $0x58] sm:$0xff]  ;;  %v1335_v21 = vld [vmem:[%s1841_s1 + $0x50] sm:$0xff] }
   0x7   :  { %738 = vmatpush.bf16.msra.mxu1 %v1339_v5  ;;  %v1345_v14 = vld [vmem:[%s1841_s1 + $0xa0] sm:$0xff]  ;;  %v1344_v18 = vld [vmem:[%s1841_s1 + $0x98] sm:$0xff]  ;;  %v1343_v22 = vld [vmem:[%s1841_s1 + $0x90] sm:$0xff] }
   0x8   :  { %757 = vmatpush.bf16.msra.mxu2 %v1347_v6  ;;  %v1353_v15 = vld [vmem:[%s1841_s1 + $0xe0] sm:$0xff]  ;;  %v1352_v19 = vld [vmem:[%s1841_s1 + $0xd8] sm:$0xff]  ;;  %v1351_v23 = vld [vmem:[%s1841_s1 + $0xd0] sm:$0xff] }
   0x9   :  { %776 = vmatpush.bf16.msra.mxu3 %v1355_v7  ;;  %v1326_v24 = vld [vmem:[%s1841_s1 + $0x8] sm:$0xff]  ;;  %v1325_v28 = vld [vmem:[%s1841_s1] sm:$0xff] }
   0xa   :  { %720 = vmatpush.bf16.msra.mxu0 %v1330_v8  ;;  %v1334_v25 = vld [vmem:[%s1841_s1 + $0x48] sm:$0xff]  ;;  %v1333_v29 = vld [vmem:[%s1841_s1 + $0x40] sm:$0xff] }
   0xb   :  { %739 = vmatpush.bf16.msra.mxu1 %v1338_v9  ;;  %v1342_v26 = vld [vmem:[%s1841_s1 + $0x88] sm:$0xff]  ;;  %v949_v30 = vld [vmem:[%s1840_s0] sm:$0xf]  ;;  %v1311_v31 = vld [vmem:[%s1840_s0 + $0x20] sm:$0xf0] }
   0xc   :  { %758 = vmatpush.bf16.msra.mxu2 %v1346_v10  ;;  %v1350_v27 = vld [vmem:[%s1841_s1 + $0xc8] sm:$0xff]  ;;  %v1307_v32 = vld [vmem:[%s1840_s0 + $0x4] sm:$0xf] }
   0xd   :  { %777 = vmatpush.bf16.msra.mxu3 %v1354_v11  ;;  %v1341_v33 = vld [vmem:[%s1841_s1 + $0x80] sm:$0xff]  ;;  %v951_v35 = vld [vmem:[%s1840_s0 + $0x24] sm:$0xf0] }
   0xe   :  { %721 = vmatpush.bf16.msra.mxu0 %v1329_v12  ;;  %v1349_v34 = vld [vmem:[%s1841_s1 + $0xc0] sm:$0xff]  ;;  %v957_v36 = vld [vmem:[%s1840_s0 + $0x8] sm:$0xf] }
   0xf   :  { %740 = vmatpush.bf16.msra.mxu1 %v1337_v13 }
  0x10   :  { %759 = vmatpush.bf16.msra.mxu2 %v1345_v14 }
  0x11   :  { %778 = vmatpush.bf16.msra.mxu3 %v1353_v15 }
  0x12   :  { %722 = vmatpush.bf16.msra.mxu0 %v1328_v16 }
  0x13   :  { %741 = vmatpush.bf16.msra.mxu1 %v1336_v17 }
  0x14   :  { %760 = vmatpush.bf16.msra.mxu2 %v1344_v18 }
  0x15   :  { %779 = vmatpush.bf16.msra.mxu3 %v1352_v19 }
  0x16   :  { %723 = vmatpush.bf16.msra.mxu0 %v1327_v20 }
  0x17   :  { %742 = vmatpush.bf16.msra.mxu1 %v1335_v21 }
  0x18   :  { %761 = vmatpush.bf16.msra.mxu2 %v1343_v22 }
  0x19   :  { %780 = vmatpush.bf16.msra.mxu3 %v1351_v23 }
  0x1a   :  { %724 = vmatpush.bf16.msra.mxu0 %v1326_v24 }
  0x1b   :  { %743 = vmatpush.bf16.msra.mxu1 %v1334_v25 }
  0x1c   :  { %13 = vsyncpa [#allocation3], 0  ;;  %762 = vmatpush.bf16.msra.mxu2 %v1342_v26  ;;  %v1312_v37 = vld [vmem:[%s1840_s0 + $0x28] sm:$0xf0]  ;;  %v959_v39 = vld [vmem:[%s1840_s0 + $0x2c] sm:$0xf0]  ;;  %v950_v42 = vor.u32 %v1311_v31, %v949_v30  ;;  %v954_v43 = vor.u32 %v1307_v32, %v951_v35 }
  0x1d   :  { %781 = vmatpush.bf16.msra.mxu3 %v1350_v27  ;;  %v1308_v38 = vld [vmem:[%s1840_s0 + $0xc] sm:$0xf]  ;;  %v1364_v40 = vld [vmem:[%s1841_s1 + $0x138] sm:$0xff]  ;;  %v958_v44 = vor.u32 %v1312_v37, %v957_v36  ;;  %v1363_v48 = vld [vmem:[%s1841_s1 + $0x130] sm:$0xff]  ;;  %s931_s23 = sshll.u32 %s1846_s6, 4  ;;  %s1438_s6 = smov 128   ;;  %s932_s23 = int_to_ptr.hbm [resolvable:$true] %s931_s23 }
  0x1e   :  { %v1372_v41 = vld [vmem:[%s1841_s1 + $0x178] sm:$0xff]  ;;  %725 = vmatpush.bf16.msra.mxu0 %v1325_v28  ;;  %v962_v45 = vor.u32 %v1308_v38, %v959_v39  ;;  %v1371_v49 = vld [vmem:[%s1841_s1 + $0x170] sm:$0xff]  ;;  %v1362_v52 = vld [vmem:[%s1841_s1 + $0x128] sm:$0xff]  ;;  %s1439_s27 = smov 8  }
  0x1f   :  { %744 = vmatpush.bf16.msra.mxu1 %v1333_v29  ;;  %v1380_v46 = vld [vmem:[%s1841_s1 + $0x1b8] sm:$0xff]  ;;  %v1379_v50 = vld [vmem:[%s1841_s1 + $0x1b0] sm:$0xff]  ;;  %v1370_v53 = vld [vmem:[%s1841_s1 + $0x168] sm:$0xff] }
  0x20   :  { %763 = vmatpush.bf16.msra.mxu2 %v1341_v33  ;;  %v1388_v47 = vld [vmem:[%s1841_s1 + $0x1f8] sm:$0xff]  ;;  %v1387_v51 = vld [vmem:[%s1841_s1 + $0x1f0] sm:$0xff]  ;;  %v1378_v54 = vld [vmem:[%s1841_s1 + $0x1a8] sm:$0xff] }
  0x21   :  { %782 = vmatpush.bf16.msra.mxu3 %v1349_v34  ;;  %726 = vmatmul.bf16.vlgmr.msra.gmra.mxu0 %v950_v42  ;;  %v1386_v55 = vld [vmem:[%s1841_s1 + $0x1e8] sm:$0xff]  ;;  %v1361_v56 = vld [vmem:[%s1841_s1 + $0x120] sm:$0xff]  ;;  %v987_v63 = vld [vmem:[%s1840_s0 + $0x6c] sm:$0xf0] }
  0x22   :  { %794 = vmatpush.bf16.msrb.mxu0 %v1364_v40  ;;  %745 = vmatmul.bf16.vlgmr.msra.gmra.mxu1 %v954_v43  ;;  %v1369_v57 = vld [vmem:[%s1841_s1 + $0x160] sm:$0xff]  ;;  %v985_v60 = vld [vmem:[%s1840_s0 + $0x48] sm:$0xf]  ;;  %v1320_v61 = vld [vmem:[%s1840_s0 + $0x68] sm:$0xf0] }
  0x23   :  { %813 = vmatpush.bf16.msrb.mxu1 %v1372_v41  ;;  %764 = vmatmul.bf16.vlgmr.msra.gmra.mxu2 %v958_v44  ;;  %v1377_v58 = vld [vmem:[%s1841_s1 + $0x1a0] sm:$0xff]  ;;  %v1316_v62 = vld [vmem:[%s1840_s0 + $0x4c] sm:$0xf]  ;;  %v993_v0 = vld [vmem:[%s1840_s0 + $0x50] sm:$0xf]  ;;  %v986_v6 = vor.u32 %v1320_v61, %v985_v60 }
  0x24   :  { %783 = vmatmul.bf16.vlgmr.msra.gmra.mxu3 %v962_v45  ;;  %832 = vmatpush.bf16.msrb.mxu2 %v1380_v46  ;;  %v1385_v59 = vld [vmem:[%s1841_s1 + $0x1e0] sm:$0xff]  ;;  %v1321_v1 = vld [vmem:[%s1840_s0 + $0x70] sm:$0xf0]  ;;  %v995_v3 = vld [vmem:[%s1840_s0 + $0x74] sm:$0xf0]  ;;  %v990_v7 = vor.u32 %v1316_v62, %v987_v63 }
  0x25   :  { %851 = vmatpush.bf16.msrb.mxu3 %v1388_v47  ;;  %v1317_v2 = vld [vmem:[%s1840_s0 + $0x54] sm:$0xf]  ;;  %v1360_v4 = vld [vmem:[%s1841_s1 + $0x118] sm:$0xff]  ;;  %v994_v8 = vor.u32 %v1321_v1, %v993_v0  ;;  %v1358_v16 = vld [vmem:[%s1841_s1 + $0x108] sm:$0xff] }
  0x26   :  { %795 = vmatpush.bf16.msrb.mxu0 %v1363_v48  ;;  %v1368_v5 = vld [vmem:[%s1841_s1 + $0x158] sm:$0xff]  ;;  %v998_v9 = vor.u32 %v1317_v2, %v995_v3  ;;  %v1359_v12 = vld [vmem:[%s1841_s1 + $0x110] sm:$0xff]  ;;  %v1366_v17 = vld [vmem:[%s1841_s1 + $0x148] sm:$0xff] }
  0x27   :  { %814 = vmatpush.bf16.msrb.mxu1 %v1371_v49  ;;  %v1376_v10 = vld [vmem:[%s1841_s1 + $0x198] sm:$0xff]  ;;  %v1367_v13 = vld [vmem:[%s1841_s1 + $0x150] sm:$0xff]  ;;  %v1374_v18 = vld [vmem:[%s1841_s1 + $0x188] sm:$0xff] }
  0x28   :  { %833 = vmatpush.bf16.msrb.mxu2 %v1379_v50  ;;  %v1384_v11 = vld [vmem:[%s1841_s1 + $0x1d8] sm:$0xff]  ;;  %v1375_v14 = vld [vmem:[%s1841_s1 + $0x190] sm:$0xff]  ;;  %v1382_v19 = vld [vmem:[%s1841_s1 + $0x1c8] sm:$0xff] }
  0x29   :  { %852 = vmatpush.bf16.msrb.mxu3 %v1387_v51  ;;  %v1383_v15 = vld [vmem:[%s1841_s1 + $0x1d0] sm:$0xff]  ;;  %v1357_v20 = vld [vmem:[%s1841_s1 + $0x100] sm:$0xff]  ;;  %v1396_v26 = vld [vmem:[%s1841_s1 + $0x238] sm:$0xff] }
  0x2a   :  { %796 = vmatpush.bf16.msrb.mxu0 %v1362_v52  ;;  %v1365_v21 = vld [vmem:[%s1841_s1 + $0x140] sm:$0xff]  ;;  %v965_v24 = vld [vmem:[%s1840_s0 + $0x10] sm:$0xf]  ;;  %v1313_v25 = vld [vmem:[%s1840_s0 + $0x30] sm:$0xf0] }
  0x2b   :  { %815 = vmatpush.bf16.msrb.mxu1 %v1370_v53  ;;  %v1373_v22 = vld [vmem:[%s1841_s1 + $0x180] sm:$0xff]  ;;  %v1309_v27 = vld [vmem:[%s1840_s0 + $0x14] sm:$0xf]  ;;  %v967_v28 = vld [vmem:[%s1840_s0 + $0x34] sm:$0xf0]  ;;  %v966_v33 = vor.u32 %v1313_v25, %v965_v24 }
  0x2c   :  { %834 = vmatpush.bf16.msrb.mxu2 %v1378_v54  ;;  %v1381_v23 = vld [vmem:[%s1841_s1 + $0x1c0] sm:$0xff]  ;;  %v973_v29 = vld [vmem:[%s1840_s0 + $0x18] sm:$0xf]  ;;  %v1314_v30 = vld [vmem:[%s1840_s0 + $0x38] sm:$0xf0]  ;;  %v970_v34 = vor.u32 %v1309_v27, %v967_v28 }
  0x2d   :  { %853 = vmatpush.bf16.msrb.mxu3 %v1386_v55  ;;  %v1310_v31 = vld [vmem:[%s1840_s0 + $0x1c] sm:$0xf]  ;;  %v975_v32 = vld [vmem:[%s1840_s0 + $0x3c] sm:$0xf0]  ;;  %v974_v35 = vor.u32 %v1314_v30, %v973_v29  ;;  %v1395_v37 = vld [vmem:[%s1841_s1 + $0x230] sm:$0xff] }
  0x2e   :  { %797 = vmatpush.bf16.msrb.mxu0 %v1361_v56  ;;  %v978_v36 = vor.u32 %v1310_v31, %v975_v32  ;;  %v1394_v38 = vld [vmem:[%s1841_s1 + $0x228] sm:$0xff]  ;;  %v1393_v39 = vld [vmem:[%s1841_s1 + $0x220] sm:$0xff]  ;;  %v1001_v40 = vld [vmem:[%s1840_s0 + $0x58] sm:$0xf] }
  0x2f   :  { %816 = vmatpush.bf16.msrb.mxu1 %v1369_v57  ;;  %v1322_v41 = vld [vmem:[%s1840_s0 + $0x78] sm:$0xf0]  ;;  %v1003_v43 = vld [vmem:[%s1840_s0 + $0x7c] sm:$0xf0]  ;;  %v1323_v45 = vld [vmem:[%s1840_s0 + $0x80] sm:$0xf0] }
  0x30   :  { %835 = vmatpush.bf16.msrb.mxu2 %v1377_v58  ;;  %v1318_v42 = vld [vmem:[%s1840_s0 + $0x5c] sm:$0xf]  ;;  %v1009_v44 = vld [vmem:[%s1840_s0 + $0x60] sm:$0xf]  ;;  %v1319_v46 = vld [vmem:[%s1840_s0 + $0x64] sm:$0xf]  ;;  %v1002_v49 = vor.u32 %v1322_v41, %v1001_v40 }
  0x31   :  { %854 = vmatpush.bf16.msrb.mxu3 %v1385_v59  ;;  %731 = vmatmul.bf16.gmra.mxu0 %v986_v6  ;;  %v1011_v47 = vld [vmem:[%s1840_s0 + $0x84] sm:$0xf0]  ;;  %v1392_v48 = vld [vmem:[%s1841_s1 + $0x218] sm:$0xff]  ;;  %v1006_v50 = vor.u32 %v1318_v42, %v1003_v43  ;;  %v1010_v51 = vor.u32 %v1323_v45, %v1009_v44  ;;  %v1391_v53 = vld [vmem:[%s1841_s1 + $0x210] sm:$0xff] }
  0x32   :  { %798 = vmatpush.bf16.msrb.mxu0 %v1360_v4  ;;  %750 = vmatmul.bf16.gmra.mxu1 %v990_v7  ;;  %v1014_v52 = vor.u32 %v1319_v46, %v1011_v47  ;;  %v1390_v54 = vld [vmem:[%s1841_s1 + $0x208] sm:$0xff]  ;;  %v1389_v55 = vld [vmem:[%s1841_s1 + $0x200] sm:$0xff] }
  0x33   :  { %817 = vmatpush.bf16.msrb.mxu1 %v1368_v5  ;;  %769 = vmatmul.bf16.gmra.mxu2 %v994_v8  ;;  %v981_v56 = vld [vmem:[%s1840_s0 + $0x20] sm:$0xf]  ;;  %v1315_v57 = vld [vmem:[%s1840_s0 + $0x40] sm:$0xf0]  ;;  %v1017_v58 = vld [vmem:[%s1840_s0 + $0x68] sm:$0xf] }
  0x34   :  { %788 = vmatmul.bf16.gmra.mxu3 %v998_v9  ;;  %836 = vmatpush.bf16.msrb.mxu2 %v1376_v10  ;;  %v1324_v59 = vld [vmem:[%s1840_s0 + $0x88] sm:$0xf0]  ;;  %v982_v60 = vor.u32 %v1315_v57, %v981_v56  ;;  %v889_v57 = vld [vmem:[%s1843_s3] sm:$0xff] }
  0x35   :  { %855 = vmatpush.bf16.msrb.mxu3 %v1384_v11  ;;  %v1018_v61 = vor.u32 %v1324_v59, %v1017_v58  ;;  %v891_v59 = vld [vmem:[%s1843_s3 + $0x10] sm:$0xff] }
  0x36   :  { %799 = vmatpush.bf16.msrb.mxu0 %v1359_v12 }
  0x37   :  { %818 = vmatpush.bf16.msrb.mxu1 %v1367_v13 }
  0x38   :  { %837 = vmatpush.bf16.msrb.mxu2 %v1375_v14 }
  0x39   :  { %856 = vmatpush.bf16.msrb.mxu3 %v1383_v15 }
  0x3a   :  { %800 = vmatpush.bf16.msrb.mxu0 %v1358_v16  ;;  %v1408_v16 = vld [vmem:[%s1842_s2] ss:$0 sm:$0xff] }
  0x3b   :  { %819 = vmatpush.bf16.msrb.mxu1 %v1366_v17 }
  0x3c   :  { %838 = vmatpush.bf16.msrb.mxu2 %v1374_v18 }
  0x3d   :  { %857 = vmatpush.bf16.msrb.mxu3 %v1382_v19 }
  0x3e   :  { %801 = vmatpush.bf16.msrb.mxu0 %v1357_v20 }
  0x3f   :  { %820 = vmatpush.bf16.msrb.mxu1 %v1365_v21 }
  0x40   :  { %839 = vmatpush.bf16.msrb.mxu2 %v1373_v22 }
  0x41   :  { %858 = vmatpush.bf16.msrb.mxu3 %v1381_v23  ;;  %802 = vmatmul.bf16.vlgmr.msrb.gmra.mxu0 %v966_v33 }
  0x42   :  { %870 = vmatpush.bf16.msra.mxu0 %v1396_v26  ;;  %821 = vmatmul.bf16.vlgmr.msrb.gmra.mxu1 %v970_v34 }
  0x43   :  { %1397 = vmatpush.bf16.msra.mxu1 %v1396_v26  ;;  %840 = vmatmul.bf16.vlgmr.msrb.gmra.mxu2 %v974_v35 }
  0x44   :  { %859 = vmatmul.bf16.vlgmr.msrb.gmra.mxu3 %v978_v36 }
  0x46   :  { %871 = vmatpush.bf16.msra.mxu0 %v1395_v37 }
  0x47   :  { %1398 = vmatpush.bf16.msra.mxu1 %v1395_v37 }
  0x4a   :  { %872 = vmatpush.bf16.msra.mxu0 %v1394_v38 }
  0x4b   :  { %1399 = vmatpush.bf16.msra.mxu1 %v1394_v38 }
  0x4e   :  { %873 = vmatpush.bf16.msra.mxu0 %v1393_v39 }
  0x4f   :  { %1400 = vmatpush.bf16.msra.mxu1 %v1393_v39 }
  0x51   :  { %807 = vmatmul.bf16.gmra.mxu0 %v1002_v49 }
  0x52   :  { %874 = vmatpush.bf16.msra.mxu0 %v1392_v48  ;;  %826 = vmatmul.bf16.gmra.mxu1 %v1006_v50 }
  0x53   :  { %1401 = vmatpush.bf16.msra.mxu1 %v1392_v48  ;;  %845 = vmatmul.bf16.gmra.mxu2 %v1010_v51 }
  0x54   :  { %864 = vmatmul.bf16.gmra.mxu3 %v1014_v52 }
  0x56   :  { %875 = vmatpush.bf16.msra.mxu0 %v1391_v53 }
  0x57   :  { %1402 = vmatpush.bf16.msra.mxu1 %v1391_v53 }
  0x5a   :  { %876 = vmatpush.bf16.msra.mxu0 %v1390_v54 }
  0x5b   :  { %1403 = vmatpush.bf16.msra.mxu1 %v1390_v54 }
  0x5e   :  { %877 = vmatpush.bf16.msra.mxu0 %v1389_v55 }
  0x5f   :  { %1404 = vmatpush.bf16.msra.mxu1 %v1389_v55 }
  0x61   :  { %878 = vmatmul.bf16.vlgmr.msra.gmra.mxu0 %v982_v60 }
  0x62   :  { %883 = vmatmul.bf16.vlgmr.msra.gmra.mxu1 %v1018_v61 }
  0x9e   :  { %v727_v62 = vpop.f32.mrf.mxu0 }
  0x9f   :  { %v746_v63 = vpop.f32.mrf.mxu1  ;;  %v728_v21 = vadd.f32 %v1408_v16, %v727_v62 }
  0xa1   :  { %v747_v23 = vadd.f32 %v746_v63, %v728_v21  ;;  %v1409_v63 = vld [vmem:[%s1844_s4] ss:$0 sm:$0xff] }
  0xa6   :  { %v765_v0 = vpop.f32.mrf.mxu2  ;;  %v729_v2 = vpop.f32.mrf.mxu0 }
  0xa7   :  { %v784_v1 = vpop.f32.mrf.mxu3  ;;  %v748_v3 = vpop.f32.mrf.mxu1  ;;  %v766_v25 = vadd.f32 %v765_v0, %v747_v23  ;;  %v730_v30 = vadd.f32 %v1408_v16, %v729_v2 }
  0xa9   :  { %v785_v33 = vadd.f32 %v784_v1, %v766_v25  ;;  %v749_v35 = vadd.f32 %v748_v3, %v730_v30 }
  0xae   :  { %v767_v4 = vpop.f32.mrf.mxu2  ;;  %v732_v6 = vpop.f32.mrf.mxu0 }
  0xaf   :  { %v786_v5 = vpop.f32.mrf.mxu3  ;;  %v751_v7 = vpop.f32.mrf.mxu1  ;;  %v733_v22 = vadd.f32 %v1408_v16, %v732_v6  ;;  %v768_v39 = vadd.f32 %v767_v4, %v749_v35  ;;  %v1410_v4 = vld [vmem:[%s1845_s5] ss:$0 sm:$0xff]  ;;  %s1437_s5 = smov [#allocation2]  }
  0xb0   :  { %s929_s20 = sshll.u32 %s1437_s5, 4  ;;  %s930_s20 = int_to_ptr.vmem [resolvable:$true] %s929_s20 }
  0xb1   :  { %v752_v24 = vadd.f32 %v751_v7, %v733_v22  ;;  %v787_v46 = vadd.f32 %v786_v5, %v768_v39 }
  0xb6   :  { %v770_v8 = vpop.f32.mrf.mxu2  ;;  %v734_v10 = vpop.f32.mrf.mxu0 }
  0xb7   :  { %v789_v9 = vpop.f32.mrf.mxu3  ;;  %v753_v11 = vpop.f32.mrf.mxu1  ;;  %v771_v26 = vadd.f32 %v770_v8, %v752_v24  ;;  %v735_v31 = vadd.f32 %v1408_v16, %v734_v10  ;;  %v892_v16 = vld [vmem:[%s1843_s3 + $0x18] sm:$0xff] }
  0xb9   :  { %v790_v34 = vadd.f32 %v789_v9, %v771_v26  ;;  %v754_v36 = vadd.f32 %v753_v11, %v735_v31 }
  0xbe   :  { %v772_v12 = vpop.f32.mrf.mxu2  ;;  %v803_v14 = vpop.f32.mrf.mxu0 }
  0xbf   :  { %v791_v13 = vpop.f32.mrf.mxu3  ;;  %v822_v15 = vpop.f32.mrf.mxu1  ;;  %v804_v37 = vadd.f32 %v803_v14, %v785_v33  ;;  %v773_v40 = vadd.f32 %v772_v12, %v754_v36  ;;  %v890_v14 = vld [vmem:[%s1843_s3 + $0x8] sm:$0xff] }
  0xc1   :  { %v823_v44 = vadd.f32 %v822_v15, %v804_v37  ;;  %v792_v47 = vadd.f32 %v791_v13, %v773_v40 }
  0xc6   :  { %v841_v17 = vpop.f32.mrf.mxu2  ;;  %v805_v19 = vpop.f32.mrf.mxu0 }
  0xc7   :  { %v860_v18 = vpop.f32.mrf.mxu3  ;;  %v824_v20 = vpop.f32.mrf.mxu1  ;;  %v842_v48 = vadd.f32 %v841_v17, %v823_v44  ;;  %v806_v51 = vadd.f32 %v805_v19, %v787_v46 }
  0xc9   :  { %v861_v53 = vadd.f32 %v860_v18, %v842_v48  ;;  %v825_v60 = vadd.f32 %v824_v20, %v806_v51 }
  0xce   :  { %v843_v27 = vpop.f32.mrf.mxu2  ;;  %v808_v28 = vpop.f32.mrf.mxu0 }
  0xcf   :  { %v827_v29 = vpop.f32.mrf.mxu1  ;;  %v862_v32 = vpop.f32.mrf.mxu3  ;;  %v809_v38 = vadd.f32 %v808_v28, %v790_v34  ;;  %v844_v1 = vadd.f32 %v843_v27, %v825_v60 }
  0xd1   :  { %v828_v45 = vadd.f32 %v827_v29, %v809_v38  ;;  %v863_v9 = vadd.f32 %v862_v32, %v844_v1 }
  0xd6   :  { %v846_v41 = vpop.f32.mrf.mxu2  ;;  %v810_v42 = vpop.f32.mrf.mxu0 }
  0xd7   :  { %v829_v43 = vpop.f32.mrf.mxu1  ;;  %v847_v49 = vadd.f32 %v846_v41, %v828_v45  ;;  %v865_v50 = vpop.f32.mrf.mxu3  ;;  %v811_v52 = vadd.f32 %v810_v42, %v792_v47 }
  0xd9   :  { %v866_v54 = vadd.f32 %v865_v50, %v847_v49  ;;  %v830_v61 = vadd.f32 %v829_v43, %v811_v52 }
  0xde   :  { %v848_v55 = vpop.f32.mrf.mxu2  ;;  %v879_v56 = vpop.f32.mrf.mxu0 }
  0xdf   :  { %v884_v58 = vpop.f32.mrf.mxu1  ;;  %v880_v62 = vadd.f32 %v879_v56, %v861_v53  ;;  %v849_v2 = vadd.f32 %v848_v55, %v830_v61  ;;  %v867_v8 = vpop.f32.mrf.mxu3 }
  0xe0   :  { %v885_v0 = vadd.f32 %v884_v58, %v866_v54 }
  0xe1   :  { %v893_v3 = vadd.f32 %v889_v57, %v880_v62  ;;  %v868_v10 = vadd.f32 %v867_v8, %v849_v2 }
  0xe2   :  { %v895_v5 = vadd.f32 %v891_v59, %v885_v0 }
  0xe3   :  { %897 = vst [vmem:[#allocation2] sm:$0xff] %v893_v3  ;;  %v905_v6 = vmul.f32 %v1409_v63, %v893_v3 }
  0xe4   :  { %v907_v7 = vmul.f32 %v1409_v63, %v895_v5  ;;  %899 = vst [vmem:[#allocation2 + $0x10] sm:$0xff] %v895_v5 }
  0xe5   :  { %v913_v11 = vadd.f32 %v1410_v4, %v905_v6 }
  0xe6   :  { %v915_v12 = vadd.f32 %v1410_v4, %v907_v7  ;;  %v881_v13 = vpop.f32.mrf.mxu0 }
  0xe7   :  { %v886_v15 = vpop.f32.mrf.mxu1  ;;  %v917_v17 = vmax.f32 %v913_v11, 0.0  ;;  %v882_v19 = vadd.f32 %v881_v13, %v863_v9 }
  0xe8   :  { %v919_v18 = vmax.f32 %v915_v12, 0.0  ;;  %v887_v20 = vadd.f32 %v886_v15, %v868_v10 }
  0xe9   :  { %921 = vst [vmem:[%s1847_s7] sm:$0xff] %v917_v17  ;;  %v894_v21 = vadd.f32 %v890_v14, %v882_v19 }
  0xea   :  { %v896_v22 = vadd.f32 %v892_v16, %v887_v20  ;;  %923 = vst [vmem:[%s1847_s7 + $0x10] sm:$0xff] %v919_v18 }
  0xeb   :  { %898 = vst [vmem:[#allocation2 + $0x8] sm:$0xff] %v894_v21  ;;  %v906_v23 = vmul.f32 %v1409_v63, %v894_v21 }
  0xec   :  { %v908_v24 = vmul.f32 %v1409_v63, %v896_v22  ;;  %900 = vst [vmem:[#allocation2 + $0x18] sm:$0xff] %v896_v22 }
  0xed   :  { %v914_v25 = vadd.f32 %v1410_v4, %v906_v23  ;;  %937 = dma.vmem_to_hbm [thread:$0]  %s930_s20, 512, %s932_s23, [#allocation3], %s1438_s6, %s1438_s6, %s1439_s27  }
  0xee   :  { %v916_v26 = vadd.f32 %v1410_v4, %v908_v24 }
  0xef   :  { %v918_v27 = vmax.f32 %v914_v25, 0.0 }
  0xf0   :  { %v920_v28 = vmax.f32 %v916_v26, 0.0 }
  0xf1   :  { %922 = vst [vmem:[%s1847_s7 + $0x8] sm:$0xff] %v918_v27 }
  0xf2   :  { %924 = vst [vmem:[%s1847_s7 + $0x18] sm:$0xff] %v920_v28 }
  0xf3   :  { %1435 = dma.done.wait [#allocation3], 512  }
  0xf4   :  { %1436 = vsyncadd [#allocation3], 4294966784 }
  0xf5   :  { %946 = vsyncpa [#allocation3], 1 }

</bundles_post_ra>
